<compile_context>
chip_gen: v7x
topology: tpu7x:2x2x1
jax: 0.10.0
libtpu: 0.0.40
codegen_flags: <defaults>
</compile_context>

<pallas_src>
import functools

import jax
import jax.numpy as jnp
from jax.experimental import pallas as pl
from jax.experimental.pallas import tpu as pltpu


def _sigmoid(z):
    # exact sigmoid via tanh: stays on the EUP slot, no exp/divide on the serial path.
    return 0.5 * jnp.tanh(0.5 * z) + 0.5


# --------------------------- single fused kernel ----------------------------
def cnn_lstm_kernel(x_ref,
                    cw1, cb1, cw2, cb2, cw3, cb3, cw4, cb4,
                    wih1, whh1, bl1, wih2, whh2, bl2, wfc, bfc,
                    h0_ref, c0_ref,
                    out_ref, hT_ref, cT_ref,
                    *, n_b, n_l, ksz, n_filt, n_hid, fc_rows):
    B, L, K, F, H = n_b, n_l, ksz, n_filt, n_hid
    T, M = L, B
    P = (K - 1) // 2                # torch module: padding=2 with filter_size=5
    G = F // L                      # channels covered by one row of the torch .view()

    # ---------- conv stack: 4 x (im2col -> ONE MXU matmul -> bias -> ReLU) ----------
    h = x_ref[...]                                            # (B*L, Cin0), NLC-flat rows
    for w_ref, b_ref in ((cw1, cb1), (cw2, cb2), (cw3, cb3), (cw4, cb4)):
        cin = h.shape[1]
        zpad = jnp.zeros((P, cin), jnp.float32)
        cols = []
        for b in range(B):                                    # static: padding stays per item
            hp = jnp.concatenate([zpad, h[b * L:(b + 1) * L, :], zpad], axis=0)  # (L+2P, cin)
            cols.append(jnp.concatenate([hp[k:k + L, :] for k in range(K)], axis=1))
        cols = jnp.concatenate(cols, axis=0)                  # (B*L, K*cin)
        h = jnp.maximum(
            jnp.dot(cols, w_ref[...], preferred_element_type=jnp.float32) + b_ref[...],
            0.0)                                              # (B*L, Cout)

    # ---------- torch `x.view(L, -1, n_filters)` scramble, entirely in VMEM ----------
    # The NCL-contiguous buffer reinterpreted as (T, M, F) obeys (needs F % L == 0):
    #   seq_flat[b*L + q, g*L + l] = h[b*L + l, q*G + g],   row r = t*M + m = b*L + q
    # Row/channel selection is done with tiny 0/1 matmuls (MXU) so no strided slices or
    # lane-mixing reshapes are needed.
    row_i = jax.lax.broadcasted_iota(jnp.int32, (L, F), 0)
    col_i = jax.lax.broadcasted_iota(jnp.int32, (L, F), 1)
    seq_rows = []
    for b in range(B):
        ht_b = h[b * L:(b + 1) * L, :].T                      # (F, L)
        blocks = [
            jnp.dot((col_i == row_i * G + g).astype(jnp.float32), ht_b,
                    preferred_element_type=jnp.float32)       # (L, L): rows q -> channel q*G+g
            for g in range(G)
        ]
        seq_rows.append(jnp.concatenate(blocks, axis=1))      # (L, F)
    seq_flat = jnp.concatenate(seq_rows, axis=0)              # (T*M, F), rows in (t, m) order

    # ---------- LSTM: input projections hoisted out of the serial loops ----------
    gx1 = jnp.dot(seq_flat, wih1[...], preferred_element_type=jnp.float32) + bl1[...]

    def cell(gx_t, h_prev, c_prev, whh_ref):
        g = gx_t + jnp.dot(h_prev, whh_ref[...], preferred_element_type=jnp.float32)
        i_g = _sigmoid(g[:, 0:H])                             # PyTorch gate order: i, f, g, o
        f_g = _sigmoid(g[:, H:2 * H])
        g_g = jnp.tanh(g[:, 2 * H:3 * H])
        o_g = _sigmoid(g[:, 3 * H:4 * H])
        c_new = f_g * c_prev + i_g * g_g
        return o_g * jnp.tanh(c_new), c_new

    # layer 1: serial step is only  h @ Whh1  (contraction H) plus gate math.
    h1, c1 = h0_ref[...], c0_ref[...]
    y1 = []
    for t in range(T):
        h1, c1 = cell(gx1[t * M:(t + 1) * M, :], h1, c1, whh1)
        y1.append(h1)
    y1 = jnp.concatenate(y1, axis=0)                          # (T*M, H)

    gx2 = jnp.dot(y1, wih2[...], preferred_element_type=jnp.float32) + bl2[...]

    # torch semantics: lstm2's initial hidden is lstm1's FINAL (h, c).
    h2, c2 = h1, c1
    fc_in = [None] * len(fc_rows)
    for t in range(T):
        h2, c2 = cell(gx2[t * M:(t + 1) * M, :], h2, c2, whh2)
        for bi, (tb, mb) in enumerate(fc_rows):               # keep only rows used by [:, -1, :]
            if tb == t:
                fc_in[bi] = h2[mb:mb + 1, :]
    fc_in = jnp.concatenate(fc_in, axis=0)                    # (batch, H)

    # TODO(synk): nn.Dropout(0.5) is identity at inference; training-mode mask not implemented.
    out_ref[...] = jnp.dot(fc_in, wfc[...], preferred_element_type=jnp.float32) + bfc[...]
    hT_ref[...] = h2
    cT_ref[...] = c2


# ----------------------------- Parameter setup ------------------------------
def init_params(key, n_hidden=64, n_filters=64, n_classes=3, filter_size=5, in_ch=10):
    keys = jax.random.split(key, 18)

    def u(k, shape, fan_in):
        bound = 1.0 / (fan_in ** 0.5)
        return jax.random.uniform(k, shape, jnp.float32, -bound, bound)

    p = {}
    p['conv1_w'] = u(keys[0], (n_filters, in_ch, filter_size), in_ch * filter_size)
    p['conv1_b'] = u(keys[1], (n_filters,), in_ch * filter_size)
    for idx, ki in zip((2, 3, 4), (2, 4, 6)):
        p[f'conv{idx}_w'] = u(keys[ki], (n_filters, n_filters, filter_size),
                              n_filters * filter_size)
        p[f'conv{idx}_b'] = u(keys[ki + 1], (n_filters,), n_filters * filter_size)
    p['lstm1_wih'] = u(keys[8], (4 * n_hidden, n_filters), n_hidden)
    p['lstm1_whh'] = u(keys[9], (4 * n_hidden, n_hidden), n_hidden)
    p['lstm1_bih'] = u(keys[10], (4 * n_hidden,), n_hidden)
    p['lstm1_bhh'] = u(keys[11], (4 * n_hidden,), n_hidden)
    p['lstm2_wih'] = u(keys[12], (4 * n_hidden, n_hidden), n_hidden)
    p['lstm2_whh'] = u(keys[13], (4 * n_hidden, n_hidden), n_hidden)
    p['lstm2_bih'] = u(keys[14], (4 * n_hidden,), n_hidden)
    p['lstm2_bhh'] = u(keys[15], (4 * n_hidden,), n_hidden)
    p['fc_w'] = u(keys[16], (n_classes, n_hidden), n_hidden)
    p['fc_b'] = u(keys[17], (n_classes,), n_hidden)
    return p


# --------------------------------- Forward ----------------------------------
def cnn_lstm_forward(params, x_ncl, hidden, batch_size,
                     n_hidden=64, n_filters=64, n_classes=3):
    # x_ncl: (B, 10, L) — PyTorch NCL Conv1d layout.
    B, cin0, L = x_ncl.shape
    h0, c0 = hidden                                   # (1, M, n_hidden) each
    K = params['conv1_w'].shape[2]

    # One-time tiny XLA weight prep:
    # conv weights -> im2col layout (K*Cin, Cout); LSTM weights transposed, biases summed.
    conv_ws, conv_bs = [], []
    for i in (1, 2, 3, 4):
        w = params[f'conv{i}_w']                      # (Cout, Cin, K)
        conv_ws.append(jnp.transpose(w, (2, 1, 0)).reshape(-1, w.shape[0]))
        conv_bs.append(params[f'conv{i}_b'].reshape(1, -1))
    wih1 = params['lstm1_wih'].T
    whh1 = params['lstm1_whh'].T
    bl1 = (params['lstm1_bih'] + params['lstm1_bhh']).reshape(1, -1)
    wih2 = params['lstm2_wih'].T
    whh2 = params['lstm2_whh'].T
    bl2 = (params['lstm2_bih'] + params['lstm2_bhh']).reshape(1, -1)
    wfc = params['fc_w'].T
    bfc = params['fc_b'].reshape(1, -1)

    # NCL -> NLC -> flat (B*L, Cin) rows (cheap one-time relayout of the 640-element input).
    x2d = jnp.transpose(x_ncl, (0, 2, 1)).reshape(B * L, cin0)

    # torch .view(L, -1, n_filters): the in-kernel scramble assumes n_filters % L == 0
    # (holds for the module's shapes).  M (the view's batch dim) is always B here.
    assert n_filters % L == 0, "in-kernel .view() scramble requires n_filters % L == 0"
    T, M = L, B
    assert (T * M) % batch_size == 0, ".view(batch_size, -1, n_classes) must divide evenly"
    rows_per_b = (T * M) // batch_size
    # Rows of the (T*M, H)-flat tensor kept by `.view(batch_size, -1, C)[:, -1, :]`.
    fc_rows = tuple(divmod(b * rows_per_b + rows_per_b - 1, M) for b in range(batch_size))

    kernel = functools.partial(cnn_lstm_kernel, n_b=B, n_l=L, ksz=K,
                               n_filt=n_filters, n_hid=n_hidden, fc_rows=fc_rows)

    operands = (x2d,
                conv_ws[0], conv_bs[0], conv_ws[1], conv_bs[1],
                conv_ws[2], conv_bs[2], conv_ws[3], conv_bs[3],
                wih1, whh1, bl1, wih2, whh2, bl2, wfc, bfc,
                h0[0], c0[0])

    out, h2, c2 = pl.pallas_call(
        kernel,
        out_shape=(jax.ShapeDtypeStruct((batch_size, n_classes), jnp.float32),
                   jax.ShapeDtypeStruct((M, n_hidden), jnp.float32),
                   jax.ShapeDtypeStruct((M, n_hidden), jnp.float32)),
        in_specs=[pl.BlockSpec(memory_space=pltpu.MemorySpace.VMEM)] * len(operands),
        out_specs=(pl.BlockSpec(memory_space=pltpu.MemorySpace.VMEM),) * 3,
    )(*operands)

    return out, (h2[None], c2[None])


if __name__ == "__main__":
    key = jax.random.PRNGKey(0)
    kp, kx = jax.random.split(key)

    B, C_in, L = 2, 10, 16
    n_hidden = 64

    params = init_params(kp)
    x = jax.random.normal(kx, (B, C_in, L), jnp.float32)
    hidden = (jnp.zeros((1, B, n_hidden), jnp.float32),
              jnp.zeros((1, B, n_hidden), jnp.float32))

    fwd = jax.jit(cnn_lstm_forward, static_argnums=(3,))
    out, hidden_out = fwd(params, x, hidden, B)
    jax.block_until_ready(out)

    assert out.shape == (B, 3)
    assert hidden_out[0].shape == (1, B, n_hidden)
    assert hidden_out[1].shape == (1, B, n_hidden)
    assert bool(jnp.all(jnp.isfinite(out)))
    print("KERNEL_OK")
</pallas_src>

<mosaic_0001>
module attributes {stable_mosaic.version = 11 : i64} {
  func.func @cnn_lstm_kernel(%arg0: memref<32x10xf32, #tpu.memory_space<vmem>>, %arg1: memref<50x64xf32, #tpu.memory_space<vmem>>, %arg2: memref<1x64xf32, #tpu.memory_space<vmem>>, %arg3: memref<320x64xf32, #tpu.memory_space<vmem>>, %arg4: memref<1x64xf32, #tpu.memory_space<vmem>>, %arg5: memref<320x64xf32, #tpu.memory_space<vmem>>, %arg6: memref<1x64xf32, #tpu.memory_space<vmem>>, %arg7: memref<320x64xf32, #tpu.memory_space<vmem>>, %arg8: memref<1x64xf32, #tpu.memory_space<vmem>>, %arg9: memref<64x256xf32, #tpu.memory_space<vmem>>, %arg10: memref<64x256xf32, #tpu.memory_space<vmem>>, %arg11: memref<1x256xf32, #tpu.memory_space<vmem>>, %arg12: memref<64x256xf32, #tpu.memory_space<vmem>>, %arg13: memref<64x256xf32, #tpu.memory_space<vmem>>, %arg14: memref<1x256xf32, #tpu.memory_space<vmem>>, %arg15: memref<64x3xf32, #tpu.memory_space<vmem>>, %arg16: memref<1x3xf32, #tpu.memory_space<vmem>>, %arg17: memref<2x64xf32, #tpu.memory_space<vmem>>, %arg18: memref<2x64xf32, #tpu.memory_space<vmem>>, %arg19: memref<2x3xf32, #tpu.memory_space<vmem>>, %arg20: memref<2x64xf32, #tpu.memory_space<vmem>>, %arg21: memref<2x64xf32, #tpu.memory_space<vmem>>) attributes {dimension_semantics = [], scalar_prefetch = 0 : i64, scratch_operands = 0 : i64, tpu.core_type = #tpu.core_type<tc>} {
    %c0 = arith.constant 0 : index
    %c0_0 = arith.constant 0 : index
    %0 = vector.load %arg0[%c0, %c0_0] : memref<32x10xf32, #tpu.memory_space<vmem>>, vector<32x10xf32>
    %cst = arith.constant 0.000000e+00 : f32
    %1 = vector.broadcast %cst : f32 to vector<2x10xf32>
    %2 = vector.extract_strided_slice %0 {offsets = [0, 0], sizes = [16, 10], strides = [1, 1]} : vector<32x10xf32> to vector<16x10xf32>
    %3 = tpu.concatenate %1, %2, %1 in 0 : vector<2x10xf32>, vector<16x10xf32>, vector<2x10xf32> -> vector<20x10xf32>
    %4 = vector.extract_strided_slice %3 {offsets = [0, 0], sizes = [16, 10], strides = [1, 1]} : vector<20x10xf32> to vector<16x10xf32>
    %5 = vector.extract_strided_slice %3 {offsets = [1, 0], sizes = [16, 10], strides = [1, 1]} : vector<20x10xf32> to vector<16x10xf32>
    %6 = vector.extract_strided_slice %3 {offsets = [2, 0], sizes = [16, 10], strides = [1, 1]} : vector<20x10xf32> to vector<16x10xf32>
    %7 = vector.extract_strided_slice %3 {offsets = [3, 0], sizes = [16, 10], strides = [1, 1]} : vector<20x10xf32> to vector<16x10xf32>
    %8 = vector.extract_strided_slice %3 {offsets = [4, 0], sizes = [16, 10], strides = [1, 1]} : vector<20x10xf32> to vector<16x10xf32>
    %9 = tpu.concatenate %4, %5, %6, %7, %8 in 1 : vector<16x10xf32>, vector<16x10xf32>, vector<16x10xf32>, vector<16x10xf32>, vector<16x10xf32> -> vector<16x50xf32>
    %10 = vector.extract_strided_slice %0 {offsets = [16, 0], sizes = [16, 10], strides = [1, 1]} : vector<32x10xf32> to vector<16x10xf32>
    %11 = tpu.concatenate %1, %10, %1 in 0 : vector<2x10xf32>, vector<16x10xf32>, vector<2x10xf32> -> vector<20x10xf32>
    %12 = vector.extract_strided_slice %11 {offsets = [0, 0], sizes = [16, 10], strides = [1, 1]} : vector<20x10xf32> to vector<16x10xf32>
    %13 = vector.extract_strided_slice %11 {offsets = [1, 0], sizes = [16, 10], strides = [1, 1]} : vector<20x10xf32> to vector<16x10xf32>
    %14 = vector.extract_strided_slice %11 {offsets = [2, 0], sizes = [16, 10], strides = [1, 1]} : vector<20x10xf32> to vector<16x10xf32>
    %15 = vector.extract_strided_slice %11 {offsets = [3, 0], sizes = [16, 10], strides = [1, 1]} : vector<20x10xf32> to vector<16x10xf32>
    %16 = vector.extract_strided_slice %11 {offsets = [4, 0], sizes = [16, 10], strides = [1, 1]} : vector<20x10xf32> to vector<16x10xf32>
    %17 = tpu.concatenate %12, %13, %14, %15, %16 in 1 : vector<16x10xf32>, vector<16x10xf32>, vector<16x10xf32>, vector<16x10xf32>, vector<16x10xf32> -> vector<16x50xf32>
    %18 = tpu.concatenate %9, %17 in 0 : vector<16x50xf32>, vector<16x50xf32> -> vector<32x50xf32>
    %c0_1 = arith.constant 0 : index
    %c0_2 = arith.constant 0 : index
    %19 = vector.load %arg1[%c0_1, %c0_2] : memref<50x64xf32, #tpu.memory_space<vmem>>, vector<50x64xf32>
    %cst_3 = arith.constant dense<0.000000e+00> : vector<32x64xf32>
    %20 = tpu.matmul %18, %19, %cst_3 {dimension_numbers = #tpu.dot_dimension_numbers<[1], [0], [0], [1], [0, 0, 1, 1], [], []>} : vector<32x50xf32>, vector<50x64xf32>, vector<32x64xf32> -> vector<32x64xf32>
    %c0_4 = arith.constant 0 : index
    %c0_5 = arith.constant 0 : index
    %21 = vector.load %arg2[%c0_4, %c0_5] : memref<1x64xf32, #tpu.memory_space<vmem>>, vector<1x64xf32>
    %22 = vector.broadcast %21 : vector<1x64xf32> to vector<32x64xf32>
    %23 = arith.addf %20, %22 : vector<32x64xf32>
    %cst_6 = arith.constant 0.000000e+00 : f32
    %24 = vector.broadcast %cst_6 : f32 to vector<32x64xf32>
    %25 = arith.maximumf %23, %24 : vector<32x64xf32>
    %cst_7 = arith.constant 0.000000e+00 : f32
    %26 = vector.broadcast %cst_7 : f32 to vector<2x64xf32>
    %27 = vector.extract_strided_slice %25 {offsets = [0, 0], sizes = [16, 64], strides = [1, 1]} : vector<32x64xf32> to vector<16x64xf32>
    %28 = tpu.concatenate %26, %27, %26 in 0 : vector<2x64xf32>, vector<16x64xf32>, vector<2x64xf32> -> vector<20x64xf32>
    %29 = vector.extract_strided_slice %28 {offsets = [0, 0], sizes = [16, 64], strides = [1, 1]} : vector<20x64xf32> to vector<16x64xf32>
    %30 = vector.extract_strided_slice %28 {offsets = [1, 0], sizes = [16, 64], strides = [1, 1]} : vector<20x64xf32> to vector<16x64xf32>
    %31 = vector.extract_strided_slice %28 {offsets = [2, 0], sizes = [16, 64], strides = [1, 1]} : vector<20x64xf32> to vector<16x64xf32>
    %32 = vector.extract_strided_slice %28 {offsets = [3, 0], sizes = [16, 64], strides = [1, 1]} : vector<20x64xf32> to vector<16x64xf32>
    %33 = vector.extract_strided_slice %28 {offsets = [4, 0], sizes = [16, 64], strides = [1, 1]} : vector<20x64xf32> to vector<16x64xf32>
    %34 = tpu.concatenate %29, %30, %31, %32, %33 in 1 : vector<16x64xf32>, vector<16x64xf32>, vector<16x64xf32>, vector<16x64xf32>, vector<16x64xf32> -> vector<16x320xf32>
    %35 = vector.extract_strided_slice %25 {offsets = [16, 0], sizes = [16, 64], strides = [1, 1]} : vector<32x64xf32> to vector<16x64xf32>
    %36 = tpu.concatenate %26, %35, %26 in 0 : vector<2x64xf32>, vector<16x64xf32>, vector<2x64xf32> -> vector<20x64xf32>
    %37 = vector.extract_strided_slice %36 {offsets = [0, 0], sizes = [16, 64], strides = [1, 1]} : vector<20x64xf32> to vector<16x64xf32>
    %38 = vector.extract_strided_slice %36 {offsets = [1, 0], sizes = [16, 64], strides = [1, 1]} : vector<20x64xf32> to vector<16x64xf32>
    %39 = vector.extract_strided_slice %36 {offsets = [2, 0], sizes = [16, 64], strides = [1, 1]} : vector<20x64xf32> to vector<16x64xf32>
    %40 = vector.extract_strided_slice %36 {offsets = [3, 0], sizes = [16, 64], strides = [1, 1]} : vector<20x64xf32> to vector<16x64xf32>
    %41 = vector.extract_strided_slice %36 {offsets = [4, 0], sizes = [16, 64], strides = [1, 1]} : vector<20x64xf32> to vector<16x64xf32>
    %42 = tpu.concatenate %37, %38, %39, %40, %41 in 1 : vector<16x64xf32>, vector<16x64xf32>, vector<16x64xf32>, vector<16x64xf32>, vector<16x64xf32> -> vector<16x320xf32>
    %43 = tpu.concatenate %34, %42 in 0 : vector<16x320xf32>, vector<16x320xf32> -> vector<32x320xf32>
    %c0_8 = arith.constant 0 : index
    %c0_9 = arith.constant 0 : index
    %44 = vector.load %arg3[%c0_8, %c0_9] : memref<320x64xf32, #tpu.memory_space<vmem>>, vector<320x64xf32>
    %cst_10 = arith.constant dense<0.000000e+00> : vector<32x64xf32>
    %45 = tpu.matmul %43, %44, %cst_10 {dimension_numbers = #tpu.dot_dimension_numbers<[1], [0], [0], [1], [0, 0, 1, 1], [], []>} : vector<32x320xf32>, vector<320x64xf32>, vector<32x64xf32> -> vector<32x64xf32>
    %c0_11 = arith.constant 0 : index
    %c0_12 = arith.constant 0 : index
    %46 = vector.load %arg4[%c0_11, %c0_12] : memref<1x64xf32, #tpu.memory_space<vmem>>, vector<1x64xf32>
    %47 = vector.broadcast %46 : vector<1x64xf32> to vector<32x64xf32>
    %48 = arith.addf %45, %47 : vector<32x64xf32>
    %cst_13 = arith.constant 0.000000e+00 : f32
    %49 = vector.broadcast %cst_13 : f32 to vector<32x64xf32>
    %50 = arith.maximumf %48, %49 : vector<32x64xf32>
    %cst_14 = arith.constant 0.000000e+00 : f32
    %51 = vector.broadcast %cst_14 : f32 to vector<2x64xf32>
    %52 = vector.extract_strided_slice %50 {offsets = [0, 0], sizes = [16, 64], strides = [1, 1]} : vector<32x64xf32> to vector<16x64xf32>
    %53 = tpu.concatenate %51, %52, %51 in 0 : vector<2x64xf32>, vector<16x64xf32>, vector<2x64xf32> -> vector<20x64xf32>
    %54 = vector.extract_strided_slice %53 {offsets = [0, 0], sizes = [16, 64], strides = [1, 1]} : vector<20x64xf32> to vector<16x64xf32>
    %55 = vector.extract_strided_slice %53 {offsets = [1, 0], sizes = [16, 64], strides = [1, 1]} : vector<20x64xf32> to vector<16x64xf32>
    %56 = vector.extract_strided_slice %53 {offsets = [2, 0], sizes = [16, 64], strides = [1, 1]} : vector<20x64xf32> to vector<16x64xf32>
    %57 = vector.extract_strided_slice %53 {offsets = [3, 0], sizes = [16, 64], strides = [1, 1]} : vector<20x64xf32> to vector<16x64xf32>
    %58 = vector.extract_strided_slice %53 {offsets = [4, 0], sizes = [16, 64], strides = [1, 1]} : vector<20x64xf32> to vector<16x64xf32>
    %59 = tpu.concatenate %54, %55, %56, %57, %58 in 1 : vector<16x64xf32>, vector<16x64xf32>, vector<16x64xf32>, vector<16x64xf32>, vector<16x64xf32> -> vector<16x320xf32>
    %60 = vector.extract_strided_slice %50 {offsets = [16, 0], sizes = [16, 64], strides = [1, 1]} : vector<32x64xf32> to vector<16x64xf32>
    %61 = tpu.concatenate %51, %60, %51 in 0 : vector<2x64xf32>, vector<16x64xf32>, vector<2x64xf32> -> vector<20x64xf32>
    %62 = vector.extract_strided_slice %61 {offsets = [0, 0], sizes = [16, 64], strides = [1, 1]} : vector<20x64xf32> to vector<16x64xf32>
    %63 = vector.extract_strided_slice %61 {offsets = [1, 0], sizes = [16, 64], strides = [1, 1]} : vector<20x64xf32> to vector<16x64xf32>
    %64 = vector.extract_strided_slice %61 {offsets = [2, 0], sizes = [16, 64], strides = [1, 1]} : vector<20x64xf32> to vector<16x64xf32>
    %65 = vector.extract_strided_slice %61 {offsets = [3, 0], sizes = [16, 64], strides = [1, 1]} : vector<20x64xf32> to vector<16x64xf32>
    %66 = vector.extract_strided_slice %61 {offsets = [4, 0], sizes = [16, 64], strides = [1, 1]} : vector<20x64xf32> to vector<16x64xf32>
    %67 = tpu.concatenate %62, %63, %64, %65, %66 in 1 : vector<16x64xf32>, vector<16x64xf32>, vector<16x64xf32>, vector<16x64xf32>, vector<16x64xf32> -> vector<16x320xf32>
    %68 = tpu.concatenate %59, %67 in 0 : vector<16x320xf32>, vector<16x320xf32> -> vector<32x320xf32>
    %c0_15 = arith.constant 0 : index
    %c0_16 = arith.constant 0 : index
    %69 = vector.load %arg5[%c0_15, %c0_16] : memref<320x64xf32, #tpu.memory_space<vmem>>, vector<320x64xf32>
    %cst_17 = arith.constant dense<0.000000e+00> : vector<32x64xf32>
    %70 = tpu.matmul %68, %69, %cst_17 {dimension_numbers = #tpu.dot_dimension_numbers<[1], [0], [0], [1], [0, 0, 1, 1], [], []>} : vector<32x320xf32>, vector<320x64xf32>, vector<32x64xf32> -> vector<32x64xf32>
    %c0_18 = arith.constant 0 : index
    %c0_19 = arith.constant 0 : index
    %71 = vector.load %arg6[%c0_18, %c0_19] : memref<1x64xf32, #tpu.memory_space<vmem>>, vector<1x64xf32>
    %72 = vector.broadcast %71 : vector<1x64xf32> to vector<32x64xf32>
    %73 = arith.addf %70, %72 : vector<32x64xf32>
    %cst_20 = arith.constant 0.000000e+00 : f32
    %74 = vector.broadcast %cst_20 : f32 to vector<32x64xf32>
    %75 = arith.maximumf %73, %74 : vector<32x64xf32>
    %cst_21 = arith.constant 0.000000e+00 : f32
    %76 = vector.broadcast %cst_21 : f32 to vector<2x64xf32>
    %77 = vector.extract_strided_slice %75 {offsets = [0, 0], sizes = [16, 64], strides = [1, 1]} : vector<32x64xf32> to vector<16x64xf32>
    %78 = tpu.concatenate %76, %77, %76 in 0 : vector<2x64xf32>, vector<16x64xf32>, vector<2x64xf32> -> vector<20x64xf32>
    %79 = vector.extract_strided_slice %78 {offsets = [0, 0], sizes = [16, 64], strides = [1, 1]} : vector<20x64xf32> to vector<16x64xf32>
    %80 = vector.extract_strided_slice %78 {offsets = [1, 0], sizes = [16, 64], strides = [1, 1]} : vector<20x64xf32> to vector<16x64xf32>
    %81 = vector.extract_strided_slice %78 {offsets = [2, 0], sizes = [16, 64], strides = [1, 1]} : vector<20x64xf32> to vector<16x64xf32>
    %82 = vector.extract_strided_slice %78 {offsets = [3, 0], sizes = [16, 64], strides = [1, 1]} : vector<20x64xf32> to vector<16x64xf32>
    %83 = vector.extract_strided_slice %78 {offsets = [4, 0], sizes = [16, 64], strides = [1, 1]} : vector<20x64xf32> to vector<16x64xf32>
    %84 = tpu.concatenate %79, %80, %81, %82, %83 in 1 : vector<16x64xf32>, vector<16x64xf32>, vector<16x64xf32>, vector<16x64xf32>, vector<16x64xf32> -> vector<16x320xf32>
    %85 = vector.extract_strided_slice %75 {offsets = [16, 0], sizes = [16, 64], strides = [1, 1]} : vector<32x64xf32> to vector<16x64xf32>
    %86 = tpu.concatenate %76, %85, %76 in 0 : vector<2x64xf32>, vector<16x64xf32>, vector<2x64xf32> -> vector<20x64xf32>
    %87 = vector.extract_strided_slice %86 {offsets = [0, 0], sizes = [16, 64], strides = [1, 1]} : vector<20x64xf32> to vector<16x64xf32>
    %88 = vector.extract_strided_slice %86 {offsets = [1, 0], sizes = [16, 64], strides = [1, 1]} : vector<20x64xf32> to vector<16x64xf32>
    %89 = vector.extract_strided_slice %86 {offsets = [2, 0], sizes = [16, 64], strides = [1, 1]} : vector<20x64xf32> to vector<16x64xf32>
    %90 = vector.extract_strided_slice %86 {offsets = [3, 0], sizes = [16, 64], strides = [1, 1]} : vector<20x64xf32> to vector<16x64xf32>
    %91 = vector.extract_strided_slice %86 {offsets = [4, 0], sizes = [16, 64], strides = [1, 1]} : vector<20x64xf32> to vector<16x64xf32>
    %92 = tpu.concatenate %87, %88, %89, %90, %91 in 1 : vector<16x64xf32>, vector<16x64xf32>, vector<16x64xf32>, vector<16x64xf32>, vector<16x64xf32> -> vector<16x320xf32>
    %93 = tpu.concatenate %84, %92 in 0 : vector<16x320xf32>, vector<16x320xf32> -> vector<32x320xf32>
    %c0_22 = arith.constant 0 : index
    %c0_23 = arith.constant 0 : index
    %94 = vector.load %arg7[%c0_22, %c0_23] : memref<320x64xf32, #tpu.memory_space<vmem>>, vector<320x64xf32>
    %cst_24 = arith.constant dense<0.000000e+00> : vector<32x64xf32>
    %95 = tpu.matmul %93, %94, %cst_24 {dimension_numbers = #tpu.dot_dimension_numbers<[1], [0], [0], [1], [0, 0, 1, 1], [], []>} : vector<32x320xf32>, vector<320x64xf32>, vector<32x64xf32> -> vector<32x64xf32>
    %c0_25 = arith.constant 0 : index
    %c0_26 = arith.constant 0 : index
    %96 = vector.load %arg8[%c0_25, %c0_26] : memref<1x64xf32, #tpu.memory_space<vmem>>, vector<1x64xf32>
    %97 = vector.broadcast %96 : vector<1x64xf32> to vector<32x64xf32>
    %98 = arith.addf %95, %97 : vector<32x64xf32>
    %cst_27 = arith.constant 0.000000e+00 : f32
    %99 = vector.broadcast %cst_27 : f32 to vector<32x64xf32>
    %100 = arith.maximumf %98, %99 : vector<32x64xf32>
    %101 = tpu.iota {dimensions = array<i32: 0>} : vector<16x64xi32>
    %102 = tpu.iota {dimensions = array<i32: 1>} : vector<16x64xi32>
    %103 = vector.extract_strided_slice %100 {offsets = [0, 0], sizes = [16, 64], strides = [1, 1]} : vector<32x64xf32> to vector<16x64xf32>
    %104 = tpu.transpose %103, [1, 0] : vector<16x64xf32> -> vector<64x16xf32>
    %c4_i32 = arith.constant 4 : i32
    %105 = vector.broadcast %c4_i32 : i32 to vector<16x64xi32>
    %106 = arith.muli %101, %105 : vector<16x64xi32>
    %c0_i32 = arith.constant 0 : i32
    %107 = vector.broadcast %c0_i32 : i32 to vector<16x64xi32>
    %108 = arith.addi %106, %107 : vector<16x64xi32>
    %109 = arith.cmpi eq, %102, %108 : vector<16x64xi32>
    %110 = arith.extui %109 : vector<16x64xi1> to vector<16x64xi32>
    %111 = arith.sitofp %110 : vector<16x64xi32> to vector<16x64xf32>
    %cst_28 = arith.constant dense<0.000000e+00> : vector<16x16xf32>
    %112 = tpu.matmul %111, %104, %cst_28 {dimension_numbers = #tpu.dot_dimension_numbers<[1], [0], [0], [1], [0, 0, 1, 1], [], []>} : vector<16x64xf32>, vector<64x16xf32>, vector<16x16xf32> -> vector<16x16xf32>
    %c4_i32_29 = arith.constant 4 : i32
    %113 = vector.broadcast %c4_i32_29 : i32 to vector<16x64xi32>
    %114 = arith.muli %101, %113 : vector<16x64xi32>
    %c1_i32 = arith.constant 1 : i32
    %115 = vector.broadcast %c1_i32 : i32 to vector<16x64xi32>
    %116 = arith.addi %114, %115 : vector<16x64xi32>
    %117 = arith.cmpi eq, %102, %116 : vector<16x64xi32>
    %118 = arith.extui %117 : vector<16x64xi1> to vector<16x64xi32>
    %119 = arith.sitofp %118 : vector<16x64xi32> to vector<16x64xf32>
    %cst_30 = arith.constant dense<0.000000e+00> : vector<16x16xf32>
    %120 = tpu.matmul %119, %104, %cst_30 {dimension_numbers = #tpu.dot_dimension_numbers<[1], [0], [0], [1], [0, 0, 1, 1], [], []>} : vector<16x64xf32>, vector<64x16xf32>, vector<16x16xf32> -> vector<16x16xf32>
    %c4_i32_31 = arith.constant 4 : i32
    %121 = vector.broadcast %c4_i32_31 : i32 to vector<16x64xi32>
    %122 = arith.muli %101, %121 : vector<16x64xi32>
    %c2_i32 = arith.constant 2 : i32
    %123 = vector.broadcast %c2_i32 : i32 to vector<16x64xi32>
    %124 = arith.addi %122, %123 : vector<16x64xi32>
    %125 = arith.cmpi eq, %102, %124 : vector<16x64xi32>
    %126 = arith.extui %125 : vector<16x64xi1> to vector<16x64xi32>
    %127 = arith.sitofp %126 : vector<16x64xi32> to vector<16x64xf32>
    %cst_32 = arith.constant dense<0.000000e+00> : vector<16x16xf32>
    %128 = tpu.matmul %127, %104, %cst_32 {dimension_numbers = #tpu.dot_dimension_numbers<[1], [0], [0], [1], [0, 0, 1, 1], [], []>} : vector<16x64xf32>, vector<64x16xf32>, vector<16x16xf32> -> vector<16x16xf32>
    %c4_i32_33 = arith.constant 4 : i32
    %129 = vector.broadcast %c4_i32_33 : i32 to vector<16x64xi32>
    %130 = arith.muli %101, %129 : vector<16x64xi32>
    %c3_i32 = arith.constant 3 : i32
    %131 = vector.broadcast %c3_i32 : i32 to vector<16x64xi32>
    %132 = arith.addi %130, %131 : vector<16x64xi32>
    %133 = arith.cmpi eq, %102, %132 : vector<16x64xi32>
    %134 = arith.extui %133 : vector<16x64xi1> to vector<16x64xi32>
    %135 = arith.sitofp %134 : vector<16x64xi32> to vector<16x64xf32>
    %cst_34 = arith.constant dense<0.000000e+00> : vector<16x16xf32>
    %136 = tpu.matmul %135, %104, %cst_34 {dimension_numbers = #tpu.dot_dimension_numbers<[1], [0], [0], [1], [0, 0, 1, 1], [], []>} : vector<16x64xf32>, vector<64x16xf32>, vector<16x16xf32> -> vector<16x16xf32>
    %137 = tpu.concatenate %112, %120, %128, %136 in 1 : vector<16x16xf32>, vector<16x16xf32>, vector<16x16xf32>, vector<16x16xf32> -> vector<16x64xf32>
    %138 = vector.extract_strided_slice %100 {offsets = [16, 0], sizes = [16, 64], strides = [1, 1]} : vector<32x64xf32> to vector<16x64xf32>
    %139 = tpu.transpose %138, [1, 0] : vector<16x64xf32> -> vector<64x16xf32>
    %c4_i32_35 = arith.constant 4 : i32
    %140 = vector.broadcast %c4_i32_35 : i32 to vector<16x64xi32>
    %141 = arith.muli %101, %140 : vector<16x64xi32>
    %c0_i32_36 = arith.constant 0 : i32
    %142 = vector.broadcast %c0_i32_36 : i32 to vector<16x64xi32>
    %143 = arith.addi %141, %142 : vector<16x64xi32>
    %144 = arith.cmpi eq, %102, %143 : vector<16x64xi32>
    %145 = arith.extui %144 : vector<16x64xi1> to vector<16x64xi32>
    %146 = arith.sitofp %145 : vector<16x64xi32> to vector<16x64xf32>
    %cst_37 = arith.constant dense<0.000000e+00> : vector<16x16xf32>
    %147 = tpu.matmul %146, %139, %cst_37 {dimension_numbers = #tpu.dot_dimension_numbers<[1], [0], [0], [1], [0, 0, 1, 1], [], []>} : vector<16x64xf32>, vector<64x16xf32>, vector<16x16xf32> -> vector<16x16xf32>
    %c4_i32_38 = arith.constant 4 : i32
    %148 = vector.broadcast %c4_i32_38 : i32 to vector<16x64xi32>
    %149 = arith.muli %101, %148 : vector<16x64xi32>
    %c1_i32_39 = arith.constant 1 : i32
    %150 = vector.broadcast %c1_i32_39 : i32 to vector<16x64xi32>
    %151 = arith.addi %149, %150 : vector<16x64xi32>
    %152 = arith.cmpi eq, %102, %151 : vector<16x64xi32>
    %153 = arith.extui %152 : vector<16x64xi1> to vector<16x64xi32>
    %154 = arith.sitofp %153 : vector<16x64xi32> to vector<16x64xf32>
    %cst_40 = arith.constant dense<0.000000e+00> : vector<16x16xf32>
    %155 = tpu.matmul %154, %139, %cst_40 {dimension_numbers = #tpu.dot_dimension_numbers<[1], [0], [0], [1], [0, 0, 1, 1], [], []>} : vector<16x64xf32>, vector<64x16xf32>, vector<16x16xf32> -> vector<16x16xf32>
    %c4_i32_41 = arith.constant 4 : i32
    %156 = vector.broadcast %c4_i32_41 : i32 to vector<16x64xi32>
    %157 = arith.muli %101, %156 : vector<16x64xi32>
    %c2_i32_42 = arith.constant 2 : i32
    %158 = vector.broadcast %c2_i32_42 : i32 to vector<16x64xi32>
    %159 = arith.addi %157, %158 : vector<16x64xi32>
    %160 = arith.cmpi eq, %102, %159 : vector<16x64xi32>
    %161 = arith.extui %160 : vector<16x64xi1> to vector<16x64xi32>
    %162 = arith.sitofp %161 : vector<16x64xi32> to vector<16x64xf32>
    %cst_43 = arith.constant dense<0.000000e+00> : vector<16x16xf32>
    %163 = tpu.matmul %162, %139, %cst_43 {dimension_numbers = #tpu.dot_dimension_numbers<[1], [0], [0], [1], [0, 0, 1, 1], [], []>} : vector<16x64xf32>, vector<64x16xf32>, vector<16x16xf32> -> vector<16x16xf32>
    %c4_i32_44 = arith.constant 4 : i32
    %164 = vector.broadcast %c4_i32_44 : i32 to vector<16x64xi32>
    %165 = arith.muli %101, %164 : vector<16x64xi32>
    %c3_i32_45 = arith.constant 3 : i32
    %166 = vector.broadcast %c3_i32_45 : i32 to vector<16x64xi32>
    %167 = arith.addi %165, %166 : vector<16x64xi32>
    %168 = arith.cmpi eq, %102, %167 : vector<16x64xi32>
    %169 = arith.extui %168 : vector<16x64xi1> to vector<16x64xi32>
    %170 = arith.sitofp %169 : vector<16x64xi32> to vector<16x64xf32>
    %cst_46 = arith.constant dense<0.000000e+00> : vector<16x16xf32>
    %171 = tpu.matmul %170, %139, %cst_46 {dimension_numbers = #tpu.dot_dimension_numbers<[1], [0], [0], [1], [0, 0, 1, 1], [], []>} : vector<16x64xf32>, vector<64x16xf32>, vector<16x16xf32> -> vector<16x16xf32>
    %172 = tpu.concatenate %147, %155, %163, %171 in 1 : vector<16x16xf32>, vector<16x16xf32>, vector<16x16xf32>, vector<16x16xf32> -> vector<16x64xf32>
    %173 = tpu.concatenate %137, %172 in 0 : vector<16x64xf32>, vector<16x64xf32> -> vector<32x64xf32>
    %c0_47 = arith.constant 0 : index
    %c0_48 = arith.constant 0 : index
    %174 = vector.load %arg9[%c0_47, %c0_48] : memref<64x256xf32, #tpu.memory_space<vmem>>, vector<64x256xf32>
    %cst_49 = arith.constant dense<0.000000e+00> : vector<32x256xf32>
    %175 = tpu.matmul %173, %174, %cst_49 {dimension_numbers = #tpu.dot_dimension_numbers<[1], [0], [0], [1], [0, 0, 1, 1], [], []>} : vector<32x64xf32>, vector<64x256xf32>, vector<32x256xf32> -> vector<32x256xf32>
    %c0_50 = arith.constant 0 : index
    %c0_51 = arith.constant 0 : index
    %176 = vector.load %arg11[%c0_50, %c0_51] : memref<1x256xf32, #tpu.memory_space<vmem>>, vector<1x256xf32>
    %177 = vector.broadcast %176 : vector<1x256xf32> to vector<32x256xf32>
    %178 = arith.addf %175, %177 : vector<32x256xf32>
    %c0_52 = arith.constant 0 : index
    %c0_53 = arith.constant 0 : index
    %179 = vector.load %arg17[%c0_52, %c0_53] : memref<2x64xf32, #tpu.memory_space<vmem>>, vector<2x64xf32>
    %c0_54 = arith.constant 0 : index
    %c0_55 = arith.constant 0 : index
    %180 = vector.load %arg18[%c0_54, %c0_55] : memref<2x64xf32, #tpu.memory_space<vmem>>, vector<2x64xf32>
    %181 = vector.extract_strided_slice %178 {offsets = [0, 0], sizes = [2, 256], strides = [1, 1]} : vector<32x256xf32> to vector<2x256xf32>
    %c0_56 = arith.constant 0 : index
    %c0_57 = arith.constant 0 : index
    %182 = vector.load %arg10[%c0_56, %c0_57] : memref<64x256xf32, #tpu.memory_space<vmem>>, vector<64x256xf32>
    %cst_58 = arith.constant dense<0.000000e+00> : vector<2x256xf32>
    %183 = tpu.matmul %179, %182, %cst_58 {dimension_numbers = #tpu.dot_dimension_numbers<[1], [0], [0], [1], [0, 0, 1, 1], [], []>} : vector<2x64xf32>, vector<64x256xf32>, vector<2x256xf32> -> vector<2x256xf32>
    %184 = arith.addf %181, %183 : vector<2x256xf32>
    %185 = vector.extract_strided_slice %184 {offsets = [0, 0], sizes = [2, 64], strides = [1, 1]} : vector<2x256xf32> to vector<2x64xf32>
    %cst_59 = arith.constant 5.000000e-01 : f32
    %186 = vector.broadcast %cst_59 : f32 to vector<2x64xf32>
    %187 = arith.mulf %186, %185 : vector<2x64xf32>
    %188 = math.tanh %187 : vector<2x64xf32>
    %cst_60 = arith.constant 5.000000e-01 : f32
    %189 = vector.broadcast %cst_60 : f32 to vector<2x64xf32>
    %190 = arith.mulf %189, %188 : vector<2x64xf32>
    %cst_61 = arith.constant 5.000000e-01 : f32
    %191 = vector.broadcast %cst_61 : f32 to vector<2x64xf32>
    %192 = arith.addf %190, %191 : vector<2x64xf32>
    %193 = vector.extract_strided_slice %184 {offsets = [0, 64], sizes = [2, 64], strides = [1, 1]} : vector<2x256xf32> to vector<2x64xf32>
    %cst_62 = arith.constant 5.000000e-01 : f32
    %194 = vector.broadcast %cst_62 : f32 to vector<2x64xf32>
    %195 = arith.mulf %194, %193 : vector<2x64xf32>
    %196 = math.tanh %195 : vector<2x64xf32>
    %cst_63 = arith.constant 5.000000e-01 : f32
    %197 = vector.broadcast %cst_63 : f32 to vector<2x64xf32>
    %198 = arith.mulf %197, %196 : vector<2x64xf32>
    %cst_64 = arith.constant 5.000000e-01 : f32
    %199 = vector.broadcast %cst_64 : f32 to vector<2x64xf32>
    %200 = arith.addf %198, %199 : vector<2x64xf32>
    %201 = vector.extract_strided_slice %184 {offsets = [0, 128], sizes = [2, 64], strides = [1, 1]} : vector<2x256xf32> to vector<2x64xf32>
    %202 = math.tanh %201 : vector<2x64xf32>
    %203 = vector.extract_strided_slice %184 {offsets = [0, 192], sizes = [2, 64], strides = [1, 1]} : vector<2x256xf32> to vector<2x64xf32>
    %cst_65 = arith.constant 5.000000e-01 : f32
    %204 = vector.broadcast %cst_65 : f32 to vector<2x64xf32>
    %205 = arith.mulf %204, %203 : vector<2x64xf32>
    %206 = math.tanh %205 : vector<2x64xf32>
    %cst_66 = arith.constant 5.000000e-01 : f32
    %207 = vector.broadcast %cst_66 : f32 to vector<2x64xf32>
    %208 = arith.mulf %207, %206 : vector<2x64xf32>
    %cst_67 = arith.constant 5.000000e-01 : f32
    %209 = vector.broadcast %cst_67 : f32 to vector<2x64xf32>
    %210 = arith.addf %208, %209 : vector<2x64xf32>
    %211 = arith.mulf %200, %180 : vector<2x64xf32>
    %212 = arith.mulf %192, %202 : vector<2x64xf32>
    %213 = arith.addf %211, %212 : vector<2x64xf32>
    %214 = math.tanh %213 : vector<2x64xf32>
    %215 = arith.mulf %210, %214 : vector<2x64xf32>
    %216 = vector.extract_strided_slice %178 {offsets = [2, 0], sizes = [2, 256], strides = [1, 1]} : vector<32x256xf32> to vector<2x256xf32>
    %c0_68 = arith.constant 0 : index
    %c0_69 = arith.constant 0 : index
    %217 = vector.load %arg10[%c0_68, %c0_69] : memref<64x256xf32, #tpu.memory_space<vmem>>, vector<64x256xf32>
    %cst_70 = arith.constant dense<0.000000e+00> : vector<2x256xf32>
    %218 = tpu.matmul %215, %217, %cst_70 {dimension_numbers = #tpu.dot_dimension_numbers<[1], [0], [0], [1], [0, 0, 1, 1], [], []>} : vector<2x64xf32>, vector<64x256xf32>, vector<2x256xf32> -> vector<2x256xf32>
    %219 = arith.addf %216, %218 : vector<2x256xf32>
    %220 = vector.extract_strided_slice %219 {offsets = [0, 0], sizes = [2, 64], strides = [1, 1]} : vector<2x256xf32> to vector<2x64xf32>
    %cst_71 = arith.constant 5.000000e-01 : f32
    %221 = vector.broadcast %cst_71 : f32 to vector<2x64xf32>
    %222 = arith.mulf %221, %220 : vector<2x64xf32>
    %223 = math.tanh %222 : vector<2x64xf32>
    %cst_72 = arith.constant 5.000000e-01 : f32
    %224 = vector.broadcast %cst_72 : f32 to vector<2x64xf32>
    %225 = arith.mulf %224, %223 : vector<2x64xf32>
    %cst_73 = arith.constant 5.000000e-01 : f32
    %226 = vector.broadcast %cst_73 : f32 to vector<2x64xf32>
    %227 = arith.addf %225, %226 : vector<2x64xf32>
    %228 = vector.extract_strided_slice %219 {offsets = [0, 64], sizes = [2, 64], strides = [1, 1]} : vector<2x256xf32> to vector<2x64xf32>
    %cst_74 = arith.constant 5.000000e-01 : f32
    %229 = vector.broadcast %cst_74 : f32 to vector<2x64xf32>
    %230 = arith.mulf %229, %228 : vector<2x64xf32>
    %231 = math.tanh %230 : vector<2x64xf32>
    %cst_75 = arith.constant 5.000000e-01 : f32
    %232 = vector.broadcast %cst_75 : f32 to vector<2x64xf32>
    %233 = arith.mulf %232, %231 : vector<2x64xf32>
    %cst_76 = arith.constant 5.000000e-01 : f32
    %234 = vector.broadcast %cst_76 : f32 to vector<2x64xf32>
    %235 = arith.addf %233, %234 : vector<2x64xf32>
    %236 = vector.extract_strided_slice %219 {offsets = [0, 128], sizes = [2, 64], strides = [1, 1]} : vector<2x256xf32> to vector<2x64xf32>
    %237 = math.tanh %236 : vector<2x64xf32>
    %238 = vector.extract_strided_slice %219 {offsets = [0, 192], sizes = [2, 64], strides = [1, 1]} : vector<2x256xf32> to vector<2x64xf32>
    %cst_77 = arith.constant 5.000000e-01 : f32
    %239 = vector.broadcast %cst_77 : f32 to vector<2x64xf32>
    %240 = arith.mulf %239, %238 : vector<2x64xf32>
    %241 = math.tanh %240 : vector<2x64xf32>
    %cst_78 = arith.constant 5.000000e-01 : f32
    %242 = vector.broadcast %cst_78 : f32 to vector<2x64xf32>
    %243 = arith.mulf %242, %241 : vector<2x64xf32>
    %cst_79 = arith.constant 5.000000e-01 : f32
    %244 = vector.broadcast %cst_79 : f32 to vector<2x64xf32>
    %245 = arith.addf %243, %244 : vector<2x64xf32>
    %246 = arith.mulf %235, %213 : vector<2x64xf32>
    %247 = arith.mulf %227, %237 : vector<2x64xf32>
    %248 = arith.addf %246, %247 : vector<2x64xf32>
    %249 = math.tanh %248 : vector<2x64xf32>
    %250 = arith.mulf %245, %249 : vector<2x64xf32>
    %251 = vector.extract_strided_slice %178 {offsets = [4, 0], sizes = [2, 256], strides = [1, 1]} : vector<32x256xf32> to vector<2x256xf32>
    %c0_80 = arith.constant 0 : index
    %c0_81 = arith.constant 0 : index
    %252 = vector.load %arg10[%c0_80, %c0_81] : memref<64x256xf32, #tpu.memory_space<vmem>>, vector<64x256xf32>
    %cst_82 = arith.constant dense<0.000000e+00> : vector<2x256xf32>
    %253 = tpu.matmul %250, %252, %cst_82 {dimension_numbers = #tpu.dot_dimension_numbers<[1], [0], [0], [1], [0, 0, 1, 1], [], []>} : vector<2x64xf32>, vector<64x256xf32>, vector<2x256xf32> -> vector<2x256xf32>
    %254 = arith.addf %251, %253 : vector<2x256xf32>
    %255 = vector.extract_strided_slice %254 {offsets = [0, 0], sizes = [2, 64], strides = [1, 1]} : vector<2x256xf32> to vector<2x64xf32>
    %cst_83 = arith.constant 5.000000e-01 : f32
    %256 = vector.broadcast %cst_83 : f32 to vector<2x64xf32>
    %257 = arith.mulf %256, %255 : vector<2x64xf32>
    %258 = math.tanh %257 : vector<2x64xf32>
    %cst_84 = arith.constant 5.000000e-01 : f32
    %259 = vector.broadcast %cst_84 : f32 to vector<2x64xf32>
    %260 = arith.mulf %259, %258 : vector<2x64xf32>
    %cst_85 = arith.constant 5.000000e-01 : f32
    %261 = vector.broadcast %cst_85 : f32 to vector<2x64xf32>
    %262 = arith.addf %260, %261 : vector<2x64xf32>
    %263 = vector.extract_strided_slice %254 {offsets = [0, 64], sizes = [2, 64], strides = [1, 1]} : vector<2x256xf32> to vector<2x64xf32>
    %cst_86 = arith.constant 5.000000e-01 : f32
    %264 = vector.broadcast %cst_86 : f32 to vector<2x64xf32>
    %265 = arith.mulf %264, %263 : vector<2x64xf32>
    %266 = math.tanh %265 : vector<2x64xf32>
    %cst_87 = arith.constant 5.000000e-01 : f32
    %267 = vector.broadcast %cst_87 : f32 to vector<2x64xf32>
    %268 = arith.mulf %267, %266 : vector<2x64xf32>
    %cst_88 = arith.constant 5.000000e-01 : f32
    %269 = vector.broadcast %cst_88 : f32 to vector<2x64xf32>
    %270 = arith.addf %268, %269 : vector<2x64xf32>
    %271 = vector.extract_strided_slice %254 {offsets = [0, 128], sizes = [2, 64], strides = [1, 1]} : vector<2x256xf32> to vector<2x64xf32>
    %272 = math.tanh %271 : vector<2x64xf32>
    %273 = vector.extract_strided_slice %254 {offsets = [0, 192], sizes = [2, 64], strides = [1, 1]} : vector<2x256xf32> to vector<2x64xf32>
    %cst_89 = arith.constant 5.000000e-01 : f32
    %274 = vector.broadcast %cst_89 : f32 to vector<2x64xf32>
    %275 = arith.mulf %274, %273 : vector<2x64xf32>
    %276 = math.tanh %275 : vector<2x64xf32>
    %cst_90 = arith.constant 5.000000e-01 : f32
    %277 = vector.broadcast %cst_90 : f32 to vector<2x64xf32>
    %278 = arith.mulf %277, %276 : vector<2x64xf32>
    %cst_91 = arith.constant 5.000000e-01 : f32
    %279 = vector.broadcast %cst_91 : f32 to vector<2x64xf32>
    %280 = arith.addf %278, %279 : vector<2x64xf32>
    %281 = arith.mulf %270, %248 : vector<2x64xf32>
    %282 = arith.mulf %262, %272 : vector<2x64xf32>
    %283 = arith.addf %281, %282 : vector<2x64xf32>
    %284 = math.tanh %283 : vector<2x64xf32>
    %285 = arith.mulf %280, %284 : vector<2x64xf32>
    %286 = vector.extract_strided_slice %178 {offsets = [6, 0], sizes = [2, 256], strides = [1, 1]} : vector<32x256xf32> to vector<2x256xf32>
    %c0_92 = arith.constant 0 : index
    %c0_93 = arith.constant 0 : index
    %287 = vector.load %arg10[%c0_92, %c0_93] : memref<64x256xf32, #tpu.memory_space<vmem>>, vector<64x256xf32>
    %cst_94 = arith.constant dense<0.000000e+00> : vector<2x256xf32>
    %288 = tpu.matmul %285, %287, %cst_94 {dimension_numbers = #tpu.dot_dimension_numbers<[1], [0], [0], [1], [0, 0, 1, 1], [], []>} : vector<2x64xf32>, vector<64x256xf32>, vector<2x256xf32> -> vector<2x256xf32>
    %289 = arith.addf %286, %288 : vector<2x256xf32>
    %290 = vector.extract_strided_slice %289 {offsets = [0, 0], sizes = [2, 64], strides = [1, 1]} : vector<2x256xf32> to vector<2x64xf32>
    %cst_95 = arith.constant 5.000000e-01 : f32
    %291 = vector.broadcast %cst_95 : f32 to vector<2x64xf32>
    %292 = arith.mulf %291, %290 : vector<2x64xf32>
    %293 = math.tanh %292 : vector<2x64xf32>
    %cst_96 = arith.constant 5.000000e-01 : f32
    %294 = vector.broadcast %cst_96 : f32 to vector<2x64xf32>
    %295 = arith.mulf %294, %293 : vector<2x64xf32>
    %cst_97 = arith.constant 5.000000e-01 : f32
    %296 = vector.broadcast %cst_97 : f32 to vector<2x64xf32>
    %297 = arith.addf %295, %296 : vector<2x64xf32>
    %298 = vector.extract_strided_slice %289 {offsets = [0, 64], sizes = [2, 64], strides = [1, 1]} : vector<2x256xf32> to vector<2x64xf32>
    %cst_98 = arith.constant 5.000000e-01 : f32
    %299 = vector.broadcast %cst_98 : f32 to vector<2x64xf32>
    %300 = arith.mulf %299, %298 : vector<2x64xf32>
    %301 = math.tanh %300 : vector<2x64xf32>
    %cst_99 = arith.constant 5.000000e-01 : f32
    %302 = vector.broadcast %cst_99 : f32 to vector<2x64xf32>
    %303 = arith.mulf %302, %301 : vector<2x64xf32>
    %cst_100 = arith.constant 5.000000e-01 : f32
    %304 = vector.broadcast %cst_100 : f32 to vector<2x64xf32>
    %305 = arith.addf %303, %304 : vector<2x64xf32>
    %306 = vector.extract_strided_slice %289 {offsets = [0, 128], sizes = [2, 64], strides = [1, 1]} : vector<2x256xf32> to vector<2x64xf32>
    %307 = math.tanh %306 : vector<2x64xf32>
    %308 = vector.extract_strided_slice %289 {offsets = [0, 192], sizes = [2, 64], strides = [1, 1]} : vector<2x256xf32> to vector<2x64xf32>
    %cst_101 = arith.constant 5.000000e-01 : f32
    %309 = vector.broadcast %cst_101 : f32 to vector<2x64xf32>
    %310 = arith.mulf %309, %308 : vector<2x64xf32>
    %311 = math.tanh %310 : vector<2x64xf32>
    %cst_102 = arith.constant 5.000000e-01 : f32
    %312 = vector.broadcast %cst_102 : f32 to vector<2x64xf32>
    %313 = arith.mulf %312, %311 : vector<2x64xf32>
    %cst_103 = arith.constant 5.000000e-01 : f32
    %314 = vector.broadcast %cst_103 : f32 to vector<2x64xf32>
    %315 = arith.addf %313, %314 : vector<2x64xf32>
    %316 = arith.mulf %305, %283 : vector<2x64xf32>
    %317 = arith.mulf %297, %307 : vector<2x64xf32>
    %318 = arith.addf %316, %317 : vector<2x64xf32>
    %319 = math.tanh %318 : vector<2x64xf32>
    %320 = arith.mulf %315, %319 : vector<2x64xf32>
    %321 = vector.extract_strided_slice %178 {offsets = [8, 0], sizes = [2, 256], strides = [1, 1]} : vector<32x256xf32> to vector<2x256xf32>
    %c0_104 = arith.constant 0 : index
    %c0_105 = arith.constant 0 : index
    %322 = vector.load %arg10[%c0_104, %c0_105] : memref<64x256xf32, #tpu.memory_space<vmem>>, vector<64x256xf32>
    %cst_106 = arith.constant dense<0.000000e+00> : vector<2x256xf32>
    %323 = tpu.matmul %320, %322, %cst_106 {dimension_numbers = #tpu.dot_dimension_numbers<[1], [0], [0], [1], [0, 0, 1, 1], [], []>} : vector<2x64xf32>, vector<64x256xf32>, vector<2x256xf32> -> vector<2x256xf32>
    %324 = arith.addf %321, %323 : vector<2x256xf32>
    %325 = vector.extract_strided_slice %324 {offsets = [0, 0], sizes = [2, 64], strides = [1, 1]} : vector<2x256xf32> to vector<2x64xf32>
    %cst_107 = arith.constant 5.000000e-01 : f32
    %326 = vector.broadcast %cst_107 : f32 to vector<2x64xf32>
    %327 = arith.mulf %326, %325 : vector<2x64xf32>
    %328 = math.tanh %327 : vector<2x64xf32>
    %cst_108 = arith.constant 5.000000e-01 : f32
    %329 = vector.broadcast %cst_108 : f32 to vector<2x64xf32>
    %330 = arith.mulf %329, %328 : vector<2x64xf32>
    %cst_109 = arith.constant 5.000000e-01 : f32
    %331 = vector.broadcast %cst_109 : f32 to vector<2x64xf32>
    %332 = arith.addf %330, %331 : vector<2x64xf32>
    %333 = vector.extract_strided_slice %324 {offsets = [0, 64], sizes = [2, 64], strides = [1, 1]} : vector<2x256xf32> to vector<2x64xf32>
    %cst_110 = arith.constant 5.000000e-01 : f32
    %334 = vector.broadcast %cst_110 : f32 to vector<2x64xf32>
    %335 = arith.mulf %334, %333 : vector<2x64xf32>
    %336 = math.tanh %335 : vector<2x64xf32>
    %cst_111 = arith.constant 5.000000e-01 : f32
    %337 = vector.broadcast %cst_111 : f32 to vector<2x64xf32>
    %338 = arith.mulf %337, %336 : vector<2x64xf32>
    %cst_112 = arith.constant 5.000000e-01 : f32
    %339 = vector.broadcast %cst_112 : f32 to vector<2x64xf32>
    %340 = arith.addf %338, %339 : vector<2x64xf32>
    %341 = vector.extract_strided_slice %324 {offsets = [0, 128], sizes = [2, 64], strides = [1, 1]} : vector<2x256xf32> to vector<2x64xf32>
    %342 = math.tanh %341 : vector<2x64xf32>
    %343 = vector.extract_strided_slice %324 {offsets = [0, 192], sizes = [2, 64], strides = [1, 1]} : vector<2x256xf32> to vector<2x64xf32>
    %cst_113 = arith.constant 5.000000e-01 : f32
    %344 = vector.broadcast %cst_113 : f32 to vector<2x64xf32>
    %345 = arith.mulf %344, %343 : vector<2x64xf32>
    %346 = math.tanh %345 : vector<2x64xf32>
    %cst_114 = arith.constant 5.000000e-01 : f32
    %347 = vector.broadcast %cst_114 : f32 to vector<2x64xf32>
    %348 = arith.mulf %347, %346 : vector<2x64xf32>
    %cst_115 = arith.constant 5.000000e-01 : f32
    %349 = vector.broadcast %cst_115 : f32 to vector<2x64xf32>
    %350 = arith.addf %348, %349 : vector<2x64xf32>
    %351 = arith.mulf %340, %318 : vector<2x64xf32>
    %352 = arith.mulf %332, %342 : vector<2x64xf32>
    %353 = arith.addf %351, %352 : vector<2x64xf32>
    %354 = math.tanh %353 : vector<2x64xf32>
    %355 = arith.mulf %350, %354 : vector<2x64xf32>
    %356 = vector.extract_strided_slice %178 {offsets = [10, 0], sizes = [2, 256], strides = [1, 1]} : vector<32x256xf32> to vector<2x256xf32>
    %c0_116 = arith.constant 0 : index
    %c0_117 = arith.constant 0 : index
    %357 = vector.load %arg10[%c0_116, %c0_117] : memref<64x256xf32, #tpu.memory_space<vmem>>, vector<64x256xf32>
    %cst_118 = arith.constant dense<0.000000e+00> : vector<2x256xf32>
    %358 = tpu.matmul %355, %357, %cst_118 {dimension_numbers = #tpu.dot_dimension_numbers<[1], [0], [0], [1], [0, 0, 1, 1], [], []>} : vector<2x64xf32>, vector<64x256xf32>, vector<2x256xf32> -> vector<2x256xf32>
    %359 = arith.addf %356, %358 : vector<2x256xf32>
    %360 = vector.extract_strided_slice %359 {offsets = [0, 0], sizes = [2, 64], strides = [1, 1]} : vector<2x256xf32> to vector<2x64xf32>
    %cst_119 = arith.constant 5.000000e-01 : f32
    %361 = vector.broadcast %cst_119 : f32 to vector<2x64xf32>
    %362 = arith.mulf %361, %360 : vector<2x64xf32>
    %363 = math.tanh %362 : vector<2x64xf32>
    %cst_120 = arith.constant 5.000000e-01 : f32
    %364 = vector.broadcast %cst_120 : f32 to vector<2x64xf32>
    %365 = arith.mulf %364, %363 : vector<2x64xf32>
    %cst_121 = arith.constant 5.000000e-01 : f32
    %366 = vector.broadcast %cst_121 : f32 to vector<2x64xf32>
    %367 = arith.addf %365, %366 : vector<2x64xf32>
    %368 = vector.extract_strided_slice %359 {offsets = [0, 64], sizes = [2, 64], strides = [1, 1]} : vector<2x256xf32> to vector<2x64xf32>
    %cst_122 = arith.constant 5.000000e-01 : f32
    %369 = vector.broadcast %cst_122 : f32 to vector<2x64xf32>
    %370 = arith.mulf %369, %368 : vector<2x64xf32>
    %371 = math.tanh %370 : vector<2x64xf32>
    %cst_123 = arith.constant 5.000000e-01 : f32
    %372 = vector.broadcast %cst_123 : f32 to vector<2x64xf32>
    %373 = arith.mulf %372, %371 : vector<2x64xf32>
    %cst_124 = arith.constant 5.000000e-01 : f32
    %374 = vector.broadcast %cst_124 : f32 to vector<2x64xf32>
    %375 = arith.addf %373, %374 : vector<2x64xf32>
    %376 = vector.extract_strided_slice %359 {offsets = [0, 128], sizes = [2, 64], strides = [1, 1]} : vector<2x256xf32> to vector<2x64xf32>
    %377 = math.tanh %376 : vector<2x64xf32>
    %378 = vector.extract_strided_slice %359 {offsets = [0, 192], sizes = [2, 64], strides = [1, 1]} : vector<2x256xf32> to vector<2x64xf32>
    %cst_125 = arith.constant 5.000000e-01 : f32
    %379 = vector.broadcast %cst_125 : f32 to vector<2x64xf32>
    %380 = arith.mulf %379, %378 : vector<2x64xf32>
    %381 = math.tanh %380 : vector<2x64xf32>
    %cst_126 = arith.constant 5.000000e-01 : f32
    %382 = vector.broadcast %cst_126 : f32 to vector<2x64xf32>
    %383 = arith.mulf %382, %381 : vector<2x64xf32>
    %cst_127 = arith.constant 5.000000e-01 : f32
    %384 = vector.broadcast %cst_127 : f32 to vector<2x64xf32>
    %385 = arith.addf %383, %384 : vector<2x64xf32>
    %386 = arith.mulf %375, %353 : vector<2x64xf32>
    %387 = arith.mulf %367, %377 : vector<2x64xf32>
    %388 = arith.addf %386, %387 : vector<2x64xf32>
    %389 = math.tanh %388 : vector<2x64xf32>
    %390 = arith.mulf %385, %389 : vector<2x64xf32>
    %391 = vector.extract_strided_slice %178 {offsets = [12, 0], sizes = [2, 256], strides = [1, 1]} : vector<32x256xf32> to vector<2x256xf32>
    %c0_128 = arith.constant 0 : index
    %c0_129 = arith.constant 0 : index
    %392 = vector.load %arg10[%c0_128, %c0_129] : memref<64x256xf32, #tpu.memory_space<vmem>>, vector<64x256xf32>
    %cst_130 = arith.constant dense<0.000000e+00> : vector<2x256xf32>
    %393 = tpu.matmul %390, %392, %cst_130 {dimension_numbers = #tpu.dot_dimension_numbers<[1], [0], [0], [1], [0, 0, 1, 1], [], []>} : vector<2x64xf32>, vector<64x256xf32>, vector<2x256xf32> -> vector<2x256xf32>
    %394 = arith.addf %391, %393 : vector<2x256xf32>
    %395 = vector.extract_strided_slice %394 {offsets = [0, 0], sizes = [2, 64], strides = [1, 1]} : vector<2x256xf32> to vector<2x64xf32>
    %cst_131 = arith.constant 5.000000e-01 : f32
    %396 = vector.broadcast %cst_131 : f32 to vector<2x64xf32>
    %397 = arith.mulf %396, %395 : vector<2x64xf32>
    %398 = math.tanh %397 : vector<2x64xf32>
    %cst_132 = arith.constant 5.000000e-01 : f32
    %399 = vector.broadcast %cst_132 : f32 to vector<2x64xf32>
    %400 = arith.mulf %399, %398 : vector<2x64xf32>
    %cst_133 = arith.constant 5.000000e-01 : f32
    %401 = vector.broadcast %cst_133 : f32 to vector<2x64xf32>
    %402 = arith.addf %400, %401 : vector<2x64xf32>
    %403 = vector.extract_strided_slice %394 {offsets = [0, 64], sizes = [2, 64], strides = [1, 1]} : vector<2x256xf32> to vector<2x64xf32>
    %cst_134 = arith.constant 5.000000e-01 : f32
    %404 = vector.broadcast %cst_134 : f32 to vector<2x64xf32>
    %405 = arith.mulf %404, %403 : vector<2x64xf32>
    %406 = math.tanh %405 : vector<2x64xf32>
    %cst_135 = arith.constant 5.000000e-01 : f32
    %407 = vector.broadcast %cst_135 : f32 to vector<2x64xf32>
    %408 = arith.mulf %407, %406 : vector<2x64xf32>
    %cst_136 = arith.constant 5.000000e-01 : f32
    %409 = vector.broadcast %cst_136 : f32 to vector<2x64xf32>
    %410 = arith.addf %408, %409 : vector<2x64xf32>
    %411 = vector.extract_strided_slice %394 {offsets = [0, 128], sizes = [2, 64], strides = [1, 1]} : vector<2x256xf32> to vector<2x64xf32>
    %412 = math.tanh %411 : vector<2x64xf32>
    %413 = vector.extract_strided_slice %394 {offsets = [0, 192], sizes = [2, 64], strides = [1, 1]} : vector<2x256xf32> to vector<2x64xf32>
    %cst_137 = arith.constant 5.000000e-01 : f32
    %414 = vector.broadcast %cst_137 : f32 to vector<2x64xf32>
    %415 = arith.mulf %414, %413 : vector<2x64xf32>
    %416 = math.tanh %415 : vector<2x64xf32>
    %cst_138 = arith.constant 5.000000e-01 : f32
    %417 = vector.broadcast %cst_138 : f32 to vector<2x64xf32>
    %418 = arith.mulf %417, %416 : vector<2x64xf32>
    %cst_139 = arith.constant 5.000000e-01 : f32
    %419 = vector.broadcast %cst_139 : f32 to vector<2x64xf32>
    %420 = arith.addf %418, %419 : vector<2x64xf32>
    %421 = arith.mulf %410, %388 : vector<2x64xf32>
    %422 = arith.mulf %402, %412 : vector<2x64xf32>
    %423 = arith.addf %421, %422 : vector<2x64xf32>
    %424 = math.tanh %423 : vector<2x64xf32>
    %425 = arith.mulf %420, %424 : vector<2x64xf32>
    %426 = vector.extract_strided_slice %178 {offsets = [14, 0], sizes = [2, 256], strides = [1, 1]} : vector<32x256xf32> to vector<2x256xf32>
    %c0_140 = arith.constant 0 : index
    %c0_141 = arith.constant 0 : index
    %427 = vector.load %arg10[%c0_140, %c0_141] : memref<64x256xf32, #tpu.memory_space<vmem>>, vector<64x256xf32>
    %cst_142 = arith.constant dense<0.000000e+00> : vector<2x256xf32>
    %428 = tpu.matmul %425, %427, %cst_142 {dimension_numbers = #tpu.dot_dimension_numbers<[1], [0], [0], [1], [0, 0, 1, 1], [], []>} : vector<2x64xf32>, vector<64x256xf32>, vector<2x256xf32> -> vector<2x256xf32>
    %429 = arith.addf %426, %428 : vector<2x256xf32>
    %430 = vector.extract_strided_slice %429 {offsets = [0, 0], sizes = [2, 64], strides = [1, 1]} : vector<2x256xf32> to vector<2x64xf32>
    %cst_143 = arith.constant 5.000000e-01 : f32
    %431 = vector.broadcast %cst_143 : f32 to vector<2x64xf32>
    %432 = arith.mulf %431, %430 : vector<2x64xf32>
    %433 = math.tanh %432 : vector<2x64xf32>
    %cst_144 = arith.constant 5.000000e-01 : f32
    %434 = vector.broadcast %cst_144 : f32 to vector<2x64xf32>
    %435 = arith.mulf %434, %433 : vector<2x64xf32>
    %cst_145 = arith.constant 5.000000e-01 : f32
    %436 = vector.broadcast %cst_145 : f32 to vector<2x64xf32>
    %437 = arith.addf %435, %436 : vector<2x64xf32>
    %438 = vector.extract_strided_slice %429 {offsets = [0, 64], sizes = [2, 64], strides = [1, 1]} : vector<2x256xf32> to vector<2x64xf32>
    %cst_146 = arith.constant 5.000000e-01 : f32
    %439 = vector.broadcast %cst_146 : f32 to vector<2x64xf32>
    %440 = arith.mulf %439, %438 : vector<2x64xf32>
    %441 = math.tanh %440 : vector<2x64xf32>
    %cst_147 = arith.constant 5.000000e-01 : f32
    %442 = vector.broadcast %cst_147 : f32 to vector<2x64xf32>
    %443 = arith.mulf %442, %441 : vector<2x64xf32>
    %cst_148 = arith.constant 5.000000e-01 : f32
    %444 = vector.broadcast %cst_148 : f32 to vector<2x64xf32>
    %445 = arith.addf %443, %444 : vector<2x64xf32>
    %446 = vector.extract_strided_slice %429 {offsets = [0, 128], sizes = [2, 64], strides = [1, 1]} : vector<2x256xf32> to vector<2x64xf32>
    %447 = math.tanh %446 : vector<2x64xf32>
    %448 = vector.extract_strided_slice %429 {offsets = [0, 192], sizes = [2, 64], strides = [1, 1]} : vector<2x256xf32> to vector<2x64xf32>
    %cst_149 = arith.constant 5.000000e-01 : f32
    %449 = vector.broadcast %cst_149 : f32 to vector<2x64xf32>
    %450 = arith.mulf %449, %448 : vector<2x64xf32>
    %451 = math.tanh %450 : vector<2x64xf32>
    %cst_150 = arith.constant 5.000000e-01 : f32
    %452 = vector.broadcast %cst_150 : f32 to vector<2x64xf32>
    %453 = arith.mulf %452, %451 : vector<2x64xf32>
    %cst_151 = arith.constant 5.000000e-01 : f32
    %454 = vector.broadcast %cst_151 : f32 to vector<2x64xf32>
    %455 = arith.addf %453, %454 : vector<2x64xf32>
    %456 = arith.mulf %445, %423 : vector<2x64xf32>
    %457 = arith.mulf %437, %447 : vector<2x64xf32>
    %458 = arith.addf %456, %457 : vector<2x64xf32>
    %459 = math.tanh %458 : vector<2x64xf32>
    %460 = arith.mulf %455, %459 : vector<2x64xf32>
    %461 = vector.extract_strided_slice %178 {offsets = [16, 0], sizes = [2, 256], strides = [1, 1]} : vector<32x256xf32> to vector<2x256xf32>
    %c0_152 = arith.constant 0 : index
    %c0_153 = arith.constant 0 : index
    %462 = vector.load %arg10[%c0_152, %c0_153] : memref<64x256xf32, #tpu.memory_space<vmem>>, vector<64x256xf32>
    %cst_154 = arith.constant dense<0.000000e+00> : vector<2x256xf32>
    %463 = tpu.matmul %460, %462, %cst_154 {dimension_numbers = #tpu.dot_dimension_numbers<[1], [0], [0], [1], [0, 0, 1, 1], [], []>} : vector<2x64xf32>, vector<64x256xf32>, vector<2x256xf32> -> vector<2x256xf32>
    %464 = arith.addf %461, %463 : vector<2x256xf32>
    %465 = vector.extract_strided_slice %464 {offsets = [0, 0], sizes = [2, 64], strides = [1, 1]} : vector<2x256xf32> to vector<2x64xf32>
    %cst_155 = arith.constant 5.000000e-01 : f32
    %466 = vector.broadcast %cst_155 : f32 to vector<2x64xf32>
    %467 = arith.mulf %466, %465 : vector<2x64xf32>
    %468 = math.tanh %467 : vector<2x64xf32>
    %cst_156 = arith.constant 5.000000e-01 : f32
    %469 = vector.broadcast %cst_156 : f32 to vector<2x64xf32>
    %470 = arith.mulf %469, %468 : vector<2x64xf32>
    %cst_157 = arith.constant 5.000000e-01 : f32
    %471 = vector.broadcast %cst_157 : f32 to vector<2x64xf32>
    %472 = arith.addf %470, %471 : vector<2x64xf32>
    %473 = vector.extract_strided_slice %464 {offsets = [0, 64], sizes = [2, 64], strides = [1, 1]} : vector<2x256xf32> to vector<2x64xf32>
    %cst_158 = arith.constant 5.000000e-01 : f32
    %474 = vector.broadcast %cst_158 : f32 to vector<2x64xf32>
    %475 = arith.mulf %474, %473 : vector<2x64xf32>
    %476 = math.tanh %475 : vector<2x64xf32>
    %cst_159 = arith.constant 5.000000e-01 : f32
    %477 = vector.broadcast %cst_159 : f32 to vector<2x64xf32>
    %478 = arith.mulf %477, %476 : vector<2x64xf32>
    %cst_160 = arith.constant 5.000000e-01 : f32
    %479 = vector.broadcast %cst_160 : f32 to vector<2x64xf32>
    %480 = arith.addf %478, %479 : vector<2x64xf32>
    %481 = vector.extract_strided_slice %464 {offsets = [0, 128], sizes = [2, 64], strides = [1, 1]} : vector<2x256xf32> to vector<2x64xf32>
    %482 = math.tanh %481 : vector<2x64xf32>
    %483 = vector.extract_strided_slice %464 {offsets = [0, 192], sizes = [2, 64], strides = [1, 1]} : vector<2x256xf32> to vector<2x64xf32>
    %cst_161 = arith.constant 5.000000e-01 : f32
    %484 = vector.broadcast %cst_161 : f32 to vector<2x64xf32>
    %485 = arith.mulf %484, %483 : vector<2x64xf32>
    %486 = math.tanh %485 : vector<2x64xf32>
    %cst_162 = arith.constant 5.000000e-01 : f32
    %487 = vector.broadcast %cst_162 : f32 to vector<2x64xf32>
    %488 = arith.mulf %487, %486 : vector<2x64xf32>
    %cst_163 = arith.constant 5.000000e-01 : f32
    %489 = vector.broadcast %cst_163 : f32 to vector<2x64xf32>
    %490 = arith.addf %488, %489 : vector<2x64xf32>
    %491 = arith.mulf %480, %458 : vector<2x64xf32>
    %492 = arith.mulf %472, %482 : vector<2x64xf32>
    %493 = arith.addf %491, %492 : vector<2x64xf32>
    %494 = math.tanh %493 : vector<2x64xf32>
    %495 = arith.mulf %490, %494 : vector<2x64xf32>
    %496 = vector.extract_strided_slice %178 {offsets = [18, 0], sizes = [2, 256], strides = [1, 1]} : vector<32x256xf32> to vector<2x256xf32>
    %c0_164 = arith.constant 0 : index
    %c0_165 = arith.constant 0 : index
    %497 = vector.load %arg10[%c0_164, %c0_165] : memref<64x256xf32, #tpu.memory_space<vmem>>, vector<64x256xf32>
    %cst_166 = arith.constant dense<0.000000e+00> : vector<2x256xf32>
    %498 = tpu.matmul %495, %497, %cst_166 {dimension_numbers = #tpu.dot_dimension_numbers<[1], [0], [0], [1], [0, 0, 1, 1], [], []>} : vector<2x64xf32>, vector<64x256xf32>, vector<2x256xf32> -> vector<2x256xf32>
    %499 = arith.addf %496, %498 : vector<2x256xf32>
    %500 = vector.extract_strided_slice %499 {offsets = [0, 0], sizes = [2, 64], strides = [1, 1]} : vector<2x256xf32> to vector<2x64xf32>
    %cst_167 = arith.constant 5.000000e-01 : f32
    %501 = vector.broadcast %cst_167 : f32 to vector<2x64xf32>
    %502 = arith.mulf %501, %500 : vector<2x64xf32>
    %503 = math.tanh %502 : vector<2x64xf32>
    %cst_168 = arith.constant 5.000000e-01 : f32
    %504 = vector.broadcast %cst_168 : f32 to vector<2x64xf32>
    %505 = arith.mulf %504, %503 : vector<2x64xf32>
    %cst_169 = arith.constant 5.000000e-01 : f32
    %506 = vector.broadcast %cst_169 : f32 to vector<2x64xf32>
    %507 = arith.addf %505, %506 : vector<2x64xf32>
    %508 = vector.extract_strided_slice %499 {offsets = [0, 64], sizes = [2, 64], strides = [1, 1]} : vector<2x256xf32> to vector<2x64xf32>
    %cst_170 = arith.constant 5.000000e-01 : f32
    %509 = vector.broadcast %cst_170 : f32 to vector<2x64xf32>
    %510 = arith.mulf %509, %508 : vector<2x64xf32>
    %511 = math.tanh %510 : vector<2x64xf32>
    %cst_171 = arith.constant 5.000000e-01 : f32
    %512 = vector.broadcast %cst_171 : f32 to vector<2x64xf32>
    %513 = arith.mulf %512, %511 : vector<2x64xf32>
    %cst_172 = arith.constant 5.000000e-01 : f32
    %514 = vector.broadcast %cst_172 : f32 to vector<2x64xf32>
    %515 = arith.addf %513, %514 : vector<2x64xf32>
    %516 = vector.extract_strided_slice %499 {offsets = [0, 128], sizes = [2, 64], strides = [1, 1]} : vector<2x256xf32> to vector<2x64xf32>
    %517 = math.tanh %516 : vector<2x64xf32>
    %518 = vector.extract_strided_slice %499 {offsets = [0, 192], sizes = [2, 64], strides = [1, 1]} : vector<2x256xf32> to vector<2x64xf32>
    %cst_173 = arith.constant 5.000000e-01 : f32
    %519 = vector.broadcast %cst_173 : f32 to vector<2x64xf32>
    %520 = arith.mulf %519, %518 : vector<2x64xf32>
    %521 = math.tanh %520 : vector<2x64xf32>
    %cst_174 = arith.constant 5.000000e-01 : f32
    %522 = vector.broadcast %cst_174 : f32 to vector<2x64xf32>
    %523 = arith.mulf %522, %521 : vector<2x64xf32>
    %cst_175 = arith.constant 5.000000e-01 : f32
    %524 = vector.broadcast %cst_175 : f32 to vector<2x64xf32>
    %525 = arith.addf %523, %524 : vector<2x64xf32>
    %526 = arith.mulf %515, %493 : vector<2x64xf32>
    %527 = arith.mulf %507, %517 : vector<2x64xf32>
    %528 = arith.addf %526, %527 : vector<2x64xf32>
    %529 = math.tanh %528 : vector<2x64xf32>
    %530 = arith.mulf %525, %529 : vector<2x64xf32>
    %531 = vector.extract_strided_slice %178 {offsets = [20, 0], sizes = [2, 256], strides = [1, 1]} : vector<32x256xf32> to vector<2x256xf32>
    %c0_176 = arith.constant 0 : index
    %c0_177 = arith.constant 0 : index
    %532 = vector.load %arg10[%c0_176, %c0_177] : memref<64x256xf32, #tpu.memory_space<vmem>>, vector<64x256xf32>
    %cst_178 = arith.constant dense<0.000000e+00> : vector<2x256xf32>
    %533 = tpu.matmul %530, %532, %cst_178 {dimension_numbers = #tpu.dot_dimension_numbers<[1], [0], [0], [1], [0, 0, 1, 1], [], []>} : vector<2x64xf32>, vector<64x256xf32>, vector<2x256xf32> -> vector<2x256xf32>
    %534 = arith.addf %531, %533 : vector<2x256xf32>
    %535 = vector.extract_strided_slice %534 {offsets = [0, 0], sizes = [2, 64], strides = [1, 1]} : vector<2x256xf32> to vector<2x64xf32>
    %cst_179 = arith.constant 5.000000e-01 : f32
    %536 = vector.broadcast %cst_179 : f32 to vector<2x64xf32>
    %537 = arith.mulf %536, %535 : vector<2x64xf32>
    %538 = math.tanh %537 : vector<2x64xf32>
    %cst_180 = arith.constant 5.000000e-01 : f32
    %539 = vector.broadcast %cst_180 : f32 to vector<2x64xf32>
    %540 = arith.mulf %539, %538 : vector<2x64xf32>
    %cst_181 = arith.constant 5.000000e-01 : f32
    %541 = vector.broadcast %cst_181 : f32 to vector<2x64xf32>
    %542 = arith.addf %540, %541 : vector<2x64xf32>
    %543 = vector.extract_strided_slice %534 {offsets = [0, 64], sizes = [2, 64], strides = [1, 1]} : vector<2x256xf32> to vector<2x64xf32>
    %cst_182 = arith.constant 5.000000e-01 : f32
    %544 = vector.broadcast %cst_182 : f32 to vector<2x64xf32>
    %545 = arith.mulf %544, %543 : vector<2x64xf32>
    %546 = math.tanh %545 : vector<2x64xf32>
    %cst_183 = arith.constant 5.000000e-01 : f32
    %547 = vector.broadcast %cst_183 : f32 to vector<2x64xf32>
    %548 = arith.mulf %547, %546 : vector<2x64xf32>
    %cst_184 = arith.constant 5.000000e-01 : f32
    %549 = vector.broadcast %cst_184 : f32 to vector<2x64xf32>
    %550 = arith.addf %548, %549 : vector<2x64xf32>
    %551 = vector.extract_strided_slice %534 {offsets = [0, 128], sizes = [2, 64], strides = [1, 1]} : vector<2x256xf32> to vector<2x64xf32>
    %552 = math.tanh %551 : vector<2x64xf32>
    %553 = vector.extract_strided_slice %534 {offsets = [0, 192], sizes = [2, 64], strides = [1, 1]} : vector<2x256xf32> to vector<2x64xf32>
    %cst_185 = arith.constant 5.000000e-01 : f32
    %554 = vector.broadcast %cst_185 : f32 to vector<2x64xf32>
    %555 = arith.mulf %554, %553 : vector<2x64xf32>
    %556 = math.tanh %555 : vector<2x64xf32>
    %cst_186 = arith.constant 5.000000e-01 : f32
    %557 = vector.broadcast %cst_186 : f32 to vector<2x64xf32>
    %558 = arith.mulf %557, %556 : vector<2x64xf32>
    %cst_187 = arith.constant 5.000000e-01 : f32
    %559 = vector.broadcast %cst_187 : f32 to vector<2x64xf32>
    %560 = arith.addf %558, %559 : vector<2x64xf32>
    %561 = arith.mulf %550, %528 : vector<2x64xf32>
    %562 = arith.mulf %542, %552 : vector<2x64xf32>
    %563 = arith.addf %561, %562 : vector<2x64xf32>
    %564 = math.tanh %563 : vector<2x64xf32>
    %565 = arith.mulf %560, %564 : vector<2x64xf32>
    %566 = vector.extract_strided_slice %178 {offsets = [22, 0], sizes = [2, 256], strides = [1, 1]} : vector<32x256xf32> to vector<2x256xf32>
    %c0_188 = arith.constant 0 : index
    %c0_189 = arith.constant 0 : index
    %567 = vector.load %arg10[%c0_188, %c0_189] : memref<64x256xf32, #tpu.memory_space<vmem>>, vector<64x256xf32>
    %cst_190 = arith.constant dense<0.000000e+00> : vector<2x256xf32>
    %568 = tpu.matmul %565, %567, %cst_190 {dimension_numbers = #tpu.dot_dimension_numbers<[1], [0], [0], [1], [0, 0, 1, 1], [], []>} : vector<2x64xf32>, vector<64x256xf32>, vector<2x256xf32> -> vector<2x256xf32>
    %569 = arith.addf %566, %568 : vector<2x256xf32>
    %570 = vector.extract_strided_slice %569 {offsets = [0, 0], sizes = [2, 64], strides = [1, 1]} : vector<2x256xf32> to vector<2x64xf32>
    %cst_191 = arith.constant 5.000000e-01 : f32
    %571 = vector.broadcast %cst_191 : f32 to vector<2x64xf32>
    %572 = arith.mulf %571, %570 : vector<2x64xf32>
    %573 = math.tanh %572 : vector<2x64xf32>
    %cst_192 = arith.constant 5.000000e-01 : f32
    %574 = vector.broadcast %cst_192 : f32 to vector<2x64xf32>
    %575 = arith.mulf %574, %573 : vector<2x64xf32>
    %cst_193 = arith.constant 5.000000e-01 : f32
    %576 = vector.broadcast %cst_193 : f32 to vector<2x64xf32>
    %577 = arith.addf %575, %576 : vector<2x64xf32>
    %578 = vector.extract_strided_slice %569 {offsets = [0, 64], sizes = [2, 64], strides = [1, 1]} : vector<2x256xf32> to vector<2x64xf32>
    %cst_194 = arith.constant 5.000000e-01 : f32
    %579 = vector.broadcast %cst_194 : f32 to vector<2x64xf32>
    %580 = arith.mulf %579, %578 : vector<2x64xf32>
    %581 = math.tanh %580 : vector<2x64xf32>
    %cst_195 = arith.constant 5.000000e-01 : f32
    %582 = vector.broadcast %cst_195 : f32 to vector<2x64xf32>
    %583 = arith.mulf %582, %581 : vector<2x64xf32>
    %cst_196 = arith.constant 5.000000e-01 : f32
    %584 = vector.broadcast %cst_196 : f32 to vector<2x64xf32>
    %585 = arith.addf %583, %584 : vector<2x64xf32>
    %586 = vector.extract_strided_slice %569 {offsets = [0, 128], sizes = [2, 64], strides = [1, 1]} : vector<2x256xf32> to vector<2x64xf32>
    %587 = math.tanh %586 : vector<2x64xf32>
    %588 = vector.extract_strided_slice %569 {offsets = [0, 192], sizes = [2, 64], strides = [1, 1]} : vector<2x256xf32> to vector<2x64xf32>
    %cst_197 = arith.constant 5.000000e-01 : f32
    %589 = vector.broadcast %cst_197 : f32 to vector<2x64xf32>
    %590 = arith.mulf %589, %588 : vector<2x64xf32>
    %591 = math.tanh %590 : vector<2x64xf32>
    %cst_198 = arith.constant 5.000000e-01 : f32
    %592 = vector.broadcast %cst_198 : f32 to vector<2x64xf32>
    %593 = arith.mulf %592, %591 : vector<2x64xf32>
    %cst_199 = arith.constant 5.000000e-01 : f32
    %594 = vector.broadcast %cst_199 : f32 to vector<2x64xf32>
    %595 = arith.addf %593, %594 : vector<2x64xf32>
    %596 = arith.mulf %585, %563 : vector<2x64xf32>
    %597 = arith.mulf %577, %587 : vector<2x64xf32>
    %598 = arith.addf %596, %597 : vector<2x64xf32>
    %599 = math.tanh %598 : vector<2x64xf32>
    %600 = arith.mulf %595, %599 : vector<2x64xf32>
    %601 = vector.extract_strided_slice %178 {offsets = [24, 0], sizes = [2, 256], strides = [1, 1]} : vector<32x256xf32> to vector<2x256xf32>
    %c0_200 = arith.constant 0 : index
    %c0_201 = arith.constant 0 : index
    %602 = vector.load %arg10[%c0_200, %c0_201] : memref<64x256xf32, #tpu.memory_space<vmem>>, vector<64x256xf32>
    %cst_202 = arith.constant dense<0.000000e+00> : vector<2x256xf32>
    %603 = tpu.matmul %600, %602, %cst_202 {dimension_numbers = #tpu.dot_dimension_numbers<[1], [0], [0], [1], [0, 0, 1, 1], [], []>} : vector<2x64xf32>, vector<64x256xf32>, vector<2x256xf32> -> vector<2x256xf32>
    %604 = arith.addf %601, %603 : vector<2x256xf32>
    %605 = vector.extract_strided_slice %604 {offsets = [0, 0], sizes = [2, 64], strides = [1, 1]} : vector<2x256xf32> to vector<2x64xf32>
    %cst_203 = arith.constant 5.000000e-01 : f32
    %606 = vector.broadcast %cst_203 : f32 to vector<2x64xf32>
    %607 = arith.mulf %606, %605 : vector<2x64xf32>
    %608 = math.tanh %607 : vector<2x64xf32>
    %cst_204 = arith.constant 5.000000e-01 : f32
    %609 = vector.broadcast %cst_204 : f32 to vector<2x64xf32>
    %610 = arith.mulf %609, %608 : vector<2x64xf32>
    %cst_205 = arith.constant 5.000000e-01 : f32
    %611 = vector.broadcast %cst_205 : f32 to vector<2x64xf32>
    %612 = arith.addf %610, %611 : vector<2x64xf32>
    %613 = vector.extract_strided_slice %604 {offsets = [0, 64], sizes = [2, 64], strides = [1, 1]} : vector<2x256xf32> to vector<2x64xf32>
    %cst_206 = arith.constant 5.000000e-01 : f32
    %614 = vector.broadcast %cst_206 : f32 to vector<2x64xf32>
    %615 = arith.mulf %614, %613 : vector<2x64xf32>
    %616 = math.tanh %615 : vector<2x64xf32>
    %cst_207 = arith.constant 5.000000e-01 : f32
    %617 = vector.broadcast %cst_207 : f32 to vector<2x64xf32>
    %618 = arith.mulf %617, %616 : vector<2x64xf32>
    %cst_208 = arith.constant 5.000000e-01 : f32
    %619 = vector.broadcast %cst_208 : f32 to vector<2x64xf32>
    %620 = arith.addf %618, %619 : vector<2x64xf32>
    %621 = vector.extract_strided_slice %604 {offsets = [0, 128], sizes = [2, 64], strides = [1, 1]} : vector<2x256xf32> to vector<2x64xf32>
    %622 = math.tanh %621 : vector<2x64xf32>
    %623 = vector.extract_strided_slice %604 {offsets = [0, 192], sizes = [2, 64], strides = [1, 1]} : vector<2x256xf32> to vector<2x64xf32>
    %cst_209 = arith.constant 5.000000e-01 : f32
    %624 = vector.broadcast %cst_209 : f32 to vector<2x64xf32>
    %625 = arith.mulf %624, %623 : vector<2x64xf32>
    %626 = math.tanh %625 : vector<2x64xf32>
    %cst_210 = arith.constant 5.000000e-01 : f32
    %627 = vector.broadcast %cst_210 : f32 to vector<2x64xf32>
    %628 = arith.mulf %627, %626 : vector<2x64xf32>
    %cst_211 = arith.constant 5.000000e-01 : f32
    %629 = vector.broadcast %cst_211 : f32 to vector<2x64xf32>
    %630 = arith.addf %628, %629 : vector<2x64xf32>
    %631 = arith.mulf %620, %598 : vector<2x64xf32>
    %632 = arith.mulf %612, %622 : vector<2x64xf32>
    %633 = arith.addf %631, %632 : vector<2x64xf32>
    %634 = math.tanh %633 : vector<2x64xf32>
    %635 = arith.mulf %630, %634 : vector<2x64xf32>
    %636 = vector.extract_strided_slice %178 {offsets = [26, 0], sizes = [2, 256], strides = [1, 1]} : vector<32x256xf32> to vector<2x256xf32>
    %c0_212 = arith.constant 0 : index
    %c0_213 = arith.constant 0 : index
    %637 = vector.load %arg10[%c0_212, %c0_213] : memref<64x256xf32, #tpu.memory_space<vmem>>, vector<64x256xf32>
    %cst_214 = arith.constant dense<0.000000e+00> : vector<2x256xf32>
    %638 = tpu.matmul %635, %637, %cst_214 {dimension_numbers = #tpu.dot_dimension_numbers<[1], [0], [0], [1], [0, 0, 1, 1], [], []>} : vector<2x64xf32>, vector<64x256xf32>, vector<2x256xf32> -> vector<2x256xf32>
    %639 = arith.addf %636, %638 : vector<2x256xf32>
    %640 = vector.extract_strided_slice %639 {offsets = [0, 0], sizes = [2, 64], strides = [1, 1]} : vector<2x256xf32> to vector<2x64xf32>
    %cst_215 = arith.constant 5.000000e-01 : f32
    %641 = vector.broadcast %cst_215 : f32 to vector<2x64xf32>
    %642 = arith.mulf %641, %640 : vector<2x64xf32>
    %643 = math.tanh %642 : vector<2x64xf32>
    %cst_216 = arith.constant 5.000000e-01 : f32
    %644 = vector.broadcast %cst_216 : f32 to vector<2x64xf32>
    %645 = arith.mulf %644, %643 : vector<2x64xf32>
    %cst_217 = arith.constant 5.000000e-01 : f32
    %646 = vector.broadcast %cst_217 : f32 to vector<2x64xf32>
    %647 = arith.addf %645, %646 : vector<2x64xf32>
    %648 = vector.extract_strided_slice %639 {offsets = [0, 64], sizes = [2, 64], strides = [1, 1]} : vector<2x256xf32> to vector<2x64xf32>
    %cst_218 = arith.constant 5.000000e-01 : f32
    %649 = vector.broadcast %cst_218 : f32 to vector<2x64xf32>
    %650 = arith.mulf %649, %648 : vector<2x64xf32>
    %651 = math.tanh %650 : vector<2x64xf32>
    %cst_219 = arith.constant 5.000000e-01 : f32
    %652 = vector.broadcast %cst_219 : f32 to vector<2x64xf32>
    %653 = arith.mulf %652, %651 : vector<2x64xf32>
    %cst_220 = arith.constant 5.000000e-01 : f32
    %654 = vector.broadcast %cst_220 : f32 to vector<2x64xf32>
    %655 = arith.addf %653, %654 : vector<2x64xf32>
    %656 = vector.extract_strided_slice %639 {offsets = [0, 128], sizes = [2, 64], strides = [1, 1]} : vector<2x256xf32> to vector<2x64xf32>
    %657 = math.tanh %656 : vector<2x64xf32>
    %658 = vector.extract_strided_slice %639 {offsets = [0, 192], sizes = [2, 64], strides = [1, 1]} : vector<2x256xf32> to vector<2x64xf32>
    %cst_221 = arith.constant 5.000000e-01 : f32
    %659 = vector.broadcast %cst_221 : f32 to vector<2x64xf32>
    %660 = arith.mulf %659, %658 : vector<2x64xf32>
    %661 = math.tanh %660 : vector<2x64xf32>
    %cst_222 = arith.constant 5.000000e-01 : f32
    %662 = vector.broadcast %cst_222 : f32 to vector<2x64xf32>
    %663 = arith.mulf %662, %661 : vector<2x64xf32>
    %cst_223 = arith.constant 5.000000e-01 : f32
    %664 = vector.broadcast %cst_223 : f32 to vector<2x64xf32>
    %665 = arith.addf %663, %664 : vector<2x64xf32>
    %666 = arith.mulf %655, %633 : vector<2x64xf32>
    %667 = arith.mulf %647, %657 : vector<2x64xf32>
    %668 = arith.addf %666, %667 : vector<2x64xf32>
    %669 = math.tanh %668 : vector<2x64xf32>
    %670 = arith.mulf %665, %669 : vector<2x64xf32>
    %671 = vector.extract_strided_slice %178 {offsets = [28, 0], sizes = [2, 256], strides = [1, 1]} : vector<32x256xf32> to vector<2x256xf32>
    %c0_224 = arith.constant 0 : index
    %c0_225 = arith.constant 0 : index
    %672 = vector.load %arg10[%c0_224, %c0_225] : memref<64x256xf32, #tpu.memory_space<vmem>>, vector<64x256xf32>
    %cst_226 = arith.constant dense<0.000000e+00> : vector<2x256xf32>
    %673 = tpu.matmul %670, %672, %cst_226 {dimension_numbers = #tpu.dot_dimension_numbers<[1], [0], [0], [1], [0, 0, 1, 1], [], []>} : vector<2x64xf32>, vector<64x256xf32>, vector<2x256xf32> -> vector<2x256xf32>
    %674 = arith.addf %671, %673 : vector<2x256xf32>
    %675 = vector.extract_strided_slice %674 {offsets = [0, 0], sizes = [2, 64], strides = [1, 1]} : vector<2x256xf32> to vector<2x64xf32>
    %cst_227 = arith.constant 5.000000e-01 : f32
    %676 = vector.broadcast %cst_227 : f32 to vector<2x64xf32>
    %677 = arith.mulf %676, %675 : vector<2x64xf32>
    %678 = math.tanh %677 : vector<2x64xf32>
    %cst_228 = arith.constant 5.000000e-01 : f32
    %679 = vector.broadcast %cst_228 : f32 to vector<2x64xf32>
    %680 = arith.mulf %679, %678 : vector<2x64xf32>
    %cst_229 = arith.constant 5.000000e-01 : f32
    %681 = vector.broadcast %cst_229 : f32 to vector<2x64xf32>
    %682 = arith.addf %680, %681 : vector<2x64xf32>
    %683 = vector.extract_strided_slice %674 {offsets = [0, 64], sizes = [2, 64], strides = [1, 1]} : vector<2x256xf32> to vector<2x64xf32>
    %cst_230 = arith.constant 5.000000e-01 : f32
    %684 = vector.broadcast %cst_230 : f32 to vector<2x64xf32>
    %685 = arith.mulf %684, %683 : vector<2x64xf32>
    %686 = math.tanh %685 : vector<2x64xf32>
    %cst_231 = arith.constant 5.000000e-01 : f32
    %687 = vector.broadcast %cst_231 : f32 to vector<2x64xf32>
    %688 = arith.mulf %687, %686 : vector<2x64xf32>
    %cst_232 = arith.constant 5.000000e-01 : f32
    %689 = vector.broadcast %cst_232 : f32 to vector<2x64xf32>
    %690 = arith.addf %688, %689 : vector<2x64xf32>
    %691 = vector.extract_strided_slice %674 {offsets = [0, 128], sizes = [2, 64], strides = [1, 1]} : vector<2x256xf32> to vector<2x64xf32>
    %692 = math.tanh %691 : vector<2x64xf32>
    %693 = vector.extract_strided_slice %674 {offsets = [0, 192], sizes = [2, 64], strides = [1, 1]} : vector<2x256xf32> to vector<2x64xf32>
    %cst_233 = arith.constant 5.000000e-01 : f32
    %694 = vector.broadcast %cst_233 : f32 to vector<2x64xf32>
    %695 = arith.mulf %694, %693 : vector<2x64xf32>
    %696 = math.tanh %695 : vector<2x64xf32>
    %cst_234 = arith.constant 5.000000e-01 : f32
    %697 = vector.broadcast %cst_234 : f32 to vector<2x64xf32>
    %698 = arith.mulf %697, %696 : vector<2x64xf32>
    %cst_235 = arith.constant 5.000000e-01 : f32
    %699 = vector.broadcast %cst_235 : f32 to vector<2x64xf32>
    %700 = arith.addf %698, %699 : vector<2x64xf32>
    %701 = arith.mulf %690, %668 : vector<2x64xf32>
    %702 = arith.mulf %682, %692 : vector<2x64xf32>
    %703 = arith.addf %701, %702 : vector<2x64xf32>
    %704 = math.tanh %703 : vector<2x64xf32>
    %705 = arith.mulf %700, %704 : vector<2x64xf32>
    %706 = vector.extract_strided_slice %178 {offsets = [30, 0], sizes = [2, 256], strides = [1, 1]} : vector<32x256xf32> to vector<2x256xf32>
    %c0_236 = arith.constant 0 : index
    %c0_237 = arith.constant 0 : index
    %707 = vector.load %arg10[%c0_236, %c0_237] : memref<64x256xf32, #tpu.memory_space<vmem>>, vector<64x256xf32>
    %cst_238 = arith.constant dense<0.000000e+00> : vector<2x256xf32>
    %708 = tpu.matmul %705, %707, %cst_238 {dimension_numbers = #tpu.dot_dimension_numbers<[1], [0], [0], [1], [0, 0, 1, 1], [], []>} : vector<2x64xf32>, vector<64x256xf32>, vector<2x256xf32> -> vector<2x256xf32>
    %709 = arith.addf %706, %708 : vector<2x256xf32>
    %710 = vector.extract_strided_slice %709 {offsets = [0, 0], sizes = [2, 64], strides = [1, 1]} : vector<2x256xf32> to vector<2x64xf32>
    %cst_239 = arith.constant 5.000000e-01 : f32
    %711 = vector.broadcast %cst_239 : f32 to vector<2x64xf32>
    %712 = arith.mulf %711, %710 : vector<2x64xf32>
    %713 = math.tanh %712 : vector<2x64xf32>
    %cst_240 = arith.constant 5.000000e-01 : f32
    %714 = vector.broadcast %cst_240 : f32 to vector<2x64xf32>
    %715 = arith.mulf %714, %713 : vector<2x64xf32>
    %cst_241 = arith.constant 5.000000e-01 : f32
    %716 = vector.broadcast %cst_241 : f32 to vector<2x64xf32>
    %717 = arith.addf %715, %716 : vector<2x64xf32>
    %718 = vector.extract_strided_slice %709 {offsets = [0, 64], sizes = [2, 64], strides = [1, 1]} : vector<2x256xf32> to vector<2x64xf32>
    %cst_242 = arith.constant 5.000000e-01 : f32
    %719 = vector.broadcast %cst_242 : f32 to vector<2x64xf32>
    %720 = arith.mulf %719, %718 : vector<2x64xf32>
    %721 = math.tanh %720 : vector<2x64xf32>
    %cst_243 = arith.constant 5.000000e-01 : f32
    %722 = vector.broadcast %cst_243 : f32 to vector<2x64xf32>
    %723 = arith.mulf %722, %721 : vector<2x64xf32>
    %cst_244 = arith.constant 5.000000e-01 : f32
    %724 = vector.broadcast %cst_244 : f32 to vector<2x64xf32>
    %725 = arith.addf %723, %724 : vector<2x64xf32>
    %726 = vector.extract_strided_slice %709 {offsets = [0, 128], sizes = [2, 64], strides = [1, 1]} : vector<2x256xf32> to vector<2x64xf32>
    %727 = math.tanh %726 : vector<2x64xf32>
    %728 = vector.extract_strided_slice %709 {offsets = [0, 192], sizes = [2, 64], strides = [1, 1]} : vector<2x256xf32> to vector<2x64xf32>
    %cst_245 = arith.constant 5.000000e-01 : f32
    %729 = vector.broadcast %cst_245 : f32 to vector<2x64xf32>
    %730 = arith.mulf %729, %728 : vector<2x64xf32>
    %731 = math.tanh %730 : vector<2x64xf32>
    %cst_246 = arith.constant 5.000000e-01 : f32
    %732 = vector.broadcast %cst_246 : f32 to vector<2x64xf32>
    %733 = arith.mulf %732, %731 : vector<2x64xf32>
    %cst_247 = arith.constant 5.000000e-01 : f32
    %734 = vector.broadcast %cst_247 : f32 to vector<2x64xf32>
    %735 = arith.addf %733, %734 : vector<2x64xf32>
    %736 = arith.mulf %725, %703 : vector<2x64xf32>
    %737 = arith.mulf %717, %727 : vector<2x64xf32>
    %738 = arith.addf %736, %737 : vector<2x64xf32>
    %739 = math.tanh %738 : vector<2x64xf32>
    %740 = arith.mulf %735, %739 : vector<2x64xf32>
    %741 = tpu.concatenate %215, %250, %285, %320, %355, %390, %425, %460, %495, %530, %565, %600, %635, %670, %705, %740 in 0 : vector<2x64xf32>, vector<2x64xf32>, vector<2x64xf32>, vector<2x64xf32>, vector<2x64xf32>, vector<2x64xf32>, vector<2x64xf32>, vector<2x64xf32>, vector<2x64xf32>, vector<2x64xf32>, vector<2x64xf32>, vector<2x64xf32>, vector<2x64xf32>, vector<2x64xf32>, vector<2x64xf32>, vector<2x64xf32> -> vector<32x64xf32>
    %c0_248 = arith.constant 0 : index
    %c0_249 = arith.constant 0 : index
    %742 = vector.load %arg12[%c0_248, %c0_249] : memref<64x256xf32, #tpu.memory_space<vmem>>, vector<64x256xf32>
    %cst_250 = arith.constant dense<0.000000e+00> : vector<32x256xf32>
    %743 = tpu.matmul %741, %742, %cst_250 {dimension_numbers = #tpu.dot_dimension_numbers<[1], [0], [0], [1], [0, 0, 1, 1], [], []>} : vector<32x64xf32>, vector<64x256xf32>, vector<32x256xf32> -> vector<32x256xf32>
    %c0_251 = arith.constant 0 : index
    %c0_252 = arith.constant 0 : index
    %744 = vector.load %arg14[%c0_251, %c0_252] : memref<1x256xf32, #tpu.memory_space<vmem>>, vector<1x256xf32>
    %745 = vector.broadcast %744 : vector<1x256xf32> to vector<32x256xf32>
    %746 = arith.addf %743, %745 : vector<32x256xf32>
    %747 = vector.extract_strided_slice %746 {offsets = [0, 0], sizes = [2, 256], strides = [1, 1]} : vector<32x256xf32> to vector<2x256xf32>
    %c0_253 = arith.constant 0 : index
    %c0_254 = arith.constant 0 : index
    %748 = vector.load %arg13[%c0_253, %c0_254] : memref<64x256xf32, #tpu.memory_space<vmem>>, vector<64x256xf32>
    %cst_255 = arith.constant dense<0.000000e+00> : vector<2x256xf32>
    %749 = tpu.matmul %740, %748, %cst_255 {dimension_numbers = #tpu.dot_dimension_numbers<[1], [0], [0], [1], [0, 0, 1, 1], [], []>} : vector<2x64xf32>, vector<64x256xf32>, vector<2x256xf32> -> vector<2x256xf32>
    %750 = arith.addf %747, %749 : vector<2x256xf32>
    %751 = vector.extract_strided_slice %750 {offsets = [0, 0], sizes = [2, 64], strides = [1, 1]} : vector<2x256xf32> to vector<2x64xf32>
    %cst_256 = arith.constant 5.000000e-01 : f32
    %752 = vector.broadcast %cst_256 : f32 to vector<2x64xf32>
    %753 = arith.mulf %752, %751 : vector<2x64xf32>
    %754 = math.tanh %753 : vector<2x64xf32>
    %cst_257 = arith.constant 5.000000e-01 : f32
    %755 = vector.broadcast %cst_257 : f32 to vector<2x64xf32>
    %756 = arith.mulf %755, %754 : vector<2x64xf32>
    %cst_258 = arith.constant 5.000000e-01 : f32
    %757 = vector.broadcast %cst_258 : f32 to vector<2x64xf32>
    %758 = arith.addf %756, %757 : vector<2x64xf32>
    %759 = vector.extract_strided_slice %750 {offsets = [0, 64], sizes = [2, 64], strides = [1, 1]} : vector<2x256xf32> to vector<2x64xf32>
    %cst_259 = arith.constant 5.000000e-01 : f32
    %760 = vector.broadcast %cst_259 : f32 to vector<2x64xf32>
    %761 = arith.mulf %760, %759 : vector<2x64xf32>
    %762 = math.tanh %761 : vector<2x64xf32>
    %cst_260 = arith.constant 5.000000e-01 : f32
    %763 = vector.broadcast %cst_260 : f32 to vector<2x64xf32>
    %764 = arith.mulf %763, %762 : vector<2x64xf32>
    %cst_261 = arith.constant 5.000000e-01 : f32
    %765 = vector.broadcast %cst_261 : f32 to vector<2x64xf32>
    %766 = arith.addf %764, %765 : vector<2x64xf32>
    %767 = vector.extract_strided_slice %750 {offsets = [0, 128], sizes = [2, 64], strides = [1, 1]} : vector<2x256xf32> to vector<2x64xf32>
    %768 = math.tanh %767 : vector<2x64xf32>
    %769 = vector.extract_strided_slice %750 {offsets = [0, 192], sizes = [2, 64], strides = [1, 1]} : vector<2x256xf32> to vector<2x64xf32>
    %cst_262 = arith.constant 5.000000e-01 : f32
    %770 = vector.broadcast %cst_262 : f32 to vector<2x64xf32>
    %771 = arith.mulf %770, %769 : vector<2x64xf32>
    %772 = math.tanh %771 : vector<2x64xf32>
    %cst_263 = arith.constant 5.000000e-01 : f32
    %773 = vector.broadcast %cst_263 : f32 to vector<2x64xf32>
    %774 = arith.mulf %773, %772 : vector<2x64xf32>
    %cst_264 = arith.constant 5.000000e-01 : f32
    %775 = vector.broadcast %cst_264 : f32 to vector<2x64xf32>
    %776 = arith.addf %774, %775 : vector<2x64xf32>
    %777 = arith.mulf %766, %738 : vector<2x64xf32>
    %778 = arith.mulf %758, %768 : vector<2x64xf32>
    %779 = arith.addf %777, %778 : vector<2x64xf32>
    %780 = math.tanh %779 : vector<2x64xf32>
    %781 = arith.mulf %776, %780 : vector<2x64xf32>
    %782 = vector.extract_strided_slice %746 {offsets = [2, 0], sizes = [2, 256], strides = [1, 1]} : vector<32x256xf32> to vector<2x256xf32>
    %c0_265 = arith.constant 0 : index
    %c0_266 = arith.constant 0 : index
    %783 = vector.load %arg13[%c0_265, %c0_266] : memref<64x256xf32, #tpu.memory_space<vmem>>, vector<64x256xf32>
    %cst_267 = arith.constant dense<0.000000e+00> : vector<2x256xf32>
    %784 = tpu.matmul %781, %783, %cst_267 {dimension_numbers = #tpu.dot_dimension_numbers<[1], [0], [0], [1], [0, 0, 1, 1], [], []>} : vector<2x64xf32>, vector<64x256xf32>, vector<2x256xf32> -> vector<2x256xf32>
    %785 = arith.addf %782, %784 : vector<2x256xf32>
    %786 = vector.extract_strided_slice %785 {offsets = [0, 0], sizes = [2, 64], strides = [1, 1]} : vector<2x256xf32> to vector<2x64xf32>
    %cst_268 = arith.constant 5.000000e-01 : f32
    %787 = vector.broadcast %cst_268 : f32 to vector<2x64xf32>
    %788 = arith.mulf %787, %786 : vector<2x64xf32>
    %789 = math.tanh %788 : vector<2x64xf32>
    %cst_269 = arith.constant 5.000000e-01 : f32
    %790 = vector.broadcast %cst_269 : f32 to vector<2x64xf32>
    %791 = arith.mulf %790, %789 : vector<2x64xf32>
    %cst_270 = arith.constant 5.000000e-01 : f32
    %792 = vector.broadcast %cst_270 : f32 to vector<2x64xf32>
    %793 = arith.addf %791, %792 : vector<2x64xf32>
    %794 = vector.extract_strided_slice %785 {offsets = [0, 64], sizes = [2, 64], strides = [1, 1]} : vector<2x256xf32> to vector<2x64xf32>
    %cst_271 = arith.constant 5.000000e-01 : f32
    %795 = vector.broadcast %cst_271 : f32 to vector<2x64xf32>
    %796 = arith.mulf %795, %794 : vector<2x64xf32>
    %797 = math.tanh %796 : vector<2x64xf32>
    %cst_272 = arith.constant 5.000000e-01 : f32
    %798 = vector.broadcast %cst_272 : f32 to vector<2x64xf32>
    %799 = arith.mulf %798, %797 : vector<2x64xf32>
    %cst_273 = arith.constant 5.000000e-01 : f32
    %800 = vector.broadcast %cst_273 : f32 to vector<2x64xf32>
    %801 = arith.addf %799, %800 : vector<2x64xf32>
    %802 = vector.extract_strided_slice %785 {offsets = [0, 128], sizes = [2, 64], strides = [1, 1]} : vector<2x256xf32> to vector<2x64xf32>
    %803 = math.tanh %802 : vector<2x64xf32>
    %804 = vector.extract_strided_slice %785 {offsets = [0, 192], sizes = [2, 64], strides = [1, 1]} : vector<2x256xf32> to vector<2x64xf32>
    %cst_274 = arith.constant 5.000000e-01 : f32
    %805 = vector.broadcast %cst_274 : f32 to vector<2x64xf32>
    %806 = arith.mulf %805, %804 : vector<2x64xf32>
    %807 = math.tanh %806 : vector<2x64xf32>
    %cst_275 = arith.constant 5.000000e-01 : f32
    %808 = vector.broadcast %cst_275 : f32 to vector<2x64xf32>
    %809 = arith.mulf %808, %807 : vector<2x64xf32>
    %cst_276 = arith.constant 5.000000e-01 : f32
    %810 = vector.broadcast %cst_276 : f32 to vector<2x64xf32>
    %811 = arith.addf %809, %810 : vector<2x64xf32>
    %812 = arith.mulf %801, %779 : vector<2x64xf32>
    %813 = arith.mulf %793, %803 : vector<2x64xf32>
    %814 = arith.addf %812, %813 : vector<2x64xf32>
    %815 = math.tanh %814 : vector<2x64xf32>
    %816 = arith.mulf %811, %815 : vector<2x64xf32>
    %817 = vector.extract_strided_slice %746 {offsets = [4, 0], sizes = [2, 256], strides = [1, 1]} : vector<32x256xf32> to vector<2x256xf32>
    %c0_277 = arith.constant 0 : index
    %c0_278 = arith.constant 0 : index
    %818 = vector.load %arg13[%c0_277, %c0_278] : memref<64x256xf32, #tpu.memory_space<vmem>>, vector<64x256xf32>
    %cst_279 = arith.constant dense<0.000000e+00> : vector<2x256xf32>
    %819 = tpu.matmul %816, %818, %cst_279 {dimension_numbers = #tpu.dot_dimension_numbers<[1], [0], [0], [1], [0, 0, 1, 1], [], []>} : vector<2x64xf32>, vector<64x256xf32>, vector<2x256xf32> -> vector<2x256xf32>
    %820 = arith.addf %817, %819 : vector<2x256xf32>
    %821 = vector.extract_strided_slice %820 {offsets = [0, 0], sizes = [2, 64], strides = [1, 1]} : vector<2x256xf32> to vector<2x64xf32>
    %cst_280 = arith.constant 5.000000e-01 : f32
    %822 = vector.broadcast %cst_280 : f32 to vector<2x64xf32>
    %823 = arith.mulf %822, %821 : vector<2x64xf32>
    %824 = math.tanh %823 : vector<2x64xf32>
    %cst_281 = arith.constant 5.000000e-01 : f32
    %825 = vector.broadcast %cst_281 : f32 to vector<2x64xf32>
    %826 = arith.mulf %825, %824 : vector<2x64xf32>
    %cst_282 = arith.constant 5.000000e-01 : f32
    %827 = vector.broadcast %cst_282 : f32 to vector<2x64xf32>
    %828 = arith.addf %826, %827 : vector<2x64xf32>
    %829 = vector.extract_strided_slice %820 {offsets = [0, 64], sizes = [2, 64], strides = [1, 1]} : vector<2x256xf32> to vector<2x64xf32>
    %cst_283 = arith.constant 5.000000e-01 : f32
    %830 = vector.broadcast %cst_283 : f32 to vector<2x64xf32>
    %831 = arith.mulf %830, %829 : vector<2x64xf32>
    %832 = math.tanh %831 : vector<2x64xf32>
    %cst_284 = arith.constant 5.000000e-01 : f32
    %833 = vector.broadcast %cst_284 : f32 to vector<2x64xf32>
    %834 = arith.mulf %833, %832 : vector<2x64xf32>
    %cst_285 = arith.constant 5.000000e-01 : f32
    %835 = vector.broadcast %cst_285 : f32 to vector<2x64xf32>
    %836 = arith.addf %834, %835 : vector<2x64xf32>
    %837 = vector.extract_strided_slice %820 {offsets = [0, 128], sizes = [2, 64], strides = [1, 1]} : vector<2x256xf32> to vector<2x64xf32>
    %838 = math.tanh %837 : vector<2x64xf32>
    %839 = vector.extract_strided_slice %820 {offsets = [0, 192], sizes = [2, 64], strides = [1, 1]} : vector<2x256xf32> to vector<2x64xf32>
    %cst_286 = arith.constant 5.000000e-01 : f32
    %840 = vector.broadcast %cst_286 : f32 to vector<2x64xf32>
    %841 = arith.mulf %840, %839 : vector<2x64xf32>
    %842 = math.tanh %841 : vector<2x64xf32>
    %cst_287 = arith.constant 5.000000e-01 : f32
    %843 = vector.broadcast %cst_287 : f32 to vector<2x64xf32>
    %844 = arith.mulf %843, %842 : vector<2x64xf32>
    %cst_288 = arith.constant 5.000000e-01 : f32
    %845 = vector.broadcast %cst_288 : f32 to vector<2x64xf32>
    %846 = arith.addf %844, %845 : vector<2x64xf32>
    %847 = arith.mulf %836, %814 : vector<2x64xf32>
    %848 = arith.mulf %828, %838 : vector<2x64xf32>
    %849 = arith.addf %847, %848 : vector<2x64xf32>
    %850 = math.tanh %849 : vector<2x64xf32>
    %851 = arith.mulf %846, %850 : vector<2x64xf32>
    %852 = vector.extract_strided_slice %746 {offsets = [6, 0], sizes = [2, 256], strides = [1, 1]} : vector<32x256xf32> to vector<2x256xf32>
    %c0_289 = arith.constant 0 : index
    %c0_290 = arith.constant 0 : index
    %853 = vector.load %arg13[%c0_289, %c0_290] : memref<64x256xf32, #tpu.memory_space<vmem>>, vector<64x256xf32>
    %cst_291 = arith.constant dense<0.000000e+00> : vector<2x256xf32>
    %854 = tpu.matmul %851, %853, %cst_291 {dimension_numbers = #tpu.dot_dimension_numbers<[1], [0], [0], [1], [0, 0, 1, 1], [], []>} : vector<2x64xf32>, vector<64x256xf32>, vector<2x256xf32> -> vector<2x256xf32>
    %855 = arith.addf %852, %854 : vector<2x256xf32>
    %856 = vector.extract_strided_slice %855 {offsets = [0, 0], sizes = [2, 64], strides = [1, 1]} : vector<2x256xf32> to vector<2x64xf32>
    %cst_292 = arith.constant 5.000000e-01 : f32
    %857 = vector.broadcast %cst_292 : f32 to vector<2x64xf32>
    %858 = arith.mulf %857, %856 : vector<2x64xf32>
    %859 = math.tanh %858 : vector<2x64xf32>
    %cst_293 = arith.constant 5.000000e-01 : f32
    %860 = vector.broadcast %cst_293 : f32 to vector<2x64xf32>
    %861 = arith.mulf %860, %859 : vector<2x64xf32>
    %cst_294 = arith.constant 5.000000e-01 : f32
    %862 = vector.broadcast %cst_294 : f32 to vector<2x64xf32>
    %863 = arith.addf %861, %862 : vector<2x64xf32>
    %864 = vector.extract_strided_slice %855 {offsets = [0, 64], sizes = [2, 64], strides = [1, 1]} : vector<2x256xf32> to vector<2x64xf32>
    %cst_295 = arith.constant 5.000000e-01 : f32
    %865 = vector.broadcast %cst_295 : f32 to vector<2x64xf32>
    %866 = arith.mulf %865, %864 : vector<2x64xf32>
    %867 = math.tanh %866 : vector<2x64xf32>
    %cst_296 = arith.constant 5.000000e-01 : f32
    %868 = vector.broadcast %cst_296 : f32 to vector<2x64xf32>
    %869 = arith.mulf %868, %867 : vector<2x64xf32>
    %cst_297 = arith.constant 5.000000e-01 : f32
    %870 = vector.broadcast %cst_297 : f32 to vector<2x64xf32>
    %871 = arith.addf %869, %870 : vector<2x64xf32>
    %872 = vector.extract_strided_slice %855 {offsets = [0, 128], sizes = [2, 64], strides = [1, 1]} : vector<2x256xf32> to vector<2x64xf32>
    %873 = math.tanh %872 : vector<2x64xf32>
    %874 = vector.extract_strided_slice %855 {offsets = [0, 192], sizes = [2, 64], strides = [1, 1]} : vector<2x256xf32> to vector<2x64xf32>
    %cst_298 = arith.constant 5.000000e-01 : f32
    %875 = vector.broadcast %cst_298 : f32 to vector<2x64xf32>
    %876 = arith.mulf %875, %874 : vector<2x64xf32>
    %877 = math.tanh %876 : vector<2x64xf32>
    %cst_299 = arith.constant 5.000000e-01 : f32
    %878 = vector.broadcast %cst_299 : f32 to vector<2x64xf32>
    %879 = arith.mulf %878, %877 : vector<2x64xf32>
    %cst_300 = arith.constant 5.000000e-01 : f32
    %880 = vector.broadcast %cst_300 : f32 to vector<2x64xf32>
    %881 = arith.addf %879, %880 : vector<2x64xf32>
    %882 = arith.mulf %871, %849 : vector<2x64xf32>
    %883 = arith.mulf %863, %873 : vector<2x64xf32>
    %884 = arith.addf %882, %883 : vector<2x64xf32>
    %885 = math.tanh %884 : vector<2x64xf32>
    %886 = arith.mulf %881, %885 : vector<2x64xf32>
    %887 = vector.extract_strided_slice %746 {offsets = [8, 0], sizes = [2, 256], strides = [1, 1]} : vector<32x256xf32> to vector<2x256xf32>
    %c0_301 = arith.constant 0 : index
    %c0_302 = arith.constant 0 : index
    %888 = vector.load %arg13[%c0_301, %c0_302] : memref<64x256xf32, #tpu.memory_space<vmem>>, vector<64x256xf32>
    %cst_303 = arith.constant dense<0.000000e+00> : vector<2x256xf32>
    %889 = tpu.matmul %886, %888, %cst_303 {dimension_numbers = #tpu.dot_dimension_numbers<[1], [0], [0], [1], [0, 0, 1, 1], [], []>} : vector<2x64xf32>, vector<64x256xf32>, vector<2x256xf32> -> vector<2x256xf32>
    %890 = arith.addf %887, %889 : vector<2x256xf32>
    %891 = vector.extract_strided_slice %890 {offsets = [0, 0], sizes = [2, 64], strides = [1, 1]} : vector<2x256xf32> to vector<2x64xf32>
    %cst_304 = arith.constant 5.000000e-01 : f32
    %892 = vector.broadcast %cst_304 : f32 to vector<2x64xf32>
    %893 = arith.mulf %892, %891 : vector<2x64xf32>
    %894 = math.tanh %893 : vector<2x64xf32>
    %cst_305 = arith.constant 5.000000e-01 : f32
    %895 = vector.broadcast %cst_305 : f32 to vector<2x64xf32>
    %896 = arith.mulf %895, %894 : vector<2x64xf32>
    %cst_306 = arith.constant 5.000000e-01 : f32
    %897 = vector.broadcast %cst_306 : f32 to vector<2x64xf32>
    %898 = arith.addf %896, %897 : vector<2x64xf32>
    %899 = vector.extract_strided_slice %890 {offsets = [0, 64], sizes = [2, 64], strides = [1, 1]} : vector<2x256xf32> to vector<2x64xf32>
    %cst_307 = arith.constant 5.000000e-01 : f32
    %900 = vector.broadcast %cst_307 : f32 to vector<2x64xf32>
    %901 = arith.mulf %900, %899 : vector<2x64xf32>
    %902 = math.tanh %901 : vector<2x64xf32>
    %cst_308 = arith.constant 5.000000e-01 : f32
    %903 = vector.broadcast %cst_308 : f32 to vector<2x64xf32>
    %904 = arith.mulf %903, %902 : vector<2x64xf32>
    %cst_309 = arith.constant 5.000000e-01 : f32
    %905 = vector.broadcast %cst_309 : f32 to vector<2x64xf32>
    %906 = arith.addf %904, %905 : vector<2x64xf32>
    %907 = vector.extract_strided_slice %890 {offsets = [0, 128], sizes = [2, 64], strides = [1, 1]} : vector<2x256xf32> to vector<2x64xf32>
    %908 = math.tanh %907 : vector<2x64xf32>
    %909 = vector.extract_strided_slice %890 {offsets = [0, 192], sizes = [2, 64], strides = [1, 1]} : vector<2x256xf32> to vector<2x64xf32>
    %cst_310 = arith.constant 5.000000e-01 : f32
    %910 = vector.broadcast %cst_310 : f32 to vector<2x64xf32>
    %911 = arith.mulf %910, %909 : vector<2x64xf32>
    %912 = math.tanh %911 : vector<2x64xf32>
    %cst_311 = arith.constant 5.000000e-01 : f32
    %913 = vector.broadcast %cst_311 : f32 to vector<2x64xf32>
    %914 = arith.mulf %913, %912 : vector<2x64xf32>
    %cst_312 = arith.constant 5.000000e-01 : f32
    %915 = vector.broadcast %cst_312 : f32 to vector<2x64xf32>
    %916 = arith.addf %914, %915 : vector<2x64xf32>
    %917 = arith.mulf %906, %884 : vector<2x64xf32>
    %918 = arith.mulf %898, %908 : vector<2x64xf32>
    %919 = arith.addf %917, %918 : vector<2x64xf32>
    %920 = math.tanh %919 : vector<2x64xf32>
    %921 = arith.mulf %916, %920 : vector<2x64xf32>
    %922 = vector.extract_strided_slice %746 {offsets = [10, 0], sizes = [2, 256], strides = [1, 1]} : vector<32x256xf32> to vector<2x256xf32>
    %c0_313 = arith.constant 0 : index
    %c0_314 = arith.constant 0 : index
    %923 = vector.load %arg13[%c0_313, %c0_314] : memref<64x256xf32, #tpu.memory_space<vmem>>, vector<64x256xf32>
    %cst_315 = arith.constant dense<0.000000e+00> : vector<2x256xf32>
    %924 = tpu.matmul %921, %923, %cst_315 {dimension_numbers = #tpu.dot_dimension_numbers<[1], [0], [0], [1], [0, 0, 1, 1], [], []>} : vector<2x64xf32>, vector<64x256xf32>, vector<2x256xf32> -> vector<2x256xf32>
    %925 = arith.addf %922, %924 : vector<2x256xf32>
    %926 = vector.extract_strided_slice %925 {offsets = [0, 0], sizes = [2, 64], strides = [1, 1]} : vector<2x256xf32> to vector<2x64xf32>
    %cst_316 = arith.constant 5.000000e-01 : f32
    %927 = vector.broadcast %cst_316 : f32 to vector<2x64xf32>
    %928 = arith.mulf %927, %926 : vector<2x64xf32>
    %929 = math.tanh %928 : vector<2x64xf32>
    %cst_317 = arith.constant 5.000000e-01 : f32
    %930 = vector.broadcast %cst_317 : f32 to vector<2x64xf32>
    %931 = arith.mulf %930, %929 : vector<2x64xf32>
    %cst_318 = arith.constant 5.000000e-01 : f32
    %932 = vector.broadcast %cst_318 : f32 to vector<2x64xf32>
    %933 = arith.addf %931, %932 : vector<2x64xf32>
    %934 = vector.extract_strided_slice %925 {offsets = [0, 64], sizes = [2, 64], strides = [1, 1]} : vector<2x256xf32> to vector<2x64xf32>
    %cst_319 = arith.constant 5.000000e-01 : f32
    %935 = vector.broadcast %cst_319 : f32 to vector<2x64xf32>
    %936 = arith.mulf %935, %934 : vector<2x64xf32>
    %937 = math.tanh %936 : vector<2x64xf32>
    %cst_320 = arith.constant 5.000000e-01 : f32
    %938 = vector.broadcast %cst_320 : f32 to vector<2x64xf32>
    %939 = arith.mulf %938, %937 : vector<2x64xf32>
    %cst_321 = arith.constant 5.000000e-01 : f32
    %940 = vector.broadcast %cst_321 : f32 to vector<2x64xf32>
    %941 = arith.addf %939, %940 : vector<2x64xf32>
    %942 = vector.extract_strided_slice %925 {offsets = [0, 128], sizes = [2, 64], strides = [1, 1]} : vector<2x256xf32> to vector<2x64xf32>
    %943 = math.tanh %942 : vector<2x64xf32>
    %944 = vector.extract_strided_slice %925 {offsets = [0, 192], sizes = [2, 64], strides = [1, 1]} : vector<2x256xf32> to vector<2x64xf32>
    %cst_322 = arith.constant 5.000000e-01 : f32
    %945 = vector.broadcast %cst_322 : f32 to vector<2x64xf32>
    %946 = arith.mulf %945, %944 : vector<2x64xf32>
    %947 = math.tanh %946 : vector<2x64xf32>
    %cst_323 = arith.constant 5.000000e-01 : f32
    %948 = vector.broadcast %cst_323 : f32 to vector<2x64xf32>
    %949 = arith.mulf %948, %947 : vector<2x64xf32>
    %cst_324 = arith.constant 5.000000e-01 : f32
    %950 = vector.broadcast %cst_324 : f32 to vector<2x64xf32>
    %951 = arith.addf %949, %950 : vector<2x64xf32>
    %952 = arith.mulf %941, %919 : vector<2x64xf32>
    %953 = arith.mulf %933, %943 : vector<2x64xf32>
    %954 = arith.addf %952, %953 : vector<2x64xf32>
    %955 = math.tanh %954 : vector<2x64xf32>
    %956 = arith.mulf %951, %955 : vector<2x64xf32>
    %957 = vector.extract_strided_slice %746 {offsets = [12, 0], sizes = [2, 256], strides = [1, 1]} : vector<32x256xf32> to vector<2x256xf32>
    %c0_325 = arith.constant 0 : index
    %c0_326 = arith.constant 0 : index
    %958 = vector.load %arg13[%c0_325, %c0_326] : memref<64x256xf32, #tpu.memory_space<vmem>>, vector<64x256xf32>
    %cst_327 = arith.constant dense<0.000000e+00> : vector<2x256xf32>
    %959 = tpu.matmul %956, %958, %cst_327 {dimension_numbers = #tpu.dot_dimension_numbers<[1], [0], [0], [1], [0, 0, 1, 1], [], []>} : vector<2x64xf32>, vector<64x256xf32>, vector<2x256xf32> -> vector<2x256xf32>
    %960 = arith.addf %957, %959 : vector<2x256xf32>
    %961 = vector.extract_strided_slice %960 {offsets = [0, 0], sizes = [2, 64], strides = [1, 1]} : vector<2x256xf32> to vector<2x64xf32>
    %cst_328 = arith.constant 5.000000e-01 : f32
    %962 = vector.broadcast %cst_328 : f32 to vector<2x64xf32>
    %963 = arith.mulf %962, %961 : vector<2x64xf32>
    %964 = math.tanh %963 : vector<2x64xf32>
    %cst_329 = arith.constant 5.000000e-01 : f32
    %965 = vector.broadcast %cst_329 : f32 to vector<2x64xf32>
    %966 = arith.mulf %965, %964 : vector<2x64xf32>
    %cst_330 = arith.constant 5.000000e-01 : f32
    %967 = vector.broadcast %cst_330 : f32 to vector<2x64xf32>
    %968 = arith.addf %966, %967 : vector<2x64xf32>
    %969 = vector.extract_strided_slice %960 {offsets = [0, 64], sizes = [2, 64], strides = [1, 1]} : vector<2x256xf32> to vector<2x64xf32>
    %cst_331 = arith.constant 5.000000e-01 : f32
    %970 = vector.broadcast %cst_331 : f32 to vector<2x64xf32>
    %971 = arith.mulf %970, %969 : vector<2x64xf32>
    %972 = math.tanh %971 : vector<2x64xf32>
    %cst_332 = arith.constant 5.000000e-01 : f32
    %973 = vector.broadcast %cst_332 : f32 to vector<2x64xf32>
    %974 = arith.mulf %973, %972 : vector<2x64xf32>
    %cst_333 = arith.constant 5.000000e-01 : f32
    %975 = vector.broadcast %cst_333 : f32 to vector<2x64xf32>
    %976 = arith.addf %974, %975 : vector<2x64xf32>
    %977 = vector.extract_strided_slice %960 {offsets = [0, 128], sizes = [2, 64], strides = [1, 1]} : vector<2x256xf32> to vector<2x64xf32>
    %978 = math.tanh %977 : vector<2x64xf32>
    %979 = vector.extract_strided_slice %960 {offsets = [0, 192], sizes = [2, 64], strides = [1, 1]} : vector<2x256xf32> to vector<2x64xf32>
    %cst_334 = arith.constant 5.000000e-01 : f32
    %980 = vector.broadcast %cst_334 : f32 to vector<2x64xf32>
    %981 = arith.mulf %980, %979 : vector<2x64xf32>
    %982 = math.tanh %981 : vector<2x64xf32>
    %cst_335 = arith.constant 5.000000e-01 : f32
    %983 = vector.broadcast %cst_335 : f32 to vector<2x64xf32>
    %984 = arith.mulf %983, %982 : vector<2x64xf32>
    %cst_336 = arith.constant 5.000000e-01 : f32
    %985 = vector.broadcast %cst_336 : f32 to vector<2x64xf32>
    %986 = arith.addf %984, %985 : vector<2x64xf32>
    %987 = arith.mulf %976, %954 : vector<2x64xf32>
    %988 = arith.mulf %968, %978 : vector<2x64xf32>
    %989 = arith.addf %987, %988 : vector<2x64xf32>
    %990 = math.tanh %989 : vector<2x64xf32>
    %991 = arith.mulf %986, %990 : vector<2x64xf32>
    %992 = vector.extract_strided_slice %746 {offsets = [14, 0], sizes = [2, 256], strides = [1, 1]} : vector<32x256xf32> to vector<2x256xf32>
    %c0_337 = arith.constant 0 : index
    %c0_338 = arith.constant 0 : index
    %993 = vector.load %arg13[%c0_337, %c0_338] : memref<64x256xf32, #tpu.memory_space<vmem>>, vector<64x256xf32>
    %cst_339 = arith.constant dense<0.000000e+00> : vector<2x256xf32>
    %994 = tpu.matmul %991, %993, %cst_339 {dimension_numbers = #tpu.dot_dimension_numbers<[1], [0], [0], [1], [0, 0, 1, 1], [], []>} : vector<2x64xf32>, vector<64x256xf32>, vector<2x256xf32> -> vector<2x256xf32>
    %995 = arith.addf %992, %994 : vector<2x256xf32>
    %996 = vector.extract_strided_slice %995 {offsets = [0, 0], sizes = [2, 64], strides = [1, 1]} : vector<2x256xf32> to vector<2x64xf32>
    %cst_340 = arith.constant 5.000000e-01 : f32
    %997 = vector.broadcast %cst_340 : f32 to vector<2x64xf32>
    %998 = arith.mulf %997, %996 : vector<2x64xf32>
    %999 = math.tanh %998 : vector<2x64xf32>
    %cst_341 = arith.constant 5.000000e-01 : f32
    %1000 = vector.broadcast %cst_341 : f32 to vector<2x64xf32>
    %1001 = arith.mulf %1000, %999 : vector<2x64xf32>
    %cst_342 = arith.constant 5.000000e-01 : f32
    %1002 = vector.broadcast %cst_342 : f32 to vector<2x64xf32>
    %1003 = arith.addf %1001, %1002 : vector<2x64xf32>
    %1004 = vector.extract_strided_slice %995 {offsets = [0, 64], sizes = [2, 64], strides = [1, 1]} : vector<2x256xf32> to vector<2x64xf32>
    %cst_343 = arith.constant 5.000000e-01 : f32
    %1005 = vector.broadcast %cst_343 : f32 to vector<2x64xf32>
    %1006 = arith.mulf %1005, %1004 : vector<2x64xf32>
    %1007 = math.tanh %1006 : vector<2x64xf32>
    %cst_344 = arith.constant 5.000000e-01 : f32
    %1008 = vector.broadcast %cst_344 : f32 to vector<2x64xf32>
    %1009 = arith.mulf %1008, %1007 : vector<2x64xf32>
    %cst_345 = arith.constant 5.000000e-01 : f32
    %1010 = vector.broadcast %cst_345 : f32 to vector<2x64xf32>
    %1011 = arith.addf %1009, %1010 : vector<2x64xf32>
    %1012 = vector.extract_strided_slice %995 {offsets = [0, 128], sizes = [2, 64], strides = [1, 1]} : vector<2x256xf32> to vector<2x64xf32>
    %1013 = math.tanh %1012 : vector<2x64xf32>
    %1014 = vector.extract_strided_slice %995 {offsets = [0, 192], sizes = [2, 64], strides = [1, 1]} : vector<2x256xf32> to vector<2x64xf32>
    %cst_346 = arith.constant 5.000000e-01 : f32
    %1015 = vector.broadcast %cst_346 : f32 to vector<2x64xf32>
    %1016 = arith.mulf %1015, %1014 : vector<2x64xf32>
    %1017 = math.tanh %1016 : vector<2x64xf32>
    %cst_347 = arith.constant 5.000000e-01 : f32
    %1018 = vector.broadcast %cst_347 : f32 to vector<2x64xf32>
    %1019 = arith.mulf %1018, %1017 : vector<2x64xf32>
    %cst_348 = arith.constant 5.000000e-01 : f32
    %1020 = vector.broadcast %cst_348 : f32 to vector<2x64xf32>
    %1021 = arith.addf %1019, %1020 : vector<2x64xf32>
    %1022 = arith.mulf %1011, %989 : vector<2x64xf32>
    %1023 = arith.mulf %1003, %1013 : vector<2x64xf32>
    %1024 = arith.addf %1022, %1023 : vector<2x64xf32>
    %1025 = math.tanh %1024 : vector<2x64xf32>
    %1026 = arith.mulf %1021, %1025 : vector<2x64xf32>
    %1027 = vector.extract_strided_slice %1026 {offsets = [1, 0], sizes = [1, 64], strides = [1, 1]} : vector<2x64xf32> to vector<1x64xf32>
    %1028 = vector.extract_strided_slice %746 {offsets = [16, 0], sizes = [2, 256], strides = [1, 1]} : vector<32x256xf32> to vector<2x256xf32>
    %c0_349 = arith.constant 0 : index
    %c0_350 = arith.constant 0 : index
    %1029 = vector.load %arg13[%c0_349, %c0_350] : memref<64x256xf32, #tpu.memory_space<vmem>>, vector<64x256xf32>
    %cst_351 = arith.constant dense<0.000000e+00> : vector<2x256xf32>
    %1030 = tpu.matmul %1026, %1029, %cst_351 {dimension_numbers = #tpu.dot_dimension_numbers<[1], [0], [0], [1], [0, 0, 1, 1], [], []>} : vector<2x64xf32>, vector<64x256xf32>, vector<2x256xf32> -> vector<2x256xf32>
    %1031 = arith.addf %1028, %1030 : vector<2x256xf32>
    %1032 = vector.extract_strided_slice %1031 {offsets = [0, 0], sizes = [2, 64], strides = [1, 1]} : vector<2x256xf32> to vector<2x64xf32>
    %cst_352 = arith.constant 5.000000e-01 : f32
    %1033 = vector.broadcast %cst_352 : f32 to vector<2x64xf32>
    %1034 = arith.mulf %1033, %1032 : vector<2x64xf32>
    %1035 = math.tanh %1034 : vector<2x64xf32>
    %cst_353 = arith.constant 5.000000e-01 : f32
    %1036 = vector.broadcast %cst_353 : f32 to vector<2x64xf32>
    %1037 = arith.mulf %1036, %1035 : vector<2x64xf32>
    %cst_354 = arith.constant 5.000000e-01 : f32
    %1038 = vector.broadcast %cst_354 : f32 to vector<2x64xf32>
    %1039 = arith.addf %1037, %1038 : vector<2x64xf32>
    %1040 = vector.extract_strided_slice %1031 {offsets = [0, 64], sizes = [2, 64], strides = [1, 1]} : vector<2x256xf32> to vector<2x64xf32>
    %cst_355 = arith.constant 5.000000e-01 : f32
    %1041 = vector.broadcast %cst_355 : f32 to vector<2x64xf32>
    %1042 = arith.mulf %1041, %1040 : vector<2x64xf32>
    %1043 = math.tanh %1042 : vector<2x64xf32>
    %cst_356 = arith.constant 5.000000e-01 : f32
    %1044 = vector.broadcast %cst_356 : f32 to vector<2x64xf32>
    %1045 = arith.mulf %1044, %1043 : vector<2x64xf32>
    %cst_357 = arith.constant 5.000000e-01 : f32
    %1046 = vector.broadcast %cst_357 : f32 to vector<2x64xf32>
    %1047 = arith.addf %1045, %1046 : vector<2x64xf32>
    %1048 = vector.extract_strided_slice %1031 {offsets = [0, 128], sizes = [2, 64], strides = [1, 1]} : vector<2x256xf32> to vector<2x64xf32>
    %1049 = math.tanh %1048 : vector<2x64xf32>
    %1050 = vector.extract_strided_slice %1031 {offsets = [0, 192], sizes = [2, 64], strides = [1, 1]} : vector<2x256xf32> to vector<2x64xf32>
    %cst_358 = arith.constant 5.000000e-01 : f32
    %1051 = vector.broadcast %cst_358 : f32 to vector<2x64xf32>
    %1052 = arith.mulf %1051, %1050 : vector<2x64xf32>
    %1053 = math.tanh %1052 : vector<2x64xf32>
    %cst_359 = arith.constant 5.000000e-01 : f32
    %1054 = vector.broadcast %cst_359 : f32 to vector<2x64xf32>
    %1055 = arith.mulf %1054, %1053 : vector<2x64xf32>
    %cst_360 = arith.constant 5.000000e-01 : f32
    %1056 = vector.broadcast %cst_360 : f32 to vector<2x64xf32>
    %1057 = arith.addf %1055, %1056 : vector<2x64xf32>
    %1058 = arith.mulf %1047, %1024 : vector<2x64xf32>
    %1059 = arith.mulf %1039, %1049 : vector<2x64xf32>
    %1060 = arith.addf %1058, %1059 : vector<2x64xf32>
    %1061 = math.tanh %1060 : vector<2x64xf32>
    %1062 = arith.mulf %1057, %1061 : vector<2x64xf32>
    %1063 = vector.extract_strided_slice %746 {offsets = [18, 0], sizes = [2, 256], strides = [1, 1]} : vector<32x256xf32> to vector<2x256xf32>
    %c0_361 = arith.constant 0 : index
    %c0_362 = arith.constant 0 : index
    %1064 = vector.load %arg13[%c0_361, %c0_362] : memref<64x256xf32, #tpu.memory_space<vmem>>, vector<64x256xf32>
    %cst_363 = arith.constant dense<0.000000e+00> : vector<2x256xf32>
    %1065 = tpu.matmul %1062, %1064, %cst_363 {dimension_numbers = #tpu.dot_dimension_numbers<[1], [0], [0], [1], [0, 0, 1, 1], [], []>} : vector<2x64xf32>, vector<64x256xf32>, vector<2x256xf32> -> vector<2x256xf32>
    %1066 = arith.addf %1063, %1065 : vector<2x256xf32>
    %1067 = vector.extract_strided_slice %1066 {offsets = [0, 0], sizes = [2, 64], strides = [1, 1]} : vector<2x256xf32> to vector<2x64xf32>
    %cst_364 = arith.constant 5.000000e-01 : f32
    %1068 = vector.broadcast %cst_364 : f32 to vector<2x64xf32>
    %1069 = arith.mulf %1068, %1067 : vector<2x64xf32>
    %1070 = math.tanh %1069 : vector<2x64xf32>
    %cst_365 = arith.constant 5.000000e-01 : f32
    %1071 = vector.broadcast %cst_365 : f32 to vector<2x64xf32>
    %1072 = arith.mulf %1071, %1070 : vector<2x64xf32>
    %cst_366 = arith.constant 5.000000e-01 : f32
    %1073 = vector.broadcast %cst_366 : f32 to vector<2x64xf32>
    %1074 = arith.addf %1072, %1073 : vector<2x64xf32>
    %1075 = vector.extract_strided_slice %1066 {offsets = [0, 64], sizes = [2, 64], strides = [1, 1]} : vector<2x256xf32> to vector<2x64xf32>
    %cst_367 = arith.constant 5.000000e-01 : f32
    %1076 = vector.broadcast %cst_367 : f32 to vector<2x64xf32>
    %1077 = arith.mulf %1076, %1075 : vector<2x64xf32>
    %1078 = math.tanh %1077 : vector<2x64xf32>
    %cst_368 = arith.constant 5.000000e-01 : f32
    %1079 = vector.broadcast %cst_368 : f32 to vector<2x64xf32>
    %1080 = arith.mulf %1079, %1078 : vector<2x64xf32>
    %cst_369 = arith.constant 5.000000e-01 : f32
    %1081 = vector.broadcast %cst_369 : f32 to vector<2x64xf32>
    %1082 = arith.addf %1080, %1081 : vector<2x64xf32>
    %1083 = vector.extract_strided_slice %1066 {offsets = [0, 128], sizes = [2, 64], strides = [1, 1]} : vector<2x256xf32> to vector<2x64xf32>
    %1084 = math.tanh %1083 : vector<2x64xf32>
    %1085 = vector.extract_strided_slice %1066 {offsets = [0, 192], sizes = [2, 64], strides = [1, 1]} : vector<2x256xf32> to vector<2x64xf32>
    %cst_370 = arith.constant 5.000000e-01 : f32
    %1086 = vector.broadcast %cst_370 : f32 to vector<2x64xf32>
    %1087 = arith.mulf %1086, %1085 : vector<2x64xf32>
    %1088 = math.tanh %1087 : vector<2x64xf32>
    %cst_371 = arith.constant 5.000000e-01 : f32
    %1089 = vector.broadcast %cst_371 : f32 to vector<2x64xf32>
    %1090 = arith.mulf %1089, %1088 : vector<2x64xf32>
    %cst_372 = arith.constant 5.000000e-01 : f32
    %1091 = vector.broadcast %cst_372 : f32 to vector<2x64xf32>
    %1092 = arith.addf %1090, %1091 : vector<2x64xf32>
    %1093 = arith.mulf %1082, %1060 : vector<2x64xf32>
    %1094 = arith.mulf %1074, %1084 : vector<2x64xf32>
    %1095 = arith.addf %1093, %1094 : vector<2x64xf32>
    %1096 = math.tanh %1095 : vector<2x64xf32>
    %1097 = arith.mulf %1092, %1096 : vector<2x64xf32>
    %1098 = vector.extract_strided_slice %746 {offsets = [20, 0], sizes = [2, 256], strides = [1, 1]} : vector<32x256xf32> to vector<2x256xf32>
    %c0_373 = arith.constant 0 : index
    %c0_374 = arith.constant 0 : index
    %1099 = vector.load %arg13[%c0_373, %c0_374] : memref<64x256xf32, #tpu.memory_space<vmem>>, vector<64x256xf32>
    %cst_375 = arith.constant dense<0.000000e+00> : vector<2x256xf32>
    %1100 = tpu.matmul %1097, %1099, %cst_375 {dimension_numbers = #tpu.dot_dimension_numbers<[1], [0], [0], [1], [0, 0, 1, 1], [], []>} : vector<2x64xf32>, vector<64x256xf32>, vector<2x256xf32> -> vector<2x256xf32>
    %1101 = arith.addf %1098, %1100 : vector<2x256xf32>
    %1102 = vector.extract_strided_slice %1101 {offsets = [0, 0], sizes = [2, 64], strides = [1, 1]} : vector<2x256xf32> to vector<2x64xf32>
    %cst_376 = arith.constant 5.000000e-01 : f32
    %1103 = vector.broadcast %cst_376 : f32 to vector<2x64xf32>
    %1104 = arith.mulf %1103, %1102 : vector<2x64xf32>
    %1105 = math.tanh %1104 : vector<2x64xf32>
    %cst_377 = arith.constant 5.000000e-01 : f32
    %1106 = vector.broadcast %cst_377 : f32 to vector<2x64xf32>
    %1107 = arith.mulf %1106, %1105 : vector<2x64xf32>
    %cst_378 = arith.constant 5.000000e-01 : f32
    %1108 = vector.broadcast %cst_378 : f32 to vector<2x64xf32>
    %1109 = arith.addf %1107, %1108 : vector<2x64xf32>
    %1110 = vector.extract_strided_slice %1101 {offsets = [0, 64], sizes = [2, 64], strides = [1, 1]} : vector<2x256xf32> to vector<2x64xf32>
    %cst_379 = arith.constant 5.000000e-01 : f32
    %1111 = vector.broadcast %cst_379 : f32 to vector<2x64xf32>
    %1112 = arith.mulf %1111, %1110 : vector<2x64xf32>
    %1113 = math.tanh %1112 : vector<2x64xf32>
    %cst_380 = arith.constant 5.000000e-01 : f32
    %1114 = vector.broadcast %cst_380 : f32 to vector<2x64xf32>
    %1115 = arith.mulf %1114, %1113 : vector<2x64xf32>
    %cst_381 = arith.constant 5.000000e-01 : f32
    %1116 = vector.broadcast %cst_381 : f32 to vector<2x64xf32>
    %1117 = arith.addf %1115, %1116 : vector<2x64xf32>
    %1118 = vector.extract_strided_slice %1101 {offsets = [0, 128], sizes = [2, 64], strides = [1, 1]} : vector<2x256xf32> to vector<2x64xf32>
    %1119 = math.tanh %1118 : vector<2x64xf32>
    %1120 = vector.extract_strided_slice %1101 {offsets = [0, 192], sizes = [2, 64], strides = [1, 1]} : vector<2x256xf32> to vector<2x64xf32>
    %cst_382 = arith.constant 5.000000e-01 : f32
    %1121 = vector.broadcast %cst_382 : f32 to vector<2x64xf32>
    %1122 = arith.mulf %1121, %1120 : vector<2x64xf32>
    %1123 = math.tanh %1122 : vector<2x64xf32>
    %cst_383 = arith.constant 5.000000e-01 : f32
    %1124 = vector.broadcast %cst_383 : f32 to vector<2x64xf32>
    %1125 = arith.mulf %1124, %1123 : vector<2x64xf32>
    %cst_384 = arith.constant 5.000000e-01 : f32
    %1126 = vector.broadcast %cst_384 : f32 to vector<2x64xf32>
    %1127 = arith.addf %1125, %1126 : vector<2x64xf32>
    %1128 = arith.mulf %1117, %1095 : vector<2x64xf32>
    %1129 = arith.mulf %1109, %1119 : vector<2x64xf32>
    %1130 = arith.addf %1128, %1129 : vector<2x64xf32>
    %1131 = math.tanh %1130 : vector<2x64xf32>
    %1132 = arith.mulf %1127, %1131 : vector<2x64xf32>
    %1133 = vector.extract_strided_slice %746 {offsets = [22, 0], sizes = [2, 256], strides = [1, 1]} : vector<32x256xf32> to vector<2x256xf32>
    %c0_385 = arith.constant 0 : index
    %c0_386 = arith.constant 0 : index
    %1134 = vector.load %arg13[%c0_385, %c0_386] : memref<64x256xf32, #tpu.memory_space<vmem>>, vector<64x256xf32>
    %cst_387 = arith.constant dense<0.000000e+00> : vector<2x256xf32>
    %1135 = tpu.matmul %1132, %1134, %cst_387 {dimension_numbers = #tpu.dot_dimension_numbers<[1], [0], [0], [1], [0, 0, 1, 1], [], []>} : vector<2x64xf32>, vector<64x256xf32>, vector<2x256xf32> -> vector<2x256xf32>
    %1136 = arith.addf %1133, %1135 : vector<2x256xf32>
    %1137 = vector.extract_strided_slice %1136 {offsets = [0, 0], sizes = [2, 64], strides = [1, 1]} : vector<2x256xf32> to vector<2x64xf32>
    %cst_388 = arith.constant 5.000000e-01 : f32
    %1138 = vector.broadcast %cst_388 : f32 to vector<2x64xf32>
    %1139 = arith.mulf %1138, %1137 : vector<2x64xf32>
    %1140 = math.tanh %1139 : vector<2x64xf32>
    %cst_389 = arith.constant 5.000000e-01 : f32
    %1141 = vector.broadcast %cst_389 : f32 to vector<2x64xf32>
    %1142 = arith.mulf %1141, %1140 : vector<2x64xf32>
    %cst_390 = arith.constant 5.000000e-01 : f32
    %1143 = vector.broadcast %cst_390 : f32 to vector<2x64xf32>
    %1144 = arith.addf %1142, %1143 : vector<2x64xf32>
    %1145 = vector.extract_strided_slice %1136 {offsets = [0, 64], sizes = [2, 64], strides = [1, 1]} : vector<2x256xf32> to vector<2x64xf32>
    %cst_391 = arith.constant 5.000000e-01 : f32
    %1146 = vector.broadcast %cst_391 : f32 to vector<2x64xf32>
    %1147 = arith.mulf %1146, %1145 : vector<2x64xf32>
    %1148 = math.tanh %1147 : vector<2x64xf32>
    %cst_392 = arith.constant 5.000000e-01 : f32
    %1149 = vector.broadcast %cst_392 : f32 to vector<2x64xf32>
    %1150 = arith.mulf %1149, %1148 : vector<2x64xf32>
    %cst_393 = arith.constant 5.000000e-01 : f32
    %1151 = vector.broadcast %cst_393 : f32 to vector<2x64xf32>
    %1152 = arith.addf %1150, %1151 : vector<2x64xf32>
    %1153 = vector.extract_strided_slice %1136 {offsets = [0, 128], sizes = [2, 64], strides = [1, 1]} : vector<2x256xf32> to vector<2x64xf32>
    %1154 = math.tanh %1153 : vector<2x64xf32>
    %1155 = vector.extract_strided_slice %1136 {offsets = [0, 192], sizes = [2, 64], strides = [1, 1]} : vector<2x256xf32> to vector<2x64xf32>
    %cst_394 = arith.constant 5.000000e-01 : f32
    %1156 = vector.broadcast %cst_394 : f32 to vector<2x64xf32>
    %1157 = arith.mulf %1156, %1155 : vector<2x64xf32>
    %1158 = math.tanh %1157 : vector<2x64xf32>
    %cst_395 = arith.constant 5.000000e-01 : f32
    %1159 = vector.broadcast %cst_395 : f32 to vector<2x64xf32>
    %1160 = arith.mulf %1159, %1158 : vector<2x64xf32>
    %cst_396 = arith.constant 5.000000e-01 : f32
    %1161 = vector.broadcast %cst_396 : f32 to vector<2x64xf32>
    %1162 = arith.addf %1160, %1161 : vector<2x64xf32>
    %1163 = arith.mulf %1152, %1130 : vector<2x64xf32>
    %1164 = arith.mulf %1144, %1154 : vector<2x64xf32>
    %1165 = arith.addf %1163, %1164 : vector<2x64xf32>
    %1166 = math.tanh %1165 : vector<2x64xf32>
    %1167 = arith.mulf %1162, %1166 : vector<2x64xf32>
    %1168 = vector.extract_strided_slice %746 {offsets = [24, 0], sizes = [2, 256], strides = [1, 1]} : vector<32x256xf32> to vector<2x256xf32>
    %c0_397 = arith.constant 0 : index
    %c0_398 = arith.constant 0 : index
    %1169 = vector.load %arg13[%c0_397, %c0_398] : memref<64x256xf32, #tpu.memory_space<vmem>>, vector<64x256xf32>
    %cst_399 = arith.constant dense<0.000000e+00> : vector<2x256xf32>
    %1170 = tpu.matmul %1167, %1169, %cst_399 {dimension_numbers = #tpu.dot_dimension_numbers<[1], [0], [0], [1], [0, 0, 1, 1], [], []>} : vector<2x64xf32>, vector<64x256xf32>, vector<2x256xf32> -> vector<2x256xf32>
    %1171 = arith.addf %1168, %1170 : vector<2x256xf32>
    %1172 = vector.extract_strided_slice %1171 {offsets = [0, 0], sizes = [2, 64], strides = [1, 1]} : vector<2x256xf32> to vector<2x64xf32>
    %cst_400 = arith.constant 5.000000e-01 : f32
    %1173 = vector.broadcast %cst_400 : f32 to vector<2x64xf32>
    %1174 = arith.mulf %1173, %1172 : vector<2x64xf32>
    %1175 = math.tanh %1174 : vector<2x64xf32>
    %cst_401 = arith.constant 5.000000e-01 : f32
    %1176 = vector.broadcast %cst_401 : f32 to vector<2x64xf32>
    %1177 = arith.mulf %1176, %1175 : vector<2x64xf32>
    %cst_402 = arith.constant 5.000000e-01 : f32
    %1178 = vector.broadcast %cst_402 : f32 to vector<2x64xf32>
    %1179 = arith.addf %1177, %1178 : vector<2x64xf32>
    %1180 = vector.extract_strided_slice %1171 {offsets = [0, 64], sizes = [2, 64], strides = [1, 1]} : vector<2x256xf32> to vector<2x64xf32>
    %cst_403 = arith.constant 5.000000e-01 : f32
    %1181 = vector.broadcast %cst_403 : f32 to vector<2x64xf32>
    %1182 = arith.mulf %1181, %1180 : vector<2x64xf32>
    %1183 = math.tanh %1182 : vector<2x64xf32>
    %cst_404 = arith.constant 5.000000e-01 : f32
    %1184 = vector.broadcast %cst_404 : f32 to vector<2x64xf32>
    %1185 = arith.mulf %1184, %1183 : vector<2x64xf32>
    %cst_405 = arith.constant 5.000000e-01 : f32
    %1186 = vector.broadcast %cst_405 : f32 to vector<2x64xf32>
    %1187 = arith.addf %1185, %1186 : vector<2x64xf32>
    %1188 = vector.extract_strided_slice %1171 {offsets = [0, 128], sizes = [2, 64], strides = [1, 1]} : vector<2x256xf32> to vector<2x64xf32>
    %1189 = math.tanh %1188 : vector<2x64xf32>
    %1190 = vector.extract_strided_slice %1171 {offsets = [0, 192], sizes = [2, 64], strides = [1, 1]} : vector<2x256xf32> to vector<2x64xf32>
    %cst_406 = arith.constant 5.000000e-01 : f32
    %1191 = vector.broadcast %cst_406 : f32 to vector<2x64xf32>
    %1192 = arith.mulf %1191, %1190 : vector<2x64xf32>
    %1193 = math.tanh %1192 : vector<2x64xf32>
    %cst_407 = arith.constant 5.000000e-01 : f32
    %1194 = vector.broadcast %cst_407 : f32 to vector<2x64xf32>
    %1195 = arith.mulf %1194, %1193 : vector<2x64xf32>
    %cst_408 = arith.constant 5.000000e-01 : f32
    %1196 = vector.broadcast %cst_408 : f32 to vector<2x64xf32>
    %1197 = arith.addf %1195, %1196 : vector<2x64xf32>
    %1198 = arith.mulf %1187, %1165 : vector<2x64xf32>
    %1199 = arith.mulf %1179, %1189 : vector<2x64xf32>
    %1200 = arith.addf %1198, %1199 : vector<2x64xf32>
    %1201 = math.tanh %1200 : vector<2x64xf32>
    %1202 = arith.mulf %1197, %1201 : vector<2x64xf32>
    %1203 = vector.extract_strided_slice %746 {offsets = [26, 0], sizes = [2, 256], strides = [1, 1]} : vector<32x256xf32> to vector<2x256xf32>
    %c0_409 = arith.constant 0 : index
    %c0_410 = arith.constant 0 : index
    %1204 = vector.load %arg13[%c0_409, %c0_410] : memref<64x256xf32, #tpu.memory_space<vmem>>, vector<64x256xf32>
    %cst_411 = arith.constant dense<0.000000e+00> : vector<2x256xf32>
    %1205 = tpu.matmul %1202, %1204, %cst_411 {dimension_numbers = #tpu.dot_dimension_numbers<[1], [0], [0], [1], [0, 0, 1, 1], [], []>} : vector<2x64xf32>, vector<64x256xf32>, vector<2x256xf32> -> vector<2x256xf32>
    %1206 = arith.addf %1203, %1205 : vector<2x256xf32>
    %1207 = vector.extract_strided_slice %1206 {offsets = [0, 0], sizes = [2, 64], strides = [1, 1]} : vector<2x256xf32> to vector<2x64xf32>
    %cst_412 = arith.constant 5.000000e-01 : f32
    %1208 = vector.broadcast %cst_412 : f32 to vector<2x64xf32>
    %1209 = arith.mulf %1208, %1207 : vector<2x64xf32>
    %1210 = math.tanh %1209 : vector<2x64xf32>
    %cst_413 = arith.constant 5.000000e-01 : f32
    %1211 = vector.broadcast %cst_413 : f32 to vector<2x64xf32>
    %1212 = arith.mulf %1211, %1210 : vector<2x64xf32>
    %cst_414 = arith.constant 5.000000e-01 : f32
    %1213 = vector.broadcast %cst_414 : f32 to vector<2x64xf32>
    %1214 = arith.addf %1212, %1213 : vector<2x64xf32>
    %1215 = vector.extract_strided_slice %1206 {offsets = [0, 64], sizes = [2, 64], strides = [1, 1]} : vector<2x256xf32> to vector<2x64xf32>
    %cst_415 = arith.constant 5.000000e-01 : f32
    %1216 = vector.broadcast %cst_415 : f32 to vector<2x64xf32>
    %1217 = arith.mulf %1216, %1215 : vector<2x64xf32>
    %1218 = math.tanh %1217 : vector<2x64xf32>
    %cst_416 = arith.constant 5.000000e-01 : f32
    %1219 = vector.broadcast %cst_416 : f32 to vector<2x64xf32>
    %1220 = arith.mulf %1219, %1218 : vector<2x64xf32>
    %cst_417 = arith.constant 5.000000e-01 : f32
    %1221 = vector.broadcast %cst_417 : f32 to vector<2x64xf32>
    %1222 = arith.addf %1220, %1221 : vector<2x64xf32>
    %1223 = vector.extract_strided_slice %1206 {offsets = [0, 128], sizes = [2, 64], strides = [1, 1]} : vector<2x256xf32> to vector<2x64xf32>
    %1224 = math.tanh %1223 : vector<2x64xf32>
    %1225 = vector.extract_strided_slice %1206 {offsets = [0, 192], sizes = [2, 64], strides = [1, 1]} : vector<2x256xf32> to vector<2x64xf32>
    %cst_418 = arith.constant 5.000000e-01 : f32
    %1226 = vector.broadcast %cst_418 : f32 to vector<2x64xf32>
    %1227 = arith.mulf %1226, %1225 : vector<2x64xf32>
    %1228 = math.tanh %1227 : vector<2x64xf32>
    %cst_419 = arith.constant 5.000000e-01 : f32
    %1229 = vector.broadcast %cst_419 : f32 to vector<2x64xf32>
    %1230 = arith.mulf %1229, %1228 : vector<2x64xf32>
    %cst_420 = arith.constant 5.000000e-01 : f32
    %1231 = vector.broadcast %cst_420 : f32 to vector<2x64xf32>
    %1232 = arith.addf %1230, %1231 : vector<2x64xf32>
    %1233 = arith.mulf %1222, %1200 : vector<2x64xf32>
    %1234 = arith.mulf %1214, %1224 : vector<2x64xf32>
    %1235 = arith.addf %1233, %1234 : vector<2x64xf32>
    %1236 = math.tanh %1235 : vector<2x64xf32>
    %1237 = arith.mulf %1232, %1236 : vector<2x64xf32>
    %1238 = vector.extract_strided_slice %746 {offsets = [28, 0], sizes = [2, 256], strides = [1, 1]} : vector<32x256xf32> to vector<2x256xf32>
    %c0_421 = arith.constant 0 : index
    %c0_422 = arith.constant 0 : index
    %1239 = vector.load %arg13[%c0_421, %c0_422] : memref<64x256xf32, #tpu.memory_space<vmem>>, vector<64x256xf32>
    %cst_423 = arith.constant dense<0.000000e+00> : vector<2x256xf32>
    %1240 = tpu.matmul %1237, %1239, %cst_423 {dimension_numbers = #tpu.dot_dimension_numbers<[1], [0], [0], [1], [0, 0, 1, 1], [], []>} : vector<2x64xf32>, vector<64x256xf32>, vector<2x256xf32> -> vector<2x256xf32>
    %1241 = arith.addf %1238, %1240 : vector<2x256xf32>
    %1242 = vector.extract_strided_slice %1241 {offsets = [0, 0], sizes = [2, 64], strides = [1, 1]} : vector<2x256xf32> to vector<2x64xf32>
    %cst_424 = arith.constant 5.000000e-01 : f32
    %1243 = vector.broadcast %cst_424 : f32 to vector<2x64xf32>
    %1244 = arith.mulf %1243, %1242 : vector<2x64xf32>
    %1245 = math.tanh %1244 : vector<2x64xf32>
    %cst_425 = arith.constant 5.000000e-01 : f32
    %1246 = vector.broadcast %cst_425 : f32 to vector<2x64xf32>
    %1247 = arith.mulf %1246, %1245 : vector<2x64xf32>
    %cst_426 = arith.constant 5.000000e-01 : f32
    %1248 = vector.broadcast %cst_426 : f32 to vector<2x64xf32>
    %1249 = arith.addf %1247, %1248 : vector<2x64xf32>
    %1250 = vector.extract_strided_slice %1241 {offsets = [0, 64], sizes = [2, 64], strides = [1, 1]} : vector<2x256xf32> to vector<2x64xf32>
    %cst_427 = arith.constant 5.000000e-01 : f32
    %1251 = vector.broadcast %cst_427 : f32 to vector<2x64xf32>
    %1252 = arith.mulf %1251, %1250 : vector<2x64xf32>
    %1253 = math.tanh %1252 : vector<2x64xf32>
    %cst_428 = arith.constant 5.000000e-01 : f32
    %1254 = vector.broadcast %cst_428 : f32 to vector<2x64xf32>
    %1255 = arith.mulf %1254, %1253 : vector<2x64xf32>
    %cst_429 = arith.constant 5.000000e-01 : f32
    %1256 = vector.broadcast %cst_429 : f32 to vector<2x64xf32>
    %1257 = arith.addf %1255, %1256 : vector<2x64xf32>
    %1258 = vector.extract_strided_slice %1241 {offsets = [0, 128], sizes = [2, 64], strides = [1, 1]} : vector<2x256xf32> to vector<2x64xf32>
    %1259 = math.tanh %1258 : vector<2x64xf32>
    %1260 = vector.extract_strided_slice %1241 {offsets = [0, 192], sizes = [2, 64], strides = [1, 1]} : vector<2x256xf32> to vector<2x64xf32>
    %cst_430 = arith.constant 5.000000e-01 : f32
    %1261 = vector.broadcast %cst_430 : f32 to vector<2x64xf32>
    %1262 = arith.mulf %1261, %1260 : vector<2x64xf32>
    %1263 = math.tanh %1262 : vector<2x64xf32>
    %cst_431 = arith.constant 5.000000e-01 : f32
    %1264 = vector.broadcast %cst_431 : f32 to vector<2x64xf32>
    %1265 = arith.mulf %1264, %1263 : vector<2x64xf32>
    %cst_432 = arith.constant 5.000000e-01 : f32
    %1266 = vector.broadcast %cst_432 : f32 to vector<2x64xf32>
    %1267 = arith.addf %1265, %1266 : vector<2x64xf32>
    %1268 = arith.mulf %1257, %1235 : vector<2x64xf32>
    %1269 = arith.mulf %1249, %1259 : vector<2x64xf32>
    %1270 = arith.addf %1268, %1269 : vector<2x64xf32>
    %1271 = math.tanh %1270 : vector<2x64xf32>
    %1272 = arith.mulf %1267, %1271 : vector<2x64xf32>
    %1273 = vector.extract_strided_slice %746 {offsets = [30, 0], sizes = [2, 256], strides = [1, 1]} : vector<32x256xf32> to vector<2x256xf32>
    %c0_433 = arith.constant 0 : index
    %c0_434 = arith.constant 0 : index
    %1274 = vector.load %arg13[%c0_433, %c0_434] : memref<64x256xf32, #tpu.memory_space<vmem>>, vector<64x256xf32>
    %cst_435 = arith.constant dense<0.000000e+00> : vector<2x256xf32>
    %1275 = tpu.matmul %1272, %1274, %cst_435 {dimension_numbers = #tpu.dot_dimension_numbers<[1], [0], [0], [1], [0, 0, 1, 1], [], []>} : vector<2x64xf32>, vector<64x256xf32>, vector<2x256xf32> -> vector<2x256xf32>
    %1276 = arith.addf %1273, %1275 : vector<2x256xf32>
    %1277 = vector.extract_strided_slice %1276 {offsets = [0, 0], sizes = [2, 64], strides = [1, 1]} : vector<2x256xf32> to vector<2x64xf32>
    %cst_436 = arith.constant 5.000000e-01 : f32
    %1278 = vector.broadcast %cst_436 : f32 to vector<2x64xf32>
    %1279 = arith.mulf %1278, %1277 : vector<2x64xf32>
    %1280 = math.tanh %1279 : vector<2x64xf32>
    %cst_437 = arith.constant 5.000000e-01 : f32
    %1281 = vector.broadcast %cst_437 : f32 to vector<2x64xf32>
    %1282 = arith.mulf %1281, %1280 : vector<2x64xf32>
    %cst_438 = arith.constant 5.000000e-01 : f32
    %1283 = vector.broadcast %cst_438 : f32 to vector<2x64xf32>
    %1284 = arith.addf %1282, %1283 : vector<2x64xf32>
    %1285 = vector.extract_strided_slice %1276 {offsets = [0, 64], sizes = [2, 64], strides = [1, 1]} : vector<2x256xf32> to vector<2x64xf32>
    %cst_439 = arith.constant 5.000000e-01 : f32
    %1286 = vector.broadcast %cst_439 : f32 to vector<2x64xf32>
    %1287 = arith.mulf %1286, %1285 : vector<2x64xf32>
    %1288 = math.tanh %1287 : vector<2x64xf32>
    %cst_440 = arith.constant 5.000000e-01 : f32
    %1289 = vector.broadcast %cst_440 : f32 to vector<2x64xf32>
    %1290 = arith.mulf %1289, %1288 : vector<2x64xf32>
    %cst_441 = arith.constant 5.000000e-01 : f32
    %1291 = vector.broadcast %cst_441 : f32 to vector<2x64xf32>
    %1292 = arith.addf %1290, %1291 : vector<2x64xf32>
    %1293 = vector.extract_strided_slice %1276 {offsets = [0, 128], sizes = [2, 64], strides = [1, 1]} : vector<2x256xf32> to vector<2x64xf32>
    %1294 = math.tanh %1293 : vector<2x64xf32>
    %1295 = vector.extract_strided_slice %1276 {offsets = [0, 192], sizes = [2, 64], strides = [1, 1]} : vector<2x256xf32> to vector<2x64xf32>
    %cst_442 = arith.constant 5.000000e-01 : f32
    %1296 = vector.broadcast %cst_442 : f32 to vector<2x64xf32>
    %1297 = arith.mulf %1296, %1295 : vector<2x64xf32>
    %1298 = math.tanh %1297 : vector<2x64xf32>
    %cst_443 = arith.constant 5.000000e-01 : f32
    %1299 = vector.broadcast %cst_443 : f32 to vector<2x64xf32>
    %1300 = arith.mulf %1299, %1298 : vector<2x64xf32>
    %cst_444 = arith.constant 5.000000e-01 : f32
    %1301 = vector.broadcast %cst_444 : f32 to vector<2x64xf32>
    %1302 = arith.addf %1300, %1301 : vector<2x64xf32>
    %1303 = arith.mulf %1292, %1270 : vector<2x64xf32>
    %1304 = arith.mulf %1284, %1294 : vector<2x64xf32>
    %1305 = arith.addf %1303, %1304 : vector<2x64xf32>
    %1306 = math.tanh %1305 : vector<2x64xf32>
    %1307 = arith.mulf %1302, %1306 : vector<2x64xf32>
    %1308 = vector.extract_strided_slice %1307 {offsets = [1, 0], sizes = [1, 64], strides = [1, 1]} : vector<2x64xf32> to vector<1x64xf32>
    %1309 = tpu.concatenate %1027, %1308 in 0 : vector<1x64xf32>, vector<1x64xf32> -> vector<2x64xf32>
    %c0_445 = arith.constant 0 : index
    %c0_446 = arith.constant 0 : index
    %1310 = vector.load %arg15[%c0_445, %c0_446] : memref<64x3xf32, #tpu.memory_space<vmem>>, vector<64x3xf32>
    %cst_447 = arith.constant dense<0.000000e+00> : vector<2x3xf32>
    %1311 = tpu.matmul %1309, %1310, %cst_447 {dimension_numbers = #tpu.dot_dimension_numbers<[1], [0], [0], [1], [0, 0, 1, 1], [], []>} : vector<2x64xf32>, vector<64x3xf32>, vector<2x3xf32> -> vector<2x3xf32>
    %c0_448 = arith.constant 0 : index
    %c0_449 = arith.constant 0 : index
    %1312 = vector.load %arg16[%c0_448, %c0_449] : memref<1x3xf32, #tpu.memory_space<vmem>>, vector<1x3xf32>
    %1313 = vector.broadcast %1312 : vector<1x3xf32> to vector<2x3xf32>
    %1314 = arith.addf %1311, %1313 : vector<2x3xf32>
    %c0_450 = arith.constant 0 : index
    %c0_451 = arith.constant 0 : index
    %1315 = vector.load %arg19[%c0_450, %c0_451] : memref<2x3xf32, #tpu.memory_space<vmem>>, vector<2x3xf32>
    tpu.vector_store %arg19[%c0_450, %c0_451], %1314 {strides = array<i32>} : memref<2x3xf32, #tpu.memory_space<vmem>>, vector<2x3xf32>,
    %c0_452 = arith.constant 0 : index
    %c0_453 = arith.constant 0 : index
    %1316 = vector.load %arg20[%c0_452, %c0_453] : memref<2x64xf32, #tpu.memory_space<vmem>>, vector<2x64xf32>
    tpu.vector_store %arg20[%c0_452, %c0_453], %1307 {strides = array<i32>} : memref<2x64xf32, #tpu.memory_space<vmem>>, vector<2x64xf32>,
    %c0_454 = arith.constant 0 : index
    %c0_455 = arith.constant 0 : index
    %1317 = vector.load %arg21[%c0_454, %c0_455] : memref<2x64xf32, #tpu.memory_space<vmem>>, vector<2x64xf32>
    tpu.vector_store %arg21[%c0_454, %c0_455], %1305 {strides = array<i32>} : memref<2x64xf32, #tpu.memory_space<vmem>>, vector<2x64xf32>,
    return
  }
}

</mosaic_0001>

<bundles_post_ra>
// kernel: cnn_lstm_forward.1
= control target key start
LH: loop header
LB: loop body
LE: loop exit
PB: predicated region body
PF: predicated region fallthrough
CT: control target
= control target key end

     0   :  { %s9362_s0 = inlined_call_operand.vmem [shape: f32[32,10], index: 0, kind: input, shape index: {}]   ;;  %s9363_s1 = inlined_call_operand.vmem [shape: f32[50,64], index: 1, kind: input, shape index: {}]   ;;  %s9364_s2 = inlined_call_operand.vmem [shape: f32[1,64], index: 2, kind: input, shape index: {}]   ;;  %s9365_s3 = inlined_call_operand.vmem [shape: f32[320,64], index: 3, kind: input, shape index: {}]   ;;  %s9366_s4 = inlined_call_operand.vmem [shape: f32[1,64], index: 4, kind: input, shape index: {}]   ;;  %s9367_s5 = inlined_call_operand.vmem [shape: f32[320,64], index: 5, kind: input, shape index: {}]   ;;  %s9368_s6 = inlined_call_operand.vmem [shape: f32[1,64], index: 6, kind: input, shape index: {}]   ;;  %s9369_s7 = inlined_call_operand.vmem [shape: f32[320,64], index: 7, kind: input, shape index: {}]   ;;  %s9370_s8 = inlined_call_operand.vmem [shape: f32[1,64], index: 8, kind: input, shape index: {}]   ;;  %s9371_s9 = inlined_call_operand.vmem [shape: f32[64,256], index: 9, kind: input, shape index: {}]   ;;  %s9372_s10 = inlined_call_operand.vmem [shape: f32[64,256], index: 10, kind: input, shape index: {}]   ;;  %s9373_s11 = inlined_call_operand.vmem [shape: f32[1,256], index: 11, kind: input, shape index: {}]   ;;  %s9374_s12 = inlined_call_operand.vmem [shape: f32[64,256], index: 12, kind: input, shape index: {}]   ;;  %s9375_s13 = inlined_call_operand.vmem [shape: f32[64,256], index: 13, kind: input, shape index: {}]   ;;  %s9376_s14 = inlined_call_operand.vmem [shape: f32[1,256], index: 14, kind: input, shape index: {}]   ;;  %s9377_s15 = inlined_call_operand.vmem [shape: f32[64,3], index: 15, kind: input, shape index: {}]   ;;  %s9378_s16 = inlined_call_operand.vmem [shape: f32[1,3], index: 16, kind: input, shape index: {}]   ;;  %s9379_s17 = inlined_call_operand.vmem [shape: f32[2,64], index: 17, kind: input, shape index: {}]   ;;  %s9380_s18 = inlined_call_operand.vmem [shape: f32[2,64], index: 18, kind: input, shape index: {}]   ;;  %s9381_s19 = inlined_call_operand.hbm [shape: f32[2,3], index: 19, kind: output, shape index: {0}]   ;;  %s9382_s20 = inlined_call_operand.hbm [shape: f32[2,64], index: 20, kind: output, shape index: {1}]   ;;  %s9383_s21 = inlined_call_operand.hbm [shape: f32[2,64], index: 21, kind: output, shape index: {2}]  }
   0x1   :  { %9388 = sst [smem:[#allocation9_spill]] %s9362_s0 }
   0x2   :  { %9389 = sst [smem:[#allocation10_spill]] %s9363_s1 }
   0x3   :  { %9390 = sst [smem:[#allocation11_spill]] %s9364_s2 }
   0x4   :  { %9391 = sst [smem:[#allocation12_spill]] %s9365_s3 }
   0x5   :  { %9392 = sst [smem:[#allocation13_spill]] %s9366_s4 }
   0x6   :  { %9393 = sst [smem:[#allocation14_spill]] %s9367_s5 }
   0x7   :  { %27 = vsyncpa [#allocation3], 0  ;;  %s9394_s26 = sld [smem:[#allocation9_spill]]  ;;  %vm73_vm0 = vcmask 1041408   ;;  %vm96_vm1 = vcmask 1045504   ;;  %vm84_vm2 = vcmask 1046528  }
   0xd   :  { %v67_v0 = vld [vmem:[%s9394_s26] sm:$0xff]  ;;  %v68_v1 = vld [vmem:[%s9394_s26 + $0x8] sm:$0xff]  ;;  %v69_v11 = vld [vmem:[%s9394_s26 + $0x10] sm:$0xff] }
   0xe   :  { %v74_v2 = vrot.slane %v67_v0, 6  ;;  %v75_v3 = vrot.slane %v68_v1, 6  ;;  %v70_v16 = vld [vmem:[%s9394_s26 + $0x18] sm:$0xff] }
  0x10   :  { %v7622_v4 = vsel %vm73_vm0, %v74_v2, %v75_v3  ;;  %v7625_v5 = vsel %vm73_vm0, 0.0, %v74_v2  ;;  %v81_v6 = vsel %vm73_vm0, %v75_v3, 0.0 }
  0x11   :  { %v97_v7 = vrot.slane %v7625_v5, 2  ;;  %v98_v8 = vrot.slane %v7622_v4, 2  ;;  %v85_v9 = vrot.slane %v7625_v5, 1  ;;  %v86_v10 = vrot.slane %v7622_v4, 1 }
  0x12   :  { %v100_v12 = vrot.slane %v81_v6, 2  ;;  %v88_v13 = vrot.slane %v81_v6, 1 }
  0x13   :  { %v99_v14 = vsel %vm96_vm1, %v97_v7, %v98_v8  ;;  %v87_v15 = vsel %vm84_vm2, %v85_v9, %v86_v10 }
  0x14   :  { %28 = vsyncpa [#allocation5], 0  ;;  %s7491_s30 = smov 20   ;;  %s7492_s5 = smov 10   ;;  %v110_v17 = vrot.slane %v7622_v4, 3  ;;  %v146_v18 = vrot.slane %v69_v11, 6  ;;  %v101_v19 = vsel %vm96_vm1, %v98_v8, %v100_v12  ;;  %v89_v20 = vsel %vm84_vm2, %v86_v10, %v88_v13 }
  0x15   :  { %102 = vrot.lane.b32.xlu1 %v99_v14, %s7491_s30  ;;  %90 = vrot.lane.b32.xlu0 %v87_v15, %s7492_s5  ;;  %v112_v21 = vrot.slane %v81_v6, 3  ;;  %v109_v22 = vrot.slane %v7625_v5, 3  ;;  %vm108_vm3 = vcmask 1044480   ;;  %v147_v23 = vrot.slane %v70_v16, 6  ;;  %s9395_s1 = sld [smem:[#allocation10_spill]]  ;;  %s7493_s28 = smov 30  }
  0x16   :  { %vm120_vm4 = vcmask 1043456   ;;  %v122_v24 = vrot.slane %v7622_v4, 4  ;;  %v124_v25 = vrot.slane %v81_v6, 4  ;;  %v121_v28 = vrot.slane %v7625_v5, 4  ;;  %s7494_s23 = smov 40   ;;  %s9396_s27 = sld [smem:[#allocation12_spill]] }
  0x17   :  { %v113_v26 = vsel %vm108_vm3, %v110_v17, %v112_v21  ;;  %v111_v27 = vsel %vm108_vm3, %v109_v22, %v110_v17  ;;  %v7653_v29 = vsel %vm73_vm0, 0.0, %v146_v18  ;;  %v7662_v32 = vsel %vm73_vm0, %v146_v18, %v147_v23  ;;  %s9398_s26 = sld [smem:[#allocation14_spill]]  ;;  %s9399_s4 = sld [smem:[#allocation13_spill]] }
  0x18   :  { %v153_v33 = vsel %vm73_vm0, %v147_v23, 0.0  ;;  %v125_v36 = vsel %vm120_vm4, %v122_v24, %v124_v25  ;;  %v156_v37 = vrot.slane %v7653_v29, 1  ;;  %v123_v39 = vsel %vm120_vm4, %v121_v28, %v122_v24  ;;  %s7497_s22 = smov 16   ;;  %s7499_s3 = smov 48  }
  0x19   :  { %104 = vrot.lane.b32.xlu1 %v101_v19, %s7491_s30  ;;  %92 = vrot.lane.b32.xlu0 %v89_v20, %s7492_s5  ;;  %v157_v40 = vrot.slane %v7662_v32, 1  ;;  %v159_v41 = vrot.slane %v153_v33, 1  ;;  %v167_v45 = vrot.slane %v7653_v29, 2  ;;  %v168_v46 = vrot.slane %v7662_v32, 2 }
  0x1a   :  { %v170_v49 = vrot.slane %v153_v33, 2  ;;  %v178_v51 = vrot.slane %v7653_v29, 3  ;;  %v179_v54 = vrot.slane %v7662_v32, 3  ;;  %v181_v55 = vrot.slane %v153_v33, 3 }
  0x1b   :  { %v208_v30 = vld [vmem:[%s9395_s1] sm:$0xff]  ;;  %v209_v31 = vld [vmem:[%s9395_s1 + $0x8] sm:$0xff]  ;;  %v210_v34 = vld [vmem:[%s9395_s1 + $0x10] sm:$0xff]  ;;  %v158_v47 = vsel %vm84_vm2, %v156_v37, %v157_v40  ;;  %v160_v48 = vsel %vm84_vm2, %v157_v40, %v159_v41  ;;  %v169_v52 = vsel %vm96_vm1, %v167_v45, %v168_v46  ;;  %v189_v59 = vrot.slane %v7653_v29, 4 }
  0x1c   :  { %v211_v35 = vld [vmem:[%s9395_s1 + $0x18] sm:$0xff]  ;;  %v6331_v38 = vpack.c.bf16 %v209_v31, %v208_v30  ;;  %v212_v43 = vld [vmem:[%s9395_s1 + $0x20] sm:$0xff]  ;;  %v213_v44 = vld [vmem:[%s9395_s1 + $0x28] sm:$0xff]  ;;  %v171_v53 = vsel %vm96_vm1, %v168_v46, %v170_v49  ;;  %v190_v60 = vrot.slane %v7662_v32, 4  ;;  %v180_v61 = vsel %vm108_vm3, %v178_v51, %v179_v54 }
  0x1d   :  { %116 = vrot.lane.b32.xlu1 %v113_v26, %s7493_s28  ;;  %114 = vrot.lane.b32.xlu0 %v111_v27, %s7493_s28  ;;  %v6335_v42 = vpack.c.bf16 %v211_v35, %v210_v34  ;;  %v6339_v50 = vpack.c.bf16 %v213_v44, %v212_v43  ;;  %v214_v56 = vld [vmem:[%s9395_s1 + $0x30] sm:$0x3]  ;;  %v460_v57 = vld [vmem:[%s9396_s27 + $0x100] sm:$0xff]  ;;  %v182_v62 = vsel %vm108_vm3, %v179_v54, %v181_v55  ;;  %v192_v63 = vrot.slane %v153_v33, 4 }
  0x1e   :  { %6332 = vmatprep.subr.bf16.mxu0 %v6331_v38  ;;  %v461_v58 = vld [vmem:[%s9396_s27 + $0x108] sm:$0xff]  ;;  %v191_v1 = vsel %vm120_vm4, %v189_v59, %v190_v60  ;;  %vm132_vm5 = vcmask 80896   ;;  %vm135_vm6 = vcmask 162816   ;;  %vm138_vm7 = vcmask 244736   ;;  %v466_v41 = vld [vmem:[%s9396_s27 + $0x130] sm:$0xff]  ;;  %v444_v44 = vld [vmem:[%s9396_s27 + $0x80] sm:$0xff] }
  0x1f   :  { %6334 = vmatpush3.bf16.msra.mxu0 %v6331_v38  ;;  %v6375_v0 = vpack.c.bf16 %v461_v58, %v460_v57  ;;  %v193_v2 = vsel %vm120_vm4, %v190_v60, %v192_v63  ;;  %vm141_vm8 = vcmask 326656   ;;  %vm222_vm9 = vcmask 408576   ;;  %v464_v38 = vld [vmem:[%s9396_s27 + $0x120] sm:$0xff]  ;;  %v445_v45 = vld [vmem:[%s9396_s27 + $0x88] sm:$0xff]  ;;  %v446_v49 = vld [vmem:[%s9396_s27 + $0x90] sm:$0xff] }
  0x20   :  { %6336 = vmatprep.subr.bf16.mxu0 %v6335_v42  ;;  %v428_v46 = vld [vmem:[%s9396_s27] sm:$0xff]  ;;  %v431_v54 = vld [vmem:[%s9396_s27 + $0x18] sm:$0xff]  ;;  %v433_v60 = vld [vmem:[%s9396_s27 + $0x28] sm:$0xff]  ;;  %vm373_vm10 = vcmask 523264  }
  0x21   :  { %128 = vrot.lane.b32.xlu1 %v125_v36, %s7494_s23  ;;  %126 = vrot.lane.b32.xlu0 %v123_v39, %s7494_s23  ;;  %v463_v36 = vld [vmem:[%s9396_s27 + $0x118] sm:$0xff]  ;;  %v465_v39 = vld [vmem:[%s9396_s27 + $0x128] sm:$0xff]  ;;  %vm8321_vm15 = vmpackc.low %vm373_vm10, %vm373_vm10 }
  0x22   :  { %v6383_v40 = vpack.c.bf16 %v465_v39, %v464_v38  ;;  %v448_v55 = vld [vmem:[%s9396_s27 + $0xa0] sm:$0xff] }
  0x23   :  { %6338 = vmatpush3.bf16.msra.mxu0 %v6335_v42  ;;  %v467_v42 = vld [vmem:[%s9396_s27 + $0x138] sm:$0xff]  ;;  %v432_v59 = vld [vmem:[%s9396_s27 + $0x20] sm:$0xff] }
  0x24   :  { %6340 = vmatprep.subr.bf16.mxu0 %v6339_v50  ;;  %v6387_v43 = vpack.c.bf16 %v467_v42, %v466_v41  ;;  %v6353_v63 = vpack.c.bf16 %v433_v60, %v432_v59 }
  0x25   :  { %161 = vrot.lane.b32.xlu0 %v158_v47, %s7492_s5  ;;  %163 = vrot.lane.b32.xlu1 %v160_v48, %s7492_s5  ;;  %v6343_v47 = vpack.c.bf16 %v445_v45, %v444_v44  ;;  %v429_v48 = vld [vmem:[%s9396_s27 + $0x8] sm:$0xff] }
  0x26   :  { %v6345_v51 = vpack.c.bf16 %v429_v48, %v428_v46 }
  0x27   :  { %6342 = vmatpush3.bf16.msra.mxu0 %v6339_v50  ;;  %v447_v50 = vld [vmem:[%s9396_s27 + $0x98] sm:$0xff]  ;;  %6344 = vmatprep.subr.bf16.mxu1 %v6343_v47 }
  0x28   :  { %6182 = vmatprep.subr.msk.mxu0 %vm73_vm0, %v214_v56  ;;  %6346 = vmatpush3.bf16.msra.mxu1 %v6345_v51 }
  0x29   :  { %172 = vrot.lane.b32.xlu0 %v169_v52, %s7491_s30  ;;  %174 = vrot.lane.b32.xlu1 %v171_v53, %s7491_s30  ;;  %v6347_v52 = vpack.c.bf16 %v447_v50, %v446_v49  ;;  %v430_v53 = vld [vmem:[%s9396_s27 + $0x10] sm:$0xff]  ;;  %s9397_s30 = sld [smem:[#allocation11_spill]] }
  0x2a   :  { %v6349_v57 = vpack.c.bf16 %v431_v54, %v430_v53 }
  0x2b   :  { %6183 = vmatpush3.msk.msra.mxu0 %vm73_vm0, %v214_v56  ;;  %v449_v56 = vld [vmem:[%s9396_s27 + $0xa8] sm:$0xff]  ;;  %6348 = vmatprep.subr.bf16.mxu1 %v6347_v52 }
  0x2c   :  { %6376 = vmatprep.subr.bf16.mxu0 %v6375_v0  ;;  %v6351_v58 = vpack.c.bf16 %v449_v56, %v448_v55  ;;  %6350 = vmatpush3.bf16.msra.mxu1 %v6349_v57 }
  0x2d   :  { %183 = vrot.lane.b32.xlu0 %v180_v61, %s7493_s28  ;;  %185 = vrot.lane.b32.xlu1 %v182_v62, %s7493_s28  ;;  %v450_v61 = vld [vmem:[%s9396_s27 + $0xb0] sm:$0xff]  ;;  %v451_v62 = vld [vmem:[%s9396_s27 + $0xb8] sm:$0xff] }
  0x2e   :  { %6352 = vmatprep.subr.bf16.mxu1 %v6351_v58 }
  0x30   :  { %6354 = vmatpush3.bf16.msra.mxu1 %v6353_v63 }
  0x31   :  { %194 = vrot.lane.b32.xlu0 %v191_v1, %s7494_s23  ;;  %196 = vrot.lane.b32.xlu1 %v193_v2, %s7494_s23  ;;  %v434_v1 = vld [vmem:[%s9396_s27 + $0x30] sm:$0xff]  ;;  %v435_v2 = vld [vmem:[%s9396_s27 + $0x38] sm:$0xff] }
  0x87   :  { %v103_v3 = vpop.permute.xlu1 %102  ;;  %v91_v6 = vpop.permute.xlu0 %90 }
  0x88   :  { %v133_v9 = vsel %vm132_vm5, %v7625_v5, %v91_v6  ;;  %v453_v6 = vld [vmem:[%s9396_s27 + $0xc8] sm:$0xff] }
  0x89   :  { %v136_v14 = vsel %vm135_vm6, %v133_v9, %v103_v3  ;;  %v452_v3 = vld [vmem:[%s9396_s27 + $0xc0] sm:$0xff] }
  0x8a   :  { %v436_v9 = vld [vmem:[%s9396_s27 + $0x40] sm:$0xff] }
  0x8b   :  { %v105_v7 = vpop.permute.xlu1 %104  ;;  %v93_v8 = vpop.permute.xlu0 %92 }
  0x8c   :  { %v134_v10 = vsel %vm132_vm5, %v7622_v4, %v93_v8  ;;  %v6359_v8 = vpack.c.bf16 %v453_v6, %v452_v3 }
  0x8d   :  { %v137_v13 = vsel %vm135_vm6, %v134_v10, %v105_v7  ;;  %v6357_v7 = vpack.c.bf16 %v435_v2, %v434_v1  ;;  %v437_v10 = vld [vmem:[%s9396_s27 + $0x48] sm:$0xff] }
  0x8f   :  { %v117_v11 = vpop.permute.xlu1 %116  ;;  %v115_v12 = vpop.permute.xlu0 %114 }
  0x90   :  { %v140_v15 = vsel %vm138_vm7, %v137_v13, %v117_v11  ;;  %v139_v16 = vsel %vm138_vm7, %v136_v14, %v115_v12  ;;  %v454_v11 = vld [vmem:[%s9396_s27 + $0xd0] sm:$0xff]  ;;  %v455_v12 = vld [vmem:[%s9396_s27 + $0xd8] sm:$0xff]  ;;  %v6361_v13 = vpack.c.bf16 %v437_v10, %v436_v9 }
  0x91   :  { %v6363_v14 = vpack.c.bf16 %v455_v12, %v454_v11 }
  0x93   :  { %v129_v17 = vpop.permute.xlu1 %128  ;;  %v127_v18 = vpop.permute.xlu0 %126 }
  0x94   :  { %v143_v5 = vsel %vm141_vm8, %v140_v15, %v129_v17  ;;  %v142_v4 = vsel %vm141_vm8, %v139_v16, %v127_v18  ;;  %v438_v15 = vld [vmem:[%s9396_s27 + $0x50] sm:$0xff]  ;;  %v439_v16 = vld [vmem:[%s9396_s27 + $0x58] sm:$0xff]  ;;  %v456_v17 = vld [vmem:[%s9396_s27 + $0xe0] sm:$0xff] }
  0x95   :  { %6184 = vmatprep.mubr.msk.f32.mxu0 %vm222_vm9, %v142_v4  ;;  %v457_v18 = vld [vmem:[%s9396_s27 + $0xe8] sm:$0xff] }
  0x96   :  { %6185 = vmatmul.mubr.msk.f32.vlgmr.msra.gmra.mrb[0].mxu0 %vm222_vm9, %v143_v5  ;;  %v6365_v5 = vpack.c.bf16 %v439_v16, %v438_v15  ;;  %v6367_v4 = vpack.c.bf16 %v457_v18, %v456_v17 }
  0x97   :  { %v162_v19 = vpop.permute.xlu0 %161  ;;  %v164_v20 = vpop.permute.xlu1 %163  ;;  %6378 = vmatpush3.bf16.msra.mxu0 %v6375_v0  ;;  %v6355_v0 = vpack.c.bf16 %v451_v62, %v450_v61 }
  0x98   :  { %v200_v21 = vsel %vm132_vm5, %v7653_v29, %v162_v19  ;;  %v201_v22 = vsel %vm132_vm5, %v7662_v32, %v164_v20  ;;  %v462_v32 = vld [vmem:[%s9396_s27 + $0x110] sm:$0xff]  ;;  %v440_v19 = vld [vmem:[%s9396_s27 + $0x60] sm:$0xff]  ;;  %v441_v20 = vld [vmem:[%s9396_s27 + $0x68] sm:$0xff] }
  0x99   :  { %v6379_v37 = vpack.c.bf16 %v463_v36, %v462_v32  ;;  %6356 = vmatprep.subr.bf16.mxu1 %v6355_v0 }
  0x9a   :  { %6358 = vmatpush3.bf16.msra.mxu1 %v6357_v7 }
  0x9b   :  { %v173_v23 = vpop.permute.xlu0 %172  ;;  %v175_v24 = vpop.permute.xlu1 %174  ;;  %6380 = vmatprep.subr.bf16.mxu0 %v6379_v37  ;;  %6360 = vmatprep.subr.bf16.mxu1 %v6359_v8 }
  0x9c   :  { %v202_v25 = vsel %vm135_vm6, %v200_v21, %v173_v23  ;;  %v203_v26 = vsel %vm135_vm6, %v201_v22, %v175_v24  ;;  %6382 = vmatpush3.bf16.msra.mxu0 %v6379_v37  ;;  %v6369_v21 = vpack.c.bf16 %v441_v20, %v440_v19  ;;  %v5847_v22 = vld [vmem:[%s9397_s30] ss:$0 sm:$0xff]  ;;  %v458_v24 = vld [vmem:[%s9396_s27 + $0xf0] sm:$0xff] }
  0x9d   :  { %6384 = vmatprep.subr.bf16.mxu0 %v6383_v40 }
  0x9e   :  { %6362 = vmatpush3.bf16.msra.mxu1 %v6361_v13 }
  0x9f   :  { %v184_v27 = vpop.permute.xlu0 %183  ;;  %v186_v28 = vpop.permute.xlu1 %185  ;;  %6364 = vmatprep.subr.bf16.mxu1 %v6363_v14 }
  0xa0   :  { %v204_v30 = vsel %vm138_vm7, %v202_v25, %v184_v27  ;;  %v205_v31 = vsel %vm138_vm7, %v203_v26, %v186_v28  ;;  %6386 = vmatpush3.bf16.msra.mxu0 %v6383_v40  ;;  %v459_v25 = vld [vmem:[%s9396_s27 + $0xf8] sm:$0xff]  ;;  %vm1706_vm7 = vcmask 130048  }
  0xa1   :  { %6388 = vmatprep.subr.bf16.mxu0 %v6387_v43  ;;  %v6371_v28 = vpack.c.bf16 %v459_v25, %v458_v24 }
  0xa2   :  { %6366 = vmatpush3.bf16.msra.mxu1 %v6365_v5 }
  0xa3   :  { %v195_v33 = vpop.permute.xlu0 %194  ;;  %v197_v34 = vpop.permute.xlu1 %196  ;;  %6368 = vmatprep.subr.bf16.mxu1 %v6367_v4 }
  0xa4   :  { %v206_v35 = vsel %vm141_vm8, %v204_v30, %v195_v33  ;;  %v207_v29 = vsel %vm141_vm8, %v205_v31, %v197_v34  ;;  %6390 = vmatpush3.bf16.msra.mxu0 %v6387_v43  ;;  %v442_v30 = vld [vmem:[%s9396_s27 + $0x70] sm:$0xff]  ;;  %v443_v31 = vld [vmem:[%s9396_s27 + $0x78] sm:$0xff]  ;;  %s7495_s27 = smov 64   ;;  %vm1709_vm8 = vcmask 261120  }
  0xa5   :  { %6187 = vmatprep.mubr.msk.f32.mxu0 %vm222_vm9, %v206_v35  ;;  %v6373_v34 = vpack.c.bf16 %v443_v31, %v442_v30 }
  0xa6   :  { %6188 = vmatmul.mubr.msk.f32.gmra.mrb[2].mxu0 %vm222_vm9, %v207_v29  ;;  %6370 = vmatpush3.bf16.msra.mxu1 %v6369_v21  ;;  %vm1712_vm9 = vcmask 392192  }
  0xa7   :  { %6372 = vmatprep.subr.bf16.mxu1 %v6371_v28 }
  0xaa   :  { %6374 = vmatpush3.bf16.msra.mxu1 %v6373_v34 }
 0x169   :  { %v6186_v23 = vpop.f32.mrb[0].mxu0 }
 0x16a   :  { %v310_v26 = vadd.f32 %v6186_v23, %v5847_v22  ;;  %v304_v27 = vpop.f32.mrb[1].mxu0 }
 0x16b   :  { %v305_v33 = vadd.f32 %v5847_v22, %v304_v27 }
 0x16c   :  { %v324_v35 = vmax.f32 %v310_v26, 0.0 }
 0x16d   :  { %v323_v29 = vmax.f32 %v305_v33, 0.0 }
 0x16e   :  { %v330_v32 = vrot.slane %v324_v35, 6 }
 0x16f   :  { %v329_v36 = vrot.slane %v323_v29, 6 }
 0x170   :  { %v7860_v37 = vsel %vm73_vm0, %v330_v32, 0.0 }
 0x171   :  { %v342_v38 = vrot.slane %v7860_v37, 1  ;;  %v360_v39 = vrot.slane %v7860_v37, 3  ;;  %v371_v40 = vrot.slane %v7860_v37, 4  ;;  %v7866_v41 = vsel %vm73_vm0, %v329_v36, %v330_v32 }
 0x172   :  { %v7869_v42 = vsel %vm73_vm0, 0.0, %v329_v36  ;;  %v369_v44 = vrot.slane %v7866_v41, 4  ;;  %v340_v45 = vrot.slane %v7866_v41, 1  ;;  %v358_v46 = vrot.slane %v7866_v41, 3 }
 0x173   :  { %v368_v43 = vrot.slane %v7869_v42, 4  ;;  %v339_v47 = vrot.slane %v7869_v42, 1  ;;  %v357_v48 = vrot.slane %v7869_v42, 3  ;;  %v350_v21 = vrot.slane %v7869_v42, 2 }
 0x174   :  { %v372_v50 = vsel %vm120_vm4, %v369_v44, %v371_v40  ;;  %v343_v51 = vsel %vm84_vm2, %v340_v45, %v342_v38  ;;  %v361_v52 = vsel %vm108_vm3, %v358_v46, %v360_v39  ;;  %v353_v24 = vrot.slane %v7860_v37, 2 }
 0x175   :  { %v370_v49 = vsel %vm120_vm4, %v368_v43, %v369_v44  ;;  %v7110_v53 = vpack.i.bf16 %v343_v51, %v361_v52  ;;  %v341_v54 = vsel %vm84_vm2, %v339_v47, %v340_v45  ;;  %v359_v55 = vsel %vm108_vm3, %v357_v48, %v358_v46  ;;  %v789_v51 = vld [vmem:[%s9398_s26 + $0x100] sm:$0xff]  ;;  %v790_v52 = vld [vmem:[%s9398_s26 + $0x108] sm:$0xff] }
 0x176   :  { %6206 = vmatprep.mubr.msk.f32.mxu0 %vm373_vm10, %v370_v49  ;;  %v7105_v56 = vpack.i.bf16 %v341_v54, %v359_v55  ;;  %v791_v55 = vld [vmem:[%s9398_s26 + $0x110] sm:$0xff] }
 0x177   :  { %6207 = vmatmul.mubr.msk.f32.vlgmr.msra.gmra.mrb[4].mxu0 %vm373_vm10, %v372_v50  ;;  %7111 = vrot.lane.b32.xlu1 %v7110_v53, %s7495_s27  ;;  %v6423_v53 = vpack.c.bf16 %v790_v52, %v789_v51 }
 0x178   :  { %7106 = vrot.lane.b32.xlu0 %v7105_v56, %s7495_s27  ;;  %v792_v56 = vld [vmem:[%s9398_s26 + $0x118] sm:$0xff] }
 0x179   :  { %v6189_v57 = vpop.f32.mrb[2].mxu0  ;;  %6424 = vmatprep.subr.bf16.mxu1 %v6423_v53 }
 0x17a   :  { %v320_v58 = vadd.f32 %v6189_v57, %v5847_v22  ;;  %v314_v59 = vpop.f32.mrb[3].mxu0 }
 0x17b   :  { %v315_v60 = vadd.f32 %v5847_v22, %v314_v59  ;;  %v351_v22 = vrot.slane %v7866_v41, 2  ;;  %v793_v59 = vld [vmem:[%s9398_s26 + $0x120] sm:$0xff] }
 0x17c   :  { %v326_v61 = vmax.f32 %v320_v58, 0.0  ;;  %v6427_v58 = vpack.c.bf16 %v792_v56, %v791_v55  ;;  %v787_v55 = vld [vmem:[%s9398_s26 + $0xf0] sm:$0xff]  ;;  %v788_v56 = vld [vmem:[%s9398_s26 + $0xf8] sm:$0xff] }
 0x17d   :  { %v325_v62 = vmax.f32 %v315_v60, 0.0  ;;  %v352_v30 = vsel %vm96_vm1, %v350_v21, %v351_v22  ;;  %v354_v35 = vsel %vm96_vm1, %v351_v22, %v353_v24  ;;  %v794_v60 = vld [vmem:[%s9398_s26 + $0x128] sm:$0xff]  ;;  %v780_v21 = vld [vmem:[%s9398_s26 + $0xb8] sm:$0xff]  ;;  %v763_v24 = vld [vmem:[%s9398_s26 + $0x30] sm:$0xff] }
 0x17e   :  { %v381_v63 = vrot.slane %v326_v61, 6  ;;  %v6431_v61 = vpack.c.bf16 %v794_v60, %v793_v59  ;;  %v6419_v60 = vpack.c.bf16 %v788_v56, %v787_v55 }
 0x17f   :  { %v380_v0 = vrot.slane %v325_v62, 6  ;;  %v795_v62 = vld [vmem:[%s9398_s26 + $0x130] sm:$0xff] }
 0x180   :  { %v387_v1 = vsel %vm73_vm0, %v381_v63, 0.0 }
 0x181   :  { %v393_v2 = vrot.slane %v387_v1, 1  ;;  %v411_v3 = vrot.slane %v387_v1, 3  ;;  %v422_v6 = vrot.slane %v387_v1, 4  ;;  %v382_v7 = vsel %vm73_vm0, %v380_v0, %v381_v63  ;;  %v796_v63 = vld [vmem:[%s9398_s26 + $0x138] sm:$0xff] }
 0x182   :  { %v386_v8 = vsel %vm73_vm0, 0.0, %v380_v0  ;;  %v391_v10 = vrot.slane %v382_v7, 1  ;;  %v409_v12 = vrot.slane %v382_v7, 3  ;;  %v420_v14 = vrot.slane %v382_v7, 4 }
 0x183   :  { %v390_v9 = vrot.slane %v386_v8, 1  ;;  %v408_v11 = vrot.slane %v386_v8, 3  ;;  %v419_v13 = vrot.slane %v386_v8, 4  ;;  %v404_v36 = vrot.slane %v387_v1, 2 }
 0x184   :  { %v394_v17 = vsel %vm84_vm2, %v391_v10, %v393_v2  ;;  %v412_v18 = vsel %vm108_vm3, %v409_v12, %v411_v3  ;;  %v423_v20 = vsel %vm120_vm4, %v420_v14, %v422_v6  ;;  %v401_v37 = vrot.slane %v386_v8, 2  ;;  %v773_v3 = vld [vmem:[%s9398_s26 + $0x80] sm:$0xff]  ;;  %v774_v6 = vld [vmem:[%s9398_s26 + $0x88] sm:$0xff] }
 0x185   :  { %v392_v15 = vsel %vm84_vm2, %v390_v9, %v391_v10  ;;  %v410_v16 = vsel %vm108_vm3, %v408_v11, %v409_v12  ;;  %v7120_v4 = vpack.i.bf16 %v394_v17, %v412_v18  ;;  %v421_v19 = vsel %vm120_vm4, %v419_v13, %v420_v14  ;;  %v758_v9 = vld [vmem:[%s9398_s26 + $0x8] sm:$0xff]  ;;  %v775_v10 = vld [vmem:[%s9398_s26 + $0x90] sm:$0xff]  ;;  %v776_v11 = vld [vmem:[%s9398_s26 + $0x98] sm:$0xff] }
 0x186   :  { %v7115_v5 = vpack.i.bf16 %v392_v15, %v410_v16  ;;  %6209 = vmatprep.mubr.msk.f32.mxu0 %vm373_vm10, %v421_v19  ;;  %v402_v38 = vrot.slane %v382_v7, 2  ;;  %v6435_v0 = vpack.c.bf16 %v796_v63, %v795_v62  ;;  %v6395_v13 = vpack.c.bf16 %v776_v11, %v775_v10  ;;  %v759_v14 = vld [vmem:[%s9398_s26 + $0x10] sm:$0xff]  ;;  %v760_v15 = vld [vmem:[%s9398_s26 + $0x18] sm:$0xff]  ;;  %v777_v16 = vld [vmem:[%s9398_s26 + $0xa0] sm:$0xff] }
 0x187   :  { %7121 = vrot.lane.b32.xlu1 %v7120_v4, %s7495_s27  ;;  %6210 = vmatmul.mubr.msk.f32.gmra.mrb[6].mxu0 %vm373_vm10, %v423_v20  ;;  %v778_v17 = vld [vmem:[%s9398_s26 + $0xa8] sm:$0xff]  ;;  %v6397_v18 = vpack.c.bf16 %v760_v15, %v759_v14  ;;  %v761_v4 = vld [vmem:[%s9398_s26 + $0x20] sm:$0xff]  ;;  %v779_v20 = vld [vmem:[%s9398_s26 + $0xb0] sm:$0xff] }
 0x188   :  { %7116 = vrot.lane.b32.xlu0 %v7115_v5, %s7495_s27  ;;  %v403_v43 = vsel %vm96_vm1, %v401_v37, %v402_v38  ;;  %v6399_v5 = vpack.c.bf16 %v778_v17, %v777_v16  ;;  %v762_v19 = vld [vmem:[%s9398_s26 + $0x28] sm:$0xff]  ;;  %v768_v37 = vld [vmem:[%s9398_s26 + $0x58] sm:$0xff] }
 0x189   :  { %v6401_v22 = vpack.c.bf16 %v762_v19, %v761_v4 }
 0x1e9   :  { %v7112_v23 = vpop.permute.xlu1 %7111 }
 0x1ea   :  { %v7107_v25 = vpop.permute.xlu0 %7106  ;;  %v7113_v26 = vunpack.i.l.bf16 %v7112_v23  ;;  %v7114_v34 = vunpack.i.h.bf16 %v7112_v23  ;;  %v6403_v23 = vpack.c.bf16 %v780_v21, %v779_v20 }
 0x1eb   :  { %v7109_v27 = vunpack.i.h.bf16 %v7107_v25  ;;  %v7108_v28 = vunpack.i.l.bf16 %v7107_v25  ;;  %v764_v25 = vld [vmem:[%s9398_s26 + $0x38] sm:$0xff] }
 0x1ec   :  { %v377_v29 = vsel %vm373_vm10, %v354_v35, %v7113_v26  ;;  %v375_v32 = vsel %vm373_vm10, %v7866_v41, %v7114_v34  ;;  %v781_v26 = vld [vmem:[%s9398_s26 + $0xc0] sm:$0xff]  ;;  %v783_v34 = vld [vmem:[%s9398_s26 + $0xd0] sm:$0xff]  ;;  %v784_v35 = vld [vmem:[%s9398_s26 + $0xd8] sm:$0xff] }
 0x1ed   :  { %v376_v31 = vsel %vm373_vm10, %v352_v30, %v7108_v28  ;;  %v374_v33 = vsel %vm373_vm10, %v7869_v42, %v7109_v27  ;;  %v405_v42 = vsel %vm96_vm1, %v402_v38, %v404_v36  ;;  %v782_v27 = vld [vmem:[%s9398_s26 + $0xc8] sm:$0xff]  ;;  %v6405_v28 = vpack.c.bf16 %v764_v25, %v763_v24  ;;  %v767_v36 = vld [vmem:[%s9398_s26 + $0x50] sm:$0xff]  ;;  %v785_v38 = vld [vmem:[%s9398_s26 + $0xe0] sm:$0xff] }
 0x1ee   :  { %547 = vmatprep.mubr.f32.mxu1 %v376_v31  ;;  %v6407_v30 = vpack.c.bf16 %v782_v27, %v781_v26  ;;  %v765_v31 = vld [vmem:[%s9398_s26 + $0x40] sm:$0xff] }
 0x1ef   :  { %548 = vmatmul.mubr.f32.vlgmr.msra.gmra.mrb[0].mxu1 %v374_v33  ;;  %v766_v33 = vld [vmem:[%s9398_s26 + $0x48] sm:$0xff] }
 0x1f0   :  { %552 = vmatprep.mubr.f32.mxu1 %v377_v29  ;;  %6426 = vmatpush3.bf16.msra.mxu1 %v6423_v53  ;;  %v6409_v29 = vpack.c.bf16 %v766_v33, %v765_v31 }
 0x1f1   :  { %6428 = vmatprep.subr.bf16.mxu1 %v6427_v58 }
 0x1f3   :  { %553 = vmatmul.mubr.f32.gmra.mrb[2].mxu1 %v375_v32  ;;  %v6411_v32 = vpack.c.bf16 %v784_v35, %v783_v34 }
 0x1f4   :  { %6430 = vmatpush3.bf16.msra.mxu1 %v6427_v58 }
 0x1f5   :  { %6432 = vmatprep.subr.bf16.mxu1 %v6431_v61 }
 0x1f8   :  { %6434 = vmatpush3.bf16.msra.mxu1 %v6431_v61  ;;  %v771_v61 = vld [vmem:[%s9398_s26 + $0x70] sm:$0xff] }
 0x1f9   :  { %v7122_v40 = vpop.permute.xlu1 %7121  ;;  %6436 = vmatprep.subr.bf16.mxu1 %v6435_v0 }
 0x1fa   :  { %v7117_v39 = vpop.permute.xlu0 %7116  ;;  %v7123_v46 = vunpack.i.l.bf16 %v7122_v40  ;;  %v7124_v47 = vunpack.i.h.bf16 %v7122_v40  ;;  %v6413_v40 = vpack.c.bf16 %v768_v37, %v767_v36 }
 0x1fb   :  { %v7119_v44 = vunpack.i.h.bf16 %v7117_v39  ;;  %v7118_v45 = vunpack.i.l.bf16 %v7117_v39  ;;  %v786_v39 = vld [vmem:[%s9398_s26 + $0xe8] sm:$0xff] }
 0x1fc   :  { %v427_v41 = vsel %vm373_vm10, %v405_v42, %v7123_v46  ;;  %v425_v50 = vsel %vm373_vm10, %v382_v7, %v7124_v47  ;;  %6438 = vmatpush3.bf16.msra.mxu1 %v6435_v0  ;;  %v757_v7 = vld [vmem:[%s9398_s26] sm:$0xff] }
 0x1fd   :  { %v426_v48 = vsel %vm373_vm10, %v403_v43, %v7118_v45  ;;  %v424_v49 = vsel %vm373_vm10, %v386_v8, %v7119_v44  ;;  %v6391_v8 = vpack.c.bf16 %v774_v6, %v773_v3  ;;  %v6393_v12 = vpack.c.bf16 %v758_v9, %v757_v7  ;;  %v769_v42 = vld [vmem:[%s9398_s26 + $0x60] sm:$0xff]  ;;  %v770_v44 = vld [vmem:[%s9398_s26 + $0x68] sm:$0xff] }
 0x1fe   :  { %557 = vmatprep.mubr.f32.mxu1 %v426_v48  ;;  %v6415_v43 = vpack.c.bf16 %v786_v39, %v785_v38  ;;  %v6417_v45 = vpack.c.bf16 %v770_v44, %v769_v42  ;;  %v5853_v47 = vld [vmem:[%s9399_s4] ss:$0 sm:$0xff] }
 0x1ff   :  { %558 = vmatmul.mubr.f32.gmra.mrb[4].mxu1 %v424_v49  ;;  %6392 = vmatprep.subr.bf16.mxu0 %v6391_v8 }
 0x200   :  { %562 = vmatprep.mubr.f32.mxu1 %v427_v41  ;;  %6394 = vmatpush3.bf16.msra.mxu0 %v6393_v12 }
 0x201   :  { %6396 = vmatprep.subr.bf16.mxu0 %v6395_v13 }
 0x203   :  { %563 = vmatmul.mubr.f32.gmra.mrb[6].mxu1 %v425_v50 }
 0x204   :  { %6398 = vmatpush3.bf16.msra.mxu0 %v6397_v18 }
 0x205   :  { %6400 = vmatprep.subr.bf16.mxu0 %v6399_v5 }
 0x208   :  { %6402 = vmatpush3.bf16.msra.mxu0 %v6401_v22 }
 0x209   :  { %6404 = vmatprep.subr.bf16.mxu0 %v6403_v23 }
 0x20c   :  { %6406 = vmatpush3.bf16.msra.mxu0 %v6405_v28 }
 0x20d   :  { %6408 = vmatprep.subr.bf16.mxu0 %v6407_v30 }
 0x210   :  { %6410 = vmatpush3.bf16.msra.mxu0 %v6409_v29 }
 0x211   :  { %6412 = vmatprep.subr.bf16.mxu0 %v6411_v32 }
 0x214   :  { %6414 = vmatpush3.bf16.msra.mxu0 %v6413_v40 }
 0x215   :  { %6416 = vmatprep.subr.bf16.mxu0 %v6415_v43 }
 0x218   :  { %6418 = vmatpush3.bf16.msra.mxu0 %v6417_v45 }
 0x219   :  { %6420 = vmatprep.subr.bf16.mxu0 %v6419_v60 }
 0x24a   :  { %v7923_v54 = vpop.f32.mrb[4].mxu0 }
 0x24b   :  { %v7931_v57 = vpop.f32.mrb[5].mxu0 }
 0x25a   :  { %v7945_v1 = vpop.f32.mrb[6].mxu0 }
 0x25b   :  { %v7947_v2 = vpop.f32.mrb[7].mxu0 }
 0x2c2   :  { %v5993_v46 = vpop.f32.mrb[0].mxu1 }
 0x2c3   :  { %v5994_v48 = vpop.f32.mrb[1].mxu1 }
 0x2c4   :  { %v5995_v49 = vadd.f32 %v5994_v48, %v5993_v46 }
 0x2c6   :  { %v550_v41 = vadd.f32 %v5995_v49, %v5853_v47  ;;  %v5996_v50 = vpop.f32.mrb[2].mxu1 }
 0x2c7   :  { %v5997_v51 = vpop.f32.mrb[3].mxu1 }
 0x2c8   :  { %v635_v52 = vadd.f32 %v7931_v57, %v550_v41  ;;  %v5998_v53 = vadd.f32 %v5997_v51, %v5996_v50  ;;  %v772_v57 = vld [vmem:[%s9398_s26 + $0x78] sm:$0xff] }
 0x2c9   :  { %v6421_v62 = vpack.c.bf16 %v772_v57, %v771_v61 }
 0x2ca   :  { %v653_v58 = vmax.f32 %v635_v52, 0.0  ;;  %v555_v59 = vadd.f32 %v5998_v53, %v5853_v47 }
 0x2cb   :  { %6422 = vmatpush3.bf16.msra.mxu0 %v6421_v62 }
 0x2cc   :  { %v659_v63 = vrot.slane %v653_v58, 6  ;;  %v640_v0 = vadd.f32 %v7923_v54, %v555_v59 }
 0x2ce   :  { %v654_v3 = vmax.f32 %v640_v0, 0.0  ;;  %v8051_v6 = vsel %vm73_vm0, 0.0, %v659_v63 }
 0x2cf   :  { %v698_v12 = vrot.slane %v8051_v6, 4  ;;  %v669_v13 = vrot.slane %v8051_v6, 1  ;;  %v687_v4 = vrot.slane %v8051_v6, 3  ;;  %v680_v61 = vrot.slane %v8051_v6, 2 }
 0x2d0   :  { %v660_v7 = vrot.slane %v654_v3, 6 }
 0x2d2   :  { %v5999_v8 = vpop.f32.mrb[4].mxu1  ;;  %v8054_v9 = vsel %vm73_vm0, %v659_v63, %v660_v7  ;;  %v8057_v10 = vsel %vm73_vm0, %v660_v7, 0.0 }
 0x2d3   :  { %v6000_v11 = vpop.f32.mrb[5].mxu1  ;;  %v701_v54 = vrot.slane %v8057_v10, 4  ;;  %v699_v15 = vrot.slane %v8054_v9, 4  ;;  %v670_v16 = vrot.slane %v8054_v9, 1  ;;  %v672_v17 = vrot.slane %v8057_v10, 1 }
 0x2d4   :  { %v6001_v14 = vadd.f32 %v6000_v11, %v5999_v8  ;;  %v688_v18 = vrot.slane %v8054_v9, 3  ;;  %v690_v5 = vrot.slane %v8057_v10, 3  ;;  %v681_v58 = vrot.slane %v8054_v9, 2 }
 0x2d5   :  { %v700_v20 = vsel %vm120_vm4, %v698_v12, %v699_v15  ;;  %v702_v21 = vsel %vm120_vm4, %v699_v15, %v701_v54  ;;  %v671_v22 = vsel %vm84_vm2, %v669_v13, %v670_v16  ;;  %v673_v25 = vsel %vm84_vm2, %v670_v16, %v672_v17 }
 0x2d6   :  { %v6002_v19 = vpop.f32.mrb[6].mxu1  ;;  %v560_v23 = vadd.f32 %v6001_v14, %v5853_v47  ;;  %6228 = vmatprep.mubr.msk.f32.mxu1 %vm373_vm10, %v700_v20  ;;  %v691_v26 = vsel %vm108_vm3, %v688_v18, %v690_v5  ;;  %v689_v27 = vsel %vm108_vm3, %v687_v4, %v688_v18  ;;  %v683_v57 = vrot.slane %v8057_v10, 2 }
 0x2d7   :  { %v6003_v24 = vpop.f32.mrb[7].mxu1  ;;  %6229 = vmatmul.mubr.msk.f32.vlgmr.msra.gmra.mrb[8].mxu1 %vm373_vm10, %v702_v21  ;;  %v7130_v30 = vpack.i.bf16 %v673_v25, %v691_v26  ;;  %v7125_v31 = vpack.i.bf16 %v671_v22, %v689_v27  ;;  %v682_v3 = vsel %vm96_vm1, %v680_v61, %v681_v58  ;;  %v1119_v25 = vld [vmem:[%s9369_s7 + $0x108] sm:$0xff]  ;;  %v1092_v61 = vld [vmem:[%s9369_s7 + $0x30] sm:$0xff] }
 0x2d8   :  { %v6004_v28 = vadd.f32 %v6003_v24, %v6002_v19  ;;  %v645_v33 = vadd.f32 %v7947_v2, %v560_v23  ;;  %v684_v12 = vsel %vm96_vm1, %v681_v58, %v683_v57  ;;  %v1118_v24 = vld [vmem:[%s9369_s7 + $0x100] sm:$0xff]  ;;  %v1109_v58 = vld [vmem:[%s9369_s7 + $0xb8] sm:$0xff] }
 0x2d9   :  { %7131 = vrot.lane.b32.xlu1 %v7130_v30, %s7495_s27  ;;  %7126 = vrot.lane.b32.xlu0 %v7125_v31, %s7495_s27  ;;  %v6471_v27 = vpack.c.bf16 %v1119_v25, %v1118_v24  ;;  %v1120_v30 = vld [vmem:[%s9369_s7 + $0x110] sm:$0xff]  ;;  %v1121_v31 = vld [vmem:[%s9369_s7 + $0x118] sm:$0xff] }
 0x2da   :  { %v565_v34 = vadd.f32 %v6004_v28, %v5853_v47  ;;  %v655_v35 = vmax.f32 %v645_v33, 0.0  ;;  %v6475_v33 = vpack.c.bf16 %v1121_v31, %v1120_v30  ;;  %v1093_v57 = vld [vmem:[%s9369_s7 + $0x38] sm:$0xff] }
 0x2db   :  { %6472 = vmatprep.subr.bf16.mxu0 %v6471_v27 }
 0x2dc   :  { %v650_v29 = vadd.f32 %v7945_v1, %v565_v34  ;;  %v709_v32 = vrot.slane %v655_v35, 6  ;;  %v1122_v34 = vld [vmem:[%s9369_s7 + $0x120] sm:$0xff]  ;;  %v1123_v35 = vld [vmem:[%s9369_s7 + $0x128] sm:$0xff] }
 0x2de   :  { %v656_v36 = vmax.f32 %v650_v29, 0.0  ;;  %v715_v37 = vsel %vm73_vm0, 0.0, %v709_v32  ;;  %v6479_v29 = vpack.c.bf16 %v1123_v35, %v1122_v34  ;;  %v1116_v35 = vld [vmem:[%s9369_s7 + $0xf0] sm:$0xff] }
 0x2df   :  { %v719_v43 = vrot.slane %v715_v37, 1  ;;  %v737_v42 = vrot.slane %v715_v37, 3  ;;  %v748_v47 = vrot.slane %v715_v37, 4  ;;  %v730_v14 = vrot.slane %v715_v37, 2 }
 0x2e0   :  { %v710_v38 = vrot.slane %v656_v36, 6  ;;  %v1125_v36 = vld [vmem:[%s9369_s7 + $0x138] sm:$0xff] }
 0x2e2   :  { %v716_v39 = vsel %vm73_vm0, %v710_v38, 0.0  ;;  %v711_v40 = vsel %vm73_vm0, %v709_v32, %v710_v38  ;;  %v1124_v32 = vld [vmem:[%s9369_s7 + $0x130] sm:$0xff] }
 0x2e3   :  { %v722_v2 = vrot.slane %v716_v39, 1  ;;  %v740_v44 = vrot.slane %v716_v39, 3  ;;  %v751_v45 = vrot.slane %v716_v39, 4  ;;  %v720_v46 = vrot.slane %v711_v40, 1 }
 0x2e4   :  { %v738_v48 = vrot.slane %v711_v40, 3  ;;  %v749_v49 = vrot.slane %v711_v40, 4  ;;  %v733_v54 = vrot.slane %v716_v39, 2  ;;  %v731_v15 = vrot.slane %v711_v40, 2 }
 0x2e5   :  { %v721_v1 = vsel %vm84_vm2, %v719_v43, %v720_v46  ;;  %v723_v50 = vsel %vm84_vm2, %v720_v46, %v722_v2  ;;  %v1103_v43 = vld [vmem:[%s9369_s7 + $0x88] sm:$0xff]  ;;  %v1105_v46 = vld [vmem:[%s9369_s7 + $0x98] sm:$0xff] }
 0x2e6   :  { %v739_v41 = vsel %vm108_vm3, %v737_v42, %v738_v48  ;;  %v741_v51 = vsel %vm108_vm3, %v738_v48, %v740_v44  ;;  %v750_v55 = vsel %vm120_vm4, %v748_v47, %v749_v49  ;;  %v752_v56 = vsel %vm120_vm4, %v749_v49, %v751_v45  ;;  %v1086_v42 = vld [vmem:[%s9369_s7] sm:$0xff]  ;;  %v1087_v44 = vld [vmem:[%s9369_s7 + $0x8] sm:$0xff]  ;;  %v1104_v45 = vld [vmem:[%s9369_s7 + $0x90] sm:$0xff] }
 0x2e7   :  { %v7135_v52 = vpack.i.bf16 %v721_v1, %v739_v41  ;;  %v7140_v53 = vpack.i.bf16 %v723_v50, %v741_v51  ;;  %6231 = vmatprep.mubr.msk.f32.mxu1 %vm373_vm10, %v750_v55  ;;  %v732_v18 = vsel %vm96_vm1, %v730_v14, %v731_v15  ;;  %v6441_v48 = vpack.c.bf16 %v1087_v44, %v1086_v42  ;;  %v1088_v49 = vld [vmem:[%s9369_s7 + $0x10] sm:$0xff]  ;;  %v1089_v1 = vld [vmem:[%s9369_s7 + $0x18] sm:$0xff]  ;;  %v1106_v41 = vld [vmem:[%s9369_s7 + $0xa0] sm:$0xff] }
 0x2e8   :  { %6232 = vmatmul.mubr.msk.f32.gmra.mrb[10].mxu1 %vm373_vm10, %v752_v56  ;;  %v6443_v47 = vpack.c.bf16 %v1105_v46, %v1104_v45  ;;  %v1107_v50 = vld [vmem:[%s9369_s7 + $0xa8] sm:$0xff]  ;;  %v6445_v51 = vpack.c.bf16 %v1089_v1, %v1088_v49  ;;  %v1108_v56 = vld [vmem:[%s9369_s7 + $0xb0] sm:$0xff]  ;;  %v1097_v14 = vld [vmem:[%s9369_s7 + $0x58] sm:$0xff] }
 0x2e9   :  { %7136 = vrot.lane.b32.xlu0 %v7135_v52, %s7495_s27  ;;  %7141 = vrot.lane.b32.xlu1 %v7140_v53, %s7495_s27  ;;  %v6447_v52 = vpack.c.bf16 %v1107_v50, %v1106_v41  ;;  %v1090_v53 = vld [vmem:[%s9369_s7 + $0x20] sm:$0xff]  ;;  %v1091_v55 = vld [vmem:[%s9369_s7 + $0x28] sm:$0xff] }
 0x34b   :  { %v7132_v59 = vpop.permute.xlu1 %7131  ;;  %v7127_v60 = vpop.permute.xlu0 %7126 }
 0x34c   :  { %v7133_v62 = vunpack.i.l.bf16 %v7132_v59  ;;  %v7129_v63 = vunpack.i.h.bf16 %v7127_v60  ;;  %v7128_v0 = vunpack.i.l.bf16 %v7127_v60  ;;  %v7134_v11 = vunpack.i.h.bf16 %v7132_v59 }
 0x34d   :  { %v6449_v59 = vpack.c.bf16 %v1091_v55, %v1090_v53  ;;  %v6451_v60 = vpack.c.bf16 %v1109_v58, %v1108_v56 }
 0x34e   :  { %v705_v7 = vsel %vm373_vm10, %v682_v3, %v7128_v0  ;;  %v703_v8 = vsel %vm373_vm10, %v8051_v6, %v7129_v63  ;;  %v706_v13 = vsel %vm373_vm10, %v684_v12, %v7133_v62  ;;  %v704_v10 = vsel %vm373_vm10, %v8054_v9, %v7134_v11  ;;  %v1110_v62 = vld [vmem:[%s9369_s7 + $0xc0] sm:$0xff]  ;;  %v1111_v63 = vld [vmem:[%s9369_s7 + $0xc8] sm:$0xff]  ;;  %v1112_v11 = vld [vmem:[%s9369_s7 + $0xd0] sm:$0xff] }
 0x34f   :  { %876 = vmatprep.mubr.f32.mxu0 %v705_v7  ;;  %v734_v6 = vsel %vm96_vm1, %v731_v15, %v733_v54  ;;  %v6453_v0 = vpack.c.bf16 %v1093_v57, %v1092_v61  ;;  %v6455_v3 = vpack.c.bf16 %v1111_v63, %v1110_v62  ;;  %v1094_v7 = vld [vmem:[%s9369_s7 + $0x40] sm:$0xff]  ;;  %v1113_v12 = vld [vmem:[%s9369_s7 + $0xd8] sm:$0xff]  ;;  %v1096_v54 = vld [vmem:[%s9369_s7 + $0x50] sm:$0xff] }
 0x350   :  { %877 = vmatmul.mubr.f32.vlgmr.msra.gmra.mrb[8].mxu0 %v703_v8  ;;  %v1095_v8 = vld [vmem:[%s9369_s7 + $0x48] sm:$0xff]  ;;  %v1114_v15 = vld [vmem:[%s9369_s7 + $0xe0] sm:$0xff] }
 0x351   :  { %881 = vmatprep.mubr.f32.mxu0 %v706_v13  ;;  %6474 = vmatpush3.bf16.msra.mxu0 %v6471_v27  ;;  %v6457_v13 = vpack.c.bf16 %v1095_v8, %v1094_v7 }
 0x352   :  { %6476 = vmatprep.subr.bf16.mxu0 %v6475_v33 }
 0x354   :  { %882 = vmatmul.mubr.f32.gmra.mrb[10].mxu0 %v704_v10  ;;  %v6459_v10 = vpack.c.bf16 %v1113_v12, %v1112_v11 }
 0x355   :  { %6478 = vmatpush3.bf16.msra.mxu0 %v6475_v33 }
 0x356   :  { %6480 = vmatprep.subr.bf16.mxu0 %v6479_v29 }
 0x359   :  { %6482 = vmatpush3.bf16.msra.mxu0 %v6479_v29  ;;  %v1117_v29 = vld [vmem:[%s9369_s7 + $0xf8] sm:$0xff] }
 0x35b   :  { %v7137_v16 = vpop.permute.xlu0 %7136  ;;  %v7142_v17 = vpop.permute.xlu1 %7141 }
 0x35c   :  { %v7139_v5 = vunpack.i.h.bf16 %v7137_v16  ;;  %v7138_v4 = vunpack.i.l.bf16 %v7137_v16  ;;  %v7143_v19 = vunpack.i.l.bf16 %v7142_v17  ;;  %v7144_v20 = vunpack.i.h.bf16 %v7142_v17  ;;  %v1115_v16 = vld [vmem:[%s9369_s7 + $0xe8] sm:$0xff] }
 0x35d   :  { %v6461_v17 = vpack.c.bf16 %v1097_v14, %v1096_v54 }
 0x35e   :  { %v755_v21 = vsel %vm373_vm10, %v732_v18, %v7138_v4  ;;  %v753_v22 = vsel %vm373_vm10, %v715_v37, %v7139_v5  ;;  %v756_v9 = vsel %vm373_vm10, %v734_v6, %v7143_v19  ;;  %v754_v23 = vsel %vm373_vm10, %v711_v40, %v7144_v20  ;;  %v1102_v40 = vld [vmem:[%s9369_s7 + $0x80] sm:$0xff]  ;;  %v1099_v5 = vld [vmem:[%s9369_s7 + $0x68] sm:$0xff] }
 0x35f   :  { %886 = vmatprep.mubr.f32.mxu0 %v755_v21  ;;  %v6483_v37 = vpack.c.bf16 %v1125_v36, %v1124_v32  ;;  %v6439_v2 = vpack.c.bf16 %v1103_v43, %v1102_v40  ;;  %v6463_v18 = vpack.c.bf16 %v1115_v16, %v1114_v15  ;;  %v1098_v6 = vld [vmem:[%s9369_s7 + $0x60] sm:$0xff]  ;;  %v1100_v32 = vld [vmem:[%s9369_s7 + $0x70] sm:$0xff]  ;;  %v6467_v36 = vpack.c.bf16 %v1117_v29, %v1116_v35 }
 0x360   :  { %887 = vmatmul.mubr.f32.gmra.mrb[12].mxu0 %v753_v22  ;;  %v6465_v4 = vpack.c.bf16 %v1099_v5, %v1098_v6  ;;  %v5858_v20 = vld [vmem:[%s9368_s6] ss:$0 sm:$0xff] }
 0x361   :  { %891 = vmatprep.mubr.f32.mxu0 %v756_v9  ;;  %6484 = vmatprep.subr.bf16.mxu0 %v6483_v37 }
 0x362   :  { %6486 = vmatpush3.bf16.msra.mxu0 %v6483_v37  ;;  %6440 = vmatprep.subr.bf16.mxu1 %v6439_v2 }
 0x363   :  { %6442 = vmatpush3.bf16.msra.mxu1 %v6441_v48 }
 0x364   :  { %892 = vmatmul.mubr.f32.gmra.mrb[14].mxu0 %v754_v23  ;;  %6444 = vmatprep.subr.bf16.mxu1 %v6443_v47 }
 0x367   :  { %6446 = vmatpush3.bf16.msra.mxu1 %v6445_v51 }
 0x368   :  { %6448 = vmatprep.subr.bf16.mxu1 %v6447_v52 }
 0x36b   :  { %6450 = vmatpush3.bf16.msra.mxu1 %v6449_v59 }
 0x36c   :  { %6452 = vmatprep.subr.bf16.mxu1 %v6451_v60 }
 0x36f   :  { %6454 = vmatpush3.bf16.msra.mxu1 %v6453_v0 }
 0x370   :  { %6456 = vmatprep.subr.bf16.mxu1 %v6455_v3 }
 0x373   :  { %6458 = vmatpush3.bf16.msra.mxu1 %v6457_v13 }
 0x374   :  { %6460 = vmatprep.subr.bf16.mxu1 %v6459_v10 }
 0x377   :  { %6462 = vmatpush3.bf16.msra.mxu1 %v6461_v17 }
 0x378   :  { %6464 = vmatprep.subr.bf16.mxu1 %v6463_v18 }
 0x37b   :  { %6466 = vmatpush3.bf16.msra.mxu1 %v6465_v4 }
 0x37c   :  { %6468 = vmatprep.subr.bf16.mxu1 %v6467_v36 }
 0x3aa   :  { %v8116_v26 = vpop.f32.mrb[8].mxu1 }
 0x3ab   :  { %v8118_v28 = vpop.f32.mrb[9].mxu1 }
 0x3bb   :  { %v8138_v38 = vpop.f32.mrb[10].mxu1 }
 0x3bc   :  { %v8140_v39 = vpop.f32.mrb[11].mxu1 }
 0x423   :  { %v6049_v19 = vpop.f32.mrb[8].mxu0 }
 0x424   :  { %v6050_v21 = vpop.f32.mrb[9].mxu0 }
 0x425   :  { %v6051_v22 = vadd.f32 %v6050_v21, %v6049_v19 }
 0x427   :  { %v879_v9 = vadd.f32 %v6051_v22, %v5858_v20  ;;  %v6052_v23 = vpop.f32.mrb[10].mxu0 }
 0x428   :  { %v6053_v24 = vpop.f32.mrb[11].mxu0 }
 0x429   :  { %v964_v25 = vadd.f32 %v8118_v28, %v879_v9  ;;  %v6054_v27 = vadd.f32 %v6053_v24, %v6052_v23  ;;  %v1101_v28 = vld [vmem:[%s9369_s7 + $0x78] sm:$0xff] }
 0x42a   :  { %v6469_v40 = vpack.c.bf16 %v1101_v28, %v1100_v32 }
 0x42b   :  { %v982_v30 = vmax.f32 %v964_v25, 0.0  ;;  %v884_v31 = vadd.f32 %v6054_v27, %v5858_v20 }
 0x42c   :  { %6470 = vmatpush3.bf16.msra.mxu1 %v6469_v40 }
 0x42d   :  { %v988_v33 = vrot.slane %v982_v30, 6  ;;  %v969_v34 = vadd.f32 %v8116_v26, %v884_v31 }
 0x42f   :  { %v983_v37 = vmax.f32 %v969_v34, 0.0  ;;  %v8244_v26 = vsel %vm73_vm0, 0.0, %v988_v33 }
 0x430   :  { %v1027_v46 = vrot.slane %v8244_v26, 4  ;;  %v998_v48 = vrot.slane %v8244_v26, 1  ;;  %v1016_v53 = vrot.slane %v8244_v26, 3  ;;  %v1009_v29 = vrot.slane %v8244_v26, 2 }
 0x431   :  { %v989_v43 = vrot.slane %v983_v37, 6 }
 0x433   :  { %v6055_v42 = vpop.f32.mrb[12].mxu0  ;;  %v8247_v2 = vsel %vm73_vm0, %v988_v33, %v989_v43  ;;  %v8250_v44 = vsel %vm73_vm0, %v989_v43, 0.0 }
 0x434   :  { %v6056_v45 = vpop.f32.mrb[13].mxu0  ;;  %v1030_v47 = vrot.slane %v8250_v44, 4  ;;  %v1028_v1 = vrot.slane %v8247_v2, 4  ;;  %v999_v41 = vrot.slane %v8247_v2, 1  ;;  %v1001_v50 = vrot.slane %v8250_v44, 1 }
 0x435   :  { %v6057_v49 = vadd.f32 %v6056_v45, %v6055_v42  ;;  %v1017_v51 = vrot.slane %v8247_v2, 3  ;;  %v1019_v52 = vrot.slane %v8250_v44, 3  ;;  %v1010_v33 = vrot.slane %v8247_v2, 2 }
 0x436   :  { %v1029_v56 = vsel %vm120_vm4, %v1027_v46, %v1028_v1  ;;  %v1031_v58 = vsel %vm120_vm4, %v1028_v1, %v1030_v47  ;;  %v1000_v59 = vsel %vm84_vm2, %v998_v48, %v999_v41  ;;  %v1002_v57 = vsel %vm84_vm2, %v999_v41, %v1001_v50 }
 0x437   :  { %v6058_v55 = vpop.f32.mrb[14].mxu0  ;;  %v889_v60 = vadd.f32 %v6057_v49, %v5858_v20  ;;  %6250 = vmatprep.mubr.msk.f32.mxu0 %vm373_vm10, %v1029_v56  ;;  %v1020_v62 = vsel %vm108_vm3, %v1017_v51, %v1019_v52  ;;  %v1018_v63 = vsel %vm108_vm3, %v1016_v53, %v1017_v51  ;;  %v1012_v32 = vrot.slane %v8250_v44, 2 }
 0x438   :  { %v6059_v61 = vpop.f32.mrb[15].mxu0  ;;  %6251 = vmatmul.mubr.msk.f32.vlgmr.msra.gmra.mrb[16].mxu0 %vm373_vm10, %v1031_v58  ;;  %v7150_v3 = vpack.i.bf16 %v1002_v57, %v1020_v62  ;;  %v7145_v7 = vpack.i.bf16 %v1000_v59, %v1018_v63  ;;  %v1011_v40 = vsel %vm96_vm1, %v1009_v29, %v1010_v33  ;;  %v1315_v62 = vlaneseq }
 0x439   :  { %v6060_v0 = vadd.f32 %v6059_v61, %v6058_v55  ;;  %v974_v8 = vadd.f32 %v8140_v39, %v889_v60  ;;  %v1013_v46 = vsel %vm96_vm1, %v1010_v33, %v1012_v32 }
 0x43a   :  { %7151 = vrot.lane.b32.xlu1 %v7150_v3, %s7495_s27  ;;  %7146 = vrot.lane.b32.xlu0 %v7145_v7, %s7495_s27  ;;  %v8303_v63 = vshrl.u32 %v1315_v62, 7 }
 0x43b   :  { %v894_v11 = vadd.f32 %v6060_v0, %v5858_v20  ;;  %v984_v12 = vmax.f32 %v974_v8, 0.0  ;;  %v8305_v0 = vand.u32 127, %v1315_v62 }
 0x43c   :  { %v1320_v3 = vmul.u32 4, %v8303_v63 }
 0x43d   :  { %v979_v13 = vadd.f32 %v8138_v38, %v894_v11  ;;  %v1038_v10 = vrot.slane %v984_v12, 6  ;;  %v7496_v11 = vmov 0.0  }
 0x43e   :  { %vm1322_vm11 = vcmp.eq.s32.totalorder %v8305_v0, %v1320_v3 }
 0x43f   :  { %v985_v54 = vmax.f32 %v979_v13, 0.0  ;;  %v1044_v14 = vsel %vm73_vm0, 0.0, %v1038_v10  ;;  %v5868_v12 = vsel %vm1322_vm11, 1.0, %v7496_v11  ;;  %v1415_v13 = vadd.s32 1, %v1320_v3 }
 0x440   :  { %v1048_v18 = vrot.slane %v1044_v14, 1  ;;  %v1066_v6 = vrot.slane %v1044_v14, 3  ;;  %v1077_v19 = vrot.slane %v1044_v14, 4  ;;  %v1059_v47 = vrot.slane %v1044_v14, 2 }
 0x441   :  { %v1039_v15 = vrot.slane %v985_v54, 6  ;;  %vm1417_vm12 = vcmp.eq.s32.totalorder %v8305_v0, %v1415_v13  ;;  %v1593_v54 = vadd.s32 3, %v1320_v3 }
 0x443   :  { %v1045_v16 = vsel %vm73_vm0, %v1039_v15, 0.0  ;;  %v1040_v17 = vsel %vm73_vm0, %v1038_v10, %v1039_v15  ;;  %v1504_v10 = vadd.s32 2, %v1320_v3  ;;  %vm1595_vm14 = vcmp.eq.s32.totalorder %v8305_v0, %v1593_v54  ;;  %v5863_v15 = vld [vmem:[%s9370_s8] ss:$0 sm:$0xff]  ;;  %v2189_v54 = vld [vmem:[%s9372_s10 + $0x38] sm:$0xff] }
 0x444   :  { %v1051_v39 = vrot.slane %v1045_v16, 1  ;;  %v1069_v5 = vrot.slane %v1045_v16, 3  ;;  %v1080_v4 = vrot.slane %v1045_v16, 4  ;;  %v1049_v21 = vrot.slane %v1040_v17, 1  ;;  %v2055_v3 = vld [vmem:[%s9371_s9 + $0x20] sm:$0xff] }
 0x445   :  { %v1067_v20 = vrot.slane %v1040_v17, 3  ;;  %v1078_v22 = vrot.slane %v1040_v17, 4  ;;  %v1060_v49 = vrot.slane %v1040_v17, 2  ;;  %v1062_v1 = vrot.slane %v1045_v16, 2 }
 0x446   :  { %v1052_v38 = vsel %vm84_vm2, %v1049_v21, %v1051_v39  ;;  %v1050_v23 = vsel %vm84_vm2, %v1048_v18, %v1049_v21  ;;  %vm1506_vm13 = vcmp.eq.s32.totalorder %v8305_v0, %v1504_v10  ;;  %v2187_v10 = vld [vmem:[%s9372_s10 + $0x28] sm:$0xff] }
 0x447   :  { %v1070_v9 = vsel %vm108_vm3, %v1067_v20, %v1069_v5  ;;  %v1068_v24 = vsel %vm108_vm3, %v1066_v6, %v1067_v20  ;;  %v1079_v30 = vsel %vm120_vm4, %v1077_v19, %v1078_v22  ;;  %v1081_v31 = vsel %vm120_vm4, %v1078_v22, %v1080_v4 }
 0x448   :  { %v7160_v25 = vpack.i.bf16 %v1052_v38, %v1070_v9  ;;  %v7155_v27 = vpack.i.bf16 %v1050_v23, %v1068_v24  ;;  %6253 = vmatprep.mubr.msk.f32.mxu0 %vm373_vm10, %v1079_v30  ;;  %v1061_v53 = vsel %vm96_vm1, %v1059_v47, %v1060_v49  ;;  %v1063_v59 = vsel %vm96_vm1, %v1060_v49, %v1062_v1  ;;  %v2192_v9 = vld [vmem:[%s9372_s10 + $0x50] sm:$0xff] }
 0x449   :  { %6254 = vmatmul.mubr.msk.f32.gmra.mrb[18].mxu0 %vm373_vm10, %v1081_v31  ;;  %v1317_v20 = vadd.s32 8, %v8303_v63  ;;  %v5886_v49 = vsel %vm1595_vm14, 1.0, %v7496_v11 }
 0x44a   :  { %7161 = vrot.lane.b32.xlu1 %v7160_v25, %s7495_s27  ;;  %7156 = vrot.lane.b32.xlu0 %v7155_v27, %s7495_s27 }
 0x44b   :  { %6260 = vmatprep.mubr.msk.f32.mxu0 %vm373_vm10, %v5868_v12  ;;  %v1321_v24 = vmul.u32 4, %v1317_v20 }
 0x44d   :  { %vm1323_vm2 = vcmp.eq.s32.totalorder %v8305_v0, %v1321_v24  ;;  %v1594_v1 = vadd.s32 3, %v1321_v24 }
 0x44e   :  { %v5869_v32 = vsel %vm1323_vm2, 1.0, %v7496_v11 }
 0x44f   :  { %vm1596_vm6 = vcmp.eq.s32.totalorder %v8305_v0, %v1594_v1 }
 0x4ac   :  { %v7152_v34 = vpop.permute.xlu1 %7151  ;;  %v7147_v35 = vpop.permute.xlu0 %7146 }
 0x4ad   :  { %v7153_v36 = vunpack.i.l.bf16 %v7152_v34  ;;  %v7149_v28 = vunpack.i.h.bf16 %v7147_v35  ;;  %v7148_v37 = vunpack.i.l.bf16 %v7147_v35  ;;  %v7154_v45 = vunpack.i.h.bf16 %v7152_v34 }
 0x4af   :  { %v1034_v43 = vsel %vm373_vm10, %v1011_v40, %v7148_v37  ;;  %v1032_v42 = vsel %vm373_vm10, %v8244_v26, %v7149_v28  ;;  %v1035_v48 = vsel %vm373_vm10, %v1013_v46, %v7153_v36  ;;  %v1033_v44 = vsel %vm373_vm10, %v8247_v2, %v7154_v45 }
 0x4b0   :  { %1205 = vmatprep.mubr.f32.mxu1 %v1034_v43  ;;  %v5874_v36 = vsel %vm1417_vm12, 1.0, %v7496_v11  ;;  %v1416_v28 = vadd.s32 1, %v1321_v24 }
 0x4b1   :  { %1206 = vmatmul.mubr.f32.vlgmr.msra.gmra.mrb[12].mxu1 %v1032_v42 }
 0x4b2   :  { %1210 = vmatprep.mubr.f32.mxu1 %v1035_v48  ;;  %vm1418_vm3 = vcmp.eq.s32.totalorder %v8305_v0, %v1416_v28  ;;  %v1505_v48 = vadd.s32 2, %v1321_v24  ;;  %v2194_v28 = vld [vmem:[%s9372_s10 + $0x60] sm:$0xff] }
 0x4b3   :  { %v5875_v46 = vsel %vm1418_vm3, 1.0, %v7496_v11 }
 0x4b4   :  { %vm1507_vm5 = vcmp.eq.s32.totalorder %v8305_v0, %v1505_v48  ;;  %v2058_v0 = vld [vmem:[%s9371_s9 + $0x38] sm:$0xff] }
 0x4b5   :  { %1211 = vmatmul.mubr.f32.gmra.mrb[14].mxu1 %v1033_v44  ;;  %v5880_v44 = vsel %vm1506_vm13, 1.0, %v7496_v11  ;;  %v5881_v47 = vsel %vm1507_vm5, 1.0, %v7496_v11 }
 0x4bc   :  { %v7162_v41 = vpop.permute.xlu1 %7161  ;;  %v7157_v50 = vpop.permute.xlu0 %7156 }
 0x4bd   :  { %v7163_v51 = vunpack.i.l.bf16 %v7162_v41  ;;  %v7159_v52 = vunpack.i.h.bf16 %v7157_v50  ;;  %v7158_v26 = vunpack.i.l.bf16 %v7157_v50  ;;  %v7164_v58 = vunpack.i.h.bf16 %v7162_v41  ;;  %v2052_v50 = vld [vmem:[%s9371_s9 + $0x8] sm:$0xff] }
 0x4be   :  { %v5887_v41 = vsel %vm1596_vm6, 1.0, %v7496_v11 }
 0x4bf   :  { %v1084_v55 = vsel %vm373_vm10, %v1061_v53, %v7158_v26  ;;  %v1082_v56 = vsel %vm373_vm10, %v1044_v14, %v7159_v52  ;;  %v1085_v2 = vsel %vm373_vm10, %v1063_v59, %v7163_v51  ;;  %v1083_v60 = vsel %vm373_vm10, %v1040_v17, %v7164_v58  ;;  %v2054_v51 = vld [vmem:[%s9371_s9 + $0x18] sm:$0xff]  ;;  %v2051_v52 = vld [vmem:[%s9371_s9] sm:$0xff]  ;;  %v2053_v53 = vld [vmem:[%s9371_s9 + $0x10] sm:$0xff] }
 0x4c0   :  { %1215 = vmatprep.mubr.f32.mxu1 %v1084_v55  ;;  %v6535_v26 = vpack.c.bf16 %v2054_v51, %v2052_v50  ;;  %v2183_v55 = vld [vmem:[%s9372_s10 + $0x8] sm:$0xff]  ;;  %v6537_v58 = vpack.c.bf16 %v2053_v53, %v2051_v52 }
 0x4c1   :  { %1216 = vmatmul.mubr.f32.gmra.mrb[16].mxu1 %v1082_v56  ;;  %v2185_v56 = vld [vmem:[%s9372_s10 + $0x18] sm:$0xff] }
 0x4c2   :  { %1220 = vmatprep.mubr.f32.mxu1 %v1085_v2  ;;  %v8408_v59 = vpack.c.bf16 %v2185_v56, %v2183_v55  ;;  %v2182_v2 = vld [vmem:[%s9372_s10] sm:$0xff] }
 0x4c5   :  { %1221 = vmatmul.mubr.f32.gmra.mrb[18].mxu1 %v1083_v60  ;;  %v2184_v60 = vld [vmem:[%s9372_s10 + $0x10] sm:$0xff] }
 0x4c6   :  { %6288 = vmatprep.mubr.msk.f32.mxu1 %vm373_vm10, %v5868_v12  ;;  %v8421_v62 = vpack.c.bf16 %v2184_v60, %v2182_v2 }
 0x50b   :  { %v6252_v61 = vpop.f32.mrb[16].mxu0 }
 0x50c   :  { %v1292_v57 = vpop.f32.mrb[17].mxu0 }
 0x51c   :  { %v6255_v7 = vpop.f32.mrb[18].mxu0 }
 0x51d   :  { %v1302_v8 = vpop.f32.mrb[19].mxu0 }
 0x584   :  { %v6105_v14 = vpop.f32.mrb[12].mxu1 }
 0x585   :  { %v6106_v16 = vpop.f32.mrb[13].mxu1 }
 0x586   :  { %v6107_v17 = vadd.f32 %v6106_v16, %v6105_v14  ;;  %v2186_v14 = vld [vmem:[%s9372_s10 + $0x20] sm:$0xff]  ;;  %v2188_v16 = vld [vmem:[%s9372_s10 + $0x30] sm:$0xff] }
 0x588   :  { %v1208_v18 = vadd.f32 %v6107_v17, %v5863_v15  ;;  %v6108_v6 = vpop.f32.mrb[14].mxu1  ;;  %v8450_v17 = vpack.c.bf16 %v2188_v16, %v2186_v14 }
 0x589   :  { %v6109_v39 = vpop.f32.mrb[15].mxu1 }
 0x58a   :  { %v1293_v5 = vadd.f32 %v1292_v57, %v1208_v18  ;;  %v6110_v4 = vadd.f32 %v6109_v39, %v6108_v6  ;;  %v2060_v18 = vld [vmem:[%s9371_s9 + $0x48] sm:$0xff]  ;;  %v2062_v6 = vld [vmem:[%s9371_s9 + $0x58] sm:$0xff]  ;;  %v2059_v39 = vld [vmem:[%s9371_s9 + $0x40] sm:$0xff] }
 0x58c   :  { %v1213_v19 = vadd.f32 %v6110_v4, %v5863_v15  ;;  %v1311_v22 = vmax.f32 %v1293_v5, 0.0  ;;  %v6543_v5 = vpack.c.bf16 %v2062_v6, %v2060_v18  ;;  %v2061_v4 = vld [vmem:[%s9371_s9 + $0x50] sm:$0xff] }
 0x58d   :  { %v6545_v20 = vpack.c.bf16 %v2061_v4, %v2059_v39 }
 0x58e   :  { %v1298_v21 = vadd.f32 %v6252_v61, %v1213_v19  ;;  %v2056_v61 = vld [vmem:[%s9371_s9 + $0x28] sm:$0xff] }
 0x58f   :  { %v6539_v12 = vpack.c.bf16 %v2058_v0, %v2056_v61  ;;  %v2191_v19 = vld [vmem:[%s9372_s10 + $0x48] sm:$0xff] }
 0x590   :  { %v1312_v38 = vmax.f32 %v1298_v21, 0.0  ;;  %v2193_v21 = vld [vmem:[%s9372_s10 + $0x58] sm:$0xff] }
 0x592   :  { %v6487_v23 = vpack.c.bf16 %v1312_v38, %v1311_v22  ;;  %v8472_v22 = vpack.c.bf16 %v2193_v21, %v2191_v19  ;;  %v2190_v38 = vld [vmem:[%s9372_s10 + $0x40] sm:$0xff] }
 0x593   :  { %v8480_v24 = vpack.c.bf16 %v2192_v9, %v2190_v38 }
 0x594   :  { %v6111_v25 = vpop.f32.mrb[16].mxu1  ;;  %6489 = vmatprep.subr.msk.bf16.mxu0 %vm8321_vm15, %v6487_v23 }
 0x595   :  { %v6112_v27 = vpop.f32.mrb[17].mxu1  ;;  %6492 = vmatpush3.bf16.xpose.msk.msra.mxu0 %vm8321_vm15, %v6487_v23 }
 0x596   :  { %v6113_v30 = vadd.f32 %v6112_v27, %v6111_v25  ;;  %6495 = vmatprep.subr.msk.bf16.mxu0 %vm8321_vm15, %v6487_v23  ;;  %v2064_v25 = vld [vmem:[%s9371_s9 + $0x68] sm:$0xff]  ;;  %v2066_v27 = vld [vmem:[%s9371_s9 + $0x78] sm:$0xff] }
 0x598   :  { %v1218_v31 = vadd.f32 %v6113_v30, %v5863_v15  ;;  %v6114_v33 = vpop.f32.mrb[18].mxu1  ;;  %v2063_v30 = vld [vmem:[%s9371_s9 + $0x60] sm:$0xff] }
 0x599   :  { %v6115_v34 = vpop.f32.mrb[19].mxu1 }
 0x59a   :  { %v1303_v35 = vadd.f32 %v1302_v8, %v1218_v31  ;;  %v6116_v29 = vadd.f32 %v6115_v34, %v6114_v33  ;;  %v6547_v33 = vpack.c.bf16 %v2066_v27, %v2064_v25  ;;  %v2065_v34 = vld [vmem:[%s9371_s9 + $0x70] sm:$0xff] }
 0x59c   :  { %v1223_v37 = vadd.f32 %v6116_v29, %v5863_v15  ;;  %6261 = vmatmul.mubr.msk.f32.vlgmr.msra.gmra.mrb[20].mxu0 %vm373_vm10, %v5869_v32  ;;  %v1313_v43 = vmax.f32 %v1303_v35, 0.0  ;;  %v8445_v15 = vpack.c.bf16 %v2189_v54, %v2187_v10  ;;  %v2195_v35 = vld [vmem:[%s9372_s10 + $0x68] sm:$0xff]  ;;  %v2197_v29 = vld [vmem:[%s9372_s10 + $0x78] sm:$0xff] }
 0x59d   :  { %6498 = vmatpush3.bf16.xpose.msk.msra.mxu0 %vm8321_vm15, %v6487_v23  ;;  %6267 = vmatprep.mubr.msk.f32.mxu0 %vm373_vm10, %v5874_v36 }
 0x59e   :  { %v1308_v40 = vadd.f32 %v6255_v7, %v1223_v37  ;;  %6501 = vmatprep.subr.msk.bf16.mxu0 %vm8321_vm15, %v6487_v23  ;;  %v2057_v7 = vld [vmem:[%s9371_s9 + $0x30] sm:$0xff] }
 0x59f   :  { %v6541_v13 = vpack.c.bf16 %v2057_v7, %v2055_v3  ;;  %v2196_v37 = vld [vmem:[%s9372_s10 + $0x70] sm:$0xff]  ;;  %s7498_s10 = smov 32   ;;  %v2071_v3 = vsub.s32 0, %v8303_v63  ;;  %v2067_v7 = vld [vmem:[%s9373_s11] sm:$0x3] }
 0x5a0   :  { %v1314_v42 = vmax.f32 %v1308_v40, 0.0  ;;  %v8511_v40 = vpack.c.bf16 %v2196_v37, %v2194_v28 }
 0x5a2   :  { %v6511_v45 = vpack.c.bf16 %v1314_v42, %v1313_v43  ;;  %v2180_v43 = vld [vmem:[%s9379_s17] sm:$0x3] }
 0x5a4   :  { %6513 = vmatprep.subr.msk.bf16.mxu1 %vm8321_vm15, %v6511_v45  ;;  %6268 = vmatmul.mubr.msk.f32.vlgmr.msra.gmra.mrb[22].mxu0 %vm373_vm10, %v5875_v46 }
 0x5a5   :  { %6516 = vmatpush3.bf16.xpose.msk.msra.mxu1 %vm8321_vm15, %v6511_v45  ;;  %6504 = vmatpush3.bf16.xpose.msk.msra.mxu0 %vm8321_vm15, %v6487_v23 }
 0x5a6   :  { %6525 = vmatprep.subr.msk.bf16.mxu1 %vm8321_vm15, %v6511_v45  ;;  %6507 = vmatprep.subr.msk.bf16.mxu0 %vm8321_vm15, %v6487_v23 }
 0x5a7   :  { %6274 = vmatprep.mubr.msk.f32.mxu0 %vm373_vm10, %v5880_v44 }
 0x5ac   :  { %6289 = vmatmul.mubr.msk.f32.vlgmr.msra.gmra.mrb[20].mxu1 %vm373_vm10, %v5869_v32  ;;  %6275 = vmatmul.mubr.msk.f32.vlgmr.msra.gmra.mrb[24].mxu0 %vm373_vm10, %v5881_v47  ;;  %v6549_v32 = vpack.c.bf16 %v2065_v34, %v2063_v30 }
 0x5ad   :  { %6528 = vmatpush3.bf16.xpose.msk.msra.mxu1 %vm8321_vm15, %v6511_v45  ;;  %6510 = vmatpush3.bf16.xpose.msk.msra.mxu0 %vm8321_vm15, %v6487_v23 }
 0x5ae   :  { %6281 = vmatprep.mubr.msk.f32.mxu0 %vm373_vm10, %v5886_v49  ;;  %6519 = vmatprep.subr.msk.bf16.mxu0 %vm8321_vm15, %v6511_v45 }
 0x5af   :  { %6302 = vmatprep.mubr.msk.f32.mxu1 %vm373_vm10, %v5880_v44  ;;  %6536 = vmatprep.subr.bf16.mxu1 %v6535_v26  ;;  %v2181_v44 = vld [vmem:[%s9380_s18] sm:$0x3] }
 0x5b4   :  { %6303 = vmatmul.mubr.msk.f32.vlgmr.msra.gmra.mrb[22].mxu1 %vm373_vm10, %v5881_v47  ;;  %6282 = vmatmul.mubr.msk.f32.vlgmr.msra.gmra.mrb[26].mxu0 %vm373_vm10, %v5887_v41 }
 0x5b5   :  { %2155 = vmatprep.mubr.f32.mxu1 %v7496_v11  ;;  %6522 = vmatpush3.bf16.xpose.msk.msra.mxu0 %vm8321_vm15, %v6511_v45 }
 0x5b6   :  { %6295 = vmatprep.mubr.msk.f32.mxu0 %vm373_vm10, %v5874_v36  ;;  %6531 = vmatprep.subr.msk.bf16.mxu0 %vm8321_vm15, %v6511_v45  ;;  %v8503_v36 = vpack.c.bf16 %v2197_v29, %v2195_v35 }
 0x5b7   :  { %6538 = vmatpush1.bf16.msra.mxu1 %v6537_v58 }
 0x5b8   :  { %6540 = vmatprep.subr.bf16.mxu1 %v6539_v12  ;;  %v8570_v12 = vrot.slane %v2067_v7, %v2071_v3 }
 0x5bb   :  { %6542 = vmatpush1.bf16.msra.mxu1 %v6541_v13 }
 0x5bc   :  { %6296 = vmatmul.mubr.msk.f32.vlgmr.msra.gmra.mrb[28].mxu0 %vm373_vm10, %v5875_v46  ;;  %6544 = vmatprep.subr.bf16.mxu1 %v6543_v5 }
 0x5bd   :  { %6534 = vmatpush3.bf16.xpose.msk.msra.mxu0 %vm8321_vm15, %v6511_v45  ;;  %6309 = vmatprep.mubr.msk.f32.mxu0 %vm373_vm10, %v5886_v49 }
 0x5be   :  { %6552 = vmatprep.subr.bf16.mxu0 %v8408_v59 }
 0x5bf   :  { %6546 = vmatpush1.bf16.msra.mxu1 %v6545_v20 }
 0x5c0   :  { %6548 = vmatprep.subr.bf16.mxu1 %v6547_v33 }
 0x5c3   :  { %6550 = vmatpush1.bf16.msra.mxu1 %v6549_v32 }
 0x5c4   :  { %6310 = vmatmul.mubr.msk.f32.vlgmr.msra.gmra.mrb[30].mxu0 %vm373_vm10, %v5887_v41  ;;  %6568 = vmatprep.subr.bf16.mxu1 %v8408_v59 }
 0x5c5   :  { %2265 = vmatprep.mubr.f32.mxu0 %v7496_v11  ;;  %6554 = vmatpush1.bf16.msra.mxu0 %v8421_v62 }
 0x5c6   :  { %6556 = vmatprep.subr.bf16.mxu0 %v8445_v15 }
 0x5c9   :  { %6558 = vmatpush1.bf16.msra.mxu0 %v8450_v17 }
 0x5ca   :  { %6560 = vmatprep.subr.bf16.mxu0 %v8472_v22 }
 0x5cd   :  { %6562 = vmatpush1.bf16.msra.mxu0 %v8480_v24 }
 0x5ce   :  { %6564 = vmatprep.subr.bf16.mxu0 %v8503_v36 }
 0x5d1   :  { %6566 = vmatpush1.bf16.msra.mxu0 %v8511_v40 }
 0x5d2   :  { %6584 = vmatprep.subr.bf16.mxu0 %v8408_v59 }
 0x5d4   :  { %5912 = vmatmul.mubr.msk.f32.vlgmr.msra.gmra.mrb[32].mxu0 %vm373_vm10, %v2180_v43 }
 0x5d5   :  { %6586 = vmatpush1.bf16.msra.mxu0 %v8421_v62  ;;  %2471 = vmatprep.mubr.f32.mxu0 %v7496_v11 }
 0x5d6   :  { %6588 = vmatprep.subr.bf16.mxu0 %v8445_v15 }
 0x5d9   :  { %6590 = vmatpush1.bf16.msra.mxu0 %v8450_v17 }
 0x5da   :  { %6592 = vmatprep.subr.bf16.mxu0 %v8472_v22 }
 0x5dd   :  { %6594 = vmatpush1.bf16.msra.mxu0 %v8480_v24 }
 0x5de   :  { %6596 = vmatprep.subr.bf16.mxu0 %v8503_v36 }
 0x5e1   :  { %6598 = vmatpush1.bf16.msra.mxu0 %v8511_v40 }
 0x5e2   :  { %6616 = vmatprep.subr.bf16.mxu0 %v8408_v59 }
 0x66f   :  { %v8419_v57 = vpop.f32.mrb[20].mxu0 }
 0x670   :  { %v8432_v8 = vpop.f32.mrb[21].mxu0 }
 0x677   :  { %v6269_v23 = vpop.f32.mrb[22].mxu0 }
 0x678   :  { %v1495_v31 = vpop.f32.mrb[23].mxu0 }
 0x679   :  { %1684 = vrot.lane.b32.xlu0 %v1495_v31, %s7497_s22 }
 0x67f   :  { %v8520_v42 = vpop.f32.mrb[24].mxu0  ;;  %v8522_v45 = vpop.f32.mrb[20].mxu1 }
 0x680   :  { %v1584_v46 = vpop.f32.mrb[25].mxu0  ;;  %v8525_v48 = vpop.f32.mrb[21].mxu1 }
 0x681   :  { %1692 = vrot.lane.b32.xlu1 %v1584_v46, %s7498_s10 }
 0x685   :  { %2284 = vrot.lane.b32.xlu1 %v2181_v44, %s7495_s27 }
 0x687   :  { %v8536_v47 = vpop.f32.mrb[22].mxu1  ;;  %v6283_v49 = vpop.f32.mrb[26].mxu0 }
 0x688   :  { %v1937_v1 = vpop.f32.mrb[23].mxu1  ;;  %v1673_v41 = vpop.f32.mrb[27].mxu0 }
 0x689   :  { %1686 = vrot.lane.b32.xlu1 %v6269_v23, %s7497_s22  ;;  %1700 = vrot.lane.b32.xlu0 %v1673_v41, %s7499_s3 }
 0x68d   :  { %1702 = vrot.lane.b32.xlu1 %v6283_v49, %s7499_s3 }
 0x68f   :  { %v6297_v50 = vpop.f32.mrb[28].mxu0 }
 0x690   :  { %v1862_v51 = vpop.f32.mrb[29].mxu0 }
 0x691   :  { %2031 = vrot.lane.b32.xlu1 %v1937_v1, %s7498_s10 }
 0x695   :  { %2025 = vrot.lane.b32.xlu1 %v6297_v50, %s7497_s22 }
 0x697   :  { %v6311_v52 = vpop.f32.mrb[30].mxu0 }
 0x698   :  { %v2012_v26 = vpop.f32.mrb[31].mxu0 }
 0x699   :  { %2041 = vrot.lane.b32.xlu1 %v6311_v52, %s7499_s3 }
 0x6a7   :  { %v2267_v61 = vpop.f32.mrb[32].mxu0 }
 0x6a8   :  { %v2269_v0 = vpop.f32.mrb[33].mxu0 }
 0x6eb   :  { %v1685_v53 = vpop.permute.xlu0 %1684 }
 0x6ec   :  { %v1707_v56 = vsel %vm1706_vm7, %v8432_v8, %v1685_v53  ;;  %v2075_v8 = vsub.s32 1, %v8303_v63 }
 0x6ee   :  { %v8574_v13 = vrot.slane %v2067_v7, %v2075_v8 }
 0x6f3   :  { %v1693_v55 = vpop.permute.xlu1 %1692 }
 0x6f4   :  { %v1710_v58 = vsel %vm1709_vm8, %v1707_v56, %v1693_v55 }
 0x6f7   :  { %v2285_v38 = vpop.permute.xlu1 %2284 }
 0x6fb   :  { %v1701_v2 = vpop.permute.xlu0 %1700  ;;  %v1687_v23 = vpop.permute.xlu1 %1686 }
 0x6fc   :  { %v1713_v60 = vsel %vm1712_vm9, %v1710_v58, %v1701_v2  ;;  %v1708_v33 = vsel %vm1706_vm7, %v8419_v57, %v1687_v23 }
 0x6fd   :  { %5908 = vmatmul.mubr.msk.f32.vlgmr.msra.gmra.mrb[24].mxu1 %vm373_vm10, %v1713_v60 }
 0x6fe   :  { %2161 = vmatprep.mubr.f32.mxu1 %v7496_v11  ;;  %6570 = vmatpush1.bf16.msra.mxu1 %v8421_v62 }
 0x6ff   :  { %6572 = vmatprep.subr.bf16.mxu1 %v8445_v15  ;;  %v1703_v31 = vpop.permute.xlu1 %1702 }
 0x702   :  { %6574 = vmatpush1.bf16.msra.mxu1 %v8450_v17 }
 0x703   :  { %6576 = vmatprep.subr.bf16.mxu1 %v8472_v22  ;;  %v2032_v28 = vpop.permute.xlu1 %2031 }
 0x706   :  { %6578 = vmatpush1.bf16.msra.mxu1 %v8480_v24 }
 0x707   :  { %6580 = vmatprep.subr.bf16.mxu1 %v8503_v36  ;;  %v2026_v49 = vpop.permute.xlu1 %2025 }
 0x708   :  { %v2046_v50 = vsel %vm1706_vm7, %v8522_v45, %v2026_v49 }
 0x70a   :  { %6582 = vmatpush1.bf16.msra.mxu1 %v8511_v40 }
 0x70b   :  { %6600 = vmatprep.subr.bf16.mxu1 %v8408_v59 }
 0x7d0   :  { %v2157_v10 = vpop.f32.mrb[24].mxu1 }
 0x7d1   :  { %v8577_v54 = vadd.f32 %v2157_v10, %v8570_v12  ;;  %v2159_v14 = vpop.f32.mrb[25].mxu1 }
 0x7d2   :  { %v8580_v16 = vadd.f32 %v2159_v14, %v8574_v13 }
 0x7d3   :  { %v2272_v18 = vadd.f32 %v2267_v61, %v8577_v54 }
 0x7d4   :  { %v2273_v39 = vadd.f32 %v2269_v0, %v8580_v16 }
 0x7d5   :  { %v2274_v6 = vmul.f32 0.5, %v2272_v18 }
 0x7d6   :  { %v2279_v9 = vmul.f32 0.5, %v2273_v39 }
 0x7d7   :  { %7165 = vtanh.f32 %v2274_v6 }
 0x7d8   :  { %7167 = vtanh.f32 %v2273_v39 }
 0x7d9   :  { %7169 = vtanh.f32 %v2279_v9 }
 0x7e1   :  { %v7166_v5 = vpop.eup %7165 }
 0x7e2   :  { %v2276_v4 = vmul.f32 0.5, %v7166_v5  ;;  %v7168_v21 = vpop.eup %7167 }
 0x7e3   :  { %v7170_v35 = vpop.eup %7169 }
 0x7e4   :  { %v2277_v19 = vadd.f32 0.5, %v2276_v4  ;;  %v2281_v37 = vmul.f32 0.5, %v7170_v35 }
 0x7e6   :  { %v2288_v20 = vmul.f32 %v7168_v21, %v2277_v19  ;;  %v2287_v25 = vmul.f32 %v2285_v38, %v2277_v19  ;;  %v2282_v57 = vadd.f32 0.5, %v2281_v37 }
 0x7e8   :  { %2290 = vrot.lane.b32.xlu0 %v2288_v20, %s7495_s27 }
 0x7ec   :  { %1694 = vrot.lane.b32.xlu0 %v8520_v42, %s7498_s10 }
 0x7f0   :  { %2023 = vrot.lane.b32.xlu0 %v1862_v51, %s7497_s22  ;;  %v2042_v51 = vpop.permute.xlu1 %2041 }
 0x7f4   :  { %2039 = vrot.lane.b32.xlu0 %v2012_v26, %s7499_s3 }
 0x7f8   :  { %2033 = vrot.lane.b32.xlu0 %v8536_v47, %s7498_s10 }
 0x85a   :  { %v2291_v27 = vpop.permute.xlu0 %2290 }
 0x85b   :  { %v8591_v30 = vadd.f32 %v2291_v27, %v2287_v25 }
 0x85d   :  { %7171 = vtanh.f32 %v8591_v30  ;;  %v2390_v4 = vrot.slane %v8591_v30, 6 }
 0x85e   :  { %v1695_v34 = vpop.permute.xlu0 %1694 }
 0x85f   :  { %v1711_v29 = vsel %vm1709_vm8, %v1708_v33, %v1695_v34 }
 0x860   :  { %v1714_v32 = vsel %vm1712_vm9, %v1711_v29, %v1703_v31 }
 0x861   :  { %5909 = vmatmul.mubr.msk.f32.gmra.mrb[26].mxu1 %vm373_vm10, %v1714_v32 }
 0x862   :  { %v2024_v43 = vpop.permute.xlu0 %2023  ;;  %2167 = vmatprep.mubr.f32.mxu1 %v7496_v11 }
 0x863   :  { %v2045_v42 = vsel %vm1706_vm7, %v8525_v48, %v2024_v43 }
 0x864   :  { %v2047_v46 = vsel %vm1709_vm8, %v2045_v42, %v2032_v28 }
 0x866   :  { %v2040_v44 = vpop.permute.xlu0 %2039 }
 0x867   :  { %v7172_v47 = vpop.eup %7171  ;;  %v2049_v1 = vsel %vm1712_vm9, %v2047_v46, %v2040_v44 }
 0x868   :  { %5910 = vmatmul.mubr.msk.f32.gmra.mrb[28].mxu1 %vm373_vm10, %v2049_v1  ;;  %v8605_v41 = vmul.f32 %v7172_v47, %v2282_v57 }
 0x869   :  { %2173 = vmatprep.mubr.f32.mxu1 %v7496_v11 }
 0x86a   :  { %2297 = vrot.lane.b32.xlu0 %v8605_v41, %s7495_s27  ;;  %v2034_v48 = vpop.permute.xlu0 %2033 }
 0x86b   :  { %v2048_v52 = vsel %vm1709_vm8, %v2046_v50, %v2034_v48 }
 0x86c   :  { %v2050_v26 = vsel %vm1712_vm9, %v2048_v52, %v2042_v51 }
 0x86d   :  { %5911 = vmatmul.mubr.msk.f32.gmra.mrb[30].mxu1 %vm373_vm10, %v2050_v26 }
 0x86e   :  { %2365 = vmatprep.mubr.f32.mxu1 %v7496_v11 }
 0x8dc   :  { %v2298_v53 = vpop.permute.xlu0 %2297 }
 0x8dd   :  { %5913 = vmatmul.mubr.msk.f32.vlgmr.msra.gmra.mrb[32].mxu1 %vm373_vm10, %v2298_v53 }
 0x8de   :  { %6602 = vmatpush1.bf16.msra.mxu1 %v8421_v62  ;;  %2577 = vmatprep.mubr.f32.mxu1 %v7496_v11 }
 0x8df   :  { %6604 = vmatprep.subr.bf16.mxu1 %v8445_v15 }
 0x8e2   :  { %6606 = vmatpush1.bf16.msra.mxu1 %v8450_v17 }
 0x8e3   :  { %6608 = vmatprep.subr.bf16.mxu1 %v8472_v22 }
 0x8e6   :  { %6610 = vmatpush1.bf16.msra.mxu1 %v8480_v24 }
 0x8e7   :  { %6612 = vmatprep.subr.bf16.mxu1 %v8503_v36 }
 0x8ea   :  { %6614 = vmatpush1.bf16.msra.mxu1 %v8511_v40 }
 0x8eb   :  { %6632 = vmatprep.subr.bf16.mxu1 %v8408_v59 }
 0x934   :  { %v8626_v45 = vpop.f32.mrb[26].mxu1 }
 0x935   :  { %v8628_v55 = vpop.f32.mrb[27].mxu1 }
 0x93b   :  { %v8630_v56 = vpop.f32.mrb[28].mxu1 }
 0x93c   :  { %v8632_v58 = vpop.f32.mrb[29].mxu1 }
 0x940   :  { %v8634_v2 = vpop.f32.mrb[30].mxu1 }
 0x941   :  { %v8636_v60 = vpop.f32.mrb[31].mxu1 }
 0x9b0   :  { %v2367_v61 = vpop.f32.mrb[32].mxu1 }
 0x9b1   :  { %v2374_v0 = vrot.slane %v2367_v61, 6  ;;  %v2369_v7 = vpop.f32.mrb[33].mxu1 }
 0x9b2   :  { %v2375_v14 = vrot.slane %v2369_v7, 6 }
 0x9b3   :  { %v2378_v10 = vadd.f32 %v2374_v0, %v8577_v54 }
 0x9b4   :  { %v2379_v6 = vadd.f32 %v2375_v14, %v8580_v16 }
 0x9b5   :  { %v2380_v18 = vmul.f32 0.5, %v2378_v10 }
 0x9b6   :  { %v2385_v9 = vmul.f32 0.5, %v2379_v6 }
 0x9b7   :  { %7173 = vtanh.f32 %v2380_v18 }
 0x9b8   :  { %7175 = vtanh.f32 %v2379_v6 }
 0x9b9   :  { %7177 = vtanh.f32 %v2385_v9 }
 0x9c1   :  { %v7174_v39 = vpop.eup %7173 }
 0x9c2   :  { %v2382_v5 = vmul.f32 0.5, %v7174_v39  ;;  %v7176_v21 = vpop.eup %7175 }
 0x9c3   :  { %v7178_v27 = vpop.eup %7177 }
 0x9c4   :  { %v2383_v19 = vadd.f32 0.5, %v2382_v5  ;;  %v2387_v31 = vmul.f32 0.5, %v7178_v27 }
 0x9c6   :  { %v2393_v20 = vmul.f32 %v7176_v21, %v2383_v19  ;;  %v2392_v38 = vmul.f32 %v2390_v4, %v2383_v19  ;;  %v2388_v33 = vadd.f32 0.5, %v2387_v31 }
 0x9c8   :  { %2395 = vrot.lane.b32.xlu1 %v2393_v20, %s7495_s27 }
 0xa3a   :  { %v2396_v23 = vpop.permute.xlu1 %2395 }
 0xa3b   :  { %v2398_v25 = vadd.f32 %v2396_v23, %v2392_v38 }
 0xa3d   :  { %7179 = vtanh.f32 %v2398_v25  ;;  %v2496_v49 = vrot.slane %v2398_v25, 6 }
 0xa47   :  { %v7180_v34 = vpop.eup %7179 }
 0xa48   :  { %v2400_v35 = vmul.f32 %v7180_v34, %v2388_v33 }
 0xa4a   :  { %v2402_v29 = vrot.slane %v2400_v35, 2  ;;  %v3864_v18 = vsel %vm73_vm0, %v8605_v41, %v2400_v35 }
 0xa4c   :  { %2403 = vrot.lane.b32.xlu0 %v2402_v29, %s7495_s27 }
 0xabe   :  { %v2404_v30 = vpop.permute.xlu0 %2403 }
 0xabf   :  { %5914 = vmatmul.mubr.msk.f32.vlgmr.msra.gmra.mrb[34].mxu0 %vm373_vm10, %v2404_v30 }
 0xac0   :  { %6618 = vmatpush1.bf16.msra.mxu0 %v8421_v62  ;;  %2683 = vmatprep.mubr.f32.mxu0 %v7496_v11 }
 0xac1   :  { %6620 = vmatprep.subr.bf16.mxu0 %v8445_v15 }
 0xac4   :  { %6622 = vmatpush1.bf16.msra.mxu0 %v8450_v17 }
 0xac5   :  { %6624 = vmatprep.subr.bf16.mxu0 %v8472_v22 }
 0xac8   :  { %6626 = vmatpush1.bf16.msra.mxu0 %v8480_v24 }
 0xac9   :  { %6628 = vmatprep.subr.bf16.mxu0 %v8503_v36 }
 0xacc   :  { %6630 = vmatpush1.bf16.msra.mxu0 %v8511_v40 }
 0xacd   :  { %6648 = vmatprep.subr.bf16.mxu0 %v8408_v59 }
 0xb92   :  { %v2473_v32 = vpop.f32.mrb[34].mxu0 }
 0xb93   :  { %v2480_v28 = vrot.slane %v2473_v32, 4  ;;  %v2475_v37 = vpop.f32.mrb[35].mxu0 }
 0xb94   :  { %v2481_v42 = vrot.slane %v2475_v37, 4 }
 0xb95   :  { %v2484_v43 = vadd.f32 %v2480_v28, %v8577_v54 }
 0xb96   :  { %v2485_v44 = vadd.f32 %v2481_v42, %v8580_v16 }
 0xb97   :  { %v2486_v46 = vmul.f32 0.5, %v2484_v43 }
 0xb98   :  { %v2491_v52 = vmul.f32 0.5, %v2485_v44 }
 0xb99   :  { %7181 = vtanh.f32 %v2486_v46 }
 0xb9a   :  { %7183 = vtanh.f32 %v2485_v44 }
 0xb9b   :  { %7185 = vtanh.f32 %v2491_v52 }
 0xba3   :  { %v7182_v57 = vpop.eup %7181 }
 0xba4   :  { %v2488_v47 = vmul.f32 0.5, %v7182_v57  ;;  %v7184_v50 = vpop.eup %7183  ;;  %v8689_v57 = vadd.f32 %v8626_v45, %v8570_v12 }
 0xba5   :  { %v7186_v61 = vpop.eup %7185 }
 0xba6   :  { %v2489_v1 = vadd.f32 0.5, %v2488_v47  ;;  %v2493_v0 = vmul.f32 0.5, %v7186_v61 }
 0xba8   :  { %v2499_v48 = vmul.f32 %v7184_v50, %v2489_v1  ;;  %v2498_v51 = vmul.f32 %v2496_v49, %v2489_v1  ;;  %v2494_v7 = vadd.f32 0.5, %v2493_v0  ;;  %v8694_v50 = vadd.f32 %v8628_v55, %v8574_v13 }
 0xbaa   :  { %2501 = vrot.lane.b32.xlu1 %v2499_v48, %s7495_s27 }
 0xc1c   :  { %v2502_v26 = vpop.permute.xlu1 %2501 }
 0xc1d   :  { %v2504_v53 = vadd.f32 %v2502_v26, %v2498_v51 }
 0xc1f   :  { %7187 = vtanh.f32 %v2504_v53  ;;  %v2602_v27 = vrot.slane %v2504_v53, 6 }
 0xc29   :  { %v7188_v10 = vpop.eup %7187 }
 0xc2a   :  { %v2506_v14 = vmul.f32 %v7188_v10, %v2494_v7 }
 0xc2c   :  { %v2508_v6 = vrot.slane %v2506_v14, 4  ;;  %v3865_v39 = vsel %vm120_vm4, %v3864_v18, %v2506_v14 }
 0xc2e   :  { %2509 = vrot.lane.b32.xlu0 %v2508_v6, %s7495_s27 }
 0xca0   :  { %v2510_v5 = vpop.permute.xlu0 %2509 }
 0xca1   :  { %5915 = vmatmul.mubr.msk.f32.vlgmr.msra.gmra.mrb[34].mxu1 %vm373_vm10, %v2510_v5 }
 0xca2   :  { %6634 = vmatpush1.bf16.msra.mxu1 %v8421_v62  ;;  %2782 = vmatprep.mubr.f32.mxu1 %v7496_v11 }
 0xca3   :  { %6636 = vmatprep.subr.bf16.mxu1 %v8445_v15 }
 0xca6   :  { %6638 = vmatpush1.bf16.msra.mxu1 %v8450_v17 }
 0xca7   :  { %6640 = vmatprep.subr.bf16.mxu1 %v8472_v22 }
 0xcaa   :  { %6642 = vmatpush1.bf16.msra.mxu1 %v8480_v24 }
 0xcab   :  { %6644 = vmatprep.subr.bf16.mxu1 %v8503_v36 }
 0xcae   :  { %6646 = vmatpush1.bf16.msra.mxu1 %v8511_v40 }
 0xcaf   :  { %6664 = vmatprep.subr.bf16.mxu1 %v8408_v59 }
 0xd74   :  { %v2579_v41 = vpop.f32.mrb[34].mxu1 }
 0xd75   :  { %v2586_v4 = vrot.slane %v2579_v41, 2  ;;  %v2581_v19 = vpop.f32.mrb[35].mxu1 }
 0xd76   :  { %v2587_v20 = vrot.slane %v2581_v19, 2 }
 0xd77   :  { %v2590_v21 = vadd.f32 %v2586_v4, %v8577_v54 }
 0xd78   :  { %v2591_v9 = vadd.f32 %v2587_v20, %v8580_v16 }
 0xd79   :  { %v2592_v38 = vmul.f32 0.5, %v2590_v21 }
 0xd7a   :  { %v2597_v29 = vmul.f32 0.5, %v2591_v9 }
 0xd7b   :  { %7189 = vtanh.f32 %v2592_v38 }
 0xd7c   :  { %7191 = vtanh.f32 %v2591_v9 }
 0xd7d   :  { %7193 = vtanh.f32 %v2597_v29 }
 0xd85   :  { %v7190_v23 = vpop.eup %7189 }
 0xd86   :  { %v2594_v25 = vmul.f32 0.5, %v7190_v23  ;;  %v7192_v33 = vpop.eup %7191 }
 0xd87   :  { %v7194_v54 = vpop.eup %7193 }
 0xd88   :  { %v2595_v31 = vadd.f32 0.5, %v2594_v25  ;;  %v2599_v28 = vmul.f32 0.5, %v7194_v54 }
 0xd8a   :  { %v2605_v34 = vmul.f32 %v7192_v33, %v2595_v31  ;;  %v2604_v35 = vmul.f32 %v2602_v27, %v2595_v31  ;;  %v2600_v37 = vadd.f32 0.5, %v2599_v28 }
 0xd8c   :  { %2607 = vrot.lane.b32.xlu1 %v2605_v34, %s7495_s27 }
 0xdfe   :  { %v2608_v30 = vpop.permute.xlu1 %2607 }
 0xdff   :  { %v2610_v32 = vadd.f32 %v2608_v30, %v2604_v35 }
 0xe01   :  { %7195 = vtanh.f32 %v2610_v32  ;;  %v2702_v53 = vrot.slane %v2610_v32, 6 }
 0xe0b   :  { %v7196_v43 = vpop.eup %7195 }
 0xe0c   :  { %v2612_v16 = vmul.f32 %v7196_v43, %v2600_v37 }
 0xe0e   :  { %v2614_v42 = vrot.slane %v2612_v16, 6  ;;  %v8674_v46 = vsel %vm96_vm1, %v3865_v39, %v2612_v16 }
 0xe10   :  { %2615 = vrot.lane.b32.xlu0 %v2614_v42, %s7495_s27 }
 0xe82   :  { %v2616_v44 = vpop.permute.xlu0 %2615 }
 0xe83   :  { %5916 = vmatmul.mubr.msk.f32.vlgmr.msra.gmra.mrb[36].mxu0 %vm373_vm10, %v2616_v44 }
 0xe84   :  { %6650 = vmatpush1.bf16.msra.mxu0 %v8421_v62  ;;  %2888 = vmatprep.mubr.f32.mxu0 %v7496_v11 }
 0xe85   :  { %6652 = vmatprep.subr.bf16.mxu0 %v8445_v15 }
 0xe88   :  { %6654 = vmatpush1.bf16.msra.mxu0 %v8450_v17 }
 0xe89   :  { %6656 = vmatprep.subr.bf16.mxu0 %v8472_v22 }
 0xe8c   :  { %6658 = vmatpush1.bf16.msra.mxu0 %v8480_v24 }
 0xe8d   :  { %6660 = vmatprep.subr.bf16.mxu0 %v8503_v36 }
 0xe90   :  { %6662 = vmatpush1.bf16.msra.mxu0 %v8511_v40 }
 0xe91   :  { %6680 = vmatprep.subr.bf16.mxu0 %v8408_v59 }
 0xf56   :  { %v2685_v47 = vpop.f32.mrb[36].mxu0 }
 0xf57   :  { %v2690_v49 = vadd.f32 %v2685_v47, %v8689_v57  ;;  %v2687_v1 = vpop.f32.mrb[37].mxu0 }
 0xf58   :  { %v2691_v51 = vadd.f32 %v2687_v1, %v8694_v50 }
 0xf59   :  { %v2692_v48 = vmul.f32 0.5, %v2690_v49 }
 0xf5a   :  { %v2697_v10 = vmul.f32 0.5, %v2691_v51 }
 0xf5b   :  { %7197 = vtanh.f32 %v2692_v48 }
 0xf5c   :  { %7199 = vtanh.f32 %v2691_v51 }
 0xf5d   :  { %7201 = vtanh.f32 %v2697_v10 }
 0xf65   :  { %v7198_v52 = vpop.eup %7197 }
 0xf66   :  { %v2694_v26 = vmul.f32 0.5, %v7198_v52  ;;  %v7200_v0 = vpop.eup %7199 }
 0xf67   :  { %v7202_v55 = vpop.eup %7201 }
 0xf68   :  { %v2695_v61 = vadd.f32 0.5, %v2694_v26  ;;  %v2699_v6 = vmul.f32 0.5, %v7202_v55 }
 0xf6a   :  { %v2705_v45 = vmul.f32 %v7200_v0, %v2695_v61  ;;  %v2704_v7 = vmul.f32 %v2702_v53, %v2695_v61  ;;  %v2700_v39 = vadd.f32 0.5, %v2699_v6 }
 0xf6c   :  { %2707 = vrot.lane.b32.xlu1 %v2705_v45, %s7495_s27 }
 0xfde   :  { %v2708_v14 = vpop.permute.xlu1 %2707 }
 0xfdf   :  { %v2710_v18 = vadd.f32 %v2708_v14, %v2704_v7 }
 0xfe1   :  { %7203 = vtanh.f32 %v2710_v18  ;;  %v2807_v33 = vrot.slane %v2710_v18, 6 }
 0xfeb   :  { %v7204_v5 = vpop.eup %7203 }
 0xfec   :  { %v8698_v41 = vmul.f32 %v7204_v5, %v2700_v39 }
 0xfee   :  { %2714 = vrot.lane.b32.xlu0 %v8698_v41, %s7495_s27 }
0x1060   :  { %v2715_v4 = vpop.permute.xlu0 %2714 }
0x1061   :  { %5917 = vmatmul.mubr.msk.f32.vlgmr.msra.gmra.mrb[36].mxu1 %vm373_vm10, %v2715_v4 }
0x1062   :  { %6666 = vmatpush1.bf16.msra.mxu1 %v8421_v62  ;;  %2994 = vmatprep.mubr.f32.mxu1 %v7496_v11 }
0x1063   :  { %6668 = vmatprep.subr.bf16.mxu1 %v8445_v15 }
0x1066   :  { %6670 = vmatpush1.bf16.msra.mxu1 %v8450_v17 }
0x1067   :  { %6672 = vmatprep.subr.bf16.mxu1 %v8472_v22 }
0x106a   :  { %6674 = vmatpush1.bf16.msra.mxu1 %v8480_v24 }
0x106b   :  { %6676 = vmatprep.subr.bf16.mxu1 %v8503_v36 }
0x106e   :  { %6678 = vmatpush1.bf16.msra.mxu1 %v8511_v40 }
0x106f   :  { %6696 = vmatprep.subr.bf16.mxu1 %v8408_v59 }
0x1134   :  { %v2784_v19 = vpop.f32.mrb[36].mxu1 }
0x1135   :  { %v2791_v21 = vrot.slane %v2784_v19, 6  ;;  %v2786_v20 = vpop.f32.mrb[37].mxu1 }
0x1136   :  { %v2792_v9 = vrot.slane %v2786_v20, 6 }
0x1137   :  { %v2795_v38 = vadd.f32 %v2791_v21, %v8689_v57 }
0x1138   :  { %v2796_v25 = vadd.f32 %v2792_v9, %v8694_v50 }
0x1139   :  { %v2797_v23 = vmul.f32 0.5, %v2795_v38 }
0x113a   :  { %v2802_v32 = vmul.f32 0.5, %v2796_v25 }
0x113b   :  { %7205 = vtanh.f32 %v2797_v23 }
0x113c   :  { %7207 = vtanh.f32 %v2796_v25 }
0x113d   :  { %7209 = vtanh.f32 %v2802_v32 }
0x1145   :  { %v7206_v27 = vpop.eup %7205 }
0x1146   :  { %v2799_v31 = vmul.f32 0.5, %v7206_v27  ;;  %v7208_v35 = vpop.eup %7207 }
0x1147   :  { %v7210_v37 = vpop.eup %7209 }
0x1148   :  { %v2800_v34 = vadd.f32 0.5, %v2799_v31  ;;  %v2804_v43 = vmul.f32 0.5, %v7210_v37 }
0x114a   :  { %v2810_v29 = vmul.f32 %v7208_v35, %v2800_v34  ;;  %v2809_v30 = vmul.f32 %v2807_v33, %v2800_v34  ;;  %v2805_v16 = vadd.f32 0.5, %v2804_v43 }
0x114c   :  { %2812 = vrot.lane.b32.xlu1 %v2810_v29, %s7495_s27 }
0x11be   :  { %v2813_v54 = vpop.permute.xlu1 %2812 }
0x11bf   :  { %v2815_v28 = vadd.f32 %v2813_v54, %v2809_v30 }
0x11c1   :  { %7211 = vtanh.f32 %v2815_v28  ;;  %v2913_v7 = vrot.slane %v2815_v28, 6 }
0x11cb   :  { %v7212_v42 = vpop.eup %7211 }
0x11cc   :  { %v2817_v44 = vmul.f32 %v7212_v42, %v2805_v16 }
0x11ce   :  { %v2819_v47 = vrot.slane %v2817_v44, 2  ;;  %v3867_v9 = vsel %vm73_vm0, %v8698_v41, %v2817_v44 }
0x11d0   :  { %2820 = vrot.lane.b32.xlu0 %v2819_v47, %s7495_s27 }
0x1242   :  { %v2821_v49 = vpop.permute.xlu0 %2820 }
0x1243   :  { %5918 = vmatmul.mubr.msk.f32.vlgmr.msra.gmra.mrb[38].mxu0 %vm373_vm10, %v2821_v49 }
0x1244   :  { %6682 = vmatpush1.bf16.msra.mxu0 %v8421_v62  ;;  %3100 = vmatprep.mubr.f32.mxu0 %v7496_v11 }
0x1245   :  { %6684 = vmatprep.subr.bf16.mxu0 %v8445_v15 }
0x1248   :  { %6686 = vmatpush1.bf16.msra.mxu0 %v8450_v17 }
0x1249   :  { %6688 = vmatprep.subr.bf16.mxu0 %v8472_v22 }
0x124c   :  { %6690 = vmatpush1.bf16.msra.mxu0 %v8480_v24 }
0x124d   :  { %6692 = vmatprep.subr.bf16.mxu0 %v8503_v36 }
0x1250   :  { %6694 = vmatpush1.bf16.msra.mxu0 %v8511_v40 }
0x1251   :  { %6712 = vmatprep.subr.bf16.mxu0 %v8408_v59 }
0x1316   :  { %v2890_v1 = vpop.f32.mrb[38].mxu0 }
0x1317   :  { %v2897_v48 = vrot.slane %v2890_v1, 4  ;;  %v2892_v51 = vpop.f32.mrb[39].mxu0 }
0x1318   :  { %v2898_v26 = vrot.slane %v2892_v51, 4 }
0x1319   :  { %v2901_v52 = vadd.f32 %v2897_v48, %v8689_v57 }
0x131a   :  { %v2902_v61 = vadd.f32 %v2898_v26, %v8694_v50 }
0x131b   :  { %v2903_v53 = vmul.f32 0.5, %v2901_v52 }
0x131c   :  { %v2908_v6 = vmul.f32 0.5, %v2902_v61 }
0x131d   :  { %7213 = vtanh.f32 %v2903_v53 }
0x131e   :  { %7215 = vtanh.f32 %v2902_v61  ;;  %v8762_v61 = vadd.f32 %v8630_v56, %v8570_v12 }
0x131f   :  { %7217 = vtanh.f32 %v2908_v6 }
0x1327   :  { %v7214_v0 = vpop.eup %7213 }
0x1328   :  { %v2905_v45 = vmul.f32 0.5, %v7214_v0  ;;  %v7216_v14 = vpop.eup %7215 }
0x1329   :  { %v7218_v4 = vpop.eup %7217 }
0x132a   :  { %v2906_v10 = vadd.f32 0.5, %v2905_v45  ;;  %v2910_v19 = vmul.f32 0.5, %v7218_v4 }
0x132c   :  { %v2916_v18 = vmul.f32 %v7216_v14, %v2906_v10  ;;  %v2915_v55 = vmul.f32 %v2913_v7, %v2906_v10  ;;  %v2911_v21 = vadd.f32 0.5, %v2910_v19  ;;  %v8767_v10 = vadd.f32 %v8632_v58, %v8574_v13 }
0x132e   :  { %2918 = vrot.lane.b32.xlu1 %v2916_v18, %s7495_s27 }
0x13a0   :  { %v2919_v39 = vpop.permute.xlu1 %2918 }
0x13a1   :  { %v2921_v5 = vadd.f32 %v2919_v39, %v2915_v55 }
0x13a3   :  { %7219 = vtanh.f32 %v2921_v5  ;;  %v3019_v28 = vrot.slane %v2921_v5, 6 }
0x13ad   :  { %v7220_v20 = vpop.eup %7219 }
0x13ae   :  { %v2923_v38 = vmul.f32 %v7220_v20, %v2911_v21 }
0x13b0   :  { %v2925_v23 = vrot.slane %v2923_v38, 4  ;;  %v3868_v25 = vsel %vm120_vm4, %v3867_v9, %v2923_v38 }
0x13b2   :  { %2926 = vrot.lane.b32.xlu0 %v2925_v23, %s7495_s27 }
0x1424   :  { %v2927_v27 = vpop.permute.xlu0 %2926 }
0x1425   :  { %5919 = vmatmul.mubr.msk.f32.vlgmr.msra.gmra.mrb[38].mxu1 %vm373_vm10, %v2927_v27 }
0x1426   :  { %6698 = vmatpush1.bf16.msra.mxu1 %v8421_v62  ;;  %3199 = vmatprep.mubr.f32.mxu1 %v7496_v11 }
0x1427   :  { %6700 = vmatprep.subr.bf16.mxu1 %v8445_v15 }
0x142a   :  { %6702 = vmatpush1.bf16.msra.mxu1 %v8450_v17 }
0x142b   :  { %6704 = vmatprep.subr.bf16.mxu1 %v8472_v22 }
0x142e   :  { %6706 = vmatpush1.bf16.msra.mxu1 %v8480_v24 }
0x142f   :  { %6708 = vmatprep.subr.bf16.mxu1 %v8503_v36 }
0x1432   :  { %6710 = vmatpush1.bf16.msra.mxu1 %v8511_v40 }
0x1433   :  { %6728 = vmatprep.subr.bf16.mxu1 %v8408_v59 }
0x14f8   :  { %v2996_v41 = vpop.f32.mrb[38].mxu1 }
0x14f9   :  { %v3003_v31 = vrot.slane %v2996_v41, 2  ;;  %v2998_v33 = vpop.f32.mrb[39].mxu1 }
0x14fa   :  { %v3004_v35 = vrot.slane %v2998_v33, 2 }
0x14fb   :  { %v3007_v34 = vadd.f32 %v3003_v31, %v8689_v57 }
0x14fc   :  { %v3008_v30 = vadd.f32 %v3004_v35, %v8694_v50 }
0x14fd   :  { %v3009_v29 = vmul.f32 0.5, %v3007_v34 }
0x14fe   :  { %v3014_v44 = vmul.f32 0.5, %v3008_v30 }
0x14ff   :  { %7221 = vtanh.f32 %v3009_v29 }
0x1500   :  { %7223 = vtanh.f32 %v3008_v30 }
0x1501   :  { %7225 = vtanh.f32 %v3014_v44 }
0x1509   :  { %v7222_v32 = vpop.eup %7221 }
0x150a   :  { %v3011_v54 = vmul.f32 0.5, %v7222_v32  ;;  %v7224_v43 = vpop.eup %7223 }
0x150b   :  { %v7226_v57 = vpop.eup %7225 }
0x150c   :  { %v3012_v37 = vadd.f32 0.5, %v3011_v54  ;;  %v3016_v1 = vmul.f32 0.5, %v7226_v57 }
0x150e   :  { %v3022_v16 = vmul.f32 %v7224_v43, %v3012_v37  ;;  %v3021_v42 = vmul.f32 %v3019_v28, %v3012_v37  ;;  %v3017_v48 = vadd.f32 0.5, %v3016_v1 }
0x1510   :  { %3024 = vrot.lane.b32.xlu1 %v3022_v16, %s7495_s27 }
0x1582   :  { %v3025_v47 = vpop.permute.xlu1 %3024 }
0x1583   :  { %v3027_v49 = vadd.f32 %v3025_v47, %v3021_v42 }
0x1585   :  { %7227 = vtanh.f32 %v3027_v49  ;;  %v3119_v39 = vrot.slane %v3027_v49, 6 }
0x158f   :  { %v7228_v51 = vpop.eup %7227 }
0x1590   :  { %v3029_v50 = vmul.f32 %v7228_v51, %v3017_v48 }
0x1592   :  { %v3031_v52 = vrot.slane %v3029_v50, 6  ;;  %v8747_v26 = vsel %vm96_vm1, %v3868_v25, %v3029_v50 }
0x1594   :  { %3032 = vrot.lane.b32.xlu0 %v3031_v52, %s7495_s27 }
0x1606   :  { %v3033_v53 = vpop.permute.xlu0 %3032 }
0x1607   :  { %5920 = vmatmul.mubr.msk.f32.vlgmr.msra.gmra.mrb[40].mxu0 %vm373_vm10, %v3033_v53 }
0x1608   :  { %6714 = vmatpush1.bf16.msra.mxu0 %v8421_v62  ;;  %3305 = vmatprep.mubr.f32.mxu0 %v7496_v11 }
0x1609   :  { %6716 = vmatprep.subr.bf16.mxu0 %v8445_v15 }
0x160c   :  { %6718 = vmatpush1.bf16.msra.mxu0 %v8450_v17 }
0x160d   :  { %6720 = vmatprep.subr.bf16.mxu0 %v8472_v22 }
0x1610   :  { %6722 = vmatpush1.bf16.msra.mxu0 %v8480_v24 }
0x1611   :  { %6724 = vmatprep.subr.bf16.mxu0 %v8503_v36 }
0x1614   :  { %6726 = vmatpush1.bf16.msra.mxu0 %v8511_v40 }
0x1615   :  { %6744 = vmatprep.subr.bf16.mxu0 %v8408_v59 }
0x16da   :  { %v3102_v0 = vpop.f32.mrb[40].mxu0 }
0x16db   :  { %v3107_v45 = vadd.f32 %v3102_v0, %v8762_v61  ;;  %v3104_v7 = vpop.f32.mrb[41].mxu0 }
0x16dc   :  { %v3108_v18 = vadd.f32 %v3104_v7, %v8767_v10 }
0x16dd   :  { %v3109_v14 = vmul.f32 0.5, %v3107_v45 }
0x16de   :  { %v3114_v21 = vmul.f32 0.5, %v3108_v18 }
0x16df   :  { %7229 = vtanh.f32 %v3109_v14 }
0x16e0   :  { %7231 = vtanh.f32 %v3108_v18 }
0x16e1   :  { %7233 = vtanh.f32 %v3114_v21 }
0x16e9   :  { %v7230_v55 = vpop.eup %7229 }
0x16ea   :  { %v3111_v6 = vmul.f32 0.5, %v7230_v55  ;;  %v7232_v4 = vpop.eup %7231 }
0x16eb   :  { %v7234_v58 = vpop.eup %7233 }
0x16ec   :  { %v3112_v5 = vadd.f32 0.5, %v3111_v6  ;;  %v3116_v9 = vmul.f32 0.5, %v7234_v58 }
0x16ee   :  { %v3122_v56 = vmul.f32 %v7232_v4, %v3112_v5  ;;  %v3121_v19 = vmul.f32 %v3119_v39, %v3112_v5  ;;  %v3117_v23 = vadd.f32 0.5, %v3116_v9 }
0x16f0   :  { %3124 = vrot.lane.b32.xlu1 %v3122_v56, %s7495_s27 }
0x1762   :  { %v3125_v20 = vpop.permute.xlu1 %3124 }
0x1763   :  { %v3127_v38 = vadd.f32 %v3125_v20, %v3121_v19 }
0x1765   :  { %7235 = vtanh.f32 %v3127_v38  ;;  %v3224_v37 = vrot.slane %v3127_v38, 6 }
0x176f   :  { %v7236_v25 = vpop.eup %7235 }
0x1770   :  { %v8771_v27 = vmul.f32 %v7236_v25, %v3117_v23 }
0x1772   :  { %3131 = vrot.lane.b32.xlu0 %v8771_v27, %s7495_s27 }
0x17e4   :  { %v3132_v41 = vpop.permute.xlu0 %3131 }
0x17e5   :  { %5921 = vmatmul.mubr.msk.f32.vlgmr.msra.gmra.mrb[40].mxu1 %vm373_vm10, %v3132_v41 }
0x17e6   :  { %6730 = vmatpush1.bf16.msra.mxu1 %v8421_v62  ;;  %3411 = vmatprep.mubr.f32.mxu1 %v7496_v11 }
0x17e7   :  { %6732 = vmatprep.subr.bf16.mxu1 %v8445_v15 }
0x17ea   :  { %6734 = vmatpush1.bf16.msra.mxu1 %v8450_v17 }
0x17eb   :  { %6736 = vmatprep.subr.bf16.mxu1 %v8472_v22 }
0x17ee   :  { %6738 = vmatpush1.bf16.msra.mxu1 %v8480_v24 }
0x17ef   :  { %6740 = vmatprep.subr.bf16.mxu1 %v8503_v36 }
0x17f2   :  { %6742 = vmatpush1.bf16.msra.mxu1 %v8511_v40 }
0x17f3   :  { %6760 = vmatprep.subr.bf16.mxu1 %v8408_v59 }
0x18b8   :  { %v3201_v31 = vpop.f32.mrb[40].mxu1 }
0x18b9   :  { %v3208_v33 = vrot.slane %v3201_v31, 6  ;;  %v3203_v34 = vpop.f32.mrb[41].mxu1 }
0x18ba   :  { %v3209_v29 = vrot.slane %v3203_v34, 6 }
0x18bb   :  { %v3212_v35 = vadd.f32 %v3208_v33, %v8762_v61 }
0x18bc   :  { %v3213_v32 = vadd.f32 %v3209_v29, %v8767_v10 }
0x18bd   :  { %v3214_v30 = vmul.f32 0.5, %v3212_v35 }
0x18be   :  { %v3219_v47 = vmul.f32 0.5, %v3213_v32 }
0x18bf   :  { %7237 = vtanh.f32 %v3214_v30 }
0x18c0   :  { %7239 = vtanh.f32 %v3213_v32 }
0x18c1   :  { %7241 = vtanh.f32 %v3219_v47 }
0x18c9   :  { %v7238_v54 = vpop.eup %7237 }
0x18ca   :  { %v3216_v28 = vmul.f32 0.5, %v7238_v54  ;;  %v7240_v16 = vpop.eup %7239 }
0x18cb   :  { %v7242_v1 = vpop.eup %7241 }
0x18cc   :  { %v3217_v43 = vadd.f32 0.5, %v3216_v28  ;;  %v3221_v48 = vmul.f32 0.5, %v7242_v1 }
0x18ce   :  { %v3227_v42 = vmul.f32 %v7240_v16, %v3217_v43  ;;  %v3226_v44 = vmul.f32 %v3224_v37, %v3217_v43  ;;  %v3222_v51 = vadd.f32 0.5, %v3221_v48 }
0x18d0   :  { %3229 = vrot.lane.b32.xlu1 %v3227_v42, %s7495_s27 }
0x1942   :  { %v3230_v49 = vpop.permute.xlu1 %3229 }
0x1943   :  { %v3232_v57 = vadd.f32 %v3230_v49, %v3226_v44 }
0x1945   :  { %7243 = vtanh.f32 %v3232_v57  ;;  %v3330_v56 = vrot.slane %v3232_v57, 6 }
0x194f   :  { %v7244_v50 = vpop.eup %7243 }
0x1950   :  { %v3234_v52 = vmul.f32 %v7244_v50, %v3222_v51 }
0x1952   :  { %v3236_v53 = vrot.slane %v3234_v52, 2  ;;  %v3870_v35 = vsel %vm73_vm0, %v8771_v27, %v3234_v52 }
0x1954   :  { %3237 = vrot.lane.b32.xlu0 %v3236_v53, %s7495_s27 }
0x19c6   :  { %v3238_v0 = vpop.permute.xlu0 %3237 }
0x19c7   :  { %5922 = vmatmul.mubr.msk.f32.vlgmr.msra.gmra.mrb[42].mxu0 %vm373_vm10, %v3238_v0 }
0x19c8   :  { %6746 = vmatpush1.bf16.msra.mxu0 %v8421_v62  ;;  %3517 = vmatprep.mubr.f32.mxu0 %v7496_v11 }
0x19c9   :  { %6748 = vmatprep.subr.bf16.mxu0 %v8445_v15 }
0x19cc   :  { %6750 = vmatpush1.bf16.msra.mxu0 %v8450_v17 }
0x19cd   :  { %6752 = vmatprep.subr.bf16.mxu0 %v8472_v22 }
0x19d0   :  { %6754 = vmatpush1.bf16.msra.mxu0 %v8480_v24 }
0x19d1   :  { %6756 = vmatprep.subr.bf16.mxu0 %v8503_v36 }
0x19d4   :  { %6758 = vmatpush1.bf16.msra.mxu0 %v8511_v40 }
0x19d5   :  { %6776 = vmatprep.subr.bf16.mxu0 %v8408_v59 }
0x1a9a   :  { %v3307_v45 = vpop.f32.mrb[42].mxu0 }
0x1a9b   :  { %v3314_v7 = vrot.slane %v3307_v45, 4  ;;  %v3309_v14 = vpop.f32.mrb[43].mxu0 }
0x1a9c   :  { %v3315_v55 = vrot.slane %v3309_v14, 4 }
0x1a9d   :  { %v3318_v18 = vadd.f32 %v3314_v7, %v8762_v61 }
0x1a9e   :  { %v3319_v39 = vadd.f32 %v3315_v55, %v8767_v10  ;;  %v8834_v55 = vadd.f32 %v8634_v2, %v8570_v12 }
0x1a9f   :  { %v3320_v6 = vmul.f32 0.5, %v3318_v18 }
0x1aa0   :  { %v3325_v58 = vmul.f32 0.5, %v3319_v39 }
0x1aa1   :  { %7245 = vtanh.f32 %v3320_v6 }
0x1aa2   :  { %7247 = vtanh.f32 %v3319_v39 }
0x1aa3   :  { %7249 = vtanh.f32 %v3325_v58 }
0x1aab   :  { %v7246_v5 = vpop.eup %7245 }
0x1aac   :  { %v3322_v4 = vmul.f32 0.5, %v7246_v5  ;;  %v7248_v21 = vpop.eup %7247 }
0x1aad   :  { %v7250_v25 = vpop.eup %7249 }
0x1aae   :  { %v3323_v19 = vadd.f32 0.5, %v3322_v4  ;;  %v3327_v41 = vmul.f32 0.5, %v7250_v25  ;;  %v8839_v4 = vadd.f32 %v8636_v60, %v8574_v13 }
0x1ab0   :  { %v3333_v20 = vmul.f32 %v7248_v21, %v3323_v19  ;;  %v3332_v38 = vmul.f32 %v3330_v56, %v3323_v19  ;;  %v3328_v31 = vadd.f32 0.5, %v3327_v41 }
0x1ab2   :  { %3335 = vrot.lane.b32.xlu1 %v3333_v20, %s7495_s27 }
0x1b24   :  { %v3336_v9 = vpop.permute.xlu1 %3335 }
0x1b25   :  { %v3338_v23 = vadd.f32 %v3336_v9, %v3332_v38 }
0x1b27   :  { %7251 = vtanh.f32 %v3338_v23  ;;  %v3436_v49 = vrot.slane %v3338_v23, 6 }
0x1b31   :  { %v7252_v33 = vpop.eup %7251 }
0x1b32   :  { %v3340_v34 = vmul.f32 %v7252_v33, %v3328_v31 }
0x1b34   :  { %v3342_v29 = vrot.slane %v3340_v34, 4  ;;  %v3871_v30 = vsel %vm120_vm4, %v3870_v35, %v3340_v34 }
0x1b36   :  { %3343 = vrot.lane.b32.xlu0 %v3342_v29, %s7495_s27 }
0x1ba8   :  { %v3344_v32 = vpop.permute.xlu0 %3343 }
0x1ba9   :  { %5923 = vmatmul.mubr.msk.f32.vlgmr.msra.gmra.mrb[42].mxu1 %vm373_vm10, %v3344_v32 }
0x1baa   :  { %6762 = vmatpush1.bf16.msra.mxu1 %v8421_v62  ;;  %3616 = vmatprep.mubr.f32.mxu1 %v7496_v11 }
0x1bab   :  { %6764 = vmatprep.subr.bf16.mxu1 %v8445_v15 }
0x1bae   :  { %6766 = vmatpush1.bf16.msra.mxu1 %v8450_v17 }
0x1baf   :  { %6768 = vmatprep.subr.bf16.mxu1 %v8472_v22 }
0x1bb2   :  { %6770 = vmatpush1.bf16.msra.mxu1 %v8480_v24 }
0x1bb3   :  { %6772 = vmatprep.subr.bf16.mxu1 %v8503_v36 }
0x1bb6   :  { %6774 = vmatpush1.bf16.msra.mxu1 %v8511_v40 }
0x1bb7   :  { %6792 = vmatprep.subr.bf16.mxu1 %v8408_v59 }
0x1c7c   :  { %v3413_v27 = vpop.f32.mrb[42].mxu1 }
0x1c7d   :  { %v3420_v54 = vrot.slane %v3413_v27, 2  ;;  %v3415_v28 = vpop.f32.mrb[43].mxu1 }
0x1c7e   :  { %v3421_v43 = vrot.slane %v3415_v28, 2 }
0x1c7f   :  { %v3424_v37 = vadd.f32 %v3420_v54, %v8762_v61 }
0x1c80   :  { %v3425_v42 = vadd.f32 %v3421_v43, %v8767_v10 }
0x1c81   :  { %v3426_v16 = vmul.f32 0.5, %v3424_v37 }
0x1c82   :  { %v3431_v59 = vmul.f32 0.5, %v3425_v42 }
0x1c83   :  { %7253 = vtanh.f32 %v3426_v16 }
0x1c84   :  { %7255 = vtanh.f32 %v3425_v42 }
0x1c85   :  { %7257 = vtanh.f32 %v3431_v59 }
0x1c8d   :  { %v7254_v44 = vpop.eup %7253 }
0x1c8e   :  { %v3428_v47 = vmul.f32 0.5, %v7254_v44  ;;  %v7256_v1 = vpop.eup %7255 }
0x1c8f   :  { %v7258_v61 = vpop.eup %7257 }
0x1c90   :  { %v3429_v57 = vadd.f32 0.5, %v3428_v47  ;;  %v3433_v53 = vmul.f32 0.5, %v7258_v61 }
0x1c92   :  { %v3439_v48 = vmul.f32 %v7256_v1, %v3429_v57  ;;  %v3438_v51 = vmul.f32 %v3436_v49, %v3429_v57  ;;  %v3434_v0 = vadd.f32 0.5, %v3433_v53 }
0x1c94   :  { %3441 = vrot.lane.b32.xlu1 %v3439_v48, %s7495_s27 }
0x1d06   :  { %v3442_v50 = vpop.permute.xlu1 %3441 }
0x1d07   :  { %v3444_v52 = vadd.f32 %v3442_v50, %v3438_v51 }
0x1d09   :  { %7259 = vtanh.f32 %v3444_v52  ;;  %v3536_v38 = vrot.slane %v3444_v52, 6 }
0x1d13   :  { %v7260_v45 = vpop.eup %7259 }
0x1d14   :  { %v3446_v10 = vmul.f32 %v7260_v45, %v3434_v0 }
0x1d16   :  { %v3448_v7 = vrot.slane %v3446_v10, 6  ;;  %v8820_v14 = vsel %vm96_vm1, %v3871_v30, %v3446_v10 }
0x1d18   :  { %3449 = vrot.lane.b32.xlu0 %v3448_v7, %s7495_s27 }
0x1d8a   :  { %v3450_v18 = vpop.permute.xlu0 %3449 }
0x1d8b   :  { %5924 = vmatmul.mubr.msk.f32.vlgmr.msra.gmra.mrb[44].mxu0 %vm373_vm10, %v3450_v18 }
0x1d8c   :  { %6778 = vmatpush1.bf16.msra.mxu0 %v8421_v62  ;;  %3722 = vmatprep.mubr.f32.mxu0 %v7496_v11 }
0x1d8d   :  { %6780 = vmatprep.subr.bf16.mxu0 %v8445_v15 }
0x1d90   :  { %6782 = vmatpush1.bf16.msra.mxu0 %v8450_v17 }
0x1d91   :  { %6784 = vmatprep.subr.bf16.mxu0 %v8472_v22 }
0x1d94   :  { %6786 = vmatpush1.bf16.msra.mxu0 %v8480_v24 }
0x1d95   :  { %6788 = vmatprep.subr.bf16.mxu0 %v8503_v36 }
0x1d98   :  { %6790 = vmatpush1.bf16.msra.mxu0 %v8511_v40 }
0x1e5e   :  { %v3519_v6 = vpop.f32.mrb[44].mxu0 }
0x1e5f   :  { %v3524_v39 = vadd.f32 %v3519_v6, %v8834_v55  ;;  %v3521_v5 = vpop.f32.mrb[45].mxu0 }
0x1e60   :  { %v3525_v19 = vadd.f32 %v3521_v5, %v8839_v4 }
0x1e61   :  { %v3526_v56 = vmul.f32 0.5, %v3524_v39 }
0x1e62   :  { %v3531_v23 = vmul.f32 0.5, %v3525_v19 }
0x1e63   :  { %7261 = vtanh.f32 %v3526_v56 }
0x1e64   :  { %7263 = vtanh.f32 %v3525_v19  ;;  %v3877_v19 = vld [vmem:[%s9374_s12 + $0x8] sm:$0xff] }
0x1e65   :  { %7265 = vtanh.f32 %v3531_v23 }
0x1e6d   :  { %v7262_v21 = vpop.eup %7261 }
0x1e6e   :  { %v3528_v20 = vmul.f32 0.5, %v7262_v21  ;;  %v7264_v9 = vpop.eup %7263  ;;  %v3879_v21 = vld [vmem:[%s9374_s12 + $0x18] sm:$0xff] }
0x1e6f   :  { %v7266_v13 = vpop.eup %7265 }
0x1e70   :  { %v3529_v58 = vadd.f32 0.5, %v3528_v20  ;;  %v3533_v60 = vmul.f32 0.5, %v7266_v13  ;;  %v3876_v20 = vld [vmem:[%s9374_s12] sm:$0xff]  ;;  %v3885_v13 = vld [vmem:[%s9374_s12 + $0x48] sm:$0xff] }
0x1e72   :  { %v3539_v12 = vmul.f32 %v7264_v9, %v3529_v58  ;;  %v3538_v2 = vmul.f32 %v3536_v38, %v3529_v58  ;;  %v3534_v31 = vadd.f32 0.5, %v3533_v60  ;;  %v6807_v38 = vpack.c.bf16 %v3879_v21, %v3877_v19  ;;  %v3878_v58 = vld [vmem:[%s9374_s12 + $0x10] sm:$0xff]  ;;  %v3881_v9 = vld [vmem:[%s9374_s12 + $0x28] sm:$0xff]  ;;  %v3887_v60 = vld [vmem:[%s9374_s12 + $0x58] sm:$0xff] }
0x1e73   :  { %v4018_v19 = vld [vmem:[%s9375_s13 + $0x28] sm:$0xff]  ;;  %v4020_v21 = vld [vmem:[%s9375_s13 + $0x38] sm:$0xff] }
0x1e74   :  { %3541 = vrot.lane.b32.xlu1 %v3539_v12, %s7495_s27  ;;  %v3883_v12 = vld [vmem:[%s9374_s12 + $0x38] sm:$0xff]  ;;  %6808 = vmatprep.subr.bf16.mxu0 %v6807_v38  ;;  %v8958_v38 = vpack.c.bf16 %v4020_v21, %v4018_v19 }
0x1e75   :  { %v6811_v23 = vpack.c.bf16 %v3883_v12, %v3881_v9  ;;  %v4019_v9 = vld [vmem:[%s9375_s13 + $0x30] sm:$0xff]  ;;  %v4022_v12 = vld [vmem:[%s9375_s13 + $0x48] sm:$0xff] }
0x1ee6   :  { %v3542_v25 = vpop.permute.xlu1 %3541 }
0x1ee7   :  { %v3544_v41 = vadd.f32 %v3542_v25, %v3538_v2  ;;  %v6809_v2 = vpack.c.bf16 %v3878_v58, %v3876_v20  ;;  %v3880_v25 = vld [vmem:[%s9374_s12 + $0x20] sm:$0xff] }
0x1ee8   :  { %v4017_v58 = vld [vmem:[%s9375_s13 + $0x20] sm:$0xff] }
0x1ee9   :  { %7267 = vtanh.f32 %v3544_v41 }
0x1ef3   :  { %v7268_v33 = vpop.eup %7267 }
0x1ef4   :  { %v8843_v34 = vmul.f32 %v7268_v33, %v3534_v31  ;;  %v6815_v33 = vpack.c.bf16 %v3887_v60, %v3885_v13  ;;  %v4023_v13 = vld [vmem:[%s9375_s13 + $0x50] sm:$0xff]  ;;  %v4026_v60 = vld [vmem:[%s9375_s13 + $0x68] sm:$0xff] }
0x1ef6   :  { %3548 = vrot.lane.b32.xlu0 %v8843_v34, %s7495_s27 }
0x1f68   :  { %v3549_v35 = vpop.permute.xlu0 %3548 }
0x1f69   :  { %5925 = vmatmul.mubr.msk.f32.vlgmr.msra.gmra.mrb[44].mxu1 %vm373_vm10, %v3549_v35  ;;  %v3884_v35 = vld [vmem:[%s9374_s12 + $0x40] sm:$0xff] }
0x1f6a   :  { %6794 = vmatpush1.bf16.msra.mxu1 %v8421_v62  ;;  %3828 = vmatprep.mubr.f32.mxu1 %v7496_v11 }
0x1f6b   :  { %6796 = vmatprep.subr.bf16.mxu1 %v8445_v15 }
0x1f6e   :  { %6798 = vmatpush1.bf16.msra.mxu1 %v8450_v17 }
0x1f6f   :  { %6800 = vmatprep.subr.bf16.mxu1 %v8472_v22  ;;  %v3641_v22 = vrot.slane %v3544_v41, 6  ;;  %v3882_v41 = vld [vmem:[%s9374_s12 + $0x30] sm:$0xff] }
0x1f70   :  { %v6813_v31 = vpack.c.bf16 %v3882_v41, %v3880_v25  ;;  %v4021_v41 = vld [vmem:[%s9375_s13 + $0x40] sm:$0xff] }
0x1f72   :  { %6802 = vmatpush1.bf16.msra.mxu1 %v8480_v24 }
0x1f73   :  { %6804 = vmatprep.subr.bf16.mxu1 %v8503_v36 }
0x1f76   :  { %6806 = vmatpush1.bf16.msra.mxu1 %v8511_v40 }
0x203c   :  { %v3618_v29 = vpop.f32.mrb[44].mxu1 }
0x203d   :  { %v3625_v30 = vrot.slane %v3618_v29, 6  ;;  %v3620_v32 = vpop.f32.mrb[45].mxu1  ;;  %v3886_v29 = vld [vmem:[%s9374_s12 + $0x50] sm:$0xff] }
0x203e   :  { %v3626_v62 = vrot.slane %v3620_v32, 6 }
0x203f   :  { %v3629_v27 = vadd.f32 %v3625_v30, %v8834_v55  ;;  %v6817_v30 = vpack.c.bf16 %v3886_v29, %v3884_v35  ;;  %v4025_v29 = vld [vmem:[%s9375_s13 + $0x60] sm:$0xff] }
0x2040   :  { %v3630_v15 = vadd.f32 %v3626_v62, %v8839_v4 }
0x2041   :  { %v3631_v54 = vmul.f32 0.5, %v3629_v27 }
0x2042   :  { %v3636_v40 = vmul.f32 0.5, %v3630_v15 }
0x2043   :  { %7269 = vtanh.f32 %v3631_v54 }
0x2044   :  { %7271 = vtanh.f32 %v3630_v15  ;;  %v3889_v15 = vld [vmem:[%s9374_s12 + $0x68] sm:$0xff] }
0x2045   :  { %7273 = vtanh.f32 %v3636_v40 }
0x204d   :  { %v7270_v17 = vpop.eup %7269 }
0x204e   :  { %v3633_v28 = vmul.f32 0.5, %v7270_v17  ;;  %v7272_v24 = vpop.eup %7271  ;;  %v3891_v17 = vld [vmem:[%s9374_s12 + $0x78] sm:$0xff] }
0x204f   :  { %v7274_v44 = vpop.eup %7273 }
0x2050   :  { %v3634_v37 = vadd.f32 0.5, %v3633_v28  ;;  %v3638_v47 = vmul.f32 0.5, %v7274_v44  ;;  %v3888_v28 = vld [vmem:[%s9374_s12 + $0x60] sm:$0xff] }
0x2052   :  { %v3644_v43 = vmul.f32 %v7272_v24, %v3634_v37  ;;  %v3643_v36 = vmul.f32 %v3641_v22, %v3634_v37  ;;  %v3639_v49 = vadd.f32 0.5, %v3638_v47  ;;  %v6819_v22 = vpack.c.bf16 %v3891_v17, %v3889_v15  ;;  %v3890_v37 = vld [vmem:[%s9374_s12 + $0x70] sm:$0xff] }
0x2053   :  { %v6821_v24 = vpack.c.bf16 %v3890_v37, %v3888_v28 }
0x2054   :  { %3646 = vrot.lane.b32.xlu1 %v3644_v43, %s7495_s27 }
0x20c6   :  { %v3647_v16 = vpop.permute.xlu1 %3646 }
0x20c7   :  { %v3649_v42 = vadd.f32 %v3647_v16, %v3643_v36 }
0x20c9   :  { %7275 = vtanh.f32 %v3649_v42  ;;  %v3747_v18 = vrot.slane %v3649_v42, 6 }
0x20d3   :  { %v7276_v57 = vpop.eup %7275 }
0x20d4   :  { %v8859_v1 = vmul.f32 %v7276_v57, %v3639_v49 }
0x20d6   :  { %v3653_v48 = vrot.slane %v8859_v1, 2  ;;  %v3873_v42 = vsel %vm73_vm0, %v8843_v34, %v8859_v1  ;;  %vm7501_vm0 = vmmov 0  }
0x20d8   :  { %3654 = vrot.lane.b32.xlu0 %v3653_v48, %s7495_s27 }
0x214a   :  { %v3655_v51 = vpop.permute.xlu0 %3654 }
0x214b   :  { %5926 = vmatmul.mubr.msk.f32.vlgmr.msra.gmra.mrb[46].mxu0 %vm373_vm10, %v3655_v51 }
0x214c   :  { %3988 = vmatprep.mubr.f32.mxu0 %v7496_v11  ;;  %6810 = vmatpush1.bf16.msra.mxu0 %v6809_v2  ;;  %v4024_v2 = vld [vmem:[%s9375_s13 + $0x58] sm:$0xff] }
0x214d   :  { %6812 = vmatprep.subr.bf16.mxu0 %v6811_v23  ;;  %v8975_v23 = vpack.c.bf16 %v4019_v9, %v4017_v58  ;;  %v8979_v25 = vpack.c.bf16 %v4024_v2, %v4022_v12 }
0x2150   :  { %6814 = vmatpush1.bf16.msra.mxu0 %v6813_v31  ;;  %v4028_v31 = vld [vmem:[%s9375_s13 + $0x78] sm:$0xff] }
0x2151   :  { %6816 = vmatprep.subr.bf16.mxu0 %v6815_v33  ;;  %v8995_v33 = vpack.c.bf16 %v4023_v13, %v4021_v41  ;;  %v8999_v35 = vpack.c.bf16 %v4028_v31, %v4026_v60 }
0x2154   :  { %6818 = vmatpush1.bf16.msra.mxu0 %v6817_v30  ;;  %v4027_v30 = vld [vmem:[%s9375_s13 + $0x70] sm:$0xff] }
0x2155   :  { %6820 = vmatprep.subr.bf16.mxu0 %v6819_v22 }
0x2158   :  { %6822 = vmatpush1.bf16.msra.mxu0 %v6821_v24 }
0x221e   :  { %v3724_v59 = vpop.f32.mrb[46].mxu0 }
0x221f   :  { %v3731_v50 = vrot.slane %v3724_v59, 4  ;;  %v3726_v52 = vpop.f32.mrb[47].mxu0 }
0x2220   :  { %v3732_v53 = vrot.slane %v3726_v52, 4 }
0x2221   :  { %v3735_v61 = vadd.f32 %v3731_v50, %v8834_v55 }
0x2222   :  { %v3736_v45 = vadd.f32 %v3732_v53, %v8839_v4 }
0x2223   :  { %v3737_v0 = vmul.f32 0.5, %v3735_v61 }
0x2224   :  { %v3742_v32 = vmul.f32 0.5, %v3736_v45 }
0x2225   :  { %7277 = vtanh.f32 %v3737_v0 }
0x2226   :  { %7279 = vtanh.f32 %v3736_v45 }
0x2227   :  { %7281 = vtanh.f32 %v3742_v32  ;;  %v9009_v32 = vpack.c.bf16 %v4027_v30, %v4025_v29 }
0x222f   :  { %v7278_v10 = vpop.eup %7277 }
0x2230   :  { %v3739_v7 = vmul.f32 0.5, %v7278_v10  ;;  %v7280_v39 = vpop.eup %7279 }
0x2231   :  { %v7282_v54 = vpop.eup %7281 }
0x2232   :  { %v3740_v6 = vadd.f32 0.5, %v3739_v7  ;;  %v3744_v43 = vmul.f32 0.5, %v7282_v54 }
0x2234   :  { %v3750_v5 = vmul.f32 %v7280_v39, %v3740_v6  ;;  %v3749_v56 = vmul.f32 %v3747_v18, %v3740_v6  ;;  %v3745_v36 = vadd.f32 0.5, %v3744_v43  ;;  %v4016_v39 = vld [vmem:[%s9375_s13 + $0x18] sm:$0xff] }
0x2236   :  { %3752 = vrot.lane.b32.xlu1 %v3750_v5, %s7495_s27 }
0x22a8   :  { %v3753_v27 = vpop.permute.xlu1 %3752 }
0x22a9   :  { %v3755_v62 = vadd.f32 %v3753_v27, %v3749_v56  ;;  %v4015_v56 = vld [vmem:[%s9375_s13 + $0x10] sm:$0xff] }
0x22ab   :  { %7283 = vtanh.f32 %v3755_v62  ;;  %v3853_v45 = vrot.slane %v3755_v62, 6 }
0x22b5   :  { %v7284_v40 = vpop.eup %7283 }
0x22b6   :  { %v3757_v16 = vmul.f32 %v7284_v40, %v3745_v36 }
0x22b8   :  { %v3759_v44 = vrot.slane %v3757_v16, 4  ;;  %v8920_v47 = vsel %vm120_vm4, %v3873_v42, %v3757_v16  ;;  %vm5799_vm4 = vcmask 523270  }
0x22ba   :  { %3760 = vrot.lane.b32.xlu0 %v3759_v44, %s7495_s27 }
0x22be   :  { %3908 = vrot.lane.b32.xlu0 %v8674_v46, %s7495_s27 }
0x232c   :  { %v3761_v49 = vpop.permute.xlu0 %3760 }
0x232d   :  { %5927 = vmatmul.mubr.msk.f32.vlgmr.msra.gmra.mrb[46].mxu1 %vm373_vm10, %v3761_v49 }
0x232e   :  { %4099 = vmatprep.mubr.f32.mxu1 %v7496_v11 }
0x2330   :  { %v3909_v57 = vpop.permute.xlu0 %3908 }
0x2331   :  { %5928 = vmatmul.mubr.msk.f32.vlgmr.msra.gmra.mrb[48].mxu0 %vm373_vm10, %v3909_v57 }
0x2332   :  { %3994 = vmatprep.mubr.f32.mxu0 %v7496_v11 }
0x2400   :  { %v3830_v34 = vpop.f32.mrb[46].mxu1 }
0x2401   :  { %v3837_v1 = vrot.slane %v3830_v34, 2  ;;  %v3832_v48 = vpop.f32.mrb[47].mxu1 }
0x2402   :  { %v3838_v59 = vrot.slane %v3832_v48, 2 }
0x2403   :  { %v3841_v51 = vadd.f32 %v3837_v1, %v8834_v55  ;;  %v4014_v55 = vld [vmem:[%s9375_s13 + $0x8] sm:$0xff] }
0x2404   :  { %v8930_v50 = vpop.f32.mrb[48].mxu0  ;;  %v3842_v61 = vadd.f32 %v3838_v59, %v8839_v4  ;;  %v4013_v4 = vld [vmem:[%s9375_s13] sm:$0xff]  ;;  %v8945_v5 = vpack.c.bf16 %v4016_v39, %v4014_v55 }
0x2405   :  { %v3843_v52 = vmul.f32 0.5, %v3841_v51  ;;  %v8932_v46 = vpop.f32.mrb[49].mxu0  ;;  %v8956_v20 = vpack.c.bf16 %v4015_v56, %v4013_v4 }
0x2406   :  { %6824 = vmatprep.subr.bf16.mxu1 %v8945_v5  ;;  %6840 = vmatprep.subr.bf16.mxu0 %v8945_v5  ;;  %v3848_v27 = vmul.f32 0.5, %v3842_v61 }
0x2407   :  { %7285 = vtanh.f32 %v3843_v52  ;;  %6826 = vmatpush1.bf16.msra.mxu1 %v8956_v20  ;;  %6842 = vmatpush1.bf16.msra.mxu0 %v8956_v20 }
0x2408   :  { %7287 = vtanh.f32 %v3842_v61  ;;  %6828 = vmatprep.subr.bf16.mxu1 %v8958_v38  ;;  %6844 = vmatprep.subr.bf16.mxu0 %v8958_v38 }
0x2409   :  { %7289 = vtanh.f32 %v3848_v27 }
0x240b   :  { %6830 = vmatpush1.bf16.msra.mxu1 %v8975_v23  ;;  %6846 = vmatpush1.bf16.msra.mxu0 %v8975_v23 }
0x240c   :  { %6832 = vmatprep.subr.bf16.mxu1 %v8979_v25  ;;  %6848 = vmatprep.subr.bf16.mxu0 %v8979_v25 }
0x240f   :  { %6834 = vmatpush1.bf16.msra.mxu1 %v8995_v33  ;;  %6850 = vmatpush1.bf16.msra.mxu0 %v8995_v33 }
0x2410   :  { %6836 = vmatprep.subr.bf16.mxu1 %v8999_v35  ;;  %6852 = vmatprep.subr.bf16.mxu0 %v8999_v35 }
0x2411   :  { %v7286_v53 = vpop.eup %7285 }
0x2412   :  { %v3845_v0 = vmul.f32 0.5, %v7286_v53  ;;  %v7288_v7 = vpop.eup %7287 }
0x2413   :  { %6838 = vmatpush1.bf16.msra.mxu1 %v9009_v32  ;;  %6854 = vmatpush1.bf16.msra.mxu0 %v9009_v32  ;;  %v7290_v15 = vpop.eup %7289 }
0x2414   :  { %v3846_v10 = vadd.f32 0.5, %v3845_v0  ;;  %6856 = vmatprep.subr.bf16.mxu1 %v8945_v5  ;;  %6872 = vmatprep.subr.bf16.mxu0 %v8945_v5  ;;  %v3850_v17 = vmul.f32 0.5, %v7290_v15 }
0x2416   :  { %v3856_v18 = vmul.f32 %v7288_v7, %v3846_v10  ;;  %v3855_v6 = vmul.f32 %v3853_v45, %v3846_v10  ;;  %v3851_v28 = vadd.f32 0.5, %v3850_v17 }
0x2418   :  { %3858 = vrot.lane.b32.xlu1 %v3856_v18, %s7495_s27 }
0x248a   :  { %v3859_v62 = vpop.permute.xlu1 %3858 }
0x248b   :  { %v3861_v54 = vadd.f32 %v3859_v62, %v3855_v6 }
0x248d   :  { %7291 = vtanh.f32 %v3861_v54  ;;  %v4118_v59 = vrot.slane %v3861_v54, 6 }
0x2497   :  { %v7292_v22 = vpop.eup %7291 }
0x2498   :  { %v3863_v37 = vmul.f32 %v7292_v22, %v3851_v28 }
0x249a   :  { %v4030_v24 = vrot.slane %v3863_v37, 6  ;;  %v3875_v43 = vsel %vm96_vm1, %v8920_v47, %v3863_v37  ;;  %vm5702_vm1 = vcmask 1040384  }
0x249c   :  { %4031 = vrot.lane.b32.xlu1 %v4030_v24, %s7495_s27 }
0x24a0   :  { %3910 = vrot.lane.b32.xlu1 %v8747_v26, %s7495_s27  ;;  %v3892_v26 = vld [vmem:[%s9376_s14] sm:$0x3] }
0x24a1   :  { %v9041_v16 = vrot.slane %v3892_v26, %v2071_v3  ;;  %v9049_v44 = vrot.slane %v3892_v26, %v2075_v8 }
0x24a3   :  { %v9045_v42 = vadd.f32 %v8930_v50, %v9041_v16  ;;  %v9054_v34 = vadd.f32 %v8932_v46, %v9049_v44 }
0x24a4   :  { %3914 = vrot.lane.b32.xlu1 %v3875_v43, %s7495_s27 }
0x250e   :  { %v4032_v36 = vpop.permute.xlu1 %4031 }
0x250f   :  { %5932 = vmatmul.mubr.msk.f32.vlgmr.msra.gmra.mrb[48].mxu1 %vm373_vm10, %v4032_v36 }
0x2510   :  { %6858 = vmatpush1.bf16.msra.mxu1 %v8956_v20  ;;  %4304 = vmatprep.mubr.f32.mxu1 %v7496_v11 }
0x2511   :  { %6860 = vmatprep.subr.bf16.mxu1 %v8958_v38 }
0x2512   :  { %v3911_v40 = vpop.permute.xlu1 %3910 }
0x2513   :  { %5929 = vmatmul.mubr.msk.f32.gmra.mrb[50].mxu0 %vm373_vm10, %v3911_v40 }
0x2514   :  { %4000 = vmatprep.mubr.f32.mxu0 %v7496_v11  ;;  %6862 = vmatpush1.bf16.msra.mxu1 %v8975_v23 }
0x2515   :  { %6864 = vmatprep.subr.bf16.mxu1 %v8979_v25 }
0x2516   :  { %v3915_v18 = vpop.permute.xlu1 %3914 }
0x2518   :  { %6866 = vmatpush1.bf16.msra.mxu1 %v8995_v33 }
0x2519   :  { %6868 = vmatprep.subr.bf16.mxu1 %v8999_v35 }
0x251c   :  { %6870 = vmatpush1.bf16.msra.mxu1 %v9009_v32 }
0x251d   :  { %6888 = vmatprep.subr.bf16.mxu1 %v8945_v5 }
0x25e2   :  { %v4101_v47 = vpop.f32.mrb[48].mxu1 }
0x25e3   :  { %v4106_v49 = vadd.f32 %v4101_v47, %v9045_v42  ;;  %v4103_v57 = vpop.f32.mrb[49].mxu1 }
0x25e4   :  { %v4107_v3 = vadd.f32 %v4103_v57, %v9054_v34 }
0x25e5   :  { %v4108_v1 = vmul.f32 0.5, %v4106_v49 }
0x25e6   :  { %v9056_v48 = vpop.f32.mrb[50].mxu0  ;;  %v4113_v46 = vmul.f32 0.5, %v4107_v3 }
0x25e7   :  { %7293 = vtanh.f32 %v4108_v1  ;;  %v9059_v51 = vpop.f32.mrb[51].mxu0 }
0x25e8   :  { %7295 = vtanh.f32 %v4107_v3 }
0x25e9   :  { %7297 = vtanh.f32 %v4113_v46 }
0x25f1   :  { %v7294_v63 = vpop.eup %7293 }
0x25f2   :  { %v4110_v8 = vmul.f32 0.5, %v7294_v63  ;;  %v7296_v52 = vpop.eup %7295 }
0x25f3   :  { %v7298_v7 = vpop.eup %7297 }
0x25f4   :  { %v4111_v50 = vadd.f32 0.5, %v4110_v8  ;;  %v4115_v6 = vmul.f32 0.5, %v7298_v7 }
0x25f6   :  { %v4121_v61 = vmul.f32 %v7296_v52, %v4111_v50  ;;  %v4120_v53 = vmul.f32 %v4118_v59, %v4111_v50  ;;  %v4116_v55 = vadd.f32 0.5, %v4115_v6 }
0x25f8   :  { %4123 = vrot.lane.b32.xlu0 %v4121_v61, %s7495_s27 }
0x25fc   :  { %3912 = vrot.lane.b32.xlu0 %v8820_v14, %s7495_s27 }
0x266a   :  { %v4124_v0 = vpop.permute.xlu0 %4123 }
0x266b   :  { %v4126_v45 = vadd.f32 %v4124_v0, %v4120_v53 }
0x266d   :  { %7299 = vtanh.f32 %v4126_v45  ;;  %v4223_v27 = vrot.slane %v4126_v45, 6 }
0x266e   :  { %v3913_v10 = vpop.permute.xlu0 %3912 }
0x266f   :  { %5930 = vmatmul.mubr.msk.f32.gmra.mrb[52].mxu0 %vm373_vm10, %v3913_v10 }
0x2670   :  { %4006 = vmatprep.mubr.f32.mxu0 %v7496_v11 }
0x2673   :  { %5931 = vmatmul.mubr.msk.f32.gmra.mrb[54].mxu0 %vm373_vm10, %v3915_v18 }
0x2674   :  { %4198 = vmatprep.mubr.f32.mxu0 %v7496_v11 }
0x2677   :  { %v7300_v39 = vpop.eup %7299 }
0x2678   :  { %v4128_v14 = vmul.f32 %v7300_v39, %v4116_v55 }
0x267a   :  { %4130 = vrot.lane.b32.xlu0 %v4128_v14, %s7495_s27 }
0x26ec   :  { %v4131_v4 = vpop.permute.xlu0 %4130 }
0x26ed   :  { %5933 = vmatmul.mubr.msk.f32.vlgmr.msra.gmra.mrb[56].mxu0 %vm373_vm10, %v4131_v4 }
0x26ee   :  { %6874 = vmatpush1.bf16.msra.mxu0 %v8956_v20  ;;  %4410 = vmatprep.mubr.f32.mxu0 %v7496_v11 }
0x26ef   :  { %6876 = vmatprep.subr.bf16.mxu0 %v8958_v38 }
0x26f2   :  { %6878 = vmatpush1.bf16.msra.mxu0 %v8975_v23 }
0x26f3   :  { %6880 = vmatprep.subr.bf16.mxu0 %v8979_v25 }
0x26f6   :  { %6882 = vmatpush1.bf16.msra.mxu0 %v8995_v33 }
0x26f7   :  { %6884 = vmatprep.subr.bf16.mxu0 %v8999_v35 }
0x26fa   :  { %6886 = vmatpush1.bf16.msra.mxu0 %v9009_v32 }
0x26fb   :  { %6904 = vmatprep.subr.bf16.mxu0 %v8945_v5 }
0x2742   :  { %v9079_v56 = vpop.f32.mrb[52].mxu0 }
0x2743   :  { %v9081_v19 = vpop.f32.mrb[53].mxu0 }
0x2746   :  { %v9083_v21 = vpop.f32.mrb[54].mxu0 }
0x2747   :  { %v9085_v58 = vpop.f32.mrb[55].mxu0 }
0x27c0   :  { %v4200_v9 = vpop.f32.mrb[56].mxu0 }
0x27c1   :  { %v4207_v12 = vrot.slane %v4200_v9, 6  ;;  %v4202_v2 = vpop.f32.mrb[57].mxu0 }
0x27c2   :  { %v4208_v13 = vrot.slane %v4202_v2, 6 }
0x27c3   :  { %v4211_v41 = vadd.f32 %v4207_v12, %v9045_v42 }
0x27c4   :  { %v4212_v31 = vadd.f32 %v4208_v13, %v9054_v34 }
0x27c5   :  { %v4213_v60 = vmul.f32 0.5, %v4211_v41 }
0x27c6   :  { %v4218_v28 = vmul.f32 0.5, %v4212_v31 }
0x27c7   :  { %7301 = vtanh.f32 %v4213_v60 }
0x27c8   :  { %7303 = vtanh.f32 %v4212_v31 }
0x27c9   :  { %7305 = vtanh.f32 %v4218_v28 }
0x27d1   :  { %v7302_v29 = vpop.eup %7301 }
0x27d2   :  { %v4215_v30 = vmul.f32 0.5, %v7302_v29  ;;  %v7304_v54 = vpop.eup %7303 }
0x27d3   :  { %v7306_v24 = vpop.eup %7305 }
0x27d4   :  { %v4216_v62 = vadd.f32 0.5, %v4215_v30  ;;  %v4220_v43 = vmul.f32 0.5, %v7306_v24 }
0x27d6   :  { %v4226_v15 = vmul.f32 %v7304_v54, %v4216_v62  ;;  %v4225_v17 = vmul.f32 %v4223_v27, %v4216_v62  ;;  %v4221_v36 = vadd.f32 0.5, %v4220_v43 }
0x27d8   :  { %4228 = vrot.lane.b32.xlu1 %v4226_v15, %s7495_s27 }
0x284a   :  { %v4229_v22 = vpop.permute.xlu1 %4228 }
0x284b   :  { %v4231_v37 = vadd.f32 %v4229_v22, %v4225_v17 }
0x284d   :  { %7307 = vtanh.f32 %v4231_v37  ;;  %v4329_v53 = vrot.slane %v4231_v37, 6 }
0x2857   :  { %v7308_v40 = vpop.eup %7307 }
0x2858   :  { %v4233_v26 = vmul.f32 %v7308_v40, %v4221_v36 }
0x285a   :  { %v4235_v47 = vrot.slane %v4233_v26, 2 }
0x285c   :  { %4236 = vrot.lane.b32.xlu0 %v4235_v47, %s7495_s27 }
0x28ce   :  { %v4237_v49 = vpop.permute.xlu0 %4236 }
0x28cf   :  { %5934 = vmatmul.mubr.msk.f32.vlgmr.msra.gmra.mrb[50].mxu1 %vm373_vm10, %v4237_v49 }
0x28d0   :  { %6890 = vmatpush1.bf16.msra.mxu1 %v8956_v20  ;;  %4516 = vmatprep.mubr.f32.mxu1 %v7496_v11 }
0x28d1   :  { %6892 = vmatprep.subr.bf16.mxu1 %v8958_v38 }
0x28d4   :  { %6894 = vmatpush1.bf16.msra.mxu1 %v8975_v23 }
0x28d5   :  { %6896 = vmatprep.subr.bf16.mxu1 %v8979_v25 }
0x28d8   :  { %6898 = vmatpush1.bf16.msra.mxu1 %v8995_v33 }
0x28d9   :  { %6900 = vmatprep.subr.bf16.mxu1 %v8999_v35 }
0x28dc   :  { %6902 = vmatpush1.bf16.msra.mxu1 %v9009_v32 }
0x28dd   :  { %6920 = vmatprep.subr.bf16.mxu1 %v8945_v5 }
0x29a2   :  { %v4306_v57 = vpop.f32.mrb[50].mxu1 }
0x29a3   :  { %v4313_v1 = vrot.slane %v4306_v57, 4  ;;  %v4308_v3 = vpop.f32.mrb[51].mxu1 }
0x29a4   :  { %v4314_v8 = vrot.slane %v4308_v3, 4 }
0x29a5   :  { %v4317_v63 = vadd.f32 %v4313_v1, %v9045_v42  ;;  %v9131_v1 = vadd.f32 %v9056_v48, %v9041_v16 }
0x29a6   :  { %v4318_v50 = vadd.f32 %v4314_v8, %v9054_v34 }
0x29a7   :  { %v4319_v59 = vmul.f32 0.5, %v4317_v63 }
0x29a8   :  { %v4324_v7 = vmul.f32 0.5, %v4318_v50 }
0x29a9   :  { %7309 = vtanh.f32 %v4319_v59  ;;  %v9136_v59 = vadd.f32 %v9059_v51, %v9049_v44 }
0x29aa   :  { %7311 = vtanh.f32 %v4318_v50 }
0x29ab   :  { %7313 = vtanh.f32 %v4324_v7 }
0x29b3   :  { %v7310_v52 = vpop.eup %7309 }
0x29b4   :  { %v4321_v61 = vmul.f32 0.5, %v7310_v52  ;;  %v7312_v0 = vpop.eup %7311 }
0x29b5   :  { %v7314_v55 = vpop.eup %7313 }
0x29b6   :  { %v4322_v46 = vadd.f32 0.5, %v4321_v61  ;;  %v4326_v39 = vmul.f32 0.5, %v7314_v55 }
0x29b8   :  { %v4332_v45 = vmul.f32 %v7312_v0, %v4322_v46  ;;  %v4331_v10 = vmul.f32 %v4329_v53, %v4322_v46  ;;  %v4327_v14 = vadd.f32 0.5, %v4326_v39 }
0x29ba   :  { %4334 = vrot.lane.b32.xlu1 %v4332_v45, %s7495_s27 }
0x2a2c   :  { %v4335_v18 = vpop.permute.xlu1 %4334 }
0x2a2d   :  { %v4337_v6 = vadd.f32 %v4335_v18, %v4331_v10 }
0x2a2f   :  { %7315 = vtanh.f32 %v4337_v6  ;;  %v4435_v15 = vrot.slane %v4337_v6, 6 }
0x2a39   :  { %v7316_v4 = vpop.eup %7315 }
0x2a3a   :  { %v4339_v9 = vmul.f32 %v7316_v4, %v4327_v14 }
0x2a3c   :  { %v4341_v12 = vrot.slane %v4339_v9, 4 }
0x2a3e   :  { %4342 = vrot.lane.b32.xlu0 %v4341_v12, %s7495_s27 }
0x2ab0   :  { %v4343_v2 = vpop.permute.xlu0 %4342 }
0x2ab1   :  { %5935 = vmatmul.mubr.msk.f32.vlgmr.msra.gmra.mrb[58].mxu0 %vm373_vm10, %v4343_v2 }
0x2ab2   :  { %6906 = vmatpush1.bf16.msra.mxu0 %v8956_v20  ;;  %4615 = vmatprep.mubr.f32.mxu0 %v7496_v11 }
0x2ab3   :  { %6908 = vmatprep.subr.bf16.mxu0 %v8958_v38 }
0x2ab6   :  { %6910 = vmatpush1.bf16.msra.mxu0 %v8975_v23 }
0x2ab7   :  { %6912 = vmatprep.subr.bf16.mxu0 %v8979_v25 }
0x2aba   :  { %6914 = vmatpush1.bf16.msra.mxu0 %v8995_v33 }
0x2abb   :  { %6916 = vmatprep.subr.bf16.mxu0 %v8999_v35 }
0x2abe   :  { %6918 = vmatpush1.bf16.msra.mxu0 %v9009_v32 }
0x2abf   :  { %6936 = vmatprep.subr.bf16.mxu0 %v8945_v5 }
0x2b84   :  { %v4412_v41 = vpop.f32.mrb[58].mxu0 }
0x2b85   :  { %v4419_v13 = vrot.slane %v4412_v41, 2  ;;  %v4414_v60 = vpop.f32.mrb[59].mxu0 }
0x2b86   :  { %v4420_v29 = vrot.slane %v4414_v60, 2 }
0x2b87   :  { %v4423_v31 = vadd.f32 %v4419_v13, %v9045_v42 }
0x2b88   :  { %v4424_v27 = vadd.f32 %v4420_v29, %v9054_v34 }
0x2b89   :  { %v4425_v30 = vmul.f32 0.5, %v4423_v31 }
0x2b8a   :  { %v4430_v24 = vmul.f32 0.5, %v4424_v27 }
0x2b8b   :  { %7317 = vtanh.f32 %v4425_v30 }
0x2b8c   :  { %7319 = vtanh.f32 %v4424_v27 }
0x2b8d   :  { %7321 = vtanh.f32 %v4430_v24 }
0x2b95   :  { %v7318_v62 = vpop.eup %7317 }
0x2b96   :  { %v4427_v54 = vmul.f32 0.5, %v7318_v62  ;;  %v7320_v28 = vpop.eup %7319 }
0x2b97   :  { %v7322_v42 = vpop.eup %7321 }
0x2b98   :  { %v4428_v17 = vadd.f32 0.5, %v4427_v54  ;;  %v4432_v40 = vmul.f32 0.5, %v7322_v42 }
0x2b9a   :  { %v4438_v22 = vmul.f32 %v7320_v28, %v4428_v17  ;;  %v4437_v37 = vmul.f32 %v4435_v15, %v4428_v17  ;;  %v4433_v26 = vadd.f32 0.5, %v4432_v40 }
0x2b9c   :  { %4440 = vrot.lane.b32.xlu1 %v4438_v22, %s7495_s27 }
0x2c0e   :  { %v4441_v43 = vpop.permute.xlu1 %4440 }
0x2c0f   :  { %v4443_v36 = vadd.f32 %v4441_v43, %v4437_v37 }
0x2c11   :  { %7323 = vtanh.f32 %v4443_v36  ;;  %v4535_v46 = vrot.slane %v4443_v36, 6 }
0x2c1b   :  { %v7324_v47 = vpop.eup %7323 }
0x2c1c   :  { %v4445_v34 = vmul.f32 %v7324_v47, %v4433_v26 }
0x2c1e   :  { %v4447_v49 = vrot.slane %v4445_v34, 6 }
0x2c20   :  { %4448 = vrot.lane.b32.xlu0 %v4447_v49, %s7495_s27 }
0x2c92   :  { %v4449_v57 = vpop.permute.xlu0 %4448 }
0x2c93   :  { %5936 = vmatmul.mubr.msk.f32.vlgmr.msra.gmra.mrb[52].mxu1 %vm373_vm10, %v4449_v57 }
0x2c94   :  { %6922 = vmatpush1.bf16.msra.mxu1 %v8956_v20  ;;  %4721 = vmatprep.mubr.f32.mxu1 %v7496_v11 }
0x2c95   :  { %6924 = vmatprep.subr.bf16.mxu1 %v8958_v38 }
0x2c98   :  { %6926 = vmatpush1.bf16.msra.mxu1 %v8975_v23 }
0x2c99   :  { %6928 = vmatprep.subr.bf16.mxu1 %v8979_v25 }
0x2c9c   :  { %6930 = vmatpush1.bf16.msra.mxu1 %v8995_v33 }
0x2c9d   :  { %6932 = vmatprep.subr.bf16.mxu1 %v8999_v35 }
0x2ca0   :  { %6934 = vmatpush1.bf16.msra.mxu1 %v9009_v32 }
0x2ca1   :  { %6952 = vmatprep.subr.bf16.mxu1 %v8945_v5 }
0x2d66   :  { %v4518_v3 = vpop.f32.mrb[52].mxu1 }
0x2d67   :  { %v4523_v63 = vadd.f32 %v4518_v3, %v9131_v1  ;;  %v4520_v8 = vpop.f32.mrb[53].mxu1 }
0x2d68   :  { %v4524_v52 = vadd.f32 %v4520_v8, %v9136_v59 }
0x2d69   :  { %v4525_v50 = vmul.f32 0.5, %v4523_v63 }
0x2d6a   :  { %v4530_v7 = vmul.f32 0.5, %v4524_v52 }
0x2d6b   :  { %7325 = vtanh.f32 %v4525_v50 }
0x2d6c   :  { %7327 = vtanh.f32 %v4524_v52 }
0x2d6d   :  { %7329 = vtanh.f32 %v4530_v7 }
0x2d75   :  { %v7326_v61 = vpop.eup %7325 }
0x2d76   :  { %v4527_v53 = vmul.f32 0.5, %v7326_v61  ;;  %v7328_v45 = vpop.eup %7327 }
0x2d77   :  { %v7330_v51 = vpop.eup %7329 }
0x2d78   :  { %v4528_v0 = vadd.f32 0.5, %v4527_v53  ;;  %v4532_v55 = vmul.f32 0.5, %v7330_v51 }
0x2d7a   :  { %v4538_v48 = vmul.f32 %v7328_v45, %v4528_v0  ;;  %v4537_v10 = vmul.f32 %v4535_v46, %v4528_v0  ;;  %v4533_v39 = vadd.f32 0.5, %v4532_v55 }
0x2d7c   :  { %4540 = vrot.lane.b32.xlu1 %v4538_v48, %s7495_s27 }
0x2dee   :  { %v4541_v18 = vpop.permute.xlu1 %4540 }
0x2def   :  { %v4543_v6 = vadd.f32 %v4541_v18, %v4537_v10 }
0x2df1   :  { %7331 = vtanh.f32 %v4543_v6  ;;  %v4640_v62 = vrot.slane %v4543_v6, 6 }
0x2dfb   :  { %v7332_v14 = vpop.eup %7331 }
0x2dfc   :  { %v4545_v4 = vmul.f32 %v7332_v14, %v4533_v39 }
0x2dfe   :  { %4547 = vrot.lane.b32.xlu0 %v4545_v4, %s7495_s27 }
0x2e70   :  { %v4548_v9 = vpop.permute.xlu0 %4547 }
0x2e71   :  { %5937 = vmatmul.mubr.msk.f32.vlgmr.msra.gmra.mrb[60].mxu0 %vm373_vm10, %v4548_v9 }
0x2e72   :  { %6938 = vmatpush1.bf16.msra.mxu0 %v8956_v20  ;;  %4827 = vmatprep.mubr.f32.mxu0 %v7496_v11 }
0x2e73   :  { %6940 = vmatprep.subr.bf16.mxu0 %v8958_v38 }
0x2e76   :  { %6942 = vmatpush1.bf16.msra.mxu0 %v8975_v23 }
0x2e77   :  { %6944 = vmatprep.subr.bf16.mxu0 %v8979_v25 }
0x2e7a   :  { %6946 = vmatpush1.bf16.msra.mxu0 %v8995_v33 }
0x2e7b   :  { %6948 = vmatprep.subr.bf16.mxu0 %v8999_v35 }
0x2e7e   :  { %6950 = vmatpush1.bf16.msra.mxu0 %v9009_v32 }
0x2e7f   :  { %6968 = vmatprep.subr.bf16.mxu0 %v8945_v5 }
0x2f44   :  { %v4617_v12 = vpop.f32.mrb[60].mxu0 }
0x2f45   :  { %v4624_v2 = vrot.slane %v4617_v12, 6  ;;  %v4619_v41 = vpop.f32.mrb[61].mxu0 }
0x2f46   :  { %v4625_v60 = vrot.slane %v4619_v41, 6 }
0x2f47   :  { %v4628_v13 = vadd.f32 %v4624_v2, %v9131_v1 }
0x2f48   :  { %v4629_v29 = vadd.f32 %v4625_v60, %v9136_v59 }
0x2f49   :  { %v4630_v31 = vmul.f32 0.5, %v4628_v13 }
0x2f4a   :  { %v4635_v22 = vmul.f32 0.5, %v4629_v29 }
0x2f4b   :  { %7333 = vtanh.f32 %v4630_v31 }
0x2f4c   :  { %7335 = vtanh.f32 %v4629_v29 }
0x2f4d   :  { %7337 = vtanh.f32 %v4635_v22 }
0x2f55   :  { %v7334_v30 = vpop.eup %7333 }
0x2f56   :  { %v4632_v27 = vmul.f32 0.5, %v7334_v30  ;;  %v7336_v15 = vpop.eup %7335 }
0x2f57   :  { %v7338_v43 = vpop.eup %7337 }
0x2f58   :  { %v4633_v54 = vadd.f32 0.5, %v4632_v27  ;;  %v4637_v36 = vmul.f32 0.5, %v7338_v43 }
0x2f5a   :  { %v4643_v17 = vmul.f32 %v7336_v15, %v4633_v54  ;;  %v4642_v28 = vmul.f32 %v4640_v62, %v4633_v54  ;;  %v4638_v42 = vadd.f32 0.5, %v4637_v36 }
0x2f5c   :  { %4645 = vrot.lane.b32.xlu1 %v4643_v17, %s7495_s27 }
0x2fce   :  { %v4646_v37 = vpop.permute.xlu1 %4645 }
0x2fcf   :  { %v4648_v24 = vadd.f32 %v4646_v37, %v4642_v28 }
0x2fd1   :  { %7339 = vtanh.f32 %v4648_v24  ;;  %v4746_v46 = vrot.slane %v4648_v24, 6 }
0x2fdb   :  { %v7340_v40 = vpop.eup %7339 }
0x2fdc   :  { %v4650_v26 = vmul.f32 %v7340_v40, %v4638_v42 }
0x2fde   :  { %v4652_v47 = vrot.slane %v4650_v26, 2 }
0x2fe0   :  { %4653 = vrot.lane.b32.xlu0 %v4652_v47, %s7495_s27 }
0x3052   :  { %v4654_v34 = vpop.permute.xlu0 %4653 }
0x3053   :  { %5938 = vmatmul.mubr.msk.f32.vlgmr.msra.gmra.mrb[54].mxu1 %vm373_vm10, %v4654_v34  ;;  %v9198_v34 = vadd.f32 %v9079_v56, %v9041_v16 }
0x3054   :  { %6954 = vmatpush1.bf16.msra.mxu1 %v8956_v20  ;;  %4933 = vmatprep.mubr.f32.mxu1 %v7496_v11 }
0x3055   :  { %6956 = vmatprep.subr.bf16.mxu1 %v8958_v38 }
0x3058   :  { %6958 = vmatpush1.bf16.msra.mxu1 %v8975_v23 }
0x3059   :  { %6960 = vmatprep.subr.bf16.mxu1 %v8979_v25 }
0x305c   :  { %6962 = vmatpush1.bf16.msra.mxu1 %v8995_v33 }
0x305d   :  { %6964 = vmatprep.subr.bf16.mxu1 %v8999_v35 }
0x3060   :  { %6966 = vmatpush1.bf16.msra.mxu1 %v9009_v32 }
0x3061   :  { %6984 = vmatprep.subr.bf16.mxu1 %v8945_v5 }
0x3126   :  { %v4723_v49 = vpop.f32.mrb[54].mxu1 }
0x3127   :  { %v4730_v57 = vrot.slane %v4723_v49, 4  ;;  %v4725_v3 = vpop.f32.mrb[55].mxu1 }
0x3128   :  { %v4731_v8 = vrot.slane %v4725_v3, 4 }
0x3129   :  { %v4734_v63 = vadd.f32 %v4730_v57, %v9131_v1 }
0x312a   :  { %v4735_v52 = vadd.f32 %v4731_v8, %v9136_v59 }
0x312b   :  { %v4736_v50 = vmul.f32 0.5, %v4734_v63  ;;  %v9203_v63 = vadd.f32 %v9081_v19, %v9049_v44 }
0x312c   :  { %v4741_v7 = vmul.f32 0.5, %v4735_v52 }
0x312d   :  { %7341 = vtanh.f32 %v4736_v50 }
0x312e   :  { %7343 = vtanh.f32 %v4735_v52 }
0x312f   :  { %7345 = vtanh.f32 %v4741_v7 }
0x3137   :  { %v7342_v61 = vpop.eup %7341 }
0x3138   :  { %v4738_v53 = vmul.f32 0.5, %v7342_v61  ;;  %v7344_v45 = vpop.eup %7343 }
0x3139   :  { %v7346_v51 = vpop.eup %7345 }
0x313a   :  { %v4739_v0 = vadd.f32 0.5, %v4738_v53  ;;  %v4743_v55 = vmul.f32 0.5, %v7346_v51 }
0x313c   :  { %v4749_v48 = vmul.f32 %v7344_v45, %v4739_v0  ;;  %v4748_v10 = vmul.f32 %v4746_v46, %v4739_v0  ;;  %v4744_v39 = vadd.f32 0.5, %v4743_v55 }
0x313e   :  { %4751 = vrot.lane.b32.xlu1 %v4749_v48, %s7495_s27 }
0x31b0   :  { %v4752_v18 = vpop.permute.xlu1 %4751 }
0x31b1   :  { %v4754_v6 = vadd.f32 %v4752_v18, %v4748_v10 }
0x31b3   :  { %7347 = vtanh.f32 %v4754_v6  ;;  %v4852_v54 = vrot.slane %v4754_v6, 6 }
0x31bd   :  { %v7348_v14 = vpop.eup %7347 }
0x31be   :  { %v4756_v4 = vmul.f32 %v7348_v14, %v4744_v39 }
0x31c0   :  { %v4758_v9 = vrot.slane %v4756_v4, 4 }
0x31c2   :  { %4759 = vrot.lane.b32.xlu0 %v4758_v9, %s7495_s27 }
0x3234   :  { %v4760_v12 = vpop.permute.xlu0 %4759 }
0x3235   :  { %5939 = vmatmul.mubr.msk.f32.vlgmr.msra.gmra.mrb[62].mxu0 %vm373_vm10, %v4760_v12 }
0x3236   :  { %6970 = vmatpush1.bf16.msra.mxu0 %v8956_v20  ;;  %5032 = vmatprep.mubr.f32.mxu0 %v7496_v11 }
0x3237   :  { %6972 = vmatprep.subr.bf16.mxu0 %v8958_v38 }
0x323a   :  { %6974 = vmatpush1.bf16.msra.mxu0 %v8975_v23 }
0x323b   :  { %6976 = vmatprep.subr.bf16.mxu0 %v8979_v25 }
0x323e   :  { %6978 = vmatpush1.bf16.msra.mxu0 %v8995_v33 }
0x323f   :  { %6980 = vmatprep.subr.bf16.mxu0 %v8999_v35 }
0x3242   :  { %6982 = vmatpush1.bf16.msra.mxu0 %v9009_v32 }
0x3243   :  { %7000 = vmatprep.subr.bf16.mxu0 %v8945_v5 }
0x3308   :  { %v4829_v2 = vpop.f32.mrb[62].mxu0 }
0x3309   :  { %v4836_v41 = vrot.slane %v4829_v2, 2  ;;  %v4831_v13 = vpop.f32.mrb[63].mxu0 }
0x330a   :  { %v4837_v31 = vrot.slane %v4831_v13, 2 }
0x330b   :  { %v4840_v60 = vadd.f32 %v4836_v41, %v9131_v1 }
0x330c   :  { %v4841_v30 = vadd.f32 %v4837_v31, %v9136_v59 }
0x330d   :  { %v4842_v29 = vmul.f32 0.5, %v4840_v60 }
0x330e   :  { %v4847_v37 = vmul.f32 0.5, %v4841_v30 }
0x330f   :  { %7349 = vtanh.f32 %v4842_v29 }
0x3310   :  { %7351 = vtanh.f32 %v4841_v30 }
0x3311   :  { %7353 = vtanh.f32 %v4847_v37 }
0x3319   :  { %v7350_v27 = vpop.eup %7349 }
0x331a   :  { %v4844_v62 = vmul.f32 0.5, %v7350_v27  ;;  %v7352_v17 = vpop.eup %7351 }
0x331b   :  { %v7354_v1 = vpop.eup %7353 }
0x331c   :  { %v4845_v15 = vadd.f32 0.5, %v4844_v62  ;;  %v4849_v36 = vmul.f32 0.5, %v7354_v1 }
0x331e   :  { %v4855_v28 = vmul.f32 %v7352_v17, %v4845_v15  ;;  %v4854_v22 = vmul.f32 %v4852_v54, %v4845_v15  ;;  %v4850_v42 = vadd.f32 0.5, %v4849_v36 }
0x3320   :  { %4857 = vrot.lane.b32.xlu1 %v4855_v28, %s7495_s27 }
0x3392   :  { %v4858_v24 = vpop.permute.xlu1 %4857 }
0x3393   :  { %v4860_v43 = vadd.f32 %v4858_v24, %v4854_v22 }
0x3395   :  { %7355 = vtanh.f32 %v4860_v43  ;;  %v4952_v53 = vrot.slane %v4860_v43, 6 }
0x339f   :  { %v7356_v40 = vpop.eup %7355 }
0x33a0   :  { %v9182_v59 = vmul.f32 %v7356_v40, %v4850_v42 }
0x33a2   :  { %v4864_v26 = vrot.slane %v9182_v59, 6 }
0x33a4   :  { %4865 = vrot.lane.b32.xlu0 %v4864_v26, %s7495_s27 }
0x3416   :  { %v4866_v47 = vpop.permute.xlu0 %4865 }
0x3417   :  { %5940 = vmatmul.mubr.msk.f32.vlgmr.msra.gmra.mrb[56].mxu1 %vm373_vm10, %v4866_v47 }
0x3418   :  { %6986 = vmatpush1.bf16.msra.mxu1 %v8956_v20  ;;  %5138 = vmatprep.mubr.f32.mxu1 %v7496_v11 }
0x3419   :  { %6988 = vmatprep.subr.bf16.mxu1 %v8958_v38 }
0x341c   :  { %6990 = vmatpush1.bf16.msra.mxu1 %v8975_v23 }
0x341d   :  { %6992 = vmatprep.subr.bf16.mxu1 %v8979_v25 }
0x3420   :  { %6994 = vmatpush1.bf16.msra.mxu1 %v8995_v33 }
0x3421   :  { %6996 = vmatprep.subr.bf16.mxu1 %v8999_v35 }
0x3424   :  { %6998 = vmatpush1.bf16.msra.mxu1 %v9009_v32 }
0x3425   :  { %7016 = vmatprep.subr.bf16.mxu1 %v8945_v5 }
0x34ea   :  { %v4935_v49 = vpop.f32.mrb[56].mxu1 }
0x34eb   :  { %v4940_v57 = vadd.f32 %v4935_v49, %v9198_v34  ;;  %v4937_v3 = vpop.f32.mrb[57].mxu1 }
0x34ec   :  { %v4941_v50 = vadd.f32 %v4937_v3, %v9203_v63 }
0x34ed   :  { %v4942_v8 = vmul.f32 0.5, %v4940_v57 }
0x34ee   :  { %v4947_v48 = vmul.f32 0.5, %v4941_v50 }
0x34ef   :  { %7357 = vtanh.f32 %v4942_v8 }
0x34f0   :  { %7359 = vtanh.f32 %v4941_v50 }
0x34f1   :  { %7361 = vtanh.f32 %v4947_v48 }
0x34f9   :  { %v7358_v52 = vpop.eup %7357 }
0x34fa   :  { %v4944_v61 = vmul.f32 0.5, %v7358_v52  ;;  %v7360_v0 = vpop.eup %7359 }
0x34fb   :  { %v7362_v19 = vpop.eup %7361 }
0x34fc   :  { %v4945_v46 = vadd.f32 0.5, %v4944_v61  ;;  %v4949_v18 = vmul.f32 0.5, %v7362_v19 }
0x34fe   :  { %v4955_v56 = vmul.f32 %v7360_v0, %v4945_v46  ;;  %v4954_v45 = vmul.f32 %v4952_v53, %v4945_v46  ;;  %v4950_v6 = vadd.f32 0.5, %v4949_v18 }
0x3500   :  { %4957 = vrot.lane.b32.xlu1 %v4955_v56, %s7495_s27 }
0x3572   :  { %v4958_v10 = vpop.permute.xlu1 %4957 }
0x3573   :  { %v4960_v7 = vadd.f32 %v4958_v10, %v4954_v45 }
0x3575   :  { %7363 = vtanh.f32 %v4960_v7  ;;  %v5057_v29 = vrot.slane %v4960_v7, 6 }
0x357f   :  { %v7364_v51 = vpop.eup %7363 }
0x3580   :  { %v4962_v55 = vmul.f32 %v7364_v51, %v4950_v6 }
0x3582   :  { %4964 = vrot.lane.b32.xlu0 %v4962_v55, %s7495_s27 }
0x35f4   :  { %v4965_v39 = vpop.permute.xlu0 %4964 }
0x35f5   :  { %5941 = vmatmul.mubr.msk.f32.vlgmr.msra.gmra.mrb[64].mxu0 %vm373_vm10, %v4965_v39 }
0x35f6   :  { %7002 = vmatpush1.bf16.msra.mxu0 %v8956_v20  ;;  %5244 = vmatprep.mubr.f32.mxu0 %v7496_v11 }
0x35f7   :  { %7004 = vmatprep.subr.bf16.mxu0 %v8958_v38 }
0x35fa   :  { %7006 = vmatpush1.bf16.msra.mxu0 %v8975_v23 }
0x35fb   :  { %7008 = vmatprep.subr.bf16.mxu0 %v8979_v25 }
0x35fe   :  { %7010 = vmatpush1.bf16.msra.mxu0 %v8995_v33 }
0x35ff   :  { %7012 = vmatprep.subr.bf16.mxu0 %v8999_v35 }
0x3602   :  { %7014 = vmatpush1.bf16.msra.mxu0 %v9009_v32 }
0x3603   :  { %7032 = vmatprep.subr.bf16.mxu0 %v8945_v5 }
0x36c8   :  { %v5034_v14 = vpop.f32.mrb[64].mxu0 }
0x36c9   :  { %v5041_v4 = vrot.slane %v5034_v14, 6  ;;  %v5036_v9 = vpop.f32.mrb[65].mxu0 }
0x36ca   :  { %v5042_v2 = vrot.slane %v5036_v9, 6 }
0x36cb   :  { %v5045_v12 = vadd.f32 %v5041_v4, %v9198_v34 }
0x36cc   :  { %v5046_v13 = vadd.f32 %v5042_v2, %v9203_v63 }
0x36cd   :  { %v5047_v41 = vmul.f32 0.5, %v5045_v12 }
0x36ce   :  { %v5052_v15 = vmul.f32 0.5, %v5046_v13 }
0x36cf   :  { %7365 = vtanh.f32 %v5047_v41 }
0x36d0   :  { %7367 = vtanh.f32 %v5046_v13 }
0x36d1   :  { %7369 = vtanh.f32 %v5052_v15 }
0x36d9   :  { %v7366_v60 = vpop.eup %7365 }
0x36da   :  { %v5049_v31 = vmul.f32 0.5, %v7366_v60  ;;  %v7368_v27 = vpop.eup %7367 }
0x36db   :  { %v7370_v22 = vpop.eup %7369 }
0x36dc   :  { %v5050_v30 = vadd.f32 0.5, %v5049_v31  ;;  %v5054_v37 = vmul.f32 0.5, %v7370_v22 }
0x36de   :  { %v5060_v62 = vmul.f32 %v7368_v27, %v5050_v30  ;;  %v5059_v54 = vmul.f32 %v5057_v29, %v5050_v30  ;;  %v5055_v24 = vadd.f32 0.5, %v5054_v37 }
0x36e0   :  { %5062 = vrot.lane.b32.xlu1 %v5060_v62, %s7495_s27 }
0x3752   :  { %v5063_v17 = vpop.permute.xlu1 %5062 }
0x3753   :  { %v5065_v28 = vadd.f32 %v5063_v17, %v5059_v54 }
0x3755   :  { %7371 = vtanh.f32 %v5065_v28  ;;  %v5163_v61 = vrot.slane %v5065_v28, 6 }
0x375f   :  { %v7372_v43 = vpop.eup %7371 }
0x3760   :  { %v5067_v1 = vmul.f32 %v7372_v43, %v5055_v24 }
0x3762   :  { %v5069_v36 = vrot.slane %v5067_v1, 2  ;;  %v9261_v1 = vadd.f32 %v9083_v21, %v9041_v16 }
0x3764   :  { %5070 = vrot.lane.b32.xlu0 %v5069_v36, %s7495_s27 }
0x37d6   :  { %v5071_v42 = vpop.permute.xlu0 %5070 }
0x37d7   :  { %5942 = vmatmul.mubr.msk.f32.vlgmr.msra.gmra.mrb[58].mxu1 %vm373_vm10, %v5071_v42 }
0x37d8   :  { %7018 = vmatpush1.bf16.msra.mxu1 %v8956_v20  ;;  %5350 = vmatprep.mubr.f32.mxu1 %v7496_v11 }
0x37d9   :  { %7020 = vmatprep.subr.bf16.mxu1 %v8958_v38 }
0x37dc   :  { %7022 = vmatpush1.bf16.msra.mxu1 %v8975_v23 }
0x37dd   :  { %7024 = vmatprep.subr.bf16.mxu1 %v8979_v25 }
0x37e0   :  { %7026 = vmatpush1.bf16.msra.mxu1 %v8995_v33 }
0x37e1   :  { %7028 = vmatprep.subr.bf16.mxu1 %v8999_v35 }
0x37e4   :  { %7030 = vmatpush1.bf16.msra.mxu1 %v9009_v32 }
0x37e5   :  { %7048 = vmatprep.subr.bf16.mxu1 %v8945_v5 }
0x38aa   :  { %v5140_v40 = vpop.f32.mrb[58].mxu1 }
0x38ab   :  { %v5147_v26 = vrot.slane %v5140_v40, 4  ;;  %v5142_v47 = vpop.f32.mrb[59].mxu1 }
0x38ac   :  { %v5148_v57 = vrot.slane %v5142_v47, 4 }
0x38ad   :  { %v5151_v49 = vadd.f32 %v5147_v26, %v9198_v34  ;;  %v9266_v26 = vadd.f32 %v9085_v58, %v9049_v44 }
0x38ae   :  { %v5152_v8 = vadd.f32 %v5148_v57, %v9203_v63 }
0x38af   :  { %v5153_v3 = vmul.f32 0.5, %v5151_v49 }
0x38b0   :  { %v5158_v45 = vmul.f32 0.5, %v5152_v8 }
0x38b1   :  { %7373 = vtanh.f32 %v5153_v3 }
0x38b2   :  { %7375 = vtanh.f32 %v5152_v8 }
0x38b3   :  { %7377 = vtanh.f32 %v5158_v45 }
0x38bb   :  { %v7374_v50 = vpop.eup %7373 }
0x38bc   :  { %v5155_v52 = vmul.f32 0.5, %v7374_v50  ;;  %v7376_v46 = vpop.eup %7375 }
0x38bd   :  { %v7378_v7 = vpop.eup %7377 }
0x38be   :  { %v5156_v53 = vadd.f32 0.5, %v5155_v52  ;;  %v5160_v19 = vmul.f32 0.5, %v7378_v7 }
0x38c0   :  { %v5166_v0 = vmul.f32 %v7376_v46, %v5156_v53  ;;  %v5165_v56 = vmul.f32 %v5163_v61, %v5156_v53  ;;  %v5161_v18 = vadd.f32 0.5, %v5160_v19 }
0x38c2   :  { %5168 = vrot.lane.b32.xlu1 %v5166_v0, %s7495_s27 }
0x3934   :  { %v5169_v48 = vpop.permute.xlu1 %5168 }
0x3935   :  { %v5171_v10 = vadd.f32 %v5169_v48, %v5165_v56 }
0x3937   :  { %7379 = vtanh.f32 %v5171_v10  ;;  %v5269_v29 = vrot.slane %v5171_v10, 6 }
0x3941   :  { %v7380_v6 = vpop.eup %7379 }
0x3942   :  { %v5173_v51 = vmul.f32 %v7380_v6, %v5161_v18 }
0x3944   :  { %v5175_v55 = vrot.slane %v5173_v51, 4 }
0x3946   :  { %5176 = vrot.lane.b32.xlu0 %v5175_v55, %s7495_s27 }
0x39b8   :  { %v5177_v39 = vpop.permute.xlu0 %5176 }
0x39b9   :  { %5943 = vmatmul.mubr.msk.f32.vlgmr.msra.gmra.mrb[66].mxu0 %vm373_vm10, %v5177_v39 }
0x39ba   :  { %7034 = vmatpush1.bf16.msra.mxu0 %v8956_v20  ;;  %5449 = vmatprep.mubr.f32.mxu0 %v7496_v11 }
0x39bb   :  { %7036 = vmatprep.subr.bf16.mxu0 %v8958_v38 }
0x39be   :  { %7038 = vmatpush1.bf16.msra.mxu0 %v8975_v23 }
0x39bf   :  { %7040 = vmatprep.subr.bf16.mxu0 %v8979_v25 }
0x39c2   :  { %7042 = vmatpush1.bf16.msra.mxu0 %v8995_v33 }
0x39c3   :  { %7044 = vmatprep.subr.bf16.mxu0 %v8999_v35 }
0x39c6   :  { %7046 = vmatpush1.bf16.msra.mxu0 %v9009_v32 }
0x39c7   :  { %7064 = vmatprep.subr.bf16.mxu0 %v8945_v5 }
0x3a8c   :  { %v5246_v14 = vpop.f32.mrb[66].mxu0 }
0x3a8d   :  { %v5253_v4 = vrot.slane %v5246_v14, 2  ;;  %v5248_v9 = vpop.f32.mrb[67].mxu0 }
0x3a8e   :  { %v5254_v2 = vrot.slane %v5248_v9, 2 }
0x3a8f   :  { %v5257_v12 = vadd.f32 %v5253_v4, %v9198_v34 }
0x3a90   :  { %v5258_v13 = vadd.f32 %v5254_v2, %v9203_v63 }
0x3a91   :  { %v5259_v41 = vmul.f32 0.5, %v5257_v12 }
0x3a92   :  { %v5264_v5 = vmul.f32 0.5, %v5258_v13 }
0x3a93   :  { %7381 = vtanh.f32 %v5259_v41 }
0x3a94   :  { %7383 = vtanh.f32 %v5258_v13 }
0x3a95   :  { %7385 = vtanh.f32 %v5264_v5 }
0x3a9d   :  { %v7382_v60 = vpop.eup %7381 }
0x3a9e   :  { %v5261_v31 = vmul.f32 0.5, %v7382_v60  ;;  %v7384_v27 = vpop.eup %7383 }
0x3a9f   :  { %v7386_v34 = vpop.eup %7385 }
0x3aa0   :  { %v5262_v30 = vadd.f32 0.5, %v5261_v31  ;;  %v5266_v28 = vmul.f32 0.5, %v7386_v34 }
0x3aa2   :  { %v5272_v62 = vmul.f32 %v7384_v27, %v5262_v30  ;;  %v5271_v54 = vmul.f32 %v5269_v29, %v5262_v30  ;;  %v5267_v22 = vadd.f32 0.5, %v5266_v28 }
0x3aa4   :  { %5274 = vrot.lane.b32.xlu1 %v5272_v62, %s7495_s27 }
0x3b16   :  { %v5275_v15 = vpop.permute.xlu1 %5274 }
0x3b17   :  { %v5277_v17 = vadd.f32 %v5275_v15, %v5271_v54 }
0x3b19   :  { %7387 = vtanh.f32 %v5277_v17  ;;  %v5369_v8 = vrot.slane %v5277_v17, 6 }
0x3b23   :  { %v7388_v37 = vpop.eup %7387 }
0x3b24   :  { %v5279_v63 = vmul.f32 %v7388_v37, %v5267_v22 }
0x3b26   :  { %v5281_v24 = vrot.slane %v5279_v63, 6 }
0x3b28   :  { %5282 = vrot.lane.b32.xlu0 %v5281_v24, %s7495_s27 }
0x3b9a   :  { %v5283_v43 = vpop.permute.xlu0 %5282 }
0x3b9b   :  { %5944 = vmatmul.mubr.msk.f32.vlgmr.msra.gmra.mrb[60].mxu1 %vm373_vm10, %v5283_v43 }
0x3b9c   :  { %7050 = vmatpush1.bf16.msra.mxu1 %v8956_v20  ;;  %5555 = vmatprep.mubr.f32.mxu1 %v7496_v11 }
0x3b9d   :  { %7052 = vmatprep.subr.bf16.mxu1 %v8958_v38 }
0x3ba0   :  { %7054 = vmatpush1.bf16.msra.mxu1 %v8975_v23 }
0x3ba1   :  { %7056 = vmatprep.subr.bf16.mxu1 %v8979_v25 }
0x3ba4   :  { %7058 = vmatpush1.bf16.msra.mxu1 %v8995_v33 }
0x3ba5   :  { %7060 = vmatprep.subr.bf16.mxu1 %v8999_v35 }
0x3ba8   :  { %7062 = vmatpush1.bf16.msra.mxu1 %v9009_v32 }
0x3c6e   :  { %v5352_v36 = vpop.f32.mrb[60].mxu1 }
0x3c6f   :  { %v5357_v42 = vadd.f32 %v5352_v36, %v9261_v1  ;;  %v5354_v40 = vpop.f32.mrb[61].mxu1 }
0x3c70   :  { %v5358_v49 = vadd.f32 %v5354_v40, %v9266_v26 }
0x3c71   :  { %v5359_v47 = vmul.f32 0.5, %v5357_v42 }
0x3c72   :  { %v5364_v61 = vmul.f32 0.5, %v5358_v49 }
0x3c73   :  { %7389 = vtanh.f32 %v5359_v47 }
0x3c74   :  { %7391 = vtanh.f32 %v5358_v49 }
0x3c75   :  { %7393 = vtanh.f32 %v5364_v61 }
0x3c7d   :  { %v7390_v57 = vpop.eup %7389 }
0x3c7e   :  { %v5361_v3 = vmul.f32 0.5, %v7390_v57  ;;  %v7392_v52 = vpop.eup %7391 }
0x3c7f   :  { %v7394_v44 = vpop.eup %7393 }
0x3c80   :  { %v5362_v50 = vadd.f32 0.5, %v5361_v3  ;;  %v5366_v58 = vmul.f32 0.5, %v7394_v44 }
0x3c82   :  { %v5372_v16 = vmul.f32 %v7392_v52, %v5362_v50  ;;  %v5371_v21 = vmul.f32 %v5369_v8, %v5362_v50  ;;  %v5367_v0 = vadd.f32 0.5, %v5366_v58 }
0x3c84   :  { %5374 = vrot.lane.b32.xlu1 %v5372_v16, %s7495_s27 }
0x3cf6   :  { %v5375_v53 = vpop.permute.xlu1 %5374 }
0x3cf7   :  { %v5377_v46 = vadd.f32 %v5375_v53, %v5371_v21 }
0x3cf9   :  { %7395 = vtanh.f32 %v5377_v46 }
0x3d03   :  { %v7396_v56 = vpop.eup %7395 }
0x3d04   :  { %v5379_v45 = vmul.f32 %v7396_v56, %v5367_v0 }
0x3d06   :  { %5381 = vrot.lane.b32.xlu0 %v5379_v45, %s7495_s27 }
0x3d78   :  { %v5382_v48 = vpop.permute.xlu0 %5381 }
0x3d79   :  { %5945 = vmatmul.mubr.msk.f32.vlgmr.msra.gmra.mrb[68].mxu0 %vm373_vm10, %v5382_v48 }
0x3d7a   :  { %7066 = vmatpush1.bf16.msra.mxu0 %v8956_v20  ;;  %5661 = vmatprep.mubr.f32.mxu0 %v7496_v11 }
0x3d7b   :  { %7068 = vmatprep.subr.bf16.mxu0 %v8958_v38 }
0x3d7e   :  { %7070 = vmatpush1.bf16.msra.mxu0 %v8975_v23 }
0x3d7f   :  { %7072 = vmatprep.subr.bf16.mxu0 %v8979_v25  ;;  %v5474_v25 = vrot.slane %v5377_v46, 6 }
0x3d82   :  { %7074 = vmatpush1.bf16.msra.mxu0 %v8995_v33 }
0x3d83   :  { %7076 = vmatprep.subr.bf16.mxu0 %v8999_v35 }
0x3d86   :  { %7078 = vmatpush1.bf16.msra.mxu0 %v9009_v32 }
0x3e4c   :  { %v5451_v10 = vpop.f32.mrb[68].mxu0 }
0x3e4d   :  { %v5458_v7 = vrot.slane %v5451_v10, 6  ;;  %v5453_v19 = vpop.f32.mrb[69].mxu0 }
0x3e4e   :  { %v5459_v20 = vrot.slane %v5453_v19, 6  ;;  %v5704_v19 = vld [vmem:[%s9377_s15] sm:$0xff] }
0x3e4f   :  { %v5462_v18 = vadd.f32 %v5458_v7, %v9261_v1 }
0x3e50   :  { %v5463_v38 = vadd.f32 %v5459_v20, %v9266_v26 }
0x3e51   :  { %v5464_v6 = vmul.f32 0.5, %v5462_v18  ;;  %v7500_v18 = vmov 0.0|0.0  }
0x3e52   :  { %v5469_v32 = vmul.f32 0.5, %v5463_v38  ;;  %7079 = vmatprep.subr.bf16.mxu1 %v7500_v18 }
0x3e53   :  { %7397 = vtanh.f32 %v5464_v6  ;;  %v5707_v6 = vld [vmem:[%s9377_s15 + $0x18] sm:$0xff] }
0x3e54   :  { %7399 = vtanh.f32 %v5463_v38 }
0x3e55   :  { %7401 = vtanh.f32 %v5469_v32  ;;  %v5711_v32 = vld [vmem:[%s9377_s15 + $0x38] sm:$0xff] }
0x3e5d   :  { %v7398_v23 = vpop.eup %7397 }
0x3e5e   :  { %v5466_v51 = vmul.f32 0.5, %v7398_v23  ;;  %v7400_v33 = vpop.eup %7399  ;;  %v5708_v23 = vld [vmem:[%s9377_s15 + $0x20] sm:$0xff] }
0x3e5f   :  { %v7402_v9 = vpop.eup %7401 }
0x3e60   :  { %v5467_v55 = vadd.f32 0.5, %v5466_v51  ;;  %v5471_v12 = vmul.f32 0.5, %v7402_v9  ;;  %v5709_v51 = vld [vmem:[%s9377_s15 + $0x28] sm:$0xff] }
0x3e62   :  { %v5477_v39 = vmul.f32 %v7400_v33, %v5467_v55  ;;  %v5476_v35 = vmul.f32 %v5474_v25, %v5467_v55  ;;  %v5472_v2 = vadd.f32 0.5, %v5471_v12  ;;  %v7086_v25 = vpack.c.bf16 %v5709_v51, %v5708_v23 }
0x3e64   :  { %5479 = vrot.lane.b32.xlu1 %v5477_v39, %s7495_s27 }
0x3ed6   :  { %v5480_v14 = vpop.permute.xlu1 %5479 }
0x3ed7   :  { %v5482_v4 = vadd.f32 %v5480_v14, %v5476_v35  ;;  %v5710_v35 = vld [vmem:[%s9377_s15 + $0x30] sm:$0xff] }
0x3ed8   :  { %v7089_v14 = vpack.c.bf16 %v5711_v32, %v5710_v35 }
0x3ed9   :  { %7403 = vtanh.f32 %v5482_v4  ;;  %v5580_v28 = vrot.slane %v5482_v4, 6 }
0x3ee3   :  { %v7404_v41 = vpop.eup %7403 }
0x3ee4   :  { %v5484_v13 = vmul.f32 %v7404_v41, %v5472_v2 }
0x3ee6   :  { %v5486_v60 = vrot.slane %v5484_v13, 2  ;;  %v5697_v13 = vrot.slane %v9182_v59, 7 }
0x3ee8   :  { %5487 = vrot.lane.b32.xlu0 %v5486_v60, %s7495_s27 }
0x3f5a   :  { %v5488_v31 = vpop.permute.xlu0 %5487 }
0x3f5b   :  { %5946 = vmatmul.mubr.msk.f32.vlgmr.msra.gmra.mrb[62].mxu1 %vm373_vm10, %v5488_v31 }
0x3f5c   :  { %6328 = vmatprep.mubr.msk.f32.mxu1 %vm7501_vm0, %v7496_v11 }
0x402e   :  { %v5557_v29 = vpop.f32.mrb[62].mxu1 }
0x402f   :  { %v5564_v30 = vrot.slane %v5557_v29, 4  ;;  %v5559_v27 = vpop.f32.mrb[63].mxu1 }
0x4030   :  { %v5565_v54 = vrot.slane %v5559_v27, 4 }
0x4031   :  { %v5568_v62 = vadd.f32 %v5564_v30, %v9261_v1 }
0x4032   :  { %v5569_v15 = vadd.f32 %v5565_v54, %v9266_v26 }
0x4033   :  { %v5570_v5 = vmul.f32 0.5, %v5568_v62 }
0x4034   :  { %v5575_v43 = vmul.f32 0.5, %v5569_v15 }
0x4035   :  { %7405 = vtanh.f32 %v5570_v5 }
0x4036   :  { %7407 = vtanh.f32 %v5569_v15 }
0x4037   :  { %7409 = vtanh.f32 %v5575_v43 }
0x403f   :  { %v7406_v17 = vpop.eup %7405 }
0x4040   :  { %v5572_v34 = vmul.f32 0.5, %v7406_v17  ;;  %v7408_v37 = vpop.eup %7407 }
0x4041   :  { %v7410_v40 = vpop.eup %7409 }
0x4042   :  { %v5573_v22 = vadd.f32 0.5, %v5572_v34  ;;  %v5577_v47 = vmul.f32 0.5, %v7410_v40 }
0x4044   :  { %v5583_v63 = vmul.f32 %v7408_v37, %v5573_v22  ;;  %v5582_v24 = vmul.f32 %v5580_v28, %v5573_v22  ;;  %v5578_v49 = vadd.f32 0.5, %v5577_v47 }
0x4046   :  { %5585 = vrot.lane.b32.xlu1 %v5583_v63, %s7495_s27 }
0x40b8   :  { %v5586_v36 = vpop.permute.xlu1 %5585 }
0x40b9   :  { %v5588_v42 = vadd.f32 %v5586_v36, %v5582_v24 }
0x40bb   :  { %7411 = vtanh.f32 %v5588_v42  ;;  %v5686_v56 = vrot.slane %v5588_v42, 6 }
0x40c5   :  { %v7412_v57 = vpop.eup %7411 }
0x40c6   :  { %v5590_v3 = vmul.f32 %v7412_v57, %v5578_v49 }
0x40c8   :  { %v5592_v8 = vrot.slane %v5590_v3, 4 }
0x40ca   :  { %5593 = vrot.lane.b32.xlu0 %v5592_v8, %s7495_s27 }
0x413c   :  { %v5594_v50 = vpop.permute.xlu0 %5593 }
0x413d   :  { %5947 = vmatmul.mubr.msk.f32.vlgmr.msra.gmra.mrb[70].mxu0 %vm373_vm10, %v5594_v50 }
0x4210   :  { %v5663_v52 = vpop.f32.mrb[70].mxu0 }
0x4211   :  { %v5670_v16 = vrot.slane %v5663_v52, 2  ;;  %v5665_v21 = vpop.f32.mrb[71].mxu0 }
0x4212   :  { %v5671_v53 = vrot.slane %v5665_v21, 2 }
0x4213   :  { %v5674_v61 = vadd.f32 %v5670_v16, %v9261_v1  ;;  %v5705_v1 = vld [vmem:[%s9377_s15 + $0x8] sm:$0xff] }
0x4214   :  { %v5675_v44 = vadd.f32 %v5671_v53, %v9266_v26  ;;  %v5706_v26 = vld [vmem:[%s9377_s15 + $0x10] sm:$0xff]  ;;  %v7080_v20 = vpack.c.bf16 %v5705_v1, %v5704_v19  ;;  %s7502_s15 = smov [#allocation4]  }
0x4215   :  { %v5676_v46 = vmul.f32 0.5, %v5674_v61  ;;  %v7083_v38 = vpack.c.bf16 %v5707_v6, %v5706_v26  ;;  %s5822_s6 = sshll.u32 %s7502_s15, 4  ;;  %s5823_s6 = int_to_ptr.vmem [resolvable:$true] %s5822_s6 }
0x4216   :  { %7081 = vmatpush3.bf16.msra.mxu1 %v7080_v20  ;;  %v5681_v55 = vmul.f32 0.5, %v5675_v44  ;;  %s7421_s9 = scalar_lea.vmem %s5823_s6, 32  ;;  %p7426_p1 = scmp.lt.s32.totalorder %s5823_s6, %s5823_s6 }
0x4217   :  { %7413 = vtanh.f32 %v5676_v46  ;;  %7082 = vmatprep.subr.bf16.mxu1 %v7500_v18  ;;  %p7422_p0 = scmp.ne.s32.totalorder %s5823_s6, %s7421_s9  ;;  %p7427_p2 = scmp.lt.s32.totalorder %s7421_s9, %s7421_s9 }
0x4218   :  { %7415 = vtanh.f32 %v5675_v44 }
0x4219   :  { %7417 = vtanh.f32 %v5681_v55  ;;  %p7428_p3 = por %p7427_p2, %p7426_p1 }
0x421a   :  { %7084 = vmatpush3.bf16.msra.mxu1 %v7083_v38 }
0x421b   :  { %7085 = vmatprep.subr.bf16.mxu1 %v7500_v18  ;;  %p7429_p4 = pnand %p7428_p3, %p7422_p0 }
0x421e   :  { %7087 = vmatpush3.bf16.msra.mxu1 %v7086_v25 }
0x421f   :  { %7088 = vmatprep.subr.bf16.mxu1 %v7500_v18 }
0x4221   :  { %v7414_v58 = vpop.eup %7413 }
0x4222   :  { %v5678_v0 = vmul.f32 0.5, %v7414_v58  ;;  %v7416_v48 = vpop.eup %7415  ;;  %7090 = vmatpush3.bf16.msra.mxu1 %v7089_v14 }
0x4223   :  { %v7418_v4 = vpop.eup %7417 }
0x4224   :  { %v5679_v45 = vadd.f32 0.5, %v5678_v0  ;;  %v5683_v9 = vmul.f32 0.5, %v7418_v4 }
0x4226   :  { %v5689_v10 = vmul.f32 %v7416_v48, %v5679_v45  ;;  %v5688_v7 = vmul.f32 %v5686_v56, %v5679_v45  ;;  %v5684_v12 = vadd.f32 0.5, %v5683_v9 }
0x4228   :  { %5691 = vrot.lane.b32.xlu1 %v5689_v10, %s7495_s27 }
0x429a   :  { %v5692_v33 = vpop.permute.xlu1 %5691 }
0x429b   :  { %v5694_v39 = vadd.f32 %v5692_v33, %v5688_v7 }
0x429d   :  { %7419 = vtanh.f32 %v5694_v39 }
0x42a7   :  { %v7420_v2 = vpop.eup %7419 }
0x42a8   :  { %v5696_v41 = vmul.f32 %v7420_v2, %v5684_v12 }
0x42aa   :  { %5796 = vrot.lane.b32.xlu1 %v5696_v41, %s7495_s27  ;;  %v5700_v60 = vrot.slane %v5696_v41, 6 }
0x42ac   :  { %v5703_v31 = vsel %vm5702_vm1, %v5697_v13, %v5700_v60 }
0x42ad   :  { %5720 = vrot.lane.b32.xlu0 %v5703_v31, %s7495_s27 }
0x42b1   :  { %5802 = vrot.lane.b32.xlu0 %v5694_v39, %s7495_s27 }
0x431c   :  { %v5797_v29 = vpop.permute.xlu1 %5796 }
0x431d   :  { %5800 = vst.msk [vmem:[#allocation4 - $0x6] sm:$0xc0] %vm5799_vm4, %v5797_v29 }
0x431f   :  { %v5721_v11 = vpop.permute.xlu0 %5720 }
0x4320   :  { %6329 = vmatmul.mubr.msk.f32.vlgmr.msra.gmra.mrb[64].mxu1 %vm373_vm10, %v5721_v11 }
0x4323   :  { %v5803_v30 = vpop.permute.xlu0 %5802 }
0x4324   :  { %5805 = vst.msk [vmem:[#allocation6 - $0x6] sm:$0xc0] %vm5799_vm4, %v5803_v30 }
0x4325   :  { %7432 = shalt.err (!%p7429_p4)
}
0x4326   :  { %s7433_s2 = scalar_lea.hbm %s9382_s20, 32 }
0x4327   :  { %p7434_p5 = scmp.ne.s32.totalorder %s9382_s20, %s7433_s2  ;;  %p7437_p6 = scmp.lt.u32.totalorder %s7433_s2, %s9382_s20 }
0x4329   :  { %p7439_p7 = pnand %p7437_p6, %p7434_p5 }
0x432b   :  { %7442 = shalt.err (!%p7439_p7)
}
0x432c   :  { %5825 = dma.vmem_to_hbm [thread:$0]  %s5823_s6, 32, %s9382_s20, [#allocation5]  }
0x432d   :  { %s7503_s3 = smov [#allocation6]  }
0x432e   :  { %s5832_s18 = sshll.u32 %s7503_s3, 4  ;;  %s5833_s18 = int_to_ptr.vmem [resolvable:$true] %s5832_s18 }
0x432f   :  { %s7443_s8 = scalar_lea.vmem %s5833_s18, 32  ;;  %p7448_p9 = scmp.lt.s32.totalorder %s5833_s18, %s5833_s18 }
0x4330   :  { %p7444_p8 = scmp.ne.s32.totalorder %s5833_s18, %s7443_s8  ;;  %p7449_p10 = scmp.lt.s32.totalorder %s7443_s8, %s7443_s8 }
0x4332   :  { %p7450_p11 = por %p7449_p10, %p7448_p9 }
0x4334   :  { %p7451_p12 = pnand %p7450_p11, %p7444_p8 }
0x4336   :  { %7454 = shalt.err (!%p7451_p12)
}
0x4337   :  { %s7455_s30 = scalar_lea.hbm %s9383_s21, 32 }
0x4338   :  { %p7456_p13 = scmp.ne.s32.totalorder %s9383_s21, %s7455_s30  ;;  %p7459_p0 = scmp.lt.u32.totalorder %s7455_s30, %s9383_s21 }
0x433a   :  { %p7461_p1 = pnand %p7459_p0, %p7456_p13 }
0x433c   :  { %7464 = shalt.err (!%p7461_p1)
}
0x433d   :  { %5835 = dma.vmem_to_hbm [thread:$0]  %s5833_s18, 32, %s9383_s21, [#allocation5]   ;;  %v5948_v59 = vld [vmem:[%s9378_s16] ss:$0 sm:$0xff]  ;;  %vm5794_vm10 = vcmask 17408  }
0x433e   :  { %s7504_s12 = smov [#allocation2]  }
0x433f   :  { %s5812_s23 = sshll.u32 %s7504_s12, 4  ;;  %s5813_s23 = int_to_ptr.vmem [resolvable:$true] %s5812_s23 }
0x4340   :  { %s7465_s15 = scalar_lea.vmem %s5813_s23, 32  ;;  %p7470_p3 = scmp.lt.s32.totalorder %s5813_s23, %s5813_s23 }
0x4341   :  { %p7466_p2 = scmp.ne.s32.totalorder %s5813_s23, %s7465_s15  ;;  %p7471_p4 = scmp.lt.s32.totalorder %s7465_s15, %s7465_s15 }
0x4343   :  { %p7472_p5 = por %p7471_p4, %p7470_p3 }
0x4345   :  { %p7473_p6 = pnand %p7472_p5, %p7466_p2 }
0x43f3   :  { %v5790_v27 = vpop.f32.mrb[64].mxu1 }
0x43f4   :  { %v5791_v62 = vadd.f32 %v5948_v59, %v5790_v27  ;;  %v6330_v54 = vpop.f32.mrb[65].mxu1 }
0x43f6   :  { %5795 = vst.msk [vmem:[#allocation2] sm:$0x3] %vm5794_vm10, %v5791_v62 }
0x43f7   :  { %7476 = shalt.err (!%p7473_p6)
}
0x43f8   :  { %s7477_s9 = scalar_lea.hbm %s9381_s19, 32 }
0x43f9   :  { %p7478_p7 = scmp.ne.s32.totalorder %s9381_s19, %s7477_s9  ;;  %p7481_p8 = scmp.lt.u32.totalorder %s7477_s9, %s9381_s19 }
0x43fb   :  { %p7483_p9 = pnand %p7481_p8, %p7478_p7 }
0x43fd   :  { %7486 = shalt.err (!%p7483_p9)
}
0x43fe   :  { %5815 = dma.vmem_to_hbm [thread:$0]  %s5813_s23, 32, %s9381_s19, [#allocation3]  }
0x43ff   :  { %7487 = dma.done.wait [#allocation3], 32  }
0x4400   :  { %7488 = vsyncadd [#allocation3], 4294967264 }
0x4401   :  { %7489 = dma.done.wait [#allocation5], 64  }
0x4402   :  { %7490 = vsyncadd [#allocation5], 4294967232 }
0x4403   :  { %5845 = vsyncpa [#allocation3], 1 }
0x4404   :  { %5846 = vsyncpa [#allocation5], 1 }

</bundles_post_ra>
